<compile_context>
chip_gen: v7x
topology: tpu7x:2x2x1
jax: 0.10.0
libtpu: 0.0.40
codegen_flags: <defaults>
</compile_context>

<pallas_src>
import jax
import jax.numpy as jnp
from jax.experimental import pallas as pl
from jax.experimental.pallas import tpu as pltpu

# ----------------------------- model dimensions -----------------------------
B = 2                      # batch
IMG_CH = 3
IMG_SIZE = 16
PATCH = 8
N_PATCH = (IMG_SIZE // PATCH) ** 2      # 4
N_IMG_TOK = N_PATCH + 1                 # 5 real tokens (CLS + patches)
IMG_SEQ = 8                             # padded per-image sequence (power of 2)
IMG_SHIFT = 3                           # log2(IMG_SEQ)
PATCH_DIM = IMG_CH * PATCH * PATCH      # 192
VISION_WIDTH = 32
TEXT_WIDTH = 32
EMBED_DIM = 16
TEXT_LEN = 8                            # stands in for max_length=35
TEXT_SHIFT = 3                          # log2(TEXT_LEN)
VOCAB = 64
QUEUE_SIZE = 8                          # stands in for 57600
MOMENTUM = 0.995
ENC_TOKEN_ID = 3                        # stands in for tokenizer.enc_token_id
NEG_INF = -1e9

# --------------------- in-kernel math helpers (traced code) -------------------


def _mm(x, w):
    """MXU matmul: bf16 operands, f32 accumulation."""
    return jnp.dot(x.astype(jnp.bfloat16), w.astype(jnp.bfloat16),
                   preferred_element_type=jnp.float32)


def _ln(x, g, b):
    mu = jnp.mean(x, axis=-1, keepdims=True)
    var = jnp.mean((x - mu) ** 2, axis=-1, keepdims=True)
    return (x - mu) * jax.lax.rsqrt(var + 1e-12) * g + b


def _softmax(x):
    m = jnp.max(x, axis=-1, keepdims=True)
    e = jnp.exp(x - m)
    return e / jnp.sum(e, axis=-1, keepdims=True)


def _log_softmax(x):
    m = jnp.max(x, axis=-1, keepdims=True)
    return x - m - jnp.log(jnp.sum(jnp.exp(x - m), axis=-1, keepdims=True))


def _attend(q, k, v, bias):
    # Single-head attention over flattened [rows, feat] tensors; per-batch block
    # structure and key padding are in the additive `bias`.
    # TODO(synk): real BLIP uses 12-head attention; this stand-in is single-head.
    scale = 1.0 / (q.shape[-1] ** 0.5)
    s = jax.lax.dot_general(q.astype(jnp.bfloat16), k.astype(jnp.bfloat16),
                            (((1,), (1,)), ((), ())),
                            preferred_element_type=jnp.float32) * scale + bias
    m = jnp.max(s, axis=-1, keepdims=True)
    e = jnp.exp(s - m)
    p = e * pl.reciprocal(jnp.sum(e, axis=-1, keepdims=True), approx=True)
    return _mm(p, v)


def _self_attn(G, pfx, x, bias, width):
    hn = _ln(x, G(pfx + "ln_g"), G(pfx + "ln_b"))
    qkv = _mm(hn, G(pfx + "wqkv")) + G(pfx + "bqkv")        # fused QKV matmul
    q = qkv[:, 0:width]
    k = qkv[:, width:2 * width]
    v = qkv[:, 2 * width:3 * width]
    return x + _mm(_attend(q, k, v, bias), G(pfx + "wo")) + G(pfx + "bo")


def _ffn(G, pfx, x):
    hn = _ln(x, G(pfx + "ln_g"), G(pfx + "ln_b"))
    h1 = jax.nn.gelu(_mm(hn, G(pfx + "w1")) + G(pfx + "b1"), approximate=True)
    return x + _mm(h1, G(pfx + "w2")) + G(pfx + "b2")


def _proj_norm(x, w, b):
    # F.normalize(proj(x), dim=-1); kept in f32 (feeds temp-scaled similarities).
    y = jnp.dot(x, w, preferred_element_type=jnp.float32) + b
    inv = jax.lax.rsqrt(jnp.maximum(jnp.sum(y * y, axis=-1, keepdims=True), 1e-24))
    return y * inv


def _take_cls(x, nseg, seqlen):
    # CLS rows sit at 8-aligned offsets s*seqlen (seqlen is a power of two).
    return jnp.concatenate([x[s * seqlen:s * seqlen + 1, :] for s in range(nseg)],
                           axis=0)


def _iota2(rows_q, rows_k):
    qi = jax.lax.broadcasted_iota(jnp.int32, (rows_q, rows_k), 0)
    ki = jax.lax.broadcasted_iota(jnp.int32, (rows_q, rows_k), 1)
    return qi, ki


def _vis_bias(rows):
    # block-diag over padded 8-token image segments; pad keys masked (in-kernel).
    qi, ki = _iota2(rows, rows)
    same = jnp.right_shift(qi, IMG_SHIFT) == jnp.right_shift(ki, IMG_SHIFT)
    kreal = jnp.bitwise_and(ki, IMG_SEQ - 1) < N_IMG_TOK
    return jnp.where(same & kreal, 0.0, NEG_INF).astype(jnp.float32)


def _txt_bias(rows, mask_row):
    # block-diag over 8-token text segments + key padding from the (1, rows) mask.
    qi, ki = _iota2(rows, rows)
    same = jnp.right_shift(qi, TEXT_SHIFT) == jnp.right_shift(ki, TEXT_SHIFT)
    block = jnp.where(same, 0.0, NEG_INF).astype(jnp.float32)
    return block + (mask_row - 1.0) * 1e9


def _cross_bias(rows_q, rows_k):
    # text-query x image-key block-diag; padded image keys masked (in-kernel).
    qi, ki = _iota2(rows_q, rows_k)
    same = jnp.right_shift(qi, TEXT_SHIFT) == jnp.right_shift(ki, IMG_SHIFT)
    kreal = jnp.bitwise_and(ki, IMG_SEQ - 1) < N_IMG_TOK
    return jnp.where(same & kreal, 0.0, NEG_INF).astype(jnp.float32)


# ---------------------- parameter slab packing (host side) --------------------


def _pack_slab(named_leaves):
    """Pack many tiny parameter leaves into ONE lane-dense (rows, 128) f32 slab.

    One DMA for the whole weight set instead of one descriptor per leaf; offsets
    are static Python ints (8-aligned rows) used for in-kernel static slicing.
    """
    offs, parts, row = {}, [], 0
    for name, arr in named_leaves:
        arr = jnp.asarray(arr, jnp.float32)
        r, c = arr.shape
        rp = ((r + 7) // 8) * 8
        parts.append(jnp.zeros((rp, 128), jnp.float32).at[:r, :c].set(arr))
        offs[name] = (row, r, c)
        row += rp
    return jnp.concatenate(parts, axis=0), offs


def _slab_getter(slab_ref, offs):
    def G(name):
        o, r, c = offs[name]
        return slab_ref[o:o + r, 0:c]
    return G


# ---------------- kernel 1: encoders (4 passes) + ITA + hard-neg --------------


def _make_encoder_ita_kernel(offs, bs, o_feat, o_w, o_loss):
    rows_v = bs * IMG_SEQ

    def kernel(patches_ref, ids_s_ref, ids_m_ref, mask_s_ref, mask_m_ref,
               sim_tgt_ref, mask_bb_ref, img_q_ref, txt_q_ref, scal_ref,
               slab_ref, out_ref):
        G = _slab_getter(slab_ref, offs)
        inv_temp = scal_ref[0]
        alpha = scal_ref[1]

        out_ref[...] = jnp.zeros_like(out_ref)

        # ------------------ vision: student + momentum passes -------------------
        vbias = _vis_bias(rows_v)

        def vision_pass(pfx):
            # CLS token / pos table / patch bias folded into the "pos" slab entry.
            x = _mm(patches_ref[...], G(pfx + "patch_w")) + G(pfx + "pos")
            x = _self_attn(G, pfx + "a_", x, vbias, VISION_WIDTH)
            x = _ffn(G, pfx + "f_", x)
            xf = _ln(x, G(pfx + "lnf_g"), G(pfx + "lnf_b"))
            cls = _take_cls(xf, bs, IMG_SEQ)
            return xf, _proj_norm(cls, G(pfx + "proj_w"), G(pfx + "proj_b"))

        image_embeds, image_feat = vision_pass("vs_")
        _, image_feat_m = vision_pass("vm_")

        # --------- text: student (ui+ob batched on rows) + momentum (ui) ---------
        def text_pass(pfx, ids_ref, mask_ref, nseg):
            rows = nseg * TEXT_LEN
            onehot = (jax.lax.broadcasted_iota(jnp.int32, (rows, VOCAB), 1)
                      == ids_ref[...]).astype(jnp.float32)
            x = _mm(onehot, G(pfx + "tok")) + G(pfx + "pos")   # bf16 one-hot matmul
            x = _ln(x, G(pfx + "e_ln_g"), G(pfx + "e_ln_b"))
            x = _self_attn(G, pfx + "a_", x, _txt_bias(rows, mask_ref[...]),
                           TEXT_WIDTH)
            x = _ffn(G, pfx + "f_", x)
            xf = _ln(x, G(pfx + "lnf_g"), G(pfx + "lnf_b"))
            cls = _take_cls(xf, nseg, TEXT_LEN)
            return _proj_norm(cls, G(pfx + "proj_w"), G(pfx + "proj_b"))

        feats_s = text_pass("ts_", ids_s_ref, mask_s_ref, 2 * bs)
        text_feat = feats_s[0:bs, :]     # ui; rows bs:2bs = ob_text_feat (unused, as in reference)
        text_feat_m = text_pass("tm_", ids_m_ref, mask_m_ref, bs)

        # --------------------- ITA loss (kept in f32) ----------------------------
        img_q = img_q_ref[...]
        txt_q = txt_q_ref[...]

        def simcat(a, bfeat, queue):
            s1 = jax.lax.dot_general(a, bfeat, (((1,), (1,)), ((), ())),
                                     preferred_element_type=jnp.float32)
            s2 = jnp.dot(a, queue, preferred_element_type=jnp.float32)
            return jnp.concatenate([s1, s2], axis=1) * inv_temp

        sim_tgt = sim_tgt_ref[...]
        t_i2t = alpha * _softmax(simcat(image_feat_m, text_feat_m, txt_q)) \
            + (1.0 - alpha) * sim_tgt
        t_t2i = alpha * _softmax(simcat(text_feat_m, image_feat_m, img_q)) \
            + (1.0 - alpha) * sim_tgt
        sim_i2t = simcat(image_feat, text_feat_m, txt_q)
        sim_t2i = simcat(text_feat, image_feat_m, img_q)
        per = 0.5 * (-jnp.sum(_log_softmax(sim_i2t) * t_i2t, axis=-1, keepdims=True)
                     - jnp.sum(_log_softmax(sim_t2i) * t_t2i, axis=-1, keepdims=True))
        loss_ita = jnp.mean(per, axis=0, keepdims=True)

        # ------------- hard-negative mining weights (no_grad branch) -------------
        blocked = mask_bb_ref[...] > 0.5
        sim_i2t_bb = jax.lax.dot_general(image_feat, text_feat,
                                         (((1,), (1,)), ((), ())),
                                         preferred_element_type=jnp.float32) * inv_temp
        sim_t2i_bb = jax.lax.dot_general(text_feat, image_feat,
                                         (((1,), (1,)), ((), ())),
                                         preferred_element_type=jnp.float32) * inv_temp
        w_i2t = jnp.where(blocked, 0.0, _softmax(sim_i2t_bb))
        w_t2i = jnp.where(blocked, 0.0, _softmax(sim_t2i_bb))

        # ----------- pack all results into one lane-dense (rows,128) slab --------
        out_ref[0:rows_v, 0:VISION_WIDTH] = image_embeds
        out_ref[o_feat:o_feat + bs, 0:2 * EMBED_DIM] = jnp.concatenate(
            [image_feat_m, text_feat_m], axis=1)
        out_ref[o_w:o_w + bs, 0:2 * bs] = jnp.concatenate([w_i2t, w_t2i], axis=1)
        out_ref[o_loss:o_loss + 1, 0:1] = loss_ita

    return kernel


# ---------------- kernel 2: cross-attention encoder + ITM loss ----------------


def _make_cross_itm_kernel(offs, bs):
    rows = 3 * bs * TEXT_LEN
    krows = 3 * bs * IMG_SEQ

    def kernel(ids_ref, mask_ref, img_ref, slab_ref, out_ref):
        G = _slab_getter(slab_ref, offs)
        onehot = (jax.lax.broadcasted_iota(jnp.int32, (rows, VOCAB), 1)
                  == ids_ref[...]).astype(jnp.float32)
        x = _mm(onehot, G("tok")) + G("pos")
        x = _ln(x, G("e_ln_g"), G("e_ln_b"))
        x = _self_attn(G, "a_", x, _txt_bias(rows, mask_ref[...]), TEXT_WIDTH)

        # cross-attention over the image tokens (fused K|V matmul); image_atts is
        # all ones, so only the in-kernel block-diag / pad mask is needed.
        hn = _ln(x, G("c_ln_g"), G("c_ln_b"))
        q = _mm(hn, G("c_wq")) + G("c_bq")
        kv = _mm(img_ref[...], G("c_wkv")) + G("c_bkv")
        k = kv[:, 0:TEXT_WIDTH]
        v = kv[:, TEXT_WIDTH:2 * TEXT_WIDTH]
        x = x + _mm(_attend(q, k, v, _cross_bias(rows, krows)), G("c_wo")) + G("c_bo")

        x = _ffn(G, "f_", x)
        xf = _ln(x, G("lnf_g"), G("lnf_b"))
        vl = _take_cls(xf, 3 * bs, TEXT_LEN)                                 # (3B, H)
        logits = jnp.dot(vl, G("itm_w"), preferred_element_type=jnp.float32) + G("itm_b")
        logsm = _log_softmax(logits)
        # itm labels generated in-kernel: first bs rows positive, rest negative.
        is_pos = jax.lax.broadcasted_iota(jnp.int32, (3 * bs, 1), 0) < bs
        per = -jnp.where(is_pos, logsm[:, 1:2], logsm[:, 0:1])
        out_ref[...] = jnp.mean(per, axis=0, keepdims=True)

    return kernel


# ----------------------------------- init -------------------------------------


def init_params(key):
    kit = iter(jax.random.split(key, 64))

    def w(fin, fout):
        return 0.02 * jax.random.normal(next(kit), (fin, fout), jnp.float32)

    def lin(fin, fout):
        return {"w": w(fin, fout), "b": jnp.zeros((1, fout), jnp.float32)}

    def attn_p(h, kv=None):
        kv = h if kv is None else kv
        return {"ln_g": jnp.ones((1, h), jnp.float32), "ln_b": jnp.zeros((1, h), jnp.float32),
                "wq": w(h, h), "bq": jnp.zeros((1, h), jnp.float32),
                "wk": w(kv, h), "bk": jnp.zeros((1, h), jnp.float32),
                "wv": w(kv, h), "bv": jnp.zeros((1, h), jnp.float32),
                "wo": w(h, h), "bo": jnp.zeros((1, h), jnp.float32)}

    def ffn_p(h):
        return {"ln_g": jnp.ones((1, h), jnp.float32), "ln_b": jnp.zeros((1, h), jnp.float32),
                "w1": w(h, 4 * h), "b1": jnp.zeros((1, 4 * h), jnp.float32),
                "w2": w(4 * h, h), "b2": jnp.zeros((1, h), jnp.float32)}

    # TODO(synk): real BLIP uses a 12-layer ViT-B/16; this is a 1-block ViT-lite stand-in.
    visual = {
        "patch_w": w(PATCH_DIM, VISION_WIDTH),
        "patch_b": jnp.zeros((1, VISION_WIDTH), jnp.float32),
        "cls": 0.02 * jax.random.normal(next(kit), (1, VISION_WIDTH), jnp.float32),
        "pos": 0.02 * jax.random.normal(next(kit), (N_IMG_TOK, VISION_WIDTH), jnp.float32),
        "attn": attn_p(VISION_WIDTH),
        "ffn": ffn_p(VISION_WIDTH),
        "lnf_g": jnp.ones((1, VISION_WIDTH), jnp.float32),
        "lnf_b": jnp.zeros((1, VISION_WIDTH), jnp.float32),
    }
    # TODO(synk): real BLIP uses a 12-layer BertModel; this is a 1-block BERT-lite stand-in.
    text = {
        "tok_emb": 0.02 * jax.random.normal(next(kit), (VOCAB, TEXT_WIDTH), jnp.float32),
        "pos_emb": 0.02 * jax.random.normal(next(kit), (TEXT_LEN, TEXT_WIDTH), jnp.float32),
        "ln_emb_g": jnp.ones((1, TEXT_WIDTH), jnp.float32),
        "ln_emb_b": jnp.zeros((1, TEXT_WIDTH), jnp.float32),
        "attn": attn_p(TEXT_WIDTH),
        "cross": attn_p(TEXT_WIDTH, kv=VISION_WIDTH),
        "ffn": ffn_p(TEXT_WIDTH),
        "lnf_g": jnp.ones((1, TEXT_WIDTH), jnp.float32),
        "lnf_b": jnp.zeros((1, TEXT_WIDTH), jnp.float32),
    }
    params = {
        "visual": visual,
        "text": text,
        "vision_proj": lin(VISION_WIDTH, EMBED_DIM),
        "text_proj": lin(TEXT_WIDTH, EMBED_DIM),
        "itm_head": lin(TEXT_WIDTH, 2),
        "temp": jnp.float32(0.07),
    }
    # copy_params(): momentum encoders start as exact copies
    ident = lambda t: jax.tree_util.tree_map(lambda x: x, t)
    params["visual_m"] = ident(visual)
    params["vision_proj_m"] = ident(params["vision_proj"])
    params["text_m"] = ident(text)
    params["text_proj_m"] = ident(params["text_proj"])
    return params


def init_state(key):
    k1, k2 = jax.random.split(key)
    iq = jax.random.normal(k1, (EMBED_DIM, QUEUE_SIZE), jnp.float32)
    tq = jax.random.normal(k2, (EMBED_DIM, QUEUE_SIZE), jnp.float32)
    iq = iq / jnp.maximum(jnp.linalg.norm(iq, axis=0, keepdims=True), 1e-12)
    tq = tq / jnp.maximum(jnp.linalg.norm(tq, axis=0, keepdims=True), 1e-12)
    return {
        "image_queue": iq,
        "text_queue": tq,
        "idx_queue": jnp.full((1, QUEUE_SIZE), -100, jnp.int32),
        "ptr": jnp.int32(0),
    }


# ---------------------------------- forward ------------------------------------


def blip_ui_retrieval_forward(params, state, image, ui_ids, ui_mask,
                              ob_ids, ob_mask, alpha, idx, sample_key):
    # TODO(synk): HF tokenizer has no Pallas equivalent; token ids / masks are inputs.
    bs = image.shape[0]
    temp = jnp.clip(params["temp"], 0.001, 0.5)
    inv_temp = 1.0 / temp

    # --- momentum update (_momentum_update, no_grad) ---
    mom = lambda m, p: jax.tree_util.tree_map(
        lambda a, b: a * MOMENTUM + b * (1.0 - MOMENTUM), m, p)
    visual_m = mom(params["visual_m"], params["visual"])
    vision_proj_m = mom(params["vision_proj_m"], params["vision_proj"])
    text_m = mom(params["text_m"], params["text"])
    text_proj_m = mom(params["text_proj_m"], params["text_proj"])

    # --- patchify; pad each image to IMG_SEQ=8 tokens (CLS + 4 patches + 3 pad) ---
    g = IMG_SIZE // PATCH
    patches = image.reshape(bs, IMG_CH, g, PATCH, g, PATCH)
    patches = patches.transpose(0, 2, 4, 1, 3, 5).reshape(bs, N_PATCH, PATCH_DIM)
    patches = jnp.concatenate(
        [jnp.zeros((bs, 1, PATCH_DIM), jnp.float32), patches,
         jnp.zeros((bs, IMG_SEQ - N_IMG_TOK, PATCH_DIM), jnp.float32)], axis=1)
    patches = patches.reshape(bs * IMG_SEQ, PATCH_DIM)

    # --- pack ALL encoder weights (4 passes) into one lane-dense slab ---
    leaves = []

    def add_attn(pfx, ap):
        leaves.extend([
            (pfx + "ln_g", ap["ln_g"]), (pfx + "ln_b", ap["ln_b"]),
            (pfx + "wqkv", jnp.concatenate([ap["wq"], ap["wk"], ap["wv"]], axis=1)),
            (pfx + "bqkv", jnp.concatenate([ap["bq"], ap["bk"], ap["bv"]], axis=1)),
            (pfx + "wo", ap["wo"]), (pfx + "bo", ap["bo"])])

    def add_ffn(pfx, fp):
        leaves.extend([
            (pfx + "ln_g", fp["ln_g"]), (pfx + "ln_b", fp["ln_b"]),
            (pfx + "w1", fp["w1"]), (pfx + "b1", fp["b1"]),
            (pfx + "w2", fp["w2"]), (pfx + "b2", fp["b2"])])

    def add_vision(pfx, enc, proj):
        cls_row = enc["cls"] + enc["pos"][0:1]                 # CLS token + pos[0]
        patch_rows = enc["patch_b"] + enc["pos"][1:]           # patch bias folded in
        per_img = jnp.concatenate(
            [cls_row, patch_rows,
             jnp.zeros((IMG_SEQ - N_IMG_TOK, VISION_WIDTH), jnp.float32)], axis=0)
        leaves.extend([(pfx + "patch_w", enc["patch_w"]),
                       (pfx + "pos", jnp.tile(per_img, (bs, 1)))])
        add_attn(pfx + "a_", enc["attn"])
        add_ffn(pfx + "f_", enc["ffn"])
        leaves.extend([(pfx + "lnf_g", enc["lnf_g"]), (pfx + "lnf_b", enc["lnf_b"]),
                       (pfx + "proj_w", proj["w"]), (pfx + "proj_b", proj["b"])])

    def add_text(pfx, enc, proj, nseg):
        leaves.extend([(pfx + "tok", enc["tok_emb"]),
                       (pfx + "pos", jnp.tile(enc["pos_emb"], (nseg, 1))),
                       (pfx + "e_ln_g", enc["ln_emb_g"]),
                       (pfx + "e_ln_b", enc["ln_emb_b"])])
        add_attn(pfx + "a_", enc["attn"])
        add_ffn(pfx + "f_", enc["ffn"])
        leaves.extend([(pfx + "lnf_g", enc["lnf_g"]), (pfx + "lnf_b", enc["lnf_b"]),
                       (pfx + "proj_w", proj["w"]), (pfx + "proj_b", proj["b"])])

    add_vision("vs_", params["visual"], params["vision_proj"])
    add_vision("vm_", visual_m, vision_proj_m)
    add_text("ts_", params["text"], params["text_proj"], 2 * bs)   # ui + ob batched
    add_text("tm_", text_m, text_proj_m, bs)                       # ui momentum
    slab1, offs1 = _pack_slab(leaves)

    # --- contrastive targets / hard-neg mask (data-dependent, tiny, XLA) ---
    idx_col = idx.reshape(-1, 1)
    idx_all = jnp.concatenate([idx_col.T, state["idx_queue"]], axis=1)     # (1, B+Q)
    pos_idx = (idx_col == idx_all).astype(jnp.float32)
    sim_targets = pos_idx / jnp.sum(pos_idx, axis=1, keepdims=True)
    mask_bb = (idx_col == idx_col.T).astype(jnp.float32)

    ids_s = jnp.concatenate([ui_ids, ob_ids], axis=0).reshape(
        2 * bs * TEXT_LEN, 1).astype(jnp.int32)
    ids_m = ui_ids.reshape(bs * TEXT_LEN, 1).astype(jnp.int32)
    mask_s = jnp.concatenate([ui_mask, ob_mask], axis=0).reshape(
        1, 2 * bs * TEXT_LEN).astype(jnp.float32)
    mask_m = ui_mask.reshape(1, bs * TEXT_LEN).astype(jnp.float32)
    scal = jnp.stack([inv_temp, jnp.asarray(alpha, jnp.float32)]).astype(jnp.float32)

    # output slab row layout (static, 8-aligned)
    o_feat = ((bs * IMG_SEQ + 7) // 8) * 8
    o_w = o_feat + 8
    o_loss = o_w + 8
    out_rows = o_loss + 8

    vspec = pl.BlockSpec(memory_space=pltpu.MemorySpace.VMEM)
    sspec = pl.BlockSpec(memory_space=pltpu.MemorySpace.SMEM)

    out1 = pl.pallas_call(
        _make_encoder_ita_kernel(offs1, bs, o_feat, o_w, o_loss),
        in_specs=[vspec] * 9 + [sspec, vspec],
        out_specs=vspec,
        out_shape=jax.ShapeDtypeStruct((out_rows, 128), jnp.float32),
    )(patches, ids_s, ids_m, mask_s, mask_m, sim_targets, mask_bb,
      state["image_queue"], state["text_queue"], scal, slab1)

    image_embeds_p = out1[0:bs * IMG_SEQ, 0:VISION_WIDTH].reshape(bs, IMG_SEQ, VISION_WIDTH)
    image_feat_m = out1[o_feat:o_feat + bs, 0:EMBED_DIM]
    text_feat_m = out1[o_feat:o_feat + bs, EMBED_DIM:2 * EMBED_DIM]
    weights_i2t = out1[o_w:o_w + bs, 0:bs]
    weights_t2i = out1[o_w:o_w + bs, bs:2 * bs]
    loss_ita = out1[o_loss, 0]

    # --- dequeue & enqueue (concat_all_gather is identity for world_size == 1) ---
    # TODO(synk): torch.distributed all_gather has no single-host Pallas equivalent.
    ptr = state["ptr"]
    new_state = {
        "image_queue": jax.lax.dynamic_update_slice(state["image_queue"], image_feat_m.T, (0, ptr)),
        "text_queue": jax.lax.dynamic_update_slice(state["text_queue"], text_feat_m.T, (0, ptr)),
        "idx_queue": jax.lax.dynamic_update_slice(state["idx_queue"], idx_col.T, (0, ptr)),
        "ptr": (ptr + bs) % QUEUE_SIZE,
    }

    # --- hard-negative sampling (negative_all_rank == False branch, no_grad) ---
    # TODO(synk): torch.multinomial replaced by jax.random.categorical with a fixed key.
    def sample_neg(key, w):
        ok = jnp.sum(w, axis=1, keepdims=True) > 0
        w = jnp.where(ok, w, 1.0)                    # guard: degenerate row -> uniform
        return jax.random.categorical(key, jnp.log(jnp.where(w > 0, w, 1e-30)), axis=1)

    k1, k2 = jax.random.split(sample_key)
    neg_idx_t2i = sample_neg(k1, weights_t2i)
    neg_idx_i2t = sample_neg(k2, weights_i2t)

    encoder_input_ids = ob_ids.at[:, 0].set(ENC_TOKEN_ID)
    image_embeds_neg = image_embeds_p[neg_idx_t2i]
    text_ids_neg = encoder_input_ids[neg_idx_i2t]
    text_atts_neg = ui_mask[neg_idx_i2t]

    # positive pair + both negative halves fused into ONE 3B-batch cross-attn pass
    ids_all = jnp.concatenate([encoder_input_ids, encoder_input_ids, text_ids_neg],
                              axis=0).reshape(3 * bs * TEXT_LEN, 1).astype(jnp.int32)
    mask_all = jnp.concatenate([ob_mask, ui_mask, text_atts_neg],
                               axis=0).reshape(1, 3 * bs * TEXT_LEN).astype(jnp.float32)
    img_all = jnp.concatenate([image_embeds_p, image_embeds_neg, image_embeds_p],
                              axis=0).reshape(3 * bs * IMG_SEQ, VISION_WIDTH)

    t = params["text"]
    leaves2 = [("tok", t["tok_emb"]), ("pos", jnp.tile(t["pos_emb"], (3 * bs, 1))),
               ("e_ln_g", t["ln_emb_g"]), ("e_ln_b", t["ln_emb_b"])]
    ap = t["attn"]
    leaves2.extend([("a_ln_g", ap["ln_g"]), ("a_ln_b", ap["ln_b"]),
                    ("a_wqkv", jnp.concatenate([ap["wq"], ap["wk"], ap["wv"]], axis=1)),
                    ("a_bqkv", jnp.concatenate([ap["bq"], ap["bk"], ap["bv"]], axis=1)),
                    ("a_wo", ap["wo"]), ("a_bo", ap["bo"])])
    cp = t["cross"]
    leaves2.extend([("c_ln_g", cp["ln_g"]), ("c_ln_b", cp["ln_b"]),
                    ("c_wq", cp["wq"]), ("c_bq", cp["bq"]),
                    ("c_wkv", jnp.concatenate([cp["wk"], cp["wv"]], axis=1)),
                    ("c_bkv", jnp.concatenate([cp["bk"], cp["bv"]], axis=1)),
                    ("c_wo", cp["wo"]), ("c_bo", cp["bo"])])
    fp = t["ffn"]
    leaves2.extend([("f_ln_g", fp["ln_g"]), ("f_ln_b", fp["ln_b"]),
                    ("f_w1", fp["w1"]), ("f_b1", fp["b1"]),
                    ("f_w2", fp["w2"]), ("f_b2", fp["b2"]),
                    ("lnf_g", t["lnf_g"]), ("lnf_b", t["lnf_b"]),
                    ("itm_w", params["itm_head"]["w"]), ("itm_b", params["itm_head"]["b"])])
    slab2, offs2 = _pack_slab(leaves2)

    loss_itm = pl.pallas_call(
        _make_cross_itm_kernel(offs2, bs),
        in_specs=[vspec] * 4,
        out_specs=vspec,
        out_shape=jax.ShapeDtypeStruct((1, 1), jnp.float32),
    )(ids_all, mask_all, img_all, slab2)[0, 0]

    new_momentum = {"visual_m": visual_m, "vision_proj_m": vision_proj_m,
                    "text_m": text_m, "text_proj_m": text_proj_m}
    return (loss_ita, loss_itm), new_state, new_momentum


# ------------------------------------ main --------------------------------------

if __name__ == "__main__":
    key = jax.random.PRNGKey(0)
    k_img, k_ui, k_ob, k_params, k_state, k_sample = jax.random.split(key, 6)

    image = jax.random.normal(k_img, (B, IMG_CH, IMG_SIZE, IMG_SIZE), jnp.float32)
    ui_ids = jax.random.randint(k_ui, (B, TEXT_LEN), 0, VOCAB, jnp.int32)
    ui_mask = jnp.concatenate(
        [jnp.ones((B, TEXT_LEN - 2), jnp.int32), jnp.zeros((B, 2), jnp.int32)], axis=1)
    ob_ids = jax.random.randint(k_ob, (B, TEXT_LEN), 0, VOCAB, jnp.int32)
    ob_mask = jnp.concatenate(
        [jnp.ones((B, TEXT_LEN - 1), jnp.int32), jnp.zeros((B, 1), jnp.int32)], axis=1)
    idx = jnp.array([7, 13], jnp.int32)
    alpha = jnp.float32(0.4)

    params = init_params(k_params)
    state = init_state(k_state)

    fwd = jax.jit(blip_ui_retrieval_forward)
    (loss_ita, loss_itm), new_state, _ = fwd(
        params, state, image, ui_ids, ui_mask, ob_ids, ob_mask, alpha, idx, k_sample)

    jax.block_until_ready((loss_ita, loss_itm, new_state))
    assert jnp.isfinite(loss_ita) and jnp.isfinite(loss_itm)
    print("KERNEL_OK")
</pallas_src>

<mosaic_0001>
module attributes {stable_mosaic.version = 11 : i64} {
  func.func @kernel(%arg0: memref<16x192xf32, #tpu.memory_space<vmem>>, %arg1: memref<32x1xi32, #tpu.memory_space<vmem>>, %arg2: memref<16x1xi32, #tpu.memory_space<vmem>>, %arg3: memref<1x32xf32, #tpu.memory_space<vmem>>, %arg4: memref<1x16xf32, #tpu.memory_space<vmem>>, %arg5: memref<2x10xf32, #tpu.memory_space<vmem>>, %arg6: memref<2x2xf32, #tpu.memory_space<vmem>>, %arg7: memref<16x8xf32, #tpu.memory_space<vmem>>, %arg8: memref<16x8xf32, #tpu.memory_space<vmem>>, %arg9: memref<2xf32, #tpu.memory_space<smem>>, %arg10: memref<2000x128xf32, #tpu.memory_space<vmem>>, %arg11: memref<40x128xf32, #tpu.memory_space<vmem>>) attributes {dimension_semantics = [], scalar_prefetch = 0 : i64, scratch_operands = 0 : i64, tpu.core_type = #tpu.core_type<tc>} {
    %c0 = arith.constant 0 : index
    %0 = memref.load %arg9[%c0] : memref<2xf32, #tpu.memory_space<smem>>
    %c1 = arith.constant 1 : index
    %1 = memref.load %arg9[%c1] : memref<2xf32, #tpu.memory_space<smem>>
    %cst = arith.constant 0.000000e+00 : f32
    %2 = vector.broadcast %cst : f32 to vector<40x128xf32>
    %c0_0 = arith.constant 0 : index
    %c0_1 = arith.constant 0 : index
    %3 = vector.load %arg11[%c0_0, %c0_1] : memref<40x128xf32, #tpu.memory_space<vmem>>, vector<40x128xf32>
    tpu.vector_store %arg11[%c0_0, %c0_1], %2 {strides = array<i32>} : memref<40x128xf32, #tpu.memory_space<vmem>>, vector<40x128xf32>,
    %4 = tpu.iota {dimensions = array<i32: 0>} : vector<16x16xi32>
    %5 = tpu.iota {dimensions = array<i32: 1>} : vector<16x16xi32>
    %c3_i32 = arith.constant 3 : i32
    %6 = vector.broadcast %c3_i32 : i32 to vector<16x16xi32>
    %7 = arith.shrsi %4, %6 : vector<16x16xi32>
    %c3_i32_2 = arith.constant 3 : i32
    %8 = vector.broadcast %c3_i32_2 : i32 to vector<16x16xi32>
    %9 = arith.shrsi %5, %8 : vector<16x16xi32>
    %10 = arith.cmpi eq, %7, %9 : vector<16x16xi32>
    %c7_i32 = arith.constant 7 : i32
    %11 = vector.broadcast %c7_i32 : i32 to vector<16x16xi32>
    %12 = arith.andi %5, %11 : vector<16x16xi32>
    %c5_i32 = arith.constant 5 : i32
    %13 = vector.broadcast %c5_i32 : i32 to vector<16x16xi32>
    %14 = arith.cmpi slt, %12, %13 : vector<16x16xi32>
    %15 = arith.andi %10, %14 : vector<16x16xi1>
    %cst_3 = arith.constant 0.000000e+00 : f32
    %cst_4 = arith.constant -1.000000e+09 : f32
    %16 = vector.broadcast %cst_3 : f32 to vector<16x16xf32>
    %17 = vector.broadcast %cst_4 : f32 to vector<16x16xf32>
    %18 = arith.select %15, %16, %17 : vector<16x16xi1>, vector<16x16xf32>
    %c0_5 = arith.constant 0 : index
    %c0_6 = arith.constant 0 : index
    %19 = vector.load %arg0[%c0_5, %c0_6] : memref<16x192xf32, #tpu.memory_space<vmem>>, vector<16x192xf32>
    %c0_7 = arith.constant 0 : index
    %c0_8 = arith.constant 0 : index
    %20 = vector.load %arg10[%c0_7, %c0_8] : memref<2000x128xf32, #tpu.memory_space<vmem>>, vector<192x32xf32>
    %21 = arith.truncf %19 : vector<16x192xf32> to vector<16x192xbf16>
    %22 = arith.truncf %20 : vector<192x32xf32> to vector<192x32xbf16>
    %cst_9 = arith.constant dense<0.000000e+00> : vector<16x32xf32>
    %23 = tpu.matmul %21, %22, %cst_9 {dimension_numbers = #tpu.dot_dimension_numbers<[1], [0], [0], [1], [0, 0, 1, 1], [], []>} : vector<16x192xbf16>, vector<192x32xbf16>, vector<16x32xf32> -> vector<16x32xf32>
    %c192 = arith.constant 192 : index
    %c0_10 = arith.constant 0 : index
    %24 = vector.load %arg10[%c192, %c0_10] : memref<2000x128xf32, #tpu.memory_space<vmem>>, vector<16x32xf32>
    %25 = arith.addf %23, %24 : vector<16x32xf32>
    %c208 = arith.constant 208 : index
    %c0_11 = arith.constant 0 : index
    %26 = vector.load %arg10[%c208, %c0_11] : memref<2000x128xf32, #tpu.memory_space<vmem>>, vector<1x32xf32>
    %c216 = arith.constant 216 : index
    %c0_12 = arith.constant 0 : index
    %27 = vector.load %arg10[%c216, %c0_12] : memref<2000x128xf32, #tpu.memory_space<vmem>>, vector<1x32xf32>
    %cst_13 = arith.constant dense<0.000000e+00> : vector<16xf32>
    %28 = vector.multi_reduction <add>, %25, %cst_13 [1] : vector<16x32xf32> to vector<16xf32>
    %29 = vector.shape_cast %28 : vector<16xf32> to vector<16x1xf32>
    %cst_14 = arith.constant 3.200000e+01 : f32
    %30 = vector.broadcast %cst_14 : f32 to vector<16x1xf32>
    %31 = arith.divf %29, %30 : vector<16x1xf32>
    %32 = vector.broadcast %31 : vector<16x1xf32> to vector<16x32xf32>
    %33 = arith.subf %25, %32 : vector<16x32xf32>
    %34 = arith.mulf %33, %33 : vector<16x32xf32>
    %cst_15 = arith.constant dense<0.000000e+00> : vector<16xf32>
    %35 = vector.multi_reduction <add>, %34, %cst_15 [1] : vector<16x32xf32> to vector<16xf32>
    %36 = vector.shape_cast %35 : vector<16xf32> to vector<16x1xf32>
    %cst_16 = arith.constant 3.200000e+01 : f32
    %37 = vector.broadcast %cst_16 : f32 to vector<16x1xf32>
    %38 = arith.divf %36, %37 : vector<16x1xf32>
    %39 = vector.broadcast %31 : vector<16x1xf32> to vector<16x32xf32>
    %40 = arith.subf %25, %39 : vector<16x32xf32>
    %cst_17 = arith.constant 9.99999996E-13 : f32
    %41 = vector.broadcast %cst_17 : f32 to vector<16x1xf32>
    %42 = arith.addf %38, %41 : vector<16x1xf32>
    %43 = math.rsqrt %42 : vector<16x1xf32>
    %44 = vector.broadcast %43 : vector<16x1xf32> to vector<16x32xf32>
    %45 = arith.mulf %40, %44 : vector<16x32xf32>
    %46 = vector.broadcast %26 : vector<1x32xf32> to vector<16x32xf32>
    %47 = arith.mulf %45, %46 : vector<16x32xf32>
    %48 = vector.broadcast %27 : vector<1x32xf32> to vector<16x32xf32>
    %49 = arith.addf %47, %48 : vector<16x32xf32>
    %c224 = arith.constant 224 : index
    %c0_18 = arith.constant 0 : index
    %50 = vector.load %arg10[%c224, %c0_18] : memref<2000x128xf32, #tpu.memory_space<vmem>>, vector<32x96xf32>
    %51 = arith.truncf %49 : vector<16x32xf32> to vector<16x32xbf16>
    %52 = arith.truncf %50 : vector<32x96xf32> to vector<32x96xbf16>
    %cst_19 = arith.constant dense<0.000000e+00> : vector<16x96xf32>
    %53 = tpu.matmul %51, %52, %cst_19 {dimension_numbers = #tpu.dot_dimension_numbers<[1], [0], [0], [1], [0, 0, 1, 1], [], []>} : vector<16x32xbf16>, vector<32x96xbf16>, vector<16x96xf32> -> vector<16x96xf32>
    %c256 = arith.constant 256 : index
    %c0_20 = arith.constant 0 : index
    %54 = vector.load %arg10[%c256, %c0_20] : memref<2000x128xf32, #tpu.memory_space<vmem>>, vector<1x96xf32>
    %55 = vector.broadcast %54 : vector<1x96xf32> to vector<16x96xf32>
    %56 = arith.addf %53, %55 : vector<16x96xf32>
    %57 = vector.extract_strided_slice %56 {offsets = [0, 0], sizes = [16, 32], strides = [1, 1]} : vector<16x96xf32> to vector<16x32xf32>
    %58 = vector.extract_strided_slice %56 {offsets = [0, 32], sizes = [16, 32], strides = [1, 1]} : vector<16x96xf32> to vector<16x32xf32>
    %59 = vector.extract_strided_slice %56 {offsets = [0, 64], sizes = [16, 32], strides = [1, 1]} : vector<16x96xf32> to vector<16x32xf32>
    %60 = arith.truncf %57 : vector<16x32xf32> to vector<16x32xbf16>
    %61 = arith.truncf %58 : vector<16x32xf32> to vector<16x32xbf16>
    %cst_21 = arith.constant dense<0.000000e+00> : vector<16x16xf32>
    %62 = tpu.matmul %60, %61, %cst_21 {dimension_numbers = #tpu.dot_dimension_numbers<[1], [1], [0], [0], [0, 0, 1, 0], [], []>} : vector<16x32xbf16>, vector<16x32xbf16>, vector<16x16xf32> -> vector<16x16xf32>
    %cst_22 = arith.constant 0.176776692 : f32
    %63 = vector.broadcast %cst_22 : f32 to vector<16x16xf32>
    %64 = arith.mulf %62, %63 : vector<16x16xf32>
    %65 = arith.addf %64, %18 : vector<16x16xf32>
    %cst_23 = arith.constant dense<0xFF800000> : vector<16xf32>
    %66 = vector.multi_reduction <maximumf>, %65, %cst_23 [1] : vector<16x16xf32> to vector<16xf32>
    %67 = vector.shape_cast %66 : vector<16xf32> to vector<16x1xf32>
    %68 = vector.broadcast %67 : vector<16x1xf32> to vector<16x16xf32>
    %69 = arith.subf %65, %68 : vector<16x16xf32>
    %70 = math.exp %69 : vector<16x16xf32>
    %cst_24 = arith.constant dense<0.000000e+00> : vector<16xf32>
    %71 = vector.multi_reduction <add>, %70, %cst_24 [1] : vector<16x16xf32> to vector<16xf32>
    %72 = vector.shape_cast %71 : vector<16xf32> to vector<16x1xf32>
    %73 = tpu.reciprocal %72 {approx = true} : vector<16x1xf32> -> vector<16x1xf32>
    %74 = vector.broadcast %73 : vector<16x1xf32> to vector<16x16xf32>
    %75 = arith.mulf %70, %74 : vector<16x16xf32>
    %76 = arith.truncf %75 : vector<16x16xf32> to vector<16x16xbf16>
    %77 = arith.truncf %59 : vector<16x32xf32> to vector<16x32xbf16>
    %cst_25 = arith.constant dense<0.000000e+00> : vector<16x32xf32>
    %78 = tpu.matmul %76, %77, %cst_25 {dimension_numbers = #tpu.dot_dimension_numbers<[1], [0], [0], [1], [0, 0, 1, 1], [], []>} : vector<16x16xbf16>, vector<16x32xbf16>, vector<16x32xf32> -> vector<16x32xf32>
    %c264 = arith.constant 264 : index
    %c0_26 = arith.constant 0 : index
    %79 = vector.load %arg10[%c264, %c0_26] : memref<2000x128xf32, #tpu.memory_space<vmem>>, vector<32x32xf32>
    %80 = arith.truncf %78 : vector<16x32xf32> to vector<16x32xbf16>
    %81 = arith.truncf %79 : vector<32x32xf32> to vector<32x32xbf16>
    %cst_27 = arith.constant dense<0.000000e+00> : vector<16x32xf32>
    %82 = tpu.matmul %80, %81, %cst_27 {dimension_numbers = #tpu.dot_dimension_numbers<[1], [0], [0], [1], [0, 0, 1, 1], [], []>} : vector<16x32xbf16>, vector<32x32xbf16>, vector<16x32xf32> -> vector<16x32xf32>
    %83 = arith.addf %25, %82 : vector<16x32xf32>
    %c296 = arith.constant 296 : index
    %c0_28 = arith.constant 0 : index
    %84 = vector.load %arg10[%c296, %c0_28] : memref<2000x128xf32, #tpu.memory_space<vmem>>, vector<1x32xf32>
    %85 = vector.broadcast %84 : vector<1x32xf32> to vector<16x32xf32>
    %86 = arith.addf %83, %85 : vector<16x32xf32>
    %c304 = arith.constant 304 : index
    %c0_29 = arith.constant 0 : index
    %87 = vector.load %arg10[%c304, %c0_29] : memref<2000x128xf32, #tpu.memory_space<vmem>>, vector<1x32xf32>
    %c312 = arith.constant 312 : index
    %c0_30 = arith.constant 0 : index
    %88 = vector.load %arg10[%c312, %c0_30] : memref<2000x128xf32, #tpu.memory_space<vmem>>, vector<1x32xf32>
    %cst_31 = arith.constant dense<0.000000e+00> : vector<16xf32>
    %89 = vector.multi_reduction <add>, %86, %cst_31 [1] : vector<16x32xf32> to vector<16xf32>
    %90 = vector.shape_cast %89 : vector<16xf32> to vector<16x1xf32>
    %cst_32 = arith.constant 3.200000e+01 : f32
    %91 = vector.broadcast %cst_32 : f32 to vector<16x1xf32>
    %92 = arith.divf %90, %91 : vector<16x1xf32>
    %93 = vector.broadcast %92 : vector<16x1xf32> to vector<16x32xf32>
    %94 = arith.subf %86, %93 : vector<16x32xf32>
    %95 = arith.mulf %94, %94 : vector<16x32xf32>
    %cst_33 = arith.constant dense<0.000000e+00> : vector<16xf32>
    %96 = vector.multi_reduction <add>, %95, %cst_33 [1] : vector<16x32xf32> to vector<16xf32>
    %97 = vector.shape_cast %96 : vector<16xf32> to vector<16x1xf32>
    %cst_34 = arith.constant 3.200000e+01 : f32
    %98 = vector.broadcast %cst_34 : f32 to vector<16x1xf32>
    %99 = arith.divf %97, %98 : vector<16x1xf32>
    %100 = vector.broadcast %92 : vector<16x1xf32> to vector<16x32xf32>
    %101 = arith.subf %86, %100 : vector<16x32xf32>
    %cst_35 = arith.constant 9.99999996E-13 : f32
    %102 = vector.broadcast %cst_35 : f32 to vector<16x1xf32>
    %103 = arith.addf %99, %102 : vector<16x1xf32>
    %104 = math.rsqrt %103 : vector<16x1xf32>
    %105 = vector.broadcast %104 : vector<16x1xf32> to vector<16x32xf32>
    %106 = arith.mulf %101, %105 : vector<16x32xf32>
    %107 = vector.broadcast %87 : vector<1x32xf32> to vector<16x32xf32>
    %108 = arith.mulf %106, %107 : vector<16x32xf32>
    %109 = vector.broadcast %88 : vector<1x32xf32> to vector<16x32xf32>
    %110 = arith.addf %108, %109 : vector<16x32xf32>
    %c320 = arith.constant 320 : index
    %c0_36 = arith.constant 0 : index
    %111 = vector.load %arg10[%c320, %c0_36] : memref<2000x128xf32, #tpu.memory_space<vmem>>, vector<32x128xf32>
    %112 = arith.truncf %110 : vector<16x32xf32> to vector<16x32xbf16>
    %113 = arith.truncf %111 : vector<32x128xf32> to vector<32x128xbf16>
    %cst_37 = arith.constant dense<0.000000e+00> : vector<16x128xf32>
    %114 = tpu.matmul %112, %113, %cst_37 {dimension_numbers = #tpu.dot_dimension_numbers<[1], [0], [0], [1], [0, 0, 1, 1], [], []>} : vector<16x32xbf16>, vector<32x128xbf16>, vector<16x128xf32> -> vector<16x128xf32>
    %c352 = arith.constant 352 : index
    %c0_38 = arith.constant 0 : index
    %115 = vector.load %arg10[%c352, %c0_38] : memref<2000x128xf32, #tpu.memory_space<vmem>>, vector<1x128xf32>
    %116 = vector.broadcast %115 : vector<1x128xf32> to vector<16x128xf32>
    %117 = arith.addf %114, %116 : vector<16x128xf32>
    %118 = arith.mulf %117, %117 : vector<16x128xf32>
    %119 = arith.mulf %117, %118 : vector<16x128xf32>
    %cst_39 = arith.constant 4.471500e-02 : f32
    %120 = vector.broadcast %cst_39 : f32 to vector<16x128xf32>
    %121 = arith.mulf %120, %119 : vector<16x128xf32>
    %122 = arith.addf %117, %121 : vector<16x128xf32>
    %cst_40 = arith.constant 0.797884583 : f32
    %123 = vector.broadcast %cst_40 : f32 to vector<16x128xf32>
    %124 = arith.mulf %123, %122 : vector<16x128xf32>
    %125 = math.tanh %124 : vector<16x128xf32>
    %cst_41 = arith.constant 1.000000e+00 : f32
    %126 = vector.broadcast %cst_41 : f32 to vector<16x128xf32>
    %127 = arith.addf %126, %125 : vector<16x128xf32>
    %cst_42 = arith.constant 5.000000e-01 : f32
    %128 = vector.broadcast %cst_42 : f32 to vector<16x128xf32>
    %129 = arith.mulf %128, %127 : vector<16x128xf32>
    %130 = arith.mulf %117, %129 : vector<16x128xf32>
    %c360 = arith.constant 360 : index
    %c0_43 = arith.constant 0 : index
    %131 = vector.load %arg10[%c360, %c0_43] : memref<2000x128xf32, #tpu.memory_space<vmem>>, vector<128x32xf32>
    %132 = arith.truncf %130 : vector<16x128xf32> to vector<16x128xbf16>
    %133 = arith.truncf %131 : vector<128x32xf32> to vector<128x32xbf16>
    %cst_44 = arith.constant dense<0.000000e+00> : vector<16x32xf32>
    %134 = tpu.matmul %132, %133, %cst_44 {dimension_numbers = #tpu.dot_dimension_numbers<[1], [0], [0], [1], [0, 0, 1, 1], [], []>} : vector<16x128xbf16>, vector<128x32xbf16>, vector<16x32xf32> -> vector<16x32xf32>
    %135 = arith.addf %86, %134 : vector<16x32xf32>
    %c488 = arith.constant 488 : index
    %c0_45 = arith.constant 0 : index
    %136 = vector.load %arg10[%c488, %c0_45] : memref<2000x128xf32, #tpu.memory_space<vmem>>, vector<1x32xf32>
    %137 = vector.broadcast %136 : vector<1x32xf32> to vector<16x32xf32>
    %138 = arith.addf %135, %137 : vector<16x32xf32>
    %c496 = arith.constant 496 : index
    %c0_46 = arith.constant 0 : index
    %139 = vector.load %arg10[%c496, %c0_46] : memref<2000x128xf32, #tpu.memory_space<vmem>>, vector<1x32xf32>
    %c504 = arith.constant 504 : index
    %c0_47 = arith.constant 0 : index
    %140 = vector.load %arg10[%c504, %c0_47] : memref<2000x128xf32, #tpu.memory_space<vmem>>, vector<1x32xf32>
    %cst_48 = arith.constant dense<0.000000e+00> : vector<16xf32>
    %141 = vector.multi_reduction <add>, %138, %cst_48 [1] : vector<16x32xf32> to vector<16xf32>
    %142 = vector.shape_cast %141 : vector<16xf32> to vector<16x1xf32>
    %cst_49 = arith.constant 3.200000e+01 : f32
    %143 = vector.broadcast %cst_49 : f32 to vector<16x1xf32>
    %144 = arith.divf %142, %143 : vector<16x1xf32>
    %145 = vector.broadcast %144 : vector<16x1xf32> to vector<16x32xf32>
    %146 = arith.subf %138, %145 : vector<16x32xf32>
    %147 = arith.mulf %146, %146 : vector<16x32xf32>
    %cst_50 = arith.constant dense<0.000000e+00> : vector<16xf32>
    %148 = vector.multi_reduction <add>, %147, %cst_50 [1] : vector<16x32xf32> to vector<16xf32>
    %149 = vector.shape_cast %148 : vector<16xf32> to vector<16x1xf32>
    %cst_51 = arith.constant 3.200000e+01 : f32
    %150 = vector.broadcast %cst_51 : f32 to vector<16x1xf32>
    %151 = arith.divf %149, %150 : vector<16x1xf32>
    %152 = vector.broadcast %144 : vector<16x1xf32> to vector<16x32xf32>
    %153 = arith.subf %138, %152 : vector<16x32xf32>
    %cst_52 = arith.constant 9.99999996E-13 : f32
    %154 = vector.broadcast %cst_52 : f32 to vector<16x1xf32>
    %155 = arith.addf %151, %154 : vector<16x1xf32>
    %156 = math.rsqrt %155 : vector<16x1xf32>
    %157 = vector.broadcast %156 : vector<16x1xf32> to vector<16x32xf32>
    %158 = arith.mulf %153, %157 : vector<16x32xf32>
    %159 = vector.broadcast %139 : vector<1x32xf32> to vector<16x32xf32>
    %160 = arith.mulf %158, %159 : vector<16x32xf32>
    %161 = vector.broadcast %140 : vector<1x32xf32> to vector<16x32xf32>
    %162 = arith.addf %160, %161 : vector<16x32xf32>
    %163 = vector.extract_strided_slice %162 {offsets = [0, 0], sizes = [1, 32], strides = [1, 1]} : vector<16x32xf32> to vector<1x32xf32>
    %164 = vector.extract_strided_slice %162 {offsets = [8, 0], sizes = [1, 32], strides = [1, 1]} : vector<16x32xf32> to vector<1x32xf32>
    %165 = tpu.concatenate %163, %164 in 0 : vector<1x32xf32>, vector<1x32xf32> -> vector<2x32xf32>
    %c512 = arith.constant 512 : index
    %c0_53 = arith.constant 0 : index
    %166 = vector.load %arg10[%c512, %c0_53] : memref<2000x128xf32, #tpu.memory_space<vmem>>, vector<32x16xf32>
    %c544 = arith.constant 544 : index
    %c0_54 = arith.constant 0 : index
    %167 = vector.load %arg10[%c544, %c0_54] : memref<2000x128xf32, #tpu.memory_space<vmem>>, vector<1x16xf32>
    %cst_55 = arith.constant dense<0.000000e+00> : vector<2x16xf32>
    %168 = tpu.matmul %165, %166, %cst_55 {dimension_numbers = #tpu.dot_dimension_numbers<[1], [0], [0], [1], [0, 0, 1, 1], [], []>} : vector<2x32xf32>, vector<32x16xf32>, vector<2x16xf32> -> vector<2x16xf32>
    %169 = vector.broadcast %167 : vector<1x16xf32> to vector<2x16xf32>
    %170 = arith.addf %168, %169 : vector<2x16xf32>
    %171 = arith.mulf %170, %170 : vector<2x16xf32>
    %cst_56 = arith.constant dense<0.000000e+00> : vector<2xf32>
    %172 = vector.multi_reduction <add>, %171, %cst_56 [1] : vector<2x16xf32> to vector<2xf32>
    %173 = vector.shape_cast %172 : vector<2xf32> to vector<2x1xf32>
    %cst_57 = arith.constant 1.000000e-24 : f32
    %174 = vector.broadcast %cst_57 : f32 to vector<2x1xf32>
    %175 = arith.maximumf %173, %174 : vector<2x1xf32>
    %176 = math.rsqrt %175 : vector<2x1xf32>
    %177 = vector.broadcast %176 : vector<2x1xf32> to vector<2x16xf32>
    %178 = arith.mulf %170, %177 : vector<2x16xf32>
    %c0_58 = arith.constant 0 : index
    %c0_59 = arith.constant 0 : index
    %179 = vector.load %arg0[%c0_58, %c0_59] : memref<16x192xf32, #tpu.memory_space<vmem>>, vector<16x192xf32>
    %c552 = arith.constant 552 : index
    %c0_60 = arith.constant 0 : index
    %180 = vector.load %arg10[%c552, %c0_60] : memref<2000x128xf32, #tpu.memory_space<vmem>>, vector<192x32xf32>
    %181 = arith.truncf %179 : vector<16x192xf32> to vector<16x192xbf16>
    %182 = arith.truncf %180 : vector<192x32xf32> to vector<192x32xbf16>
    %cst_61 = arith.constant dense<0.000000e+00> : vector<16x32xf32>
    %183 = tpu.matmul %181, %182, %cst_61 {dimension_numbers = #tpu.dot_dimension_numbers<[1], [0], [0], [1], [0, 0, 1, 1], [], []>} : vector<16x192xbf16>, vector<192x32xbf16>, vector<16x32xf32> -> vector<16x32xf32>
    %c744 = arith.constant 744 : index
    %c0_62 = arith.constant 0 : index
    %184 = vector.load %arg10[%c744, %c0_62] : memref<2000x128xf32, #tpu.memory_space<vmem>>, vector<16x32xf32>
    %185 = arith.addf %183, %184 : vector<16x32xf32>
    %c760 = arith.constant 760 : index
    %c0_63 = arith.constant 0 : index
    %186 = vector.load %arg10[%c760, %c0_63] : memref<2000x128xf32, #tpu.memory_space<vmem>>, vector<1x32xf32>
    %c768 = arith.constant 768 : index
    %c0_64 = arith.constant 0 : index
    %187 = vector.load %arg10[%c768, %c0_64] : memref<2000x128xf32, #tpu.memory_space<vmem>>, vector<1x32xf32>
    %cst_65 = arith.constant dense<0.000000e+00> : vector<16xf32>
    %188 = vector.multi_reduction <add>, %185, %cst_65 [1] : vector<16x32xf32> to vector<16xf32>
    %189 = vector.shape_cast %188 : vector<16xf32> to vector<16x1xf32>
    %cst_66 = arith.constant 3.200000e+01 : f32
    %190 = vector.broadcast %cst_66 : f32 to vector<16x1xf32>
    %191 = arith.divf %189, %190 : vector<16x1xf32>
    %192 = vector.broadcast %191 : vector<16x1xf32> to vector<16x32xf32>
    %193 = arith.subf %185, %192 : vector<16x32xf32>
    %194 = arith.mulf %193, %193 : vector<16x32xf32>
    %cst_67 = arith.constant dense<0.000000e+00> : vector<16xf32>
    %195 = vector.multi_reduction <add>, %194, %cst_67 [1] : vector<16x32xf32> to vector<16xf32>
    %196 = vector.shape_cast %195 : vector<16xf32> to vector<16x1xf32>
    %cst_68 = arith.constant 3.200000e+01 : f32
    %197 = vector.broadcast %cst_68 : f32 to vector<16x1xf32>
    %198 = arith.divf %196, %197 : vector<16x1xf32>
    %199 = vector.broadcast %191 : vector<16x1xf32> to vector<16x32xf32>
    %200 = arith.subf %185, %199 : vector<16x32xf32>
    %cst_69 = arith.constant 9.99999996E-13 : f32
    %201 = vector.broadcast %cst_69 : f32 to vector<16x1xf32>
    %202 = arith.addf %198, %201 : vector<16x1xf32>
    %203 = math.rsqrt %202 : vector<16x1xf32>
    %204 = vector.broadcast %203 : vector<16x1xf32> to vector<16x32xf32>
    %205 = arith.mulf %200, %204 : vector<16x32xf32>
    %206 = vector.broadcast %186 : vector<1x32xf32> to vector<16x32xf32>
    %207 = arith.mulf %205, %206 : vector<16x32xf32>
    %208 = vector.broadcast %187 : vector<1x32xf32> to vector<16x32xf32>
    %209 = arith.addf %207, %208 : vector<16x32xf32>
    %c776 = arith.constant 776 : index
    %c0_70 = arith.constant 0 : index
    %210 = vector.load %arg10[%c776, %c0_70] : memref<2000x128xf32, #tpu.memory_space<vmem>>, vector<32x96xf32>
    %211 = arith.truncf %209 : vector<16x32xf32> to vector<16x32xbf16>
    %212 = arith.truncf %210 : vector<32x96xf32> to vector<32x96xbf16>
    %cst_71 = arith.constant dense<0.000000e+00> : vector<16x96xf32>
    %213 = tpu.matmul %211, %212, %cst_71 {dimension_numbers = #tpu.dot_dimension_numbers<[1], [0], [0], [1], [0, 0, 1, 1], [], []>} : vector<16x32xbf16>, vector<32x96xbf16>, vector<16x96xf32> -> vector<16x96xf32>
    %c808 = arith.constant 808 : index
    %c0_72 = arith.constant 0 : index
    %214 = vector.load %arg10[%c808, %c0_72] : memref<2000x128xf32, #tpu.memory_space<vmem>>, vector<1x96xf32>
    %215 = vector.broadcast %214 : vector<1x96xf32> to vector<16x96xf32>
    %216 = arith.addf %213, %215 : vector<16x96xf32>
    %217 = vector.extract_strided_slice %216 {offsets = [0, 0], sizes = [16, 32], strides = [1, 1]} : vector<16x96xf32> to vector<16x32xf32>
    %218 = vector.extract_strided_slice %216 {offsets = [0, 32], sizes = [16, 32], strides = [1, 1]} : vector<16x96xf32> to vector<16x32xf32>
    %219 = vector.extract_strided_slice %216 {offsets = [0, 64], sizes = [16, 32], strides = [1, 1]} : vector<16x96xf32> to vector<16x32xf32>
    %220 = arith.truncf %217 : vector<16x32xf32> to vector<16x32xbf16>
    %221 = arith.truncf %218 : vector<16x32xf32> to vector<16x32xbf16>
    %cst_73 = arith.constant dense<0.000000e+00> : vector<16x16xf32>
    %222 = tpu.matmul %220, %221, %cst_73 {dimension_numbers = #tpu.dot_dimension_numbers<[1], [1], [0], [0], [0, 0, 1, 0], [], []>} : vector<16x32xbf16>, vector<16x32xbf16>, vector<16x16xf32> -> vector<16x16xf32>
    %cst_74 = arith.constant 0.176776692 : f32
    %223 = vector.broadcast %cst_74 : f32 to vector<16x16xf32>
    %224 = arith.mulf %222, %223 : vector<16x16xf32>
    %225 = arith.addf %224, %18 : vector<16x16xf32>
    %cst_75 = arith.constant dense<0xFF800000> : vector<16xf32>
    %226 = vector.multi_reduction <maximumf>, %225, %cst_75 [1] : vector<16x16xf32> to vector<16xf32>
    %227 = vector.shape_cast %226 : vector<16xf32> to vector<16x1xf32>
    %228 = vector.broadcast %227 : vector<16x1xf32> to vector<16x16xf32>
    %229 = arith.subf %225, %228 : vector<16x16xf32>
    %230 = math.exp %229 : vector<16x16xf32>
    %cst_76 = arith.constant dense<0.000000e+00> : vector<16xf32>
    %231 = vector.multi_reduction <add>, %230, %cst_76 [1] : vector<16x16xf32> to vector<16xf32>
    %232 = vector.shape_cast %231 : vector<16xf32> to vector<16x1xf32>
    %233 = tpu.reciprocal %232 {approx = true} : vector<16x1xf32> -> vector<16x1xf32>
    %234 = vector.broadcast %233 : vector<16x1xf32> to vector<16x16xf32>
    %235 = arith.mulf %230, %234 : vector<16x16xf32>
    %236 = arith.truncf %235 : vector<16x16xf32> to vector<16x16xbf16>
    %237 = arith.truncf %219 : vector<16x32xf32> to vector<16x32xbf16>
    %cst_77 = arith.constant dense<0.000000e+00> : vector<16x32xf32>
    %238 = tpu.matmul %236, %237, %cst_77 {dimension_numbers = #tpu.dot_dimension_numbers<[1], [0], [0], [1], [0, 0, 1, 1], [], []>} : vector<16x16xbf16>, vector<16x32xbf16>, vector<16x32xf32> -> vector<16x32xf32>
    %c816 = arith.constant 816 : index
    %c0_78 = arith.constant 0 : index
    %239 = vector.load %arg10[%c816, %c0_78] : memref<2000x128xf32, #tpu.memory_space<vmem>>, vector<32x32xf32>
    %240 = arith.truncf %238 : vector<16x32xf32> to vector<16x32xbf16>
    %241 = arith.truncf %239 : vector<32x32xf32> to vector<32x32xbf16>
    %cst_79 = arith.constant dense<0.000000e+00> : vector<16x32xf32>
    %242 = tpu.matmul %240, %241, %cst_79 {dimension_numbers = #tpu.dot_dimension_numbers<[1], [0], [0], [1], [0, 0, 1, 1], [], []>} : vector<16x32xbf16>, vector<32x32xbf16>, vector<16x32xf32> -> vector<16x32xf32>
    %243 = arith.addf %185, %242 : vector<16x32xf32>
    %c848 = arith.constant 848 : index
    %c0_80 = arith.constant 0 : index
    %244 = vector.load %arg10[%c848, %c0_80] : memref<2000x128xf32, #tpu.memory_space<vmem>>, vector<1x32xf32>
    %245 = vector.broadcast %244 : vector<1x32xf32> to vector<16x32xf32>
    %246 = arith.addf %243, %245 : vector<16x32xf32>
    %c856 = arith.constant 856 : index
    %c0_81 = arith.constant 0 : index
    %247 = vector.load %arg10[%c856, %c0_81] : memref<2000x128xf32, #tpu.memory_space<vmem>>, vector<1x32xf32>
    %c864 = arith.constant 864 : index
    %c0_82 = arith.constant 0 : index
    %248 = vector.load %arg10[%c864, %c0_82] : memref<2000x128xf32, #tpu.memory_space<vmem>>, vector<1x32xf32>
    %cst_83 = arith.constant dense<0.000000e+00> : vector<16xf32>
    %249 = vector.multi_reduction <add>, %246, %cst_83 [1] : vector<16x32xf32> to vector<16xf32>
    %250 = vector.shape_cast %249 : vector<16xf32> to vector<16x1xf32>
    %cst_84 = arith.constant 3.200000e+01 : f32
    %251 = vector.broadcast %cst_84 : f32 to vector<16x1xf32>
    %252 = arith.divf %250, %251 : vector<16x1xf32>
    %253 = vector.broadcast %252 : vector<16x1xf32> to vector<16x32xf32>
    %254 = arith.subf %246, %253 : vector<16x32xf32>
    %255 = arith.mulf %254, %254 : vector<16x32xf32>
    %cst_85 = arith.constant dense<0.000000e+00> : vector<16xf32>
    %256 = vector.multi_reduction <add>, %255, %cst_85 [1] : vector<16x32xf32> to vector<16xf32>
    %257 = vector.shape_cast %256 : vector<16xf32> to vector<16x1xf32>
    %cst_86 = arith.constant 3.200000e+01 : f32
    %258 = vector.broadcast %cst_86 : f32 to vector<16x1xf32>
    %259 = arith.divf %257, %258 : vector<16x1xf32>
    %260 = vector.broadcast %252 : vector<16x1xf32> to vector<16x32xf32>
    %261 = arith.subf %246, %260 : vector<16x32xf32>
    %cst_87 = arith.constant 9.99999996E-13 : f32
    %262 = vector.broadcast %cst_87 : f32 to vector<16x1xf32>
    %263 = arith.addf %259, %262 : vector<16x1xf32>
    %264 = math.rsqrt %263 : vector<16x1xf32>
    %265 = vector.broadcast %264 : vector<16x1xf32> to vector<16x32xf32>
    %266 = arith.mulf %261, %265 : vector<16x32xf32>
    %267 = vector.broadcast %247 : vector<1x32xf32> to vector<16x32xf32>
    %268 = arith.mulf %266, %267 : vector<16x32xf32>
    %269 = vector.broadcast %248 : vector<1x32xf32> to vector<16x32xf32>
    %270 = arith.addf %268, %269 : vector<16x32xf32>
    %c872 = arith.constant 872 : index
    %c0_88 = arith.constant 0 : index
    %271 = vector.load %arg10[%c872, %c0_88] : memref<2000x128xf32, #tpu.memory_space<vmem>>, vector<32x128xf32>
    %272 = arith.truncf %270 : vector<16x32xf32> to vector<16x32xbf16>
    %273 = arith.truncf %271 : vector<32x128xf32> to vector<32x128xbf16>
    %cst_89 = arith.constant dense<0.000000e+00> : vector<16x128xf32>
    %274 = tpu.matmul %272, %273, %cst_89 {dimension_numbers = #tpu.dot_dimension_numbers<[1], [0], [0], [1], [0, 0, 1, 1], [], []>} : vector<16x32xbf16>, vector<32x128xbf16>, vector<16x128xf32> -> vector<16x128xf32>
    %c904 = arith.constant 904 : index
    %c0_90 = arith.constant 0 : index
    %275 = vector.load %arg10[%c904, %c0_90] : memref<2000x128xf32, #tpu.memory_space<vmem>>, vector<1x128xf32>
    %276 = vector.broadcast %275 : vector<1x128xf32> to vector<16x128xf32>
    %277 = arith.addf %274, %276 : vector<16x128xf32>
    %278 = arith.mulf %277, %277 : vector<16x128xf32>
    %279 = arith.mulf %277, %278 : vector<16x128xf32>
    %cst_91 = arith.constant 4.471500e-02 : f32
    %280 = vector.broadcast %cst_91 : f32 to vector<16x128xf32>
    %281 = arith.mulf %280, %279 : vector<16x128xf32>
    %282 = arith.addf %277, %281 : vector<16x128xf32>
    %cst_92 = arith.constant 0.797884583 : f32
    %283 = vector.broadcast %cst_92 : f32 to vector<16x128xf32>
    %284 = arith.mulf %283, %282 : vector<16x128xf32>
    %285 = math.tanh %284 : vector<16x128xf32>
    %cst_93 = arith.constant 1.000000e+00 : f32
    %286 = vector.broadcast %cst_93 : f32 to vector<16x128xf32>
    %287 = arith.addf %286, %285 : vector<16x128xf32>
    %cst_94 = arith.constant 5.000000e-01 : f32
    %288 = vector.broadcast %cst_94 : f32 to vector<16x128xf32>
    %289 = arith.mulf %288, %287 : vector<16x128xf32>
    %290 = arith.mulf %277, %289 : vector<16x128xf32>
    %c912 = arith.constant 912 : index
    %c0_95 = arith.constant 0 : index
    %291 = vector.load %arg10[%c912, %c0_95] : memref<2000x128xf32, #tpu.memory_space<vmem>>, vector<128x32xf32>
    %292 = arith.truncf %290 : vector<16x128xf32> to vector<16x128xbf16>
    %293 = arith.truncf %291 : vector<128x32xf32> to vector<128x32xbf16>
    %cst_96 = arith.constant dense<0.000000e+00> : vector<16x32xf32>
    %294 = tpu.matmul %292, %293, %cst_96 {dimension_numbers = #tpu.dot_dimension_numbers<[1], [0], [0], [1], [0, 0, 1, 1], [], []>} : vector<16x128xbf16>, vector<128x32xbf16>, vector<16x32xf32> -> vector<16x32xf32>
    %295 = arith.addf %246, %294 : vector<16x32xf32>
    %c1040 = arith.constant 1040 : index
    %c0_97 = arith.constant 0 : index
    %296 = vector.load %arg10[%c1040, %c0_97] : memref<2000x128xf32, #tpu.memory_space<vmem>>, vector<1x32xf32>
    %297 = vector.broadcast %296 : vector<1x32xf32> to vector<16x32xf32>
    %298 = arith.addf %295, %297 : vector<16x32xf32>
    %c1048 = arith.constant 1048 : index
    %c0_98 = arith.constant 0 : index
    %299 = vector.load %arg10[%c1048, %c0_98] : memref<2000x128xf32, #tpu.memory_space<vmem>>, vector<1x32xf32>
    %c1056 = arith.constant 1056 : index
    %c0_99 = arith.constant 0 : index
    %300 = vector.load %arg10[%c1056, %c0_99] : memref<2000x128xf32, #tpu.memory_space<vmem>>, vector<1x32xf32>
    %cst_100 = arith.constant dense<0.000000e+00> : vector<16xf32>
    %301 = vector.multi_reduction <add>, %298, %cst_100 [1] : vector<16x32xf32> to vector<16xf32>
    %302 = vector.shape_cast %301 : vector<16xf32> to vector<16x1xf32>
    %cst_101 = arith.constant 3.200000e+01 : f32
    %303 = vector.broadcast %cst_101 : f32 to vector<16x1xf32>
    %304 = arith.divf %302, %303 : vector<16x1xf32>
    %305 = vector.broadcast %304 : vector<16x1xf32> to vector<16x32xf32>
    %306 = arith.subf %298, %305 : vector<16x32xf32>
    %307 = arith.mulf %306, %306 : vector<16x32xf32>
    %cst_102 = arith.constant dense<0.000000e+00> : vector<16xf32>
    %308 = vector.multi_reduction <add>, %307, %cst_102 [1] : vector<16x32xf32> to vector<16xf32>
    %309 = vector.shape_cast %308 : vector<16xf32> to vector<16x1xf32>
    %cst_103 = arith.constant 3.200000e+01 : f32
    %310 = vector.broadcast %cst_103 : f32 to vector<16x1xf32>
    %311 = arith.divf %309, %310 : vector<16x1xf32>
    %312 = vector.broadcast %304 : vector<16x1xf32> to vector<16x32xf32>
    %313 = arith.subf %298, %312 : vector<16x32xf32>
    %cst_104 = arith.constant 9.99999996E-13 : f32
    %314 = vector.broadcast %cst_104 : f32 to vector<16x1xf32>
    %315 = arith.addf %311, %314 : vector<16x1xf32>
    %316 = math.rsqrt %315 : vector<16x1xf32>
    %317 = vector.broadcast %316 : vector<16x1xf32> to vector<16x32xf32>
    %318 = arith.mulf %313, %317 : vector<16x32xf32>
    %319 = vector.broadcast %299 : vector<1x32xf32> to vector<16x32xf32>
    %320 = arith.mulf %318, %319 : vector<16x32xf32>
    %321 = vector.broadcast %300 : vector<1x32xf32> to vector<16x32xf32>
    %322 = arith.addf %320, %321 : vector<16x32xf32>
    %323 = vector.extract_strided_slice %322 {offsets = [0, 0], sizes = [1, 32], strides = [1, 1]} : vector<16x32xf32> to vector<1x32xf32>
    %324 = vector.extract_strided_slice %322 {offsets = [8, 0], sizes = [1, 32], strides = [1, 1]} : vector<16x32xf32> to vector<1x32xf32>
    %325 = tpu.concatenate %323, %324 in 0 : vector<1x32xf32>, vector<1x32xf32> -> vector<2x32xf32>
    %c1064 = arith.constant 1064 : index
    %c0_105 = arith.constant 0 : index
    %326 = vector.load %arg10[%c1064, %c0_105] : memref<2000x128xf32, #tpu.memory_space<vmem>>, vector<32x16xf32>
    %c1096 = arith.constant 1096 : index
    %c0_106 = arith.constant 0 : index
    %327 = vector.load %arg10[%c1096, %c0_106] : memref<2000x128xf32, #tpu.memory_space<vmem>>, vector<1x16xf32>
    %cst_107 = arith.constant dense<0.000000e+00> : vector<2x16xf32>
    %328 = tpu.matmul %325, %326, %cst_107 {dimension_numbers = #tpu.dot_dimension_numbers<[1], [0], [0], [1], [0, 0, 1, 1], [], []>} : vector<2x32xf32>, vector<32x16xf32>, vector<2x16xf32> -> vector<2x16xf32>
    %329 = vector.broadcast %327 : vector<1x16xf32> to vector<2x16xf32>
    %330 = arith.addf %328, %329 : vector<2x16xf32>
    %331 = arith.mulf %330, %330 : vector<2x16xf32>
    %cst_108 = arith.constant dense<0.000000e+00> : vector<2xf32>
    %332 = vector.multi_reduction <add>, %331, %cst_108 [1] : vector<2x16xf32> to vector<2xf32>
    %333 = vector.shape_cast %332 : vector<2xf32> to vector<2x1xf32>
    %cst_109 = arith.constant 1.000000e-24 : f32
    %334 = vector.broadcast %cst_109 : f32 to vector<2x1xf32>
    %335 = arith.maximumf %333, %334 : vector<2x1xf32>
    %336 = math.rsqrt %335 : vector<2x1xf32>
    %337 = vector.broadcast %336 : vector<2x1xf32> to vector<2x16xf32>
    %338 = arith.mulf %330, %337 : vector<2x16xf32>
    %339 = tpu.iota {dimensions = array<i32: 1>} : vector<32x64xi32>
    %c0_110 = arith.constant 0 : index
    %c0_111 = arith.constant 0 : index
    %340 = vector.load %arg1[%c0_110, %c0_111] : memref<32x1xi32, #tpu.memory_space<vmem>>, vector<32x1xi32>
    %341 = vector.broadcast %340 : vector<32x1xi32> to vector<32x64xi32>
    %342 = arith.cmpi eq, %339, %341 : vector<32x64xi32>
    %343 = arith.extui %342 : vector<32x64xi1> to vector<32x64xi32>
    %344 = arith.sitofp %343 : vector<32x64xi32> to vector<32x64xf32>
    %c1104 = arith.constant 1104 : index
    %c0_112 = arith.constant 0 : index
    %345 = vector.load %arg10[%c1104, %c0_112] : memref<2000x128xf32, #tpu.memory_space<vmem>>, vector<64x32xf32>
    %346 = arith.truncf %344 : vector<32x64xf32> to vector<32x64xbf16>
    %347 = arith.truncf %345 : vector<64x32xf32> to vector<64x32xbf16>
    %cst_113 = arith.constant dense<0.000000e+00> : vector<32x32xf32>
    %348 = tpu.matmul %346, %347, %cst_113 {dimension_numbers = #tpu.dot_dimension_numbers<[1], [0], [0], [1], [0, 0, 1, 1], [], []>} : vector<32x64xbf16>, vector<64x32xbf16>, vector<32x32xf32> -> vector<32x32xf32>
    %c1168 = arith.constant 1168 : index
    %c0_114 = arith.constant 0 : index
    %349 = vector.load %arg10[%c1168, %c0_114] : memref<2000x128xf32, #tpu.memory_space<vmem>>, vector<32x32xf32>
    %350 = arith.addf %348, %349 : vector<32x32xf32>
    %c1200 = arith.constant 1200 : index
    %c0_115 = arith.constant 0 : index
    %351 = vector.load %arg10[%c1200, %c0_115] : memref<2000x128xf32, #tpu.memory_space<vmem>>, vector<1x32xf32>
    %c1208 = arith.constant 1208 : index
    %c0_116 = arith.constant 0 : index
    %352 = vector.load %arg10[%c1208, %c0_116] : memref<2000x128xf32, #tpu.memory_space<vmem>>, vector<1x32xf32>
    %cst_117 = arith.constant dense<0.000000e+00> : vector<32xf32>
    %353 = vector.multi_reduction <add>, %350, %cst_117 [1] : vector<32x32xf32> to vector<32xf32>
    %354 = vector.shape_cast %353 : vector<32xf32> to vector<32x1xf32>
    %cst_118 = arith.constant 3.200000e+01 : f32
    %355 = vector.broadcast %cst_118 : f32 to vector<32x1xf32>
    %356 = arith.divf %354, %355 : vector<32x1xf32>
    %357 = vector.broadcast %356 : vector<32x1xf32> to vector<32x32xf32>
    %358 = arith.subf %350, %357 : vector<32x32xf32>
    %359 = arith.mulf %358, %358 : vector<32x32xf32>
    %cst_119 = arith.constant dense<0.000000e+00> : vector<32xf32>
    %360 = vector.multi_reduction <add>, %359, %cst_119 [1] : vector<32x32xf32> to vector<32xf32>
    %361 = vector.shape_cast %360 : vector<32xf32> to vector<32x1xf32>
    %cst_120 = arith.constant 3.200000e+01 : f32
    %362 = vector.broadcast %cst_120 : f32 to vector<32x1xf32>
    %363 = arith.divf %361, %362 : vector<32x1xf32>
    %364 = vector.broadcast %356 : vector<32x1xf32> to vector<32x32xf32>
    %365 = arith.subf %350, %364 : vector<32x32xf32>
    %cst_121 = arith.constant 9.99999996E-13 : f32
    %366 = vector.broadcast %cst_121 : f32 to vector<32x1xf32>
    %367 = arith.addf %363, %366 : vector<32x1xf32>
    %368 = math.rsqrt %367 : vector<32x1xf32>
    %369 = vector.broadcast %368 : vector<32x1xf32> to vector<32x32xf32>
    %370 = arith.mulf %365, %369 : vector<32x32xf32>
    %371 = vector.broadcast %351 : vector<1x32xf32> to vector<32x32xf32>
    %372 = arith.mulf %370, %371 : vector<32x32xf32>
    %373 = vector.broadcast %352 : vector<1x32xf32> to vector<32x32xf32>
    %374 = arith.addf %372, %373 : vector<32x32xf32>
    %c0_122 = arith.constant 0 : index
    %c0_123 = arith.constant 0 : index
    %375 = vector.load %arg3[%c0_122, %c0_123] : memref<1x32xf32, #tpu.memory_space<vmem>>, vector<1x32xf32>
    %376 = tpu.iota {dimensions = array<i32: 0>} : vector<32x32xi32>
    %377 = tpu.iota {dimensions = array<i32: 1>} : vector<32x32xi32>
    %c3_i32_124 = arith.constant 3 : i32
    %378 = vector.broadcast %c3_i32_124 : i32 to vector<32x32xi32>
    %379 = arith.shrsi %376, %378 : vector<32x32xi32>
    %c3_i32_125 = arith.constant 3 : i32
    %380 = vector.broadcast %c3_i32_125 : i32 to vector<32x32xi32>
    %381 = arith.shrsi %377, %380 : vector<32x32xi32>
    %382 = arith.cmpi eq, %379, %381 : vector<32x32xi32>
    %cst_126 = arith.constant 0.000000e+00 : f32
    %cst_127 = arith.constant -1.000000e+09 : f32
    %383 = vector.broadcast %cst_126 : f32 to vector<32x32xf32>
    %384 = vector.broadcast %cst_127 : f32 to vector<32x32xf32>
    %385 = arith.select %382, %383, %384 : vector<32x32xi1>, vector<32x32xf32>
    %cst_128 = arith.constant 1.000000e+00 : f32
    %386 = vector.broadcast %cst_128 : f32 to vector<1x32xf32>
    %387 = arith.subf %375, %386 : vector<1x32xf32>
    %cst_129 = arith.constant 1.000000e+09 : f32
    %388 = vector.broadcast %cst_129 : f32 to vector<1x32xf32>
    %389 = arith.mulf %387, %388 : vector<1x32xf32>
    %390 = vector.broadcast %389 : vector<1x32xf32> to vector<32x32xf32>
    %391 = arith.addf %385, %390 : vector<32x32xf32>
    %c1216 = arith.constant 1216 : index
    %c0_130 = arith.constant 0 : index
    %392 = vector.load %arg10[%c1216, %c0_130] : memref<2000x128xf32, #tpu.memory_space<vmem>>, vector<1x32xf32>
    %c1224 = arith.constant 1224 : index
    %c0_131 = arith.constant 0 : index
    %393 = vector.load %arg10[%c1224, %c0_131] : memref<2000x128xf32, #tpu.memory_space<vmem>>, vector<1x32xf32>
    %cst_132 = arith.constant dense<0.000000e+00> : vector<32xf32>
    %394 = vector.multi_reduction <add>, %374, %cst_132 [1] : vector<32x32xf32> to vector<32xf32>
    %395 = vector.shape_cast %394 : vector<32xf32> to vector<32x1xf32>
    %cst_133 = arith.constant 3.200000e+01 : f32
    %396 = vector.broadcast %cst_133 : f32 to vector<32x1xf32>
    %397 = arith.divf %395, %396 : vector<32x1xf32>
    %398 = vector.broadcast %397 : vector<32x1xf32> to vector<32x32xf32>
    %399 = arith.subf %374, %398 : vector<32x32xf32>
    %400 = arith.mulf %399, %399 : vector<32x32xf32>
    %cst_134 = arith.constant dense<0.000000e+00> : vector<32xf32>
    %401 = vector.multi_reduction <add>, %400, %cst_134 [1] : vector<32x32xf32> to vector<32xf32>
    %402 = vector.shape_cast %401 : vector<32xf32> to vector<32x1xf32>
    %cst_135 = arith.constant 3.200000e+01 : f32
    %403 = vector.broadcast %cst_135 : f32 to vector<32x1xf32>
    %404 = arith.divf %402, %403 : vector<32x1xf32>
    %405 = vector.broadcast %397 : vector<32x1xf32> to vector<32x32xf32>
    %406 = arith.subf %374, %405 : vector<32x32xf32>
    %cst_136 = arith.constant 9.99999996E-13 : f32
    %407 = vector.broadcast %cst_136 : f32 to vector<32x1xf32>
    %408 = arith.addf %404, %407 : vector<32x1xf32>
    %409 = math.rsqrt %408 : vector<32x1xf32>
    %410 = vector.broadcast %409 : vector<32x1xf32> to vector<32x32xf32>
    %411 = arith.mulf %406, %410 : vector<32x32xf32>
    %412 = vector.broadcast %392 : vector<1x32xf32> to vector<32x32xf32>
    %413 = arith.mulf %411, %412 : vector<32x32xf32>
    %414 = vector.broadcast %393 : vector<1x32xf32> to vector<32x32xf32>
    %415 = arith.addf %413, %414 : vector<32x32xf32>
    %c1232 = arith.constant 1232 : index
    %c0_137 = arith.constant 0 : index
    %416 = vector.load %arg10[%c1232, %c0_137] : memref<2000x128xf32, #tpu.memory_space<vmem>>, vector<32x96xf32>
    %417 = arith.truncf %415 : vector<32x32xf32> to vector<32x32xbf16>
    %418 = arith.truncf %416 : vector<32x96xf32> to vector<32x96xbf16>
    %cst_138 = arith.constant dense<0.000000e+00> : vector<32x96xf32>
    %419 = tpu.matmul %417, %418, %cst_138 {dimension_numbers = #tpu.dot_dimension_numbers<[1], [0], [0], [1], [0, 0, 1, 1], [], []>} : vector<32x32xbf16>, vector<32x96xbf16>, vector<32x96xf32> -> vector<32x96xf32>
    %c1264 = arith.constant 1264 : index
    %c0_139 = arith.constant 0 : index
    %420 = vector.load %arg10[%c1264, %c0_139] : memref<2000x128xf32, #tpu.memory_space<vmem>>, vector<1x96xf32>
    %421 = vector.broadcast %420 : vector<1x96xf32> to vector<32x96xf32>
    %422 = arith.addf %419, %421 : vector<32x96xf32>
    %423 = vector.extract_strided_slice %422 {offsets = [0, 0], sizes = [32, 32], strides = [1, 1]} : vector<32x96xf32> to vector<32x32xf32>
    %424 = vector.extract_strided_slice %422 {offsets = [0, 32], sizes = [32, 32], strides = [1, 1]} : vector<32x96xf32> to vector<32x32xf32>
    %425 = vector.extract_strided_slice %422 {offsets = [0, 64], sizes = [32, 32], strides = [1, 1]} : vector<32x96xf32> to vector<32x32xf32>
    %426 = arith.truncf %423 : vector<32x32xf32> to vector<32x32xbf16>
    %427 = arith.truncf %424 : vector<32x32xf32> to vector<32x32xbf16>
    %cst_140 = arith.constant dense<0.000000e+00> : vector<32x32xf32>
    %428 = tpu.matmul %426, %427, %cst_140 {dimension_numbers = #tpu.dot_dimension_numbers<[1], [1], [0], [0], [0, 0, 1, 0], [], []>} : vector<32x32xbf16>, vector<32x32xbf16>, vector<32x32xf32> -> vector<32x32xf32>
    %cst_141 = arith.constant 0.176776692 : f32
    %429 = vector.broadcast %cst_141 : f32 to vector<32x32xf32>
    %430 = arith.mulf %428, %429 : vector<32x32xf32>
    %431 = arith.addf %430, %391 : vector<32x32xf32>
    %cst_142 = arith.constant dense<0xFF800000> : vector<32xf32>
    %432 = vector.multi_reduction <maximumf>, %431, %cst_142 [1] : vector<32x32xf32> to vector<32xf32>
    %433 = vector.shape_cast %432 : vector<32xf32> to vector<32x1xf32>
    %434 = vector.broadcast %433 : vector<32x1xf32> to vector<32x32xf32>
    %435 = arith.subf %431, %434 : vector<32x32xf32>
    %436 = math.exp %435 : vector<32x32xf32>
    %cst_143 = arith.constant dense<0.000000e+00> : vector<32xf32>
    %437 = vector.multi_reduction <add>, %436, %cst_143 [1] : vector<32x32xf32> to vector<32xf32>
    %438 = vector.shape_cast %437 : vector<32xf32> to vector<32x1xf32>
    %439 = tpu.reciprocal %438 {approx = true} : vector<32x1xf32> -> vector<32x1xf32>
    %440 = vector.broadcast %439 : vector<32x1xf32> to vector<32x32xf32>
    %441 = arith.mulf %436, %440 : vector<32x32xf32>
    %442 = arith.truncf %441 : vector<32x32xf32> to vector<32x32xbf16>
    %443 = arith.truncf %425 : vector<32x32xf32> to vector<32x32xbf16>
    %cst_144 = arith.constant dense<0.000000e+00> : vector<32x32xf32>
    %444 = tpu.matmul %442, %443, %cst_144 {dimension_numbers = #tpu.dot_dimension_numbers<[1], [0], [0], [1], [0, 0, 1, 1], [], []>} : vector<32x32xbf16>, vector<32x32xbf16>, vector<32x32xf32> -> vector<32x32xf32>
    %c1272 = arith.constant 1272 : index
    %c0_145 = arith.constant 0 : index
    %445 = vector.load %arg10[%c1272, %c0_145] : memref<2000x128xf32, #tpu.memory_space<vmem>>, vector<32x32xf32>
    %446 = arith.truncf %444 : vector<32x32xf32> to vector<32x32xbf16>
    %447 = arith.truncf %445 : vector<32x32xf32> to vector<32x32xbf16>
    %cst_146 = arith.constant dense<0.000000e+00> : vector<32x32xf32>
    %448 = tpu.matmul %446, %447, %cst_146 {dimension_numbers = #tpu.dot_dimension_numbers<[1], [0], [0], [1], [0, 0, 1, 1], [], []>} : vector<32x32xbf16>, vector<32x32xbf16>, vector<32x32xf32> -> vector<32x32xf32>
    %449 = arith.addf %374, %448 : vector<32x32xf32>
    %c1304 = arith.constant 1304 : index
    %c0_147 = arith.constant 0 : index
    %450 = vector.load %arg10[%c1304, %c0_147] : memref<2000x128xf32, #tpu.memory_space<vmem>>, vector<1x32xf32>
    %451 = vector.broadcast %450 : vector<1x32xf32> to vector<32x32xf32>
    %452 = arith.addf %449, %451 : vector<32x32xf32>
    %c1312 = arith.constant 1312 : index
    %c0_148 = arith.constant 0 : index
    %453 = vector.load %arg10[%c1312, %c0_148] : memref<2000x128xf32, #tpu.memory_space<vmem>>, vector<1x32xf32>
    %c1320 = arith.constant 1320 : index
    %c0_149 = arith.constant 0 : index
    %454 = vector.load %arg10[%c1320, %c0_149] : memref<2000x128xf32, #tpu.memory_space<vmem>>, vector<1x32xf32>
    %cst_150 = arith.constant dense<0.000000e+00> : vector<32xf32>
    %455 = vector.multi_reduction <add>, %452, %cst_150 [1] : vector<32x32xf32> to vector<32xf32>
    %456 = vector.shape_cast %455 : vector<32xf32> to vector<32x1xf32>
    %cst_151 = arith.constant 3.200000e+01 : f32
    %457 = vector.broadcast %cst_151 : f32 to vector<32x1xf32>
    %458 = arith.divf %456, %457 : vector<32x1xf32>
    %459 = vector.broadcast %458 : vector<32x1xf32> to vector<32x32xf32>
    %460 = arith.subf %452, %459 : vector<32x32xf32>
    %461 = arith.mulf %460, %460 : vector<32x32xf32>
    %cst_152 = arith.constant dense<0.000000e+00> : vector<32xf32>
    %462 = vector.multi_reduction <add>, %461, %cst_152 [1] : vector<32x32xf32> to vector<32xf32>
    %463 = vector.shape_cast %462 : vector<32xf32> to vector<32x1xf32>
    %cst_153 = arith.constant 3.200000e+01 : f32
    %464 = vector.broadcast %cst_153 : f32 to vector<32x1xf32>
    %465 = arith.divf %463, %464 : vector<32x1xf32>
    %466 = vector.broadcast %458 : vector<32x1xf32> to vector<32x32xf32>
    %467 = arith.subf %452, %466 : vector<32x32xf32>
    %cst_154 = arith.constant 9.99999996E-13 : f32
    %468 = vector.broadcast %cst_154 : f32 to vector<32x1xf32>
    %469 = arith.addf %465, %468 : vector<32x1xf32>
    %470 = math.rsqrt %469 : vector<32x1xf32>
    %471 = vector.broadcast %470 : vector<32x1xf32> to vector<32x32xf32>
    %472 = arith.mulf %467, %471 : vector<32x32xf32>
    %473 = vector.broadcast %453 : vector<1x32xf32> to vector<32x32xf32>
    %474 = arith.mulf %472, %473 : vector<32x32xf32>
    %475 = vector.broadcast %454 : vector<1x32xf32> to vector<32x32xf32>
    %476 = arith.addf %474, %475 : vector<32x32xf32>
    %c1328 = arith.constant 1328 : index
    %c0_155 = arith.constant 0 : index
    %477 = vector.load %arg10[%c1328, %c0_155] : memref<2000x128xf32, #tpu.memory_space<vmem>>, vector<32x128xf32>
    %478 = arith.truncf %476 : vector<32x32xf32> to vector<32x32xbf16>
    %479 = arith.truncf %477 : vector<32x128xf32> to vector<32x128xbf16>
    %cst_156 = arith.constant dense<0.000000e+00> : vector<32x128xf32>
    %480 = tpu.matmul %478, %479, %cst_156 {dimension_numbers = #tpu.dot_dimension_numbers<[1], [0], [0], [1], [0, 0, 1, 1], [], []>} : vector<32x32xbf16>, vector<32x128xbf16>, vector<32x128xf32> -> vector<32x128xf32>
    %c1360 = arith.constant 1360 : index
    %c0_157 = arith.constant 0 : index
    %481 = vector.load %arg10[%c1360, %c0_157] : memref<2000x128xf32, #tpu.memory_space<vmem>>, vector<1x128xf32>
    %482 = vector.broadcast %481 : vector<1x128xf32> to vector<32x128xf32>
    %483 = arith.addf %480, %482 : vector<32x128xf32>
    %484 = arith.mulf %483, %483 : vector<32x128xf32>
    %485 = arith.mulf %483, %484 : vector<32x128xf32>
    %cst_158 = arith.constant 4.471500e-02 : f32
    %486 = vector.broadcast %cst_158 : f32 to vector<32x128xf32>
    %487 = arith.mulf %486, %485 : vector<32x128xf32>
    %488 = arith.addf %483, %487 : vector<32x128xf32>
    %cst_159 = arith.constant 0.797884583 : f32
    %489 = vector.broadcast %cst_159 : f32 to vector<32x128xf32>
    %490 = arith.mulf %489, %488 : vector<32x128xf32>
    %491 = math.tanh %490 : vector<32x128xf32>
    %cst_160 = arith.constant 1.000000e+00 : f32
    %492 = vector.broadcast %cst_160 : f32 to vector<32x128xf32>
    %493 = arith.addf %492, %491 : vector<32x128xf32>
    %cst_161 = arith.constant 5.000000e-01 : f32
    %494 = vector.broadcast %cst_161 : f32 to vector<32x128xf32>
    %495 = arith.mulf %494, %493 : vector<32x128xf32>
    %496 = arith.mulf %483, %495 : vector<32x128xf32>
    %c1368 = arith.constant 1368 : index
    %c0_162 = arith.constant 0 : index
    %497 = vector.load %arg10[%c1368, %c0_162] : memref<2000x128xf32, #tpu.memory_space<vmem>>, vector<128x32xf32>
    %498 = arith.truncf %496 : vector<32x128xf32> to vector<32x128xbf16>
    %499 = arith.truncf %497 : vector<128x32xf32> to vector<128x32xbf16>
    %cst_163 = arith.constant dense<0.000000e+00> : vector<32x32xf32>
    %500 = tpu.matmul %498, %499, %cst_163 {dimension_numbers = #tpu.dot_dimension_numbers<[1], [0], [0], [1], [0, 0, 1, 1], [], []>} : vector<32x128xbf16>, vector<128x32xbf16>, vector<32x32xf32> -> vector<32x32xf32>
    %501 = arith.addf %452, %500 : vector<32x32xf32>
    %c1496 = arith.constant 1496 : index
    %c0_164 = arith.constant 0 : index
    %502 = vector.load %arg10[%c1496, %c0_164] : memref<2000x128xf32, #tpu.memory_space<vmem>>, vector<1x32xf32>
    %503 = vector.broadcast %502 : vector<1x32xf32> to vector<32x32xf32>
    %504 = arith.addf %501, %503 : vector<32x32xf32>
    %c1504 = arith.constant 1504 : index
    %c0_165 = arith.constant 0 : index
    %505 = vector.load %arg10[%c1504, %c0_165] : memref<2000x128xf32, #tpu.memory_space<vmem>>, vector<1x32xf32>
    %c1512 = arith.constant 1512 : index
    %c0_166 = arith.constant 0 : index
    %506 = vector.load %arg10[%c1512, %c0_166] : memref<2000x128xf32, #tpu.memory_space<vmem>>, vector<1x32xf32>
    %cst_167 = arith.constant dense<0.000000e+00> : vector<32xf32>
    %507 = vector.multi_reduction <add>, %504, %cst_167 [1] : vector<32x32xf32> to vector<32xf32>
    %508 = vector.shape_cast %507 : vector<32xf32> to vector<32x1xf32>
    %cst_168 = arith.constant 3.200000e+01 : f32
    %509 = vector.broadcast %cst_168 : f32 to vector<32x1xf32>
    %510 = arith.divf %508, %509 : vector<32x1xf32>
    %511 = vector.broadcast %510 : vector<32x1xf32> to vector<32x32xf32>
    %512 = arith.subf %504, %511 : vector<32x32xf32>
    %513 = arith.mulf %512, %512 : vector<32x32xf32>
    %cst_169 = arith.constant dense<0.000000e+00> : vector<32xf32>
    %514 = vector.multi_reduction <add>, %513, %cst_169 [1] : vector<32x32xf32> to vector<32xf32>
    %515 = vector.shape_cast %514 : vector<32xf32> to vector<32x1xf32>
    %cst_170 = arith.constant 3.200000e+01 : f32
    %516 = vector.broadcast %cst_170 : f32 to vector<32x1xf32>
    %517 = arith.divf %515, %516 : vector<32x1xf32>
    %518 = vector.broadcast %510 : vector<32x1xf32> to vector<32x32xf32>
    %519 = arith.subf %504, %518 : vector<32x32xf32>
    %cst_171 = arith.constant 9.99999996E-13 : f32
    %520 = vector.broadcast %cst_171 : f32 to vector<32x1xf32>
    %521 = arith.addf %517, %520 : vector<32x1xf32>
    %522 = math.rsqrt %521 : vector<32x1xf32>
    %523 = vector.broadcast %522 : vector<32x1xf32> to vector<32x32xf32>
    %524 = arith.mulf %519, %523 : vector<32x32xf32>
    %525 = vector.broadcast %505 : vector<1x32xf32> to vector<32x32xf32>
    %526 = arith.mulf %524, %525 : vector<32x32xf32>
    %527 = vector.broadcast %506 : vector<1x32xf32> to vector<32x32xf32>
    %528 = arith.addf %526, %527 : vector<32x32xf32>
    %529 = vector.extract_strided_slice %528 {offsets = [0, 0], sizes = [1, 32], strides = [1, 1]} : vector<32x32xf32> to vector<1x32xf32>
    %530 = vector.extract_strided_slice %528 {offsets = [8, 0], sizes = [1, 32], strides = [1, 1]} : vector<32x32xf32> to vector<1x32xf32>
    %531 = vector.extract_strided_slice %528 {offsets = [16, 0], sizes = [1, 32], strides = [1, 1]} : vector<32x32xf32> to vector<1x32xf32>
    %532 = vector.extract_strided_slice %528 {offsets = [24, 0], sizes = [1, 32], strides = [1, 1]} : vector<32x32xf32> to vector<1x32xf32>
    %533 = tpu.concatenate %529, %530, %531, %532 in 0 : vector<1x32xf32>, vector<1x32xf32>, vector<1x32xf32>, vector<1x32xf32> -> vector<4x32xf32>
    %c1520 = arith.constant 1520 : index
    %c0_172 = arith.constant 0 : index
    %534 = vector.load %arg10[%c1520, %c0_172] : memref<2000x128xf32, #tpu.memory_space<vmem>>, vector<32x16xf32>
    %c1552 = arith.constant 1552 : index
    %c0_173 = arith.constant 0 : index
    %535 = vector.load %arg10[%c1552, %c0_173] : memref<2000x128xf32, #tpu.memory_space<vmem>>, vector<1x16xf32>
    %cst_174 = arith.constant dense<0.000000e+00> : vector<4x16xf32>
    %536 = tpu.matmul %533, %534, %cst_174 {dimension_numbers = #tpu.dot_dimension_numbers<[1], [0], [0], [1], [0, 0, 1, 1], [], []>} : vector<4x32xf32>, vector<32x16xf32>, vector<4x16xf32> -> vector<4x16xf32>
    %537 = vector.broadcast %535 : vector<1x16xf32> to vector<4x16xf32>
    %538 = arith.addf %536, %537 : vector<4x16xf32>
    %539 = arith.mulf %538, %538 : vector<4x16xf32>
    %cst_175 = arith.constant dense<0.000000e+00> : vector<4xf32>
    %540 = vector.multi_reduction <add>, %539, %cst_175 [1] : vector<4x16xf32> to vector<4xf32>
    %541 = vector.shape_cast %540 : vector<4xf32> to vector<4x1xf32>
    %cst_176 = arith.constant 1.000000e-24 : f32
    %542 = vector.broadcast %cst_176 : f32 to vector<4x1xf32>
    %543 = arith.maximumf %541, %542 : vector<4x1xf32>
    %544 = math.rsqrt %543 : vector<4x1xf32>
    %545 = vector.broadcast %544 : vector<4x1xf32> to vector<4x16xf32>
    %546 = arith.mulf %538, %545 : vector<4x16xf32>
    %547 = vector.extract_strided_slice %546 {offsets = [0, 0], sizes = [2, 16], strides = [1, 1]} : vector<4x16xf32> to vector<2x16xf32>
    %548 = tpu.iota {dimensions = array<i32: 1>} : vector<16x64xi32>
    %c0_177 = arith.constant 0 : index
    %c0_178 = arith.constant 0 : index
    %549 = vector.load %arg2[%c0_177, %c0_178] : memref<16x1xi32, #tpu.memory_space<vmem>>, vector<16x1xi32>
    %550 = vector.broadcast %549 : vector<16x1xi32> to vector<16x64xi32>
    %551 = arith.cmpi eq, %548, %550 : vector<16x64xi32>
    %552 = arith.extui %551 : vector<16x64xi1> to vector<16x64xi32>
    %553 = arith.sitofp %552 : vector<16x64xi32> to vector<16x64xf32>
    %c1560 = arith.constant 1560 : index
    %c0_179 = arith.constant 0 : index
    %554 = vector.load %arg10[%c1560, %c0_179] : memref<2000x128xf32, #tpu.memory_space<vmem>>, vector<64x32xf32>
    %555 = arith.truncf %553 : vector<16x64xf32> to vector<16x64xbf16>
    %556 = arith.truncf %554 : vector<64x32xf32> to vector<64x32xbf16>
    %cst_180 = arith.constant dense<0.000000e+00> : vector<16x32xf32>
    %557 = tpu.matmul %555, %556, %cst_180 {dimension_numbers = #tpu.dot_dimension_numbers<[1], [0], [0], [1], [0, 0, 1, 1], [], []>} : vector<16x64xbf16>, vector<64x32xbf16>, vector<16x32xf32> -> vector<16x32xf32>
    %c1624 = arith.constant 1624 : index
    %c0_181 = arith.constant 0 : index
    %558 = vector.load %arg10[%c1624, %c0_181] : memref<2000x128xf32, #tpu.memory_space<vmem>>, vector<16x32xf32>
    %559 = arith.addf %557, %558 : vector<16x32xf32>
    %c1640 = arith.constant 1640 : index
    %c0_182 = arith.constant 0 : index
    %560 = vector.load %arg10[%c1640, %c0_182] : memref<2000x128xf32, #tpu.memory_space<vmem>>, vector<1x32xf32>
    %c1648 = arith.constant 1648 : index
    %c0_183 = arith.constant 0 : index
    %561 = vector.load %arg10[%c1648, %c0_183] : memref<2000x128xf32, #tpu.memory_space<vmem>>, vector<1x32xf32>
    %cst_184 = arith.constant dense<0.000000e+00> : vector<16xf32>
    %562 = vector.multi_reduction <add>, %559, %cst_184 [1] : vector<16x32xf32> to vector<16xf32>
    %563 = vector.shape_cast %562 : vector<16xf32> to vector<16x1xf32>
    %cst_185 = arith.constant 3.200000e+01 : f32
    %564 = vector.broadcast %cst_185 : f32 to vector<16x1xf32>
    %565 = arith.divf %563, %564 : vector<16x1xf32>
    %566 = vector.broadcast %565 : vector<16x1xf32> to vector<16x32xf32>
    %567 = arith.subf %559, %566 : vector<16x32xf32>
    %568 = arith.mulf %567, %567 : vector<16x32xf32>
    %cst_186 = arith.constant dense<0.000000e+00> : vector<16xf32>
    %569 = vector.multi_reduction <add>, %568, %cst_186 [1] : vector<16x32xf32> to vector<16xf32>
    %570 = vector.shape_cast %569 : vector<16xf32> to vector<16x1xf32>
    %cst_187 = arith.constant 3.200000e+01 : f32
    %571 = vector.broadcast %cst_187 : f32 to vector<16x1xf32>
    %572 = arith.divf %570, %571 : vector<16x1xf32>
    %573 = vector.broadcast %565 : vector<16x1xf32> to vector<16x32xf32>
    %574 = arith.subf %559, %573 : vector<16x32xf32>
    %cst_188 = arith.constant 9.99999996E-13 : f32
    %575 = vector.broadcast %cst_188 : f32 to vector<16x1xf32>
    %576 = arith.addf %572, %575 : vector<16x1xf32>
    %577 = math.rsqrt %576 : vector<16x1xf32>
    %578 = vector.broadcast %577 : vector<16x1xf32> to vector<16x32xf32>
    %579 = arith.mulf %574, %578 : vector<16x32xf32>
    %580 = vector.broadcast %560 : vector<1x32xf32> to vector<16x32xf32>
    %581 = arith.mulf %579, %580 : vector<16x32xf32>
    %582 = vector.broadcast %561 : vector<1x32xf32> to vector<16x32xf32>
    %583 = arith.addf %581, %582 : vector<16x32xf32>
    %c0_189 = arith.constant 0 : index
    %c0_190 = arith.constant 0 : index
    %584 = vector.load %arg4[%c0_189, %c0_190] : memref<1x16xf32, #tpu.memory_space<vmem>>, vector<1x16xf32>
    %585 = tpu.iota {dimensions = array<i32: 0>} : vector<16x16xi32>
    %586 = tpu.iota {dimensions = array<i32: 1>} : vector<16x16xi32>
    %c3_i32_191 = arith.constant 3 : i32
    %587 = vector.broadcast %c3_i32_191 : i32 to vector<16x16xi32>
    %588 = arith.shrsi %585, %587 : vector<16x16xi32>
    %c3_i32_192 = arith.constant 3 : i32
    %589 = vector.broadcast %c3_i32_192 : i32 to vector<16x16xi32>
    %590 = arith.shrsi %586, %589 : vector<16x16xi32>
    %591 = arith.cmpi eq, %588, %590 : vector<16x16xi32>
    %cst_193 = arith.constant 0.000000e+00 : f32
    %cst_194 = arith.constant -1.000000e+09 : f32
    %592 = vector.broadcast %cst_193 : f32 to vector<16x16xf32>
    %593 = vector.broadcast %cst_194 : f32 to vector<16x16xf32>
    %594 = arith.select %591, %592, %593 : vector<16x16xi1>, vector<16x16xf32>
    %cst_195 = arith.constant 1.000000e+00 : f32
    %595 = vector.broadcast %cst_195 : f32 to vector<1x16xf32>
    %596 = arith.subf %584, %595 : vector<1x16xf32>
    %cst_196 = arith.constant 1.000000e+09 : f32
    %597 = vector.broadcast %cst_196 : f32 to vector<1x16xf32>
    %598 = arith.mulf %596, %597 : vector<1x16xf32>
    %599 = vector.broadcast %598 : vector<1x16xf32> to vector<16x16xf32>
    %600 = arith.addf %594, %599 : vector<16x16xf32>
    %c1656 = arith.constant 1656 : index
    %c0_197 = arith.constant 0 : index
    %601 = vector.load %arg10[%c1656, %c0_197] : memref<2000x128xf32, #tpu.memory_space<vmem>>, vector<1x32xf32>
    %c1664 = arith.constant 1664 : index
    %c0_198 = arith.constant 0 : index
    %602 = vector.load %arg10[%c1664, %c0_198] : memref<2000x128xf32, #tpu.memory_space<vmem>>, vector<1x32xf32>
    %cst_199 = arith.constant dense<0.000000e+00> : vector<16xf32>
    %603 = vector.multi_reduction <add>, %583, %cst_199 [1] : vector<16x32xf32> to vector<16xf32>
    %604 = vector.shape_cast %603 : vector<16xf32> to vector<16x1xf32>
    %cst_200 = arith.constant 3.200000e+01 : f32
    %605 = vector.broadcast %cst_200 : f32 to vector<16x1xf32>
    %606 = arith.divf %604, %605 : vector<16x1xf32>
    %607 = vector.broadcast %606 : vector<16x1xf32> to vector<16x32xf32>
    %608 = arith.subf %583, %607 : vector<16x32xf32>
    %609 = arith.mulf %608, %608 : vector<16x32xf32>
    %cst_201 = arith.constant dense<0.000000e+00> : vector<16xf32>
    %610 = vector.multi_reduction <add>, %609, %cst_201 [1] : vector<16x32xf32> to vector<16xf32>
    %611 = vector.shape_cast %610 : vector<16xf32> to vector<16x1xf32>
    %cst_202 = arith.constant 3.200000e+01 : f32
    %612 = vector.broadcast %cst_202 : f32 to vector<16x1xf32>
    %613 = arith.divf %611, %612 : vector<16x1xf32>
    %614 = vector.broadcast %606 : vector<16x1xf32> to vector<16x32xf32>
    %615 = arith.subf %583, %614 : vector<16x32xf32>
    %cst_203 = arith.constant 9.99999996E-13 : f32
    %616 = vector.broadcast %cst_203 : f32 to vector<16x1xf32>
    %617 = arith.addf %613, %616 : vector<16x1xf32>
    %618 = math.rsqrt %617 : vector<16x1xf32>
    %619 = vector.broadcast %618 : vector<16x1xf32> to vector<16x32xf32>
    %620 = arith.mulf %615, %619 : vector<16x32xf32>
    %621 = vector.broadcast %601 : vector<1x32xf32> to vector<16x32xf32>
    %622 = arith.mulf %620, %621 : vector<16x32xf32>
    %623 = vector.broadcast %602 : vector<1x32xf32> to vector<16x32xf32>
    %624 = arith.addf %622, %623 : vector<16x32xf32>
    %c1672 = arith.constant 1672 : index
    %c0_204 = arith.constant 0 : index
    %625 = vector.load %arg10[%c1672, %c0_204] : memref<2000x128xf32, #tpu.memory_space<vmem>>, vector<32x96xf32>
    %626 = arith.truncf %624 : vector<16x32xf32> to vector<16x32xbf16>
    %627 = arith.truncf %625 : vector<32x96xf32> to vector<32x96xbf16>
    %cst_205 = arith.constant dense<0.000000e+00> : vector<16x96xf32>
    %628 = tpu.matmul %626, %627, %cst_205 {dimension_numbers = #tpu.dot_dimension_numbers<[1], [0], [0], [1], [0, 0, 1, 1], [], []>} : vector<16x32xbf16>, vector<32x96xbf16>, vector<16x96xf32> -> vector<16x96xf32>
    %c1704 = arith.constant 1704 : index
    %c0_206 = arith.constant 0 : index
    %629 = vector.load %arg10[%c1704, %c0_206] : memref<2000x128xf32, #tpu.memory_space<vmem>>, vector<1x96xf32>
    %630 = vector.broadcast %629 : vector<1x96xf32> to vector<16x96xf32>
    %631 = arith.addf %628, %630 : vector<16x96xf32>
    %632 = vector.extract_strided_slice %631 {offsets = [0, 0], sizes = [16, 32], strides = [1, 1]} : vector<16x96xf32> to vector<16x32xf32>
    %633 = vector.extract_strided_slice %631 {offsets = [0, 32], sizes = [16, 32], strides = [1, 1]} : vector<16x96xf32> to vector<16x32xf32>
    %634 = vector.extract_strided_slice %631 {offsets = [0, 64], sizes = [16, 32], strides = [1, 1]} : vector<16x96xf32> to vector<16x32xf32>
    %635 = arith.truncf %632 : vector<16x32xf32> to vector<16x32xbf16>
    %636 = arith.truncf %633 : vector<16x32xf32> to vector<16x32xbf16>
    %cst_207 = arith.constant dense<0.000000e+00> : vector<16x16xf32>
    %637 = tpu.matmul %635, %636, %cst_207 {dimension_numbers = #tpu.dot_dimension_numbers<[1], [1], [0], [0], [0, 0, 1, 0], [], []>} : vector<16x32xbf16>, vector<16x32xbf16>, vector<16x16xf32> -> vector<16x16xf32>
    %cst_208 = arith.constant 0.176776692 : f32
    %638 = vector.broadcast %cst_208 : f32 to vector<16x16xf32>
    %639 = arith.mulf %637, %638 : vector<16x16xf32>
    %640 = arith.addf %639, %600 : vector<16x16xf32>
    %cst_209 = arith.constant dense<0xFF800000> : vector<16xf32>
    %641 = vector.multi_reduction <maximumf>, %640, %cst_209 [1] : vector<16x16xf32> to vector<16xf32>
    %642 = vector.shape_cast %641 : vector<16xf32> to vector<16x1xf32>
    %643 = vector.broadcast %642 : vector<16x1xf32> to vector<16x16xf32>
    %644 = arith.subf %640, %643 : vector<16x16xf32>
    %645 = math.exp %644 : vector<16x16xf32>
    %cst_210 = arith.constant dense<0.000000e+00> : vector<16xf32>
    %646 = vector.multi_reduction <add>, %645, %cst_210 [1] : vector<16x16xf32> to vector<16xf32>
    %647 = vector.shape_cast %646 : vector<16xf32> to vector<16x1xf32>
    %648 = tpu.reciprocal %647 {approx = true} : vector<16x1xf32> -> vector<16x1xf32>
    %649 = vector.broadcast %648 : vector<16x1xf32> to vector<16x16xf32>
    %650 = arith.mulf %645, %649 : vector<16x16xf32>
    %651 = arith.truncf %650 : vector<16x16xf32> to vector<16x16xbf16>
    %652 = arith.truncf %634 : vector<16x32xf32> to vector<16x32xbf16>
    %cst_211 = arith.constant dense<0.000000e+00> : vector<16x32xf32>
    %653 = tpu.matmul %651, %652, %cst_211 {dimension_numbers = #tpu.dot_dimension_numbers<[1], [0], [0], [1], [0, 0, 1, 1], [], []>} : vector<16x16xbf16>, vector<16x32xbf16>, vector<16x32xf32> -> vector<16x32xf32>
    %c1712 = arith.constant 1712 : index
    %c0_212 = arith.constant 0 : index
    %654 = vector.load %arg10[%c1712, %c0_212] : memref<2000x128xf32, #tpu.memory_space<vmem>>, vector<32x32xf32>
    %655 = arith.truncf %653 : vector<16x32xf32> to vector<16x32xbf16>
    %656 = arith.truncf %654 : vector<32x32xf32> to vector<32x32xbf16>
    %cst_213 = arith.constant dense<0.000000e+00> : vector<16x32xf32>
    %657 = tpu.matmul %655, %656, %cst_213 {dimension_numbers = #tpu.dot_dimension_numbers<[1], [0], [0], [1], [0, 0, 1, 1], [], []>} : vector<16x32xbf16>, vector<32x32xbf16>, vector<16x32xf32> -> vector<16x32xf32>
    %658 = arith.addf %583, %657 : vector<16x32xf32>
    %c1744 = arith.constant 1744 : index
    %c0_214 = arith.constant 0 : index
    %659 = vector.load %arg10[%c1744, %c0_214] : memref<2000x128xf32, #tpu.memory_space<vmem>>, vector<1x32xf32>
    %660 = vector.broadcast %659 : vector<1x32xf32> to vector<16x32xf32>
    %661 = arith.addf %658, %660 : vector<16x32xf32>
    %c1752 = arith.constant 1752 : index
    %c0_215 = arith.constant 0 : index
    %662 = vector.load %arg10[%c1752, %c0_215] : memref<2000x128xf32, #tpu.memory_space<vmem>>, vector<1x32xf32>
    %c1760 = arith.constant 1760 : index
    %c0_216 = arith.constant 0 : index
    %663 = vector.load %arg10[%c1760, %c0_216] : memref<2000x128xf32, #tpu.memory_space<vmem>>, vector<1x32xf32>
    %cst_217 = arith.constant dense<0.000000e+00> : vector<16xf32>
    %664 = vector.multi_reduction <add>, %661, %cst_217 [1] : vector<16x32xf32> to vector<16xf32>
    %665 = vector.shape_cast %664 : vector<16xf32> to vector<16x1xf32>
    %cst_218 = arith.constant 3.200000e+01 : f32
    %666 = vector.broadcast %cst_218 : f32 to vector<16x1xf32>
    %667 = arith.divf %665, %666 : vector<16x1xf32>
    %668 = vector.broadcast %667 : vector<16x1xf32> to vector<16x32xf32>
    %669 = arith.subf %661, %668 : vector<16x32xf32>
    %670 = arith.mulf %669, %669 : vector<16x32xf32>
    %cst_219 = arith.constant dense<0.000000e+00> : vector<16xf32>
    %671 = vector.multi_reduction <add>, %670, %cst_219 [1] : vector<16x32xf32> to vector<16xf32>
    %672 = vector.shape_cast %671 : vector<16xf32> to vector<16x1xf32>
    %cst_220 = arith.constant 3.200000e+01 : f32
    %673 = vector.broadcast %cst_220 : f32 to vector<16x1xf32>
    %674 = arith.divf %672, %673 : vector<16x1xf32>
    %675 = vector.broadcast %667 : vector<16x1xf32> to vector<16x32xf32>
    %676 = arith.subf %661, %675 : vector<16x32xf32>
    %cst_221 = arith.constant 9.99999996E-13 : f32
    %677 = vector.broadcast %cst_221 : f32 to vector<16x1xf32>
    %678 = arith.addf %674, %677 : vector<16x1xf32>
    %679 = math.rsqrt %678 : vector<16x1xf32>
    %680 = vector.broadcast %679 : vector<16x1xf32> to vector<16x32xf32>
    %681 = arith.mulf %676, %680 : vector<16x32xf32>
    %682 = vector.broadcast %662 : vector<1x32xf32> to vector<16x32xf32>
    %683 = arith.mulf %681, %682 : vector<16x32xf32>
    %684 = vector.broadcast %663 : vector<1x32xf32> to vector<16x32xf32>
    %685 = arith.addf %683, %684 : vector<16x32xf32>
    %c1768 = arith.constant 1768 : index
    %c0_222 = arith.constant 0 : index
    %686 = vector.load %arg10[%c1768, %c0_222] : memref<2000x128xf32, #tpu.memory_space<vmem>>, vector<32x128xf32>
    %687 = arith.truncf %685 : vector<16x32xf32> to vector<16x32xbf16>
    %688 = arith.truncf %686 : vector<32x128xf32> to vector<32x128xbf16>
    %cst_223 = arith.constant dense<0.000000e+00> : vector<16x128xf32>
    %689 = tpu.matmul %687, %688, %cst_223 {dimension_numbers = #tpu.dot_dimension_numbers<[1], [0], [0], [1], [0, 0, 1, 1], [], []>} : vector<16x32xbf16>, vector<32x128xbf16>, vector<16x128xf32> -> vector<16x128xf32>
    %c1800 = arith.constant 1800 : index
    %c0_224 = arith.constant 0 : index
    %690 = vector.load %arg10[%c1800, %c0_224] : memref<2000x128xf32, #tpu.memory_space<vmem>>, vector<1x128xf32>
    %691 = vector.broadcast %690 : vector<1x128xf32> to vector<16x128xf32>
    %692 = arith.addf %689, %691 : vector<16x128xf32>
    %693 = arith.mulf %692, %692 : vector<16x128xf32>
    %694 = arith.mulf %692, %693 : vector<16x128xf32>
    %cst_225 = arith.constant 4.471500e-02 : f32
    %695 = vector.broadcast %cst_225 : f32 to vector<16x128xf32>
    %696 = arith.mulf %695, %694 : vector<16x128xf32>
    %697 = arith.addf %692, %696 : vector<16x128xf32>
    %cst_226 = arith.constant 0.797884583 : f32
    %698 = vector.broadcast %cst_226 : f32 to vector<16x128xf32>
    %699 = arith.mulf %698, %697 : vector<16x128xf32>
    %700 = math.tanh %699 : vector<16x128xf32>
    %cst_227 = arith.constant 1.000000e+00 : f32
    %701 = vector.broadcast %cst_227 : f32 to vector<16x128xf32>
    %702 = arith.addf %701, %700 : vector<16x128xf32>
    %cst_228 = arith.constant 5.000000e-01 : f32
    %703 = vector.broadcast %cst_228 : f32 to vector<16x128xf32>
    %704 = arith.mulf %703, %702 : vector<16x128xf32>
    %705 = arith.mulf %692, %704 : vector<16x128xf32>
    %c1808 = arith.constant 1808 : index
    %c0_229 = arith.constant 0 : index
    %706 = vector.load %arg10[%c1808, %c0_229] : memref<2000x128xf32, #tpu.memory_space<vmem>>, vector<128x32xf32>
    %707 = arith.truncf %705 : vector<16x128xf32> to vector<16x128xbf16>
    %708 = arith.truncf %706 : vector<128x32xf32> to vector<128x32xbf16>
    %cst_230 = arith.constant dense<0.000000e+00> : vector<16x32xf32>
    %709 = tpu.matmul %707, %708, %cst_230 {dimension_numbers = #tpu.dot_dimension_numbers<[1], [0], [0], [1], [0, 0, 1, 1], [], []>} : vector<16x128xbf16>, vector<128x32xbf16>, vector<16x32xf32> -> vector<16x32xf32>
    %710 = arith.addf %661, %709 : vector<16x32xf32>
    %c1936 = arith.constant 1936 : index
    %c0_231 = arith.constant 0 : index
    %711 = vector.load %arg10[%c1936, %c0_231] : memref<2000x128xf32, #tpu.memory_space<vmem>>, vector<1x32xf32>
    %712 = vector.broadcast %711 : vector<1x32xf32> to vector<16x32xf32>
    %713 = arith.addf %710, %712 : vector<16x32xf32>
    %c1944 = arith.constant 1944 : index
    %c0_232 = arith.constant 0 : index
    %714 = vector.load %arg10[%c1944, %c0_232] : memref<2000x128xf32, #tpu.memory_space<vmem>>, vector<1x32xf32>
    %c1952 = arith.constant 1952 : index
    %c0_233 = arith.constant 0 : index
    %715 = vector.load %arg10[%c1952, %c0_233] : memref<2000x128xf32, #tpu.memory_space<vmem>>, vector<1x32xf32>
    %cst_234 = arith.constant dense<0.000000e+00> : vector<16xf32>
    %716 = vector.multi_reduction <add>, %713, %cst_234 [1] : vector<16x32xf32> to vector<16xf32>
    %717 = vector.shape_cast %716 : vector<16xf32> to vector<16x1xf32>
    %cst_235 = arith.constant 3.200000e+01 : f32
    %718 = vector.broadcast %cst_235 : f32 to vector<16x1xf32>
    %719 = arith.divf %717, %718 : vector<16x1xf32>
    %720 = vector.broadcast %719 : vector<16x1xf32> to vector<16x32xf32>
    %721 = arith.subf %713, %720 : vector<16x32xf32>
    %722 = arith.mulf %721, %721 : vector<16x32xf32>
    %cst_236 = arith.constant dense<0.000000e+00> : vector<16xf32>
    %723 = vector.multi_reduction <add>, %722, %cst_236 [1] : vector<16x32xf32> to vector<16xf32>
    %724 = vector.shape_cast %723 : vector<16xf32> to vector<16x1xf32>
    %cst_237 = arith.constant 3.200000e+01 : f32
    %725 = vector.broadcast %cst_237 : f32 to vector<16x1xf32>
    %726 = arith.divf %724, %725 : vector<16x1xf32>
    %727 = vector.broadcast %719 : vector<16x1xf32> to vector<16x32xf32>
    %728 = arith.subf %713, %727 : vector<16x32xf32>
    %cst_238 = arith.constant 9.99999996E-13 : f32
    %729 = vector.broadcast %cst_238 : f32 to vector<16x1xf32>
    %730 = arith.addf %726, %729 : vector<16x1xf32>
    %731 = math.rsqrt %730 : vector<16x1xf32>
    %732 = vector.broadcast %731 : vector<16x1xf32> to vector<16x32xf32>
    %733 = arith.mulf %728, %732 : vector<16x32xf32>
    %734 = vector.broadcast %714 : vector<1x32xf32> to vector<16x32xf32>
    %735 = arith.mulf %733, %734 : vector<16x32xf32>
    %736 = vector.broadcast %715 : vector<1x32xf32> to vector<16x32xf32>
    %737 = arith.addf %735, %736 : vector<16x32xf32>
    %738 = vector.extract_strided_slice %737 {offsets = [0, 0], sizes = [1, 32], strides = [1, 1]} : vector<16x32xf32> to vector<1x32xf32>
    %739 = vector.extract_strided_slice %737 {offsets = [8, 0], sizes = [1, 32], strides = [1, 1]} : vector<16x32xf32> to vector<1x32xf32>
    %740 = tpu.concatenate %738, %739 in 0 : vector<1x32xf32>, vector<1x32xf32> -> vector<2x32xf32>
    %c1960 = arith.constant 1960 : index
    %c0_239 = arith.constant 0 : index
    %741 = vector.load %arg10[%c1960, %c0_239] : memref<2000x128xf32, #tpu.memory_space<vmem>>, vector<32x16xf32>
    %c1992 = arith.constant 1992 : index
    %c0_240 = arith.constant 0 : index
    %742 = vector.load %arg10[%c1992, %c0_240] : memref<2000x128xf32, #tpu.memory_space<vmem>>, vector<1x16xf32>
    %cst_241 = arith.constant dense<0.000000e+00> : vector<2x16xf32>
    %743 = tpu.matmul %740, %741, %cst_241 {dimension_numbers = #tpu.dot_dimension_numbers<[1], [0], [0], [1], [0, 0, 1, 1], [], []>} : vector<2x32xf32>, vector<32x16xf32>, vector<2x16xf32> -> vector<2x16xf32>
    %744 = vector.broadcast %742 : vector<1x16xf32> to vector<2x16xf32>
    %745 = arith.addf %743, %744 : vector<2x16xf32>
    %746 = arith.mulf %745, %745 : vector<2x16xf32>
    %cst_242 = arith.constant dense<0.000000e+00> : vector<2xf32>
    %747 = vector.multi_reduction <add>, %746, %cst_242 [1] : vector<2x16xf32> to vector<2xf32>
    %748 = vector.shape_cast %747 : vector<2xf32> to vector<2x1xf32>
    %cst_243 = arith.constant 1.000000e-24 : f32
    %749 = vector.broadcast %cst_243 : f32 to vector<2x1xf32>
    %750 = arith.maximumf %748, %749 : vector<2x1xf32>
    %751 = math.rsqrt %750 : vector<2x1xf32>
    %752 = vector.broadcast %751 : vector<2x1xf32> to vector<2x16xf32>
    %753 = arith.mulf %745, %752 : vector<2x16xf32>
    %c0_244 = arith.constant 0 : index
    %c0_245 = arith.constant 0 : index
    %754 = vector.load %arg7[%c0_244, %c0_245] : memref<16x8xf32, #tpu.memory_space<vmem>>, vector<16x8xf32>
    %c0_246 = arith.constant 0 : index
    %c0_247 = arith.constant 0 : index
    %755 = vector.load %arg8[%c0_246, %c0_247] : memref<16x8xf32, #tpu.memory_space<vmem>>, vector<16x8xf32>
    %c0_248 = arith.constant 0 : index
    %c0_249 = arith.constant 0 : index
    %756 = vector.load %arg5[%c0_248, %c0_249] : memref<2x10xf32, #tpu.memory_space<vmem>>, vector<2x10xf32>
    %cst_250 = arith.constant dense<0.000000e+00> : vector<2x2xf32>
    %757 = tpu.matmul %338, %753, %cst_250 {dimension_numbers = #tpu.dot_dimension_numbers<[1], [1], [0], [0], [0, 0, 1, 0], [], []>} : vector<2x16xf32>, vector<2x16xf32>, vector<2x2xf32> -> vector<2x2xf32>
    %cst_251 = arith.constant dense<0.000000e+00> : vector<2x8xf32>
    %758 = tpu.matmul %338, %755, %cst_251 {dimension_numbers = #tpu.dot_dimension_numbers<[1], [0], [0], [1], [0, 0, 1, 1], [], []>} : vector<2x16xf32>, vector<16x8xf32>, vector<2x8xf32> -> vector<2x8xf32>
    %759 = tpu.concatenate %757, %758 in 1 : vector<2x2xf32>, vector<2x8xf32> -> vector<2x10xf32>
    %760 = vector.broadcast %0 : f32 to vector<2x10xf32>
    %761 = arith.mulf %759, %760 : vector<2x10xf32>
    %cst_252 = arith.constant dense<0xFF800000> : vector<2xf32>
    %762 = vector.multi_reduction <maximumf>, %761, %cst_252 [1] : vector<2x10xf32> to vector<2xf32>
    %763 = vector.shape_cast %762 : vector<2xf32> to vector<2x1xf32>
    %764 = vector.broadcast %763 : vector<2x1xf32> to vector<2x10xf32>
    %765 = arith.subf %761, %764 : vector<2x10xf32>
    %766 = math.exp %765 : vector<2x10xf32>
    %cst_253 = arith.constant dense<0.000000e+00> : vector<2xf32>
    %767 = vector.multi_reduction <add>, %766, %cst_253 [1] : vector<2x10xf32> to vector<2xf32>
    %768 = vector.shape_cast %767 : vector<2xf32> to vector<2x1xf32>
    %769 = vector.broadcast %768 : vector<2x1xf32> to vector<2x10xf32>
    %770 = arith.divf %766, %769 : vector<2x10xf32>
    %771 = vector.broadcast %1 : f32 to vector<2x10xf32>
    %772 = arith.mulf %771, %770 : vector<2x10xf32>
    %cst_254 = arith.constant 1.000000e+00 : f32
    %773 = arith.subf %cst_254, %1 : f32
    %774 = vector.broadcast %773 : f32 to vector<2x10xf32>
    %775 = arith.mulf %774, %756 : vector<2x10xf32>
    %776 = arith.addf %772, %775 : vector<2x10xf32>
    %cst_255 = arith.constant dense<0.000000e+00> : vector<2x2xf32>
    %777 = tpu.matmul %753, %338, %cst_255 {dimension_numbers = #tpu.dot_dimension_numbers<[1], [1], [0], [0], [0, 0, 1, 0], [], []>} : vector<2x16xf32>, vector<2x16xf32>, vector<2x2xf32> -> vector<2x2xf32>
    %cst_256 = arith.constant dense<0.000000e+00> : vector<2x8xf32>
    %778 = tpu.matmul %753, %754, %cst_256 {dimension_numbers = #tpu.dot_dimension_numbers<[1], [0], [0], [1], [0, 0, 1, 1], [], []>} : vector<2x16xf32>, vector<16x8xf32>, vector<2x8xf32> -> vector<2x8xf32>
    %779 = tpu.concatenate %777, %778 in 1 : vector<2x2xf32>, vector<2x8xf32> -> vector<2x10xf32>
    %780 = vector.broadcast %0 : f32 to vector<2x10xf32>
    %781 = arith.mulf %779, %780 : vector<2x10xf32>
    %cst_257 = arith.constant dense<0xFF800000> : vector<2xf32>
    %782 = vector.multi_reduction <maximumf>, %781, %cst_257 [1] : vector<2x10xf32> to vector<2xf32>
    %783 = vector.shape_cast %782 : vector<2xf32> to vector<2x1xf32>
    %784 = vector.broadcast %783 : vector<2x1xf32> to vector<2x10xf32>
    %785 = arith.subf %781, %784 : vector<2x10xf32>
    %786 = math.exp %785 : vector<2x10xf32>
    %cst_258 = arith.constant dense<0.000000e+00> : vector<2xf32>
    %787 = vector.multi_reduction <add>, %786, %cst_258 [1] : vector<2x10xf32> to vector<2xf32>
    %788 = vector.shape_cast %787 : vector<2xf32> to vector<2x1xf32>
    %789 = vector.broadcast %788 : vector<2x1xf32> to vector<2x10xf32>
    %790 = arith.divf %786, %789 : vector<2x10xf32>
    %791 = vector.broadcast %1 : f32 to vector<2x10xf32>
    %792 = arith.mulf %791, %790 : vector<2x10xf32>
    %cst_259 = arith.constant 1.000000e+00 : f32
    %793 = arith.subf %cst_259, %1 : f32
    %794 = vector.broadcast %793 : f32 to vector<2x10xf32>
    %795 = arith.mulf %794, %756 : vector<2x10xf32>
    %796 = arith.addf %792, %795 : vector<2x10xf32>
    %cst_260 = arith.constant dense<0.000000e+00> : vector<2x2xf32>
    %797 = tpu.matmul %178, %753, %cst_260 {dimension_numbers = #tpu.dot_dimension_numbers<[1], [1], [0], [0], [0, 0, 1, 0], [], []>} : vector<2x16xf32>, vector<2x16xf32>, vector<2x2xf32> -> vector<2x2xf32>
    %cst_261 = arith.constant dense<0.000000e+00> : vector<2x8xf32>
    %798 = tpu.matmul %178, %755, %cst_261 {dimension_numbers = #tpu.dot_dimension_numbers<[1], [0], [0], [1], [0, 0, 1, 1], [], []>} : vector<2x16xf32>, vector<16x8xf32>, vector<2x8xf32> -> vector<2x8xf32>
    %799 = tpu.concatenate %797, %798 in 1 : vector<2x2xf32>, vector<2x8xf32> -> vector<2x10xf32>
    %800 = vector.broadcast %0 : f32 to vector<2x10xf32>
    %801 = arith.mulf %799, %800 : vector<2x10xf32>
    %cst_262 = arith.constant dense<0.000000e+00> : vector<2x2xf32>
    %802 = tpu.matmul %547, %338, %cst_262 {dimension_numbers = #tpu.dot_dimension_numbers<[1], [1], [0], [0], [0, 0, 1, 0], [], []>} : vector<2x16xf32>, vector<2x16xf32>, vector<2x2xf32> -> vector<2x2xf32>
    %cst_263 = arith.constant dense<0.000000e+00> : vector<2x8xf32>
    %803 = tpu.matmul %547, %754, %cst_263 {dimension_numbers = #tpu.dot_dimension_numbers<[1], [0], [0], [1], [0, 0, 1, 1], [], []>} : vector<2x16xf32>, vector<16x8xf32>, vector<2x8xf32> -> vector<2x8xf32>
    %804 = tpu.concatenate %802, %803 in 1 : vector<2x2xf32>, vector<2x8xf32> -> vector<2x10xf32>
    %805 = vector.broadcast %0 : f32 to vector<2x10xf32>
    %806 = arith.mulf %804, %805 : vector<2x10xf32>
    %cst_264 = arith.constant dense<0xFF800000> : vector<2xf32>
    %807 = vector.multi_reduction <maximumf>, %801, %cst_264 [1] : vector<2x10xf32> to vector<2xf32>
    %808 = vector.shape_cast %807 : vector<2xf32> to vector<2x1xf32>
    %809 = vector.broadcast %808 : vector<2x1xf32> to vector<2x10xf32>
    %810 = arith.subf %801, %809 : vector<2x10xf32>
    %811 = vector.broadcast %808 : vector<2x1xf32> to vector<2x10xf32>
    %812 = arith.subf %801, %811 : vector<2x10xf32>
    %813 = math.exp %812 : vector<2x10xf32>
    %cst_265 = arith.constant dense<0.000000e+00> : vector<2xf32>
    %814 = vector.multi_reduction <add>, %813, %cst_265 [1] : vector<2x10xf32> to vector<2xf32>
    %815 = vector.shape_cast %814 : vector<2xf32> to vector<2x1xf32>
    %816 = math.log %815 : vector<2x1xf32>
    %817 = vector.broadcast %816 : vector<2x1xf32> to vector<2x10xf32>
    %818 = arith.subf %810, %817 : vector<2x10xf32>
    %819 = arith.mulf %818, %776 : vector<2x10xf32>
    %cst_266 = arith.constant dense<0.000000e+00> : vector<2xf32>
    %820 = vector.multi_reduction <add>, %819, %cst_266 [1] : vector<2x10xf32> to vector<2xf32>
    %821 = vector.shape_cast %820 : vector<2xf32> to vector<2x1xf32>
    %cst_267 = arith.constant 0.000000e+00 : f32
    %822 = vector.broadcast %cst_267 : f32 to vector<2x1xf32>
    %823 = arith.subf %822, %821 : vector<2x1xf32>
    %cst_268 = arith.constant dense<0xFF800000> : vector<2xf32>
    %824 = vector.multi_reduction <maximumf>, %806, %cst_268 [1] : vector<2x10xf32> to vector<2xf32>
    %825 = vector.shape_cast %824 : vector<2xf32> to vector<2x1xf32>
    %826 = vector.broadcast %825 : vector<2x1xf32> to vector<2x10xf32>
    %827 = arith.subf %806, %826 : vector<2x10xf32>
    %828 = vector.broadcast %825 : vector<2x1xf32> to vector<2x10xf32>
    %829 = arith.subf %806, %828 : vector<2x10xf32>
    %830 = math.exp %829 : vector<2x10xf32>
    %cst_269 = arith.constant dense<0.000000e+00> : vector<2xf32>
    %831 = vector.multi_reduction <add>, %830, %cst_269 [1] : vector<2x10xf32> to vector<2xf32>
    %832 = vector.shape_cast %831 : vector<2xf32> to vector<2x1xf32>
    %833 = math.log %832 : vector<2x1xf32>
    %834 = vector.broadcast %833 : vector<2x1xf32> to vector<2x10xf32>
    %835 = arith.subf %827, %834 : vector<2x10xf32>
    %836 = arith.mulf %835, %796 : vector<2x10xf32>
    %cst_270 = arith.constant dense<0.000000e+00> : vector<2xf32>
    %837 = vector.multi_reduction <add>, %836, %cst_270 [1] : vector<2x10xf32> to vector<2xf32>
    %838 = vector.shape_cast %837 : vector<2xf32> to vector<2x1xf32>
    %839 = arith.subf %823, %838 : vector<2x1xf32>
    %cst_271 = arith.constant 5.000000e-01 : f32
    %840 = vector.broadcast %cst_271 : f32 to vector<2x1xf32>
    %841 = arith.mulf %840, %839 : vector<2x1xf32>
    %cst_272 = arith.constant dense<0.000000e+00> : vector<1xf32>
    %842 = vector.multi_reduction <add>, %841, %cst_272 [0] : vector<2x1xf32> to vector<1xf32>
    %843 = vector.shape_cast %842 : vector<1xf32> to vector<1x1xf32>
    %cst_273 = arith.constant 2.000000e+00 : f32
    %844 = vector.broadcast %cst_273 : f32 to vector<1x1xf32>
    %845 = arith.divf %843, %844 : vector<1x1xf32>
    %c0_274 = arith.constant 0 : index
    %c0_275 = arith.constant 0 : index
    %846 = vector.load %arg6[%c0_274, %c0_275] : memref<2x2xf32, #tpu.memory_space<vmem>>, vector<2x2xf32>
    %cst_276 = arith.constant 5.000000e-01 : f32
    %847 = vector.broadcast %cst_276 : f32 to vector<2x2xf32>
    %848 = arith.cmpf ogt, %846, %847 : vector<2x2xf32>
    %cst_277 = arith.constant dense<0.000000e+00> : vector<2x2xf32>
    %849 = tpu.matmul %178, %547, %cst_277 {dimension_numbers = #tpu.dot_dimension_numbers<[1], [1], [0], [0], [0, 0, 1, 0], [], []>} : vector<2x16xf32>, vector<2x16xf32>, vector<2x2xf32> -> vector<2x2xf32>
    %850 = vector.broadcast %0 : f32 to vector<2x2xf32>
    %851 = arith.mulf %849, %850 : vector<2x2xf32>
    %cst_278 = arith.constant dense<0.000000e+00> : vector<2x2xf32>
    %852 = tpu.matmul %547, %178, %cst_278 {dimension_numbers = #tpu.dot_dimension_numbers<[1], [1], [0], [0], [0, 0, 1, 0], [], []>} : vector<2x16xf32>, vector<2x16xf32>, vector<2x2xf32> -> vector<2x2xf32>
    %853 = vector.broadcast %0 : f32 to vector<2x2xf32>
    %854 = arith.mulf %852, %853 : vector<2x2xf32>
    %cst_279 = arith.constant dense<0xFF800000> : vector<2xf32>
    %855 = vector.multi_reduction <maximumf>, %851, %cst_279 [1] : vector<2x2xf32> to vector<2xf32>
    %856 = vector.shape_cast %855 : vector<2xf32> to vector<2x1xf32>
    %857 = vector.broadcast %856 : vector<2x1xf32> to vector<2x2xf32>
    %858 = arith.subf %851, %857 : vector<2x2xf32>
    %859 = math.exp %858 : vector<2x2xf32>
    %cst_280 = arith.constant dense<0.000000e+00> : vector<2xf32>
    %860 = vector.multi_reduction <add>, %859, %cst_280 [1] : vector<2x2xf32> to vector<2xf32>
    %861 = vector.shape_cast %860 : vector<2xf32> to vector<2x1xf32>
    %862 = vector.broadcast %861 : vector<2x1xf32> to vector<2x2xf32>
    %863 = arith.divf %859, %862 : vector<2x2xf32>
    %cst_281 = arith.constant 0.000000e+00 : f32
    %864 = vector.broadcast %cst_281 : f32 to vector<2x2xf32>
    %865 = arith.select %848, %864, %863 : vector<2x2xi1>, vector<2x2xf32>
    %cst_282 = arith.constant dense<0xFF800000> : vector<2xf32>
    %866 = vector.multi_reduction <maximumf>, %854, %cst_282 [1] : vector<2x2xf32> to vector<2xf32>
    %867 = vector.shape_cast %866 : vector<2xf32> to vector<2x1xf32>
    %868 = vector.broadcast %867 : vector<2x1xf32> to vector<2x2xf32>
    %869 = arith.subf %854, %868 : vector<2x2xf32>
    %870 = math.exp %869 : vector<2x2xf32>
    %cst_283 = arith.constant dense<0.000000e+00> : vector<2xf32>
    %871 = vector.multi_reduction <add>, %870, %cst_283 [1] : vector<2x2xf32> to vector<2xf32>
    %872 = vector.shape_cast %871 : vector<2xf32> to vector<2x1xf32>
    %873 = vector.broadcast %872 : vector<2x1xf32> to vector<2x2xf32>
    %874 = arith.divf %870, %873 : vector<2x2xf32>
    %cst_284 = arith.constant 0.000000e+00 : f32
    %875 = vector.broadcast %cst_284 : f32 to vector<2x2xf32>
    %876 = arith.select %848, %875, %874 : vector<2x2xi1>, vector<2x2xf32>
    %c0_285 = arith.constant 0 : index
    %c0_286 = arith.constant 0 : index
    %877 = vector.load %arg11[%c0_285, %c0_286] : memref<40x128xf32, #tpu.memory_space<vmem>>, vector<16x32xf32>
    tpu.vector_store %arg11[%c0_285, %c0_286], %162 {strides = array<i32>} : memref<40x128xf32, #tpu.memory_space<vmem>>, vector<16x32xf32>,
    %878 = tpu.concatenate %338, %753 in 1 : vector<2x16xf32>, vector<2x16xf32> -> vector<2x32xf32>
    %c16 = arith.constant 16 : index
    %c0_287 = arith.constant 0 : index
    %879 = vector.load %arg11[%c16, %c0_287] : memref<40x128xf32, #tpu.memory_space<vmem>>, vector<2x32xf32>
    tpu.vector_store %arg11[%c16, %c0_287], %878 {strides = array<i32>} : memref<40x128xf32, #tpu.memory_space<vmem>>, vector<2x32xf32>,
    %880 = tpu.concatenate %865, %876 in 1 : vector<2x2xf32>, vector<2x2xf32> -> vector<2x4xf32>
    %c24 = arith.constant 24 : index
    %c0_288 = arith.constant 0 : index
    %881 = vector.load %arg11[%c24, %c0_288] : memref<40x128xf32, #tpu.memory_space<vmem>>, vector<2x4xf32>
    tpu.vector_store %arg11[%c24, %c0_288], %880 {strides = array<i32>} : memref<40x128xf32, #tpu.memory_space<vmem>>, vector<2x4xf32>,
    %c32 = arith.constant 32 : index
    %c0_289 = arith.constant 0 : index
    %882 = vector.load %arg11[%c32, %c0_289] : memref<40x128xf32, #tpu.memory_space<vmem>>, vector<1x1xf32>
    tpu.vector_store %arg11[%c32, %c0_289], %845 {strides = array<i32>} : memref<40x128xf32, #tpu.memory_space<vmem>>, vector<1x1xf32>,
    return
  }
}

module attributes {stable_mosaic.version = 11 : i64} {
  func.func @kernel(%arg0: memref<48x1xi32, #tpu.memory_space<vmem>>, %arg1: memref<1x48xf32, #tpu.memory_space<vmem>>, %arg2: memref<48x32xf32, #tpu.memory_space<vmem>>, %arg3: memref<608x128xf32, #tpu.memory_space<vmem>>, %arg4: memref<1x1xf32, #tpu.memory_space<vmem>>) attributes {dimension_semantics = [], scalar_prefetch = 0 : i64, scratch_operands = 0 : i64, tpu.core_type = #tpu.core_type<tc>} {
    %0 = tpu.iota {dimensions = array<i32: 1>} : vector<48x64xi32>
    %c0 = arith.constant 0 : index
    %c0_0 = arith.constant 0 : index
    %1 = vector.load %arg0[%c0, %c0_0] : memref<48x1xi32, #tpu.memory_space<vmem>>, vector<48x1xi32>
    %2 = vector.broadcast %1 : vector<48x1xi32> to vector<48x64xi32>
    %3 = arith.cmpi eq, %0, %2 : vector<48x64xi32>
    %4 = arith.extui %3 : vector<48x64xi1> to vector<48x64xi32>
    %5 = arith.sitofp %4 : vector<48x64xi32> to vector<48x64xf32>
    %c0_1 = arith.constant 0 : index
    %c0_2 = arith.constant 0 : index
    %6 = vector.load %arg3[%c0_1, %c0_2] : memref<608x128xf32, #tpu.memory_space<vmem>>, vector<64x32xf32>
    %7 = arith.truncf %5 : vector<48x64xf32> to vector<48x64xbf16>
    %8 = arith.truncf %6 : vector<64x32xf32> to vector<64x32xbf16>
    %cst = arith.constant dense<0.000000e+00> : vector<48x32xf32>
    %9 = tpu.matmul %7, %8, %cst {dimension_numbers = #tpu.dot_dimension_numbers<[1], [0], [0], [1], [0, 0, 1, 1], [], []>} : vector<48x64xbf16>, vector<64x32xbf16>, vector<48x32xf32> -> vector<48x32xf32>
    %c64 = arith.constant 64 : index
    %c0_3 = arith.constant 0 : index
    %10 = vector.load %arg3[%c64, %c0_3] : memref<608x128xf32, #tpu.memory_space<vmem>>, vector<48x32xf32>
    %11 = arith.addf %9, %10 : vector<48x32xf32>
    %c112 = arith.constant 112 : index
    %c0_4 = arith.constant 0 : index
    %12 = vector.load %arg3[%c112, %c0_4] : memref<608x128xf32, #tpu.memory_space<vmem>>, vector<1x32xf32>
    %c120 = arith.constant 120 : index
    %c0_5 = arith.constant 0 : index
    %13 = vector.load %arg3[%c120, %c0_5] : memref<608x128xf32, #tpu.memory_space<vmem>>, vector<1x32xf32>
    %cst_6 = arith.constant dense<0.000000e+00> : vector<48xf32>
    %14 = vector.multi_reduction <add>, %11, %cst_6 [1] : vector<48x32xf32> to vector<48xf32>
    %15 = vector.shape_cast %14 : vector<48xf32> to vector<48x1xf32>
    %cst_7 = arith.constant 3.200000e+01 : f32
    %16 = vector.broadcast %cst_7 : f32 to vector<48x1xf32>
    %17 = arith.divf %15, %16 : vector<48x1xf32>
    %18 = vector.broadcast %17 : vector<48x1xf32> to vector<48x32xf32>
    %19 = arith.subf %11, %18 : vector<48x32xf32>
    %20 = arith.mulf %19, %19 : vector<48x32xf32>
    %cst_8 = arith.constant dense<0.000000e+00> : vector<48xf32>
    %21 = vector.multi_reduction <add>, %20, %cst_8 [1] : vector<48x32xf32> to vector<48xf32>
    %22 = vector.shape_cast %21 : vector<48xf32> to vector<48x1xf32>
    %cst_9 = arith.constant 3.200000e+01 : f32
    %23 = vector.broadcast %cst_9 : f32 to vector<48x1xf32>
    %24 = arith.divf %22, %23 : vector<48x1xf32>
    %25 = vector.broadcast %17 : vector<48x1xf32> to vector<48x32xf32>
    %26 = arith.subf %11, %25 : vector<48x32xf32>
    %cst_10 = arith.constant 9.99999996E-13 : f32
    %27 = vector.broadcast %cst_10 : f32 to vector<48x1xf32>
    %28 = arith.addf %24, %27 : vector<48x1xf32>
    %29 = math.rsqrt %28 : vector<48x1xf32>
    %30 = vector.broadcast %29 : vector<48x1xf32> to vector<48x32xf32>
    %31 = arith.mulf %26, %30 : vector<48x32xf32>
    %32 = vector.broadcast %12 : vector<1x32xf32> to vector<48x32xf32>
    %33 = arith.mulf %31, %32 : vector<48x32xf32>
    %34 = vector.broadcast %13 : vector<1x32xf32> to vector<48x32xf32>
    %35 = arith.addf %33, %34 : vector<48x32xf32>
    %c0_11 = arith.constant 0 : index
    %c0_12 = arith.constant 0 : index
    %36 = vector.load %arg1[%c0_11, %c0_12] : memref<1x48xf32, #tpu.memory_space<vmem>>, vector<1x48xf32>
    %37 = tpu.iota {dimensions = array<i32: 0>} : vector<48x48xi32>
    %38 = tpu.iota {dimensions = array<i32: 1>} : vector<48x48xi32>
    %c3_i32 = arith.constant 3 : i32
    %39 = vector.broadcast %c3_i32 : i32 to vector<48x48xi32>
    %40 = arith.shrsi %37, %39 : vector<48x48xi32>
    %c3_i32_13 = arith.constant 3 : i32
    %41 = vector.broadcast %c3_i32_13 : i32 to vector<48x48xi32>
    %42 = arith.shrsi %38, %41 : vector<48x48xi32>
    %43 = arith.cmpi eq, %40, %42 : vector<48x48xi32>
    %cst_14 = arith.constant 0.000000e+00 : f32
    %cst_15 = arith.constant -1.000000e+09 : f32
    %44 = vector.broadcast %cst_14 : f32 to vector<48x48xf32>
    %45 = vector.broadcast %cst_15 : f32 to vector<48x48xf32>
    %46 = arith.select %43, %44, %45 : vector<48x48xi1>, vector<48x48xf32>
    %cst_16 = arith.constant 1.000000e+00 : f32
    %47 = vector.broadcast %cst_16 : f32 to vector<1x48xf32>
    %48 = arith.subf %36, %47 : vector<1x48xf32>
    %cst_17 = arith.constant 1.000000e+09 : f32
    %49 = vector.broadcast %cst_17 : f32 to vector<1x48xf32>
    %50 = arith.mulf %48, %49 : vector<1x48xf32>
    %51 = vector.broadcast %50 : vector<1x48xf32> to vector<48x48xf32>
    %52 = arith.addf %46, %51 : vector<48x48xf32>
    %c128 = arith.constant 128 : index
    %c0_18 = arith.constant 0 : index
    %53 = vector.load %arg3[%c128, %c0_18] : memref<608x128xf32, #tpu.memory_space<vmem>>, vector<1x32xf32>
    %c136 = arith.constant 136 : index
    %c0_19 = arith.constant 0 : index
    %54 = vector.load %arg3[%c136, %c0_19] : memref<608x128xf32, #tpu.memory_space<vmem>>, vector<1x32xf32>
    %cst_20 = arith.constant dense<0.000000e+00> : vector<48xf32>
    %55 = vector.multi_reduction <add>, %35, %cst_20 [1] : vector<48x32xf32> to vector<48xf32>
    %56 = vector.shape_cast %55 : vector<48xf32> to vector<48x1xf32>
    %cst_21 = arith.constant 3.200000e+01 : f32
    %57 = vector.broadcast %cst_21 : f32 to vector<48x1xf32>
    %58 = arith.divf %56, %57 : vector<48x1xf32>
    %59 = vector.broadcast %58 : vector<48x1xf32> to vector<48x32xf32>
    %60 = arith.subf %35, %59 : vector<48x32xf32>
    %61 = arith.mulf %60, %60 : vector<48x32xf32>
    %cst_22 = arith.constant dense<0.000000e+00> : vector<48xf32>
    %62 = vector.multi_reduction <add>, %61, %cst_22 [1] : vector<48x32xf32> to vector<48xf32>
    %63 = vector.shape_cast %62 : vector<48xf32> to vector<48x1xf32>
    %cst_23 = arith.constant 3.200000e+01 : f32
    %64 = vector.broadcast %cst_23 : f32 to vector<48x1xf32>
    %65 = arith.divf %63, %64 : vector<48x1xf32>
    %66 = vector.broadcast %58 : vector<48x1xf32> to vector<48x32xf32>
    %67 = arith.subf %35, %66 : vector<48x32xf32>
    %cst_24 = arith.constant 9.99999996E-13 : f32
    %68 = vector.broadcast %cst_24 : f32 to vector<48x1xf32>
    %69 = arith.addf %65, %68 : vector<48x1xf32>
    %70 = math.rsqrt %69 : vector<48x1xf32>
    %71 = vector.broadcast %70 : vector<48x1xf32> to vector<48x32xf32>
    %72 = arith.mulf %67, %71 : vector<48x32xf32>
    %73 = vector.broadcast %53 : vector<1x32xf32> to vector<48x32xf32>
    %74 = arith.mulf %72, %73 : vector<48x32xf32>
    %75 = vector.broadcast %54 : vector<1x32xf32> to vector<48x32xf32>
    %76 = arith.addf %74, %75 : vector<48x32xf32>
    %c144 = arith.constant 144 : index
    %c0_25 = arith.constant 0 : index
    %77 = vector.load %arg3[%c144, %c0_25] : memref<608x128xf32, #tpu.memory_space<vmem>>, vector<32x96xf32>
    %78 = arith.truncf %76 : vector<48x32xf32> to vector<48x32xbf16>
    %79 = arith.truncf %77 : vector<32x96xf32> to vector<32x96xbf16>
    %cst_26 = arith.constant dense<0.000000e+00> : vector<48x96xf32>
    %80 = tpu.matmul %78, %79, %cst_26 {dimension_numbers = #tpu.dot_dimension_numbers<[1], [0], [0], [1], [0, 0, 1, 1], [], []>} : vector<48x32xbf16>, vector<32x96xbf16>, vector<48x96xf32> -> vector<48x96xf32>
    %c176 = arith.constant 176 : index
    %c0_27 = arith.constant 0 : index
    %81 = vector.load %arg3[%c176, %c0_27] : memref<608x128xf32, #tpu.memory_space<vmem>>, vector<1x96xf32>
    %82 = vector.broadcast %81 : vector<1x96xf32> to vector<48x96xf32>
    %83 = arith.addf %80, %82 : vector<48x96xf32>
    %84 = vector.extract_strided_slice %83 {offsets = [0, 0], sizes = [48, 32], strides = [1, 1]} : vector<48x96xf32> to vector<48x32xf32>
    %85 = vector.extract_strided_slice %83 {offsets = [0, 32], sizes = [48, 32], strides = [1, 1]} : vector<48x96xf32> to vector<48x32xf32>
    %86 = vector.extract_strided_slice %83 {offsets = [0, 64], sizes = [48, 32], strides = [1, 1]} : vector<48x96xf32> to vector<48x32xf32>
    %87 = arith.truncf %84 : vector<48x32xf32> to vector<48x32xbf16>
    %88 = arith.truncf %85 : vector<48x32xf32> to vector<48x32xbf16>
    %cst_28 = arith.constant dense<0.000000e+00> : vector<48x48xf32>
    %89 = tpu.matmul %87, %88, %cst_28 {dimension_numbers = #tpu.dot_dimension_numbers<[1], [1], [0], [0], [0, 0, 1, 0], [], []>} : vector<48x32xbf16>, vector<48x32xbf16>, vector<48x48xf32> -> vector<48x48xf32>
    %cst_29 = arith.constant 0.176776692 : f32
    %90 = vector.broadcast %cst_29 : f32 to vector<48x48xf32>
    %91 = arith.mulf %89, %90 : vector<48x48xf32>
    %92 = arith.addf %91, %52 : vector<48x48xf32>
    %cst_30 = arith.constant dense<0xFF800000> : vector<48xf32>
    %93 = vector.multi_reduction <maximumf>, %92, %cst_30 [1] : vector<48x48xf32> to vector<48xf32>
    %94 = vector.shape_cast %93 : vector<48xf32> to vector<48x1xf32>
    %95 = vector.broadcast %94 : vector<48x1xf32> to vector<48x48xf32>
    %96 = arith.subf %92, %95 : vector<48x48xf32>
    %97 = math.exp %96 : vector<48x48xf32>
    %cst_31 = arith.constant dense<0.000000e+00> : vector<48xf32>
    %98 = vector.multi_reduction <add>, %97, %cst_31 [1] : vector<48x48xf32> to vector<48xf32>
    %99 = vector.shape_cast %98 : vector<48xf32> to vector<48x1xf32>
    %100 = tpu.reciprocal %99 {approx = true} : vector<48x1xf32> -> vector<48x1xf32>
    %101 = vector.broadcast %100 : vector<48x1xf32> to vector<48x48xf32>
    %102 = arith.mulf %97, %101 : vector<48x48xf32>
    %103 = arith.truncf %102 : vector<48x48xf32> to vector<48x48xbf16>
    %104 = arith.truncf %86 : vector<48x32xf32> to vector<48x32xbf16>
    %cst_32 = arith.constant dense<0.000000e+00> : vector<48x32xf32>
    %105 = tpu.matmul %103, %104, %cst_32 {dimension_numbers = #tpu.dot_dimension_numbers<[1], [0], [0], [1], [0, 0, 1, 1], [], []>} : vector<48x48xbf16>, vector<48x32xbf16>, vector<48x32xf32> -> vector<48x32xf32>
    %c184 = arith.constant 184 : index
    %c0_33 = arith.constant 0 : index
    %106 = vector.load %arg3[%c184, %c0_33] : memref<608x128xf32, #tpu.memory_space<vmem>>, vector<32x32xf32>
    %107 = arith.truncf %105 : vector<48x32xf32> to vector<48x32xbf16>
    %108 = arith.truncf %106 : vector<32x32xf32> to vector<32x32xbf16>
    %cst_34 = arith.constant dense<0.000000e+00> : vector<48x32xf32>
    %109 = tpu.matmul %107, %108, %cst_34 {dimension_numbers = #tpu.dot_dimension_numbers<[1], [0], [0], [1], [0, 0, 1, 1], [], []>} : vector<48x32xbf16>, vector<32x32xbf16>, vector<48x32xf32> -> vector<48x32xf32>
    %110 = arith.addf %35, %109 : vector<48x32xf32>
    %c216 = arith.constant 216 : index
    %c0_35 = arith.constant 0 : index
    %111 = vector.load %arg3[%c216, %c0_35] : memref<608x128xf32, #tpu.memory_space<vmem>>, vector<1x32xf32>
    %112 = vector.broadcast %111 : vector<1x32xf32> to vector<48x32xf32>
    %113 = arith.addf %110, %112 : vector<48x32xf32>
    %c224 = arith.constant 224 : index
    %c0_36 = arith.constant 0 : index
    %114 = vector.load %arg3[%c224, %c0_36] : memref<608x128xf32, #tpu.memory_space<vmem>>, vector<1x32xf32>
    %c232 = arith.constant 232 : index
    %c0_37 = arith.constant 0 : index
    %115 = vector.load %arg3[%c232, %c0_37] : memref<608x128xf32, #tpu.memory_space<vmem>>, vector<1x32xf32>
    %cst_38 = arith.constant dense<0.000000e+00> : vector<48xf32>
    %116 = vector.multi_reduction <add>, %113, %cst_38 [1] : vector<48x32xf32> to vector<48xf32>
    %117 = vector.shape_cast %116 : vector<48xf32> to vector<48x1xf32>
    %cst_39 = arith.constant 3.200000e+01 : f32
    %118 = vector.broadcast %cst_39 : f32 to vector<48x1xf32>
    %119 = arith.divf %117, %118 : vector<48x1xf32>
    %120 = vector.broadcast %119 : vector<48x1xf32> to vector<48x32xf32>
    %121 = arith.subf %113, %120 : vector<48x32xf32>
    %122 = arith.mulf %121, %121 : vector<48x32xf32>
    %cst_40 = arith.constant dense<0.000000e+00> : vector<48xf32>
    %123 = vector.multi_reduction <add>, %122, %cst_40 [1] : vector<48x32xf32> to vector<48xf32>
    %124 = vector.shape_cast %123 : vector<48xf32> to vector<48x1xf32>
    %cst_41 = arith.constant 3.200000e+01 : f32
    %125 = vector.broadcast %cst_41 : f32 to vector<48x1xf32>
    %126 = arith.divf %124, %125 : vector<48x1xf32>
    %127 = vector.broadcast %119 : vector<48x1xf32> to vector<48x32xf32>
    %128 = arith.subf %113, %127 : vector<48x32xf32>
    %cst_42 = arith.constant 9.99999996E-13 : f32
    %129 = vector.broadcast %cst_42 : f32 to vector<48x1xf32>
    %130 = arith.addf %126, %129 : vector<48x1xf32>
    %131 = math.rsqrt %130 : vector<48x1xf32>
    %132 = vector.broadcast %131 : vector<48x1xf32> to vector<48x32xf32>
    %133 = arith.mulf %128, %132 : vector<48x32xf32>
    %134 = vector.broadcast %114 : vector<1x32xf32> to vector<48x32xf32>
    %135 = arith.mulf %133, %134 : vector<48x32xf32>
    %136 = vector.broadcast %115 : vector<1x32xf32> to vector<48x32xf32>
    %137 = arith.addf %135, %136 : vector<48x32xf32>
    %c240 = arith.constant 240 : index
    %c0_43 = arith.constant 0 : index
    %138 = vector.load %arg3[%c240, %c0_43] : memref<608x128xf32, #tpu.memory_space<vmem>>, vector<32x32xf32>
    %139 = arith.truncf %137 : vector<48x32xf32> to vector<48x32xbf16>
    %140 = arith.truncf %138 : vector<32x32xf32> to vector<32x32xbf16>
    %cst_44 = arith.constant dense<0.000000e+00> : vector<48x32xf32>
    %141 = tpu.matmul %139, %140, %cst_44 {dimension_numbers = #tpu.dot_dimension_numbers<[1], [0], [0], [1], [0, 0, 1, 1], [], []>} : vector<48x32xbf16>, vector<32x32xbf16>, vector<48x32xf32> -> vector<48x32xf32>
    %c272 = arith.constant 272 : index
    %c0_45 = arith.constant 0 : index
    %142 = vector.load %arg3[%c272, %c0_45] : memref<608x128xf32, #tpu.memory_space<vmem>>, vector<1x32xf32>
    %143 = vector.broadcast %142 : vector<1x32xf32> to vector<48x32xf32>
    %144 = arith.addf %141, %143 : vector<48x32xf32>
    %c0_46 = arith.constant 0 : index
    %c0_47 = arith.constant 0 : index
    %145 = vector.load %arg2[%c0_46, %c0_47] : memref<48x32xf32, #tpu.memory_space<vmem>>, vector<48x32xf32>
    %c280 = arith.constant 280 : index
    %c0_48 = arith.constant 0 : index
    %146 = vector.load %arg3[%c280, %c0_48] : memref<608x128xf32, #tpu.memory_space<vmem>>, vector<32x64xf32>
    %147 = arith.truncf %145 : vector<48x32xf32> to vector<48x32xbf16>
    %148 = arith.truncf %146 : vector<32x64xf32> to vector<32x64xbf16>
    %cst_49 = arith.constant dense<0.000000e+00> : vector<48x64xf32>
    %149 = tpu.matmul %147, %148, %cst_49 {dimension_numbers = #tpu.dot_dimension_numbers<[1], [0], [0], [1], [0, 0, 1, 1], [], []>} : vector<48x32xbf16>, vector<32x64xbf16>, vector<48x64xf32> -> vector<48x64xf32>
    %c312 = arith.constant 312 : index
    %c0_50 = arith.constant 0 : index
    %150 = vector.load %arg3[%c312, %c0_50] : memref<608x128xf32, #tpu.memory_space<vmem>>, vector<1x64xf32>
    %151 = vector.broadcast %150 : vector<1x64xf32> to vector<48x64xf32>
    %152 = arith.addf %149, %151 : vector<48x64xf32>
    %153 = vector.extract_strided_slice %152 {offsets = [0, 0], sizes = [48, 32], strides = [1, 1]} : vector<48x64xf32> to vector<48x32xf32>
    %154 = vector.extract_strided_slice %152 {offsets = [0, 32], sizes = [48, 32], strides = [1, 1]} : vector<48x64xf32> to vector<48x32xf32>
    %155 = tpu.iota {dimensions = array<i32: 0>} : vector<48x48xi32>
    %156 = tpu.iota {dimensions = array<i32: 1>} : vector<48x48xi32>
    %c3_i32_51 = arith.constant 3 : i32
    %157 = vector.broadcast %c3_i32_51 : i32 to vector<48x48xi32>
    %158 = arith.shrsi %155, %157 : vector<48x48xi32>
    %c3_i32_52 = arith.constant 3 : i32
    %159 = vector.broadcast %c3_i32_52 : i32 to vector<48x48xi32>
    %160 = arith.shrsi %156, %159 : vector<48x48xi32>
    %161 = arith.cmpi eq, %158, %160 : vector<48x48xi32>
    %c7_i32 = arith.constant 7 : i32
    %162 = vector.broadcast %c7_i32 : i32 to vector<48x48xi32>
    %163 = arith.andi %156, %162 : vector<48x48xi32>
    %c5_i32 = arith.constant 5 : i32
    %164 = vector.broadcast %c5_i32 : i32 to vector<48x48xi32>
    %165 = arith.cmpi slt, %163, %164 : vector<48x48xi32>
    %166 = arith.andi %161, %165 : vector<48x48xi1>
    %cst_53 = arith.constant 0.000000e+00 : f32
    %cst_54 = arith.constant -1.000000e+09 : f32
    %167 = vector.broadcast %cst_53 : f32 to vector<48x48xf32>
    %168 = vector.broadcast %cst_54 : f32 to vector<48x48xf32>
    %169 = arith.select %166, %167, %168 : vector<48x48xi1>, vector<48x48xf32>
    %170 = arith.truncf %144 : vector<48x32xf32> to vector<48x32xbf16>
    %171 = arith.truncf %153 : vector<48x32xf32> to vector<48x32xbf16>
    %cst_55 = arith.constant dense<0.000000e+00> : vector<48x48xf32>
    %172 = tpu.matmul %170, %171, %cst_55 {dimension_numbers = #tpu.dot_dimension_numbers<[1], [1], [0], [0], [0, 0, 1, 0], [], []>} : vector<48x32xbf16>, vector<48x32xbf16>, vector<48x48xf32> -> vector<48x48xf32>
    %cst_56 = arith.constant 0.176776692 : f32
    %173 = vector.broadcast %cst_56 : f32 to vector<48x48xf32>
    %174 = arith.mulf %172, %173 : vector<48x48xf32>
    %175 = arith.addf %174, %169 : vector<48x48xf32>
    %cst_57 = arith.constant dense<0xFF800000> : vector<48xf32>
    %176 = vector.multi_reduction <maximumf>, %175, %cst_57 [1] : vector<48x48xf32> to vector<48xf32>
    %177 = vector.shape_cast %176 : vector<48xf32> to vector<48x1xf32>
    %178 = vector.broadcast %177 : vector<48x1xf32> to vector<48x48xf32>
    %179 = arith.subf %175, %178 : vector<48x48xf32>
    %180 = math.exp %179 : vector<48x48xf32>
    %cst_58 = arith.constant dense<0.000000e+00> : vector<48xf32>
    %181 = vector.multi_reduction <add>, %180, %cst_58 [1] : vector<48x48xf32> to vector<48xf32>
    %182 = vector.shape_cast %181 : vector<48xf32> to vector<48x1xf32>
    %183 = tpu.reciprocal %182 {approx = true} : vector<48x1xf32> -> vector<48x1xf32>
    %184 = vector.broadcast %183 : vector<48x1xf32> to vector<48x48xf32>
    %185 = arith.mulf %180, %184 : vector<48x48xf32>
    %186 = arith.truncf %185 : vector<48x48xf32> to vector<48x48xbf16>
    %187 = arith.truncf %154 : vector<48x32xf32> to vector<48x32xbf16>
    %cst_59 = arith.constant dense<0.000000e+00> : vector<48x32xf32>
    %188 = tpu.matmul %186, %187, %cst_59 {dimension_numbers = #tpu.dot_dimension_numbers<[1], [0], [0], [1], [0, 0, 1, 1], [], []>} : vector<48x48xbf16>, vector<48x32xbf16>, vector<48x32xf32> -> vector<48x32xf32>
    %c320 = arith.constant 320 : index
    %c0_60 = arith.constant 0 : index
    %189 = vector.load %arg3[%c320, %c0_60] : memref<608x128xf32, #tpu.memory_space<vmem>>, vector<32x32xf32>
    %190 = arith.truncf %188 : vector<48x32xf32> to vector<48x32xbf16>
    %191 = arith.truncf %189 : vector<32x32xf32> to vector<32x32xbf16>
    %cst_61 = arith.constant dense<0.000000e+00> : vector<48x32xf32>
    %192 = tpu.matmul %190, %191, %cst_61 {dimension_numbers = #tpu.dot_dimension_numbers<[1], [0], [0], [1], [0, 0, 1, 1], [], []>} : vector<48x32xbf16>, vector<32x32xbf16>, vector<48x32xf32> -> vector<48x32xf32>
    %193 = arith.addf %113, %192 : vector<48x32xf32>
    %c352 = arith.constant 352 : index
    %c0_62 = arith.constant 0 : index
    %194 = vector.load %arg3[%c352, %c0_62] : memref<608x128xf32, #tpu.memory_space<vmem>>, vector<1x32xf32>
    %195 = vector.broadcast %194 : vector<1x32xf32> to vector<48x32xf32>
    %196 = arith.addf %193, %195 : vector<48x32xf32>
    %c360 = arith.constant 360 : index
    %c0_63 = arith.constant 0 : index
    %197 = vector.load %arg3[%c360, %c0_63] : memref<608x128xf32, #tpu.memory_space<vmem>>, vector<1x32xf32>
    %c368 = arith.constant 368 : index
    %c0_64 = arith.constant 0 : index
    %198 = vector.load %arg3[%c368, %c0_64] : memref<608x128xf32, #tpu.memory_space<vmem>>, vector<1x32xf32>
    %cst_65 = arith.constant dense<0.000000e+00> : vector<48xf32>
    %199 = vector.multi_reduction <add>, %196, %cst_65 [1] : vector<48x32xf32> to vector<48xf32>
    %200 = vector.shape_cast %199 : vector<48xf32> to vector<48x1xf32>
    %cst_66 = arith.constant 3.200000e+01 : f32
    %201 = vector.broadcast %cst_66 : f32 to vector<48x1xf32>
    %202 = arith.divf %200, %201 : vector<48x1xf32>
    %203 = vector.broadcast %202 : vector<48x1xf32> to vector<48x32xf32>
    %204 = arith.subf %196, %203 : vector<48x32xf32>
    %205 = arith.mulf %204, %204 : vector<48x32xf32>
    %cst_67 = arith.constant dense<0.000000e+00> : vector<48xf32>
    %206 = vector.multi_reduction <add>, %205, %cst_67 [1] : vector<48x32xf32> to vector<48xf32>
    %207 = vector.shape_cast %206 : vector<48xf32> to vector<48x1xf32>
    %cst_68 = arith.constant 3.200000e+01 : f32
    %208 = vector.broadcast %cst_68 : f32 to vector<48x1xf32>
    %209 = arith.divf %207, %208 : vector<48x1xf32>
    %210 = vector.broadcast %202 : vector<48x1xf32> to vector<48x32xf32>
    %211 = arith.subf %196, %210 : vector<48x32xf32>
    %cst_69 = arith.constant 9.99999996E-13 : f32
    %212 = vector.broadcast %cst_69 : f32 to vector<48x1xf32>
    %213 = arith.addf %209, %212 : vector<48x1xf32>
    %214 = math.rsqrt %213 : vector<48x1xf32>
    %215 = vector.broadcast %214 : vector<48x1xf32> to vector<48x32xf32>
    %216 = arith.mulf %211, %215 : vector<48x32xf32>
    %217 = vector.broadcast %197 : vector<1x32xf32> to vector<48x32xf32>
    %218 = arith.mulf %216, %217 : vector<48x32xf32>
    %219 = vector.broadcast %198 : vector<1x32xf32> to vector<48x32xf32>
    %220 = arith.addf %218, %219 : vector<48x32xf32>
    %c376 = arith.constant 376 : index
    %c0_70 = arith.constant 0 : index
    %221 = vector.load %arg3[%c376, %c0_70] : memref<608x128xf32, #tpu.memory_space<vmem>>, vector<32x128xf32>
    %222 = arith.truncf %220 : vector<48x32xf32> to vector<48x32xbf16>
    %223 = arith.truncf %221 : vector<32x128xf32> to vector<32x128xbf16>
    %cst_71 = arith.constant dense<0.000000e+00> : vector<48x128xf32>
    %224 = tpu.matmul %222, %223, %cst_71 {dimension_numbers = #tpu.dot_dimension_numbers<[1], [0], [0], [1], [0, 0, 1, 1], [], []>} : vector<48x32xbf16>, vector<32x128xbf16>, vector<48x128xf32> -> vector<48x128xf32>
    %c408 = arith.constant 408 : index
    %c0_72 = arith.constant 0 : index
    %225 = vector.load %arg3[%c408, %c0_72] : memref<608x128xf32, #tpu.memory_space<vmem>>, vector<1x128xf32>
    %226 = vector.broadcast %225 : vector<1x128xf32> to vector<48x128xf32>
    %227 = arith.addf %224, %226 : vector<48x128xf32>
    %228 = arith.mulf %227, %227 : vector<48x128xf32>
    %229 = arith.mulf %227, %228 : vector<48x128xf32>
    %cst_73 = arith.constant 4.471500e-02 : f32
    %230 = vector.broadcast %cst_73 : f32 to vector<48x128xf32>
    %231 = arith.mulf %230, %229 : vector<48x128xf32>
    %232 = arith.addf %227, %231 : vector<48x128xf32>
    %cst_74 = arith.constant 0.797884583 : f32
    %233 = vector.broadcast %cst_74 : f32 to vector<48x128xf32>
    %234 = arith.mulf %233, %232 : vector<48x128xf32>
    %235 = math.tanh %234 : vector<48x128xf32>
    %cst_75 = arith.constant 1.000000e+00 : f32
    %236 = vector.broadcast %cst_75 : f32 to vector<48x128xf32>
    %237 = arith.addf %236, %235 : vector<48x128xf32>
    %cst_76 = arith.constant 5.000000e-01 : f32
    %238 = vector.broadcast %cst_76 : f32 to vector<48x128xf32>
    %239 = arith.mulf %238, %237 : vector<48x128xf32>
    %240 = arith.mulf %227, %239 : vector<48x128xf32>
    %c416 = arith.constant 416 : index
    %c0_77 = arith.constant 0 : index
    %241 = vector.load %arg3[%c416, %c0_77] : memref<608x128xf32, #tpu.memory_space<vmem>>, vector<128x32xf32>
    %242 = arith.truncf %240 : vector<48x128xf32> to vector<48x128xbf16>
    %243 = arith.truncf %241 : vector<128x32xf32> to vector<128x32xbf16>
    %cst_78 = arith.constant dense<0.000000e+00> : vector<48x32xf32>
    %244 = tpu.matmul %242, %243, %cst_78 {dimension_numbers = #tpu.dot_dimension_numbers<[1], [0], [0], [1], [0, 0, 1, 1], [], []>} : vector<48x128xbf16>, vector<128x32xbf16>, vector<48x32xf32> -> vector<48x32xf32>
    %245 = arith.addf %196, %244 : vector<48x32xf32>
    %c544 = arith.constant 544 : index
    %c0_79 = arith.constant 0 : index
    %246 = vector.load %arg3[%c544, %c0_79] : memref<608x128xf32, #tpu.memory_space<vmem>>, vector<1x32xf32>
    %247 = vector.broadcast %246 : vector<1x32xf32> to vector<48x32xf32>
    %248 = arith.addf %245, %247 : vector<48x32xf32>
    %c552 = arith.constant 552 : index
    %c0_80 = arith.constant 0 : index
    %249 = vector.load %arg3[%c552, %c0_80] : memref<608x128xf32, #tpu.memory_space<vmem>>, vector<1x32xf32>
    %c560 = arith.constant 560 : index
    %c0_81 = arith.constant 0 : index
    %250 = vector.load %arg3[%c560, %c0_81] : memref<608x128xf32, #tpu.memory_space<vmem>>, vector<1x32xf32>
    %cst_82 = arith.constant dense<0.000000e+00> : vector<48xf32>
    %251 = vector.multi_reduction <add>, %248, %cst_82 [1] : vector<48x32xf32> to vector<48xf32>
    %252 = vector.shape_cast %251 : vector<48xf32> to vector<48x1xf32>
    %cst_83 = arith.constant 3.200000e+01 : f32
    %253 = vector.broadcast %cst_83 : f32 to vector<48x1xf32>
    %254 = arith.divf %252, %253 : vector<48x1xf32>
    %255 = vector.broadcast %254 : vector<48x1xf32> to vector<48x32xf32>
    %256 = arith.subf %248, %255 : vector<48x32xf32>
    %257 = arith.mulf %256, %256 : vector<48x32xf32>
    %cst_84 = arith.constant dense<0.000000e+00> : vector<48xf32>
    %258 = vector.multi_reduction <add>, %257, %cst_84 [1] : vector<48x32xf32> to vector<48xf32>
    %259 = vector.shape_cast %258 : vector<48xf32> to vector<48x1xf32>
    %cst_85 = arith.constant 3.200000e+01 : f32
    %260 = vector.broadcast %cst_85 : f32 to vector<48x1xf32>
    %261 = arith.divf %259, %260 : vector<48x1xf32>
    %262 = vector.broadcast %254 : vector<48x1xf32> to vector<48x32xf32>
    %263 = arith.subf %248, %262 : vector<48x32xf32>
    %cst_86 = arith.constant 9.99999996E-13 : f32
    %264 = vector.broadcast %cst_86 : f32 to vector<48x1xf32>
    %265 = arith.addf %261, %264 : vector<48x1xf32>
    %266 = math.rsqrt %265 : vector<48x1xf32>
    %267 = vector.broadcast %266 : vector<48x1xf32> to vector<48x32xf32>
    %268 = arith.mulf %263, %267 : vector<48x32xf32>
    %269 = vector.broadcast %249 : vector<1x32xf32> to vector<48x32xf32>
    %270 = arith.mulf %268, %269 : vector<48x32xf32>
    %271 = vector.broadcast %250 : vector<1x32xf32> to vector<48x32xf32>
    %272 = arith.addf %270, %271 : vector<48x32xf32>
    %273 = vector.extract_strided_slice %272 {offsets = [0, 0], sizes = [1, 32], strides = [1, 1]} : vector<48x32xf32> to vector<1x32xf32>
    %274 = vector.extract_strided_slice %272 {offsets = [8, 0], sizes = [1, 32], strides = [1, 1]} : vector<48x32xf32> to vector<1x32xf32>
    %275 = vector.extract_strided_slice %272 {offsets = [16, 0], sizes = [1, 32], strides = [1, 1]} : vector<48x32xf32> to vector<1x32xf32>
    %276 = vector.extract_strided_slice %272 {offsets = [24, 0], sizes = [1, 32], strides = [1, 1]} : vector<48x32xf32> to vector<1x32xf32>
    %277 = vector.extract_strided_slice %272 {offsets = [32, 0], sizes = [1, 32], strides = [1, 1]} : vector<48x32xf32> to vector<1x32xf32>
    %278 = vector.extract_strided_slice %272 {offsets = [40, 0], sizes = [1, 32], strides = [1, 1]} : vector<48x32xf32> to vector<1x32xf32>
    %279 = tpu.concatenate %273, %274, %275, %276, %277, %278 in 0 : vector<1x32xf32>, vector<1x32xf32>, vector<1x32xf32>, vector<1x32xf32>, vector<1x32xf32>, vector<1x32xf32> -> vector<6x32xf32>
    %c568 = arith.constant 568 : index
    %c0_87 = arith.constant 0 : index
    %280 = vector.load %arg3[%c568, %c0_87] : memref<608x128xf32, #tpu.memory_space<vmem>>, vector<32x2xf32>
    %cst_88 = arith.constant dense<0.000000e+00> : vector<6x2xf32>
    %281 = tpu.matmul %279, %280, %cst_88 {dimension_numbers = #tpu.dot_dimension_numbers<[1], [0], [0], [1], [0, 0, 1, 1], [], []>} : vector<6x32xf32>, vector<32x2xf32>, vector<6x2xf32> -> vector<6x2xf32>
    %c600 = arith.constant 600 : index
    %c0_89 = arith.constant 0 : index
    %282 = vector.load %arg3[%c600, %c0_89] : memref<608x128xf32, #tpu.memory_space<vmem>>, vector<1x2xf32>
    %283 = vector.broadcast %282 : vector<1x2xf32> to vector<6x2xf32>
    %284 = arith.addf %281, %283 : vector<6x2xf32>
    %cst_90 = arith.constant dense<0xFF800000> : vector<6xf32>
    %285 = vector.multi_reduction <maximumf>, %284, %cst_90 [1] : vector<6x2xf32> to vector<6xf32>
    %286 = vector.shape_cast %285 : vector<6xf32> to vector<6x1xf32>
    %287 = vector.broadcast %286 : vector<6x1xf32> to vector<6x2xf32>
    %288 = arith.subf %284, %287 : vector<6x2xf32>
    %289 = vector.broadcast %286 : vector<6x1xf32> to vector<6x2xf32>
    %290 = arith.subf %284, %289 : vector<6x2xf32>
    %291 = math.exp %290 : vector<6x2xf32>
    %cst_91 = arith.constant dense<0.000000e+00> : vector<6xf32>
    %292 = vector.multi_reduction <add>, %291, %cst_91 [1] : vector<6x2xf32> to vector<6xf32>
    %293 = vector.shape_cast %292 : vector<6xf32> to vector<6x1xf32>
    %294 = math.log %293 : vector<6x1xf32>
    %295 = vector.broadcast %294 : vector<6x1xf32> to vector<6x2xf32>
    %296 = arith.subf %288, %295 : vector<6x2xf32>
    %297 = tpu.iota {dimensions = array<i32: 0>} : vector<6x1xi32>
    %c2_i32 = arith.constant 2 : i32
    %298 = vector.broadcast %c2_i32 : i32 to vector<6x1xi32>
    %299 = arith.cmpi slt, %297, %298 : vector<6x1xi32>
    %300 = vector.extract_strided_slice %296 {offsets = [0, 1], sizes = [6, 1], strides = [1, 1]} : vector<6x2xf32> to vector<6x1xf32>
    %301 = vector.extract_strided_slice %296 {offsets = [0, 0], sizes = [6, 1], strides = [1, 1]} : vector<6x2xf32> to vector<6x1xf32>
    %302 = arith.select %299, %300, %301 : vector<6x1xi1>, vector<6x1xf32>
    %cst_92 = arith.constant 0.000000e+00 : f32
    %303 = vector.broadcast %cst_92 : f32 to vector<6x1xf32>
    %304 = arith.subf %303, %302 : vector<6x1xf32>
    %cst_93 = arith.constant dense<0.000000e+00> : vector<1xf32>
    %305 = vector.multi_reduction <add>, %304, %cst_93 [0] : vector<6x1xf32> to vector<1xf32>
    %306 = vector.shape_cast %305 : vector<1xf32> to vector<1x1xf32>
    %cst_94 = arith.constant 6.000000e+00 : f32
    %307 = vector.broadcast %cst_94 : f32 to vector<1x1xf32>
    %308 = arith.divf %306, %307 : vector<1x1xf32>
    %c0_95 = arith.constant 0 : index
    %c0_96 = arith.constant 0 : index
    %309 = vector.load %arg4[%c0_95, %c0_96] : memref<1x1xf32, #tpu.memory_space<vmem>>, vector<1x1xf32>
    tpu.vector_store %arg4[%c0_95, %c0_96], %308 {strides = array<i32>} : memref<1x1xf32, #tpu.memory_space<vmem>>, vector<1x1xf32>,
    return
  }
}

</mosaic_0001>

<bundles_post_ra>
// kernel: blip_ui_retrieval_forward.3
= control target key start
LH: loop header
LB: loop body
LE: loop exit
PB: predicated region body
PF: predicated region fallthrough
CT: control target
= control target key end

     0   :  { %v2543_v2 = vmov 0   ;;  %v2544_v8 = vmov 0.0   ;;  %s3428_s0 = inlined_call_operand.vmem [shape: s32[48,1], index: 0, kind: input, shape index: {}]   ;;  %s3429_s1 = inlined_call_operand.vmem [shape: f32[1,48], index: 1, kind: input, shape index: {}]   ;;  %s3430_s2 = inlined_call_operand.vmem [shape: f32[48,32], index: 2, kind: input, shape index: {}]   ;;  %s3431_s3 = inlined_call_operand.vmem [shape: f32[608,128], index: 3, kind: input, shape index: {}]   ;;  %s3432_s4 = inlined_call_operand.hbm [shape: f32[1,1], index: 4, kind: output, shape index: {}]  }
   0x1   :  { %v23_v0 = vld [vmem:[%s3428_s0 + $0x10] sm:$0xff]  ;;  %v21_v1 = vld [vmem:[%s3428_s0] sm:$0xff]  ;;  %2394 = vset.pattern.permute.xlu1 %v2543_v2  ;;  %2393 = vset.pattern.permute.xlu0 %v2543_v2  ;;  %v52_v4 = vld [vmem:[%s3431_s3 + $0x8] sm:$0xff] }
   0x2   :  { %34 = vperm.xlu1 %2394, %v23_v0   ;;  %28 = vperm.xlu0 %2393, %v21_v1   ;;  %v51_v3 = vld [vmem:[%s3431_s3] sm:$0xff]  ;;  %v53_v5 = vld [vmem:[%s3431_s3 + $0x10] sm:$0xff]  ;;  %v24_v6 = vld [vmem:[%s3428_s0 + $0x18] sm:$0xff] }
   0x3   :  { %v22_v7 = vld [vmem:[%s3428_s0 + $0x8] sm:$0xff]  ;;  %2150 = vmatprep.subr.bf16.mxu0 %v2544_v8  ;;  %v74_v9 = vpack.c.bf16 %v52_v4, %v51_v3  ;;  %v54_v10 = vld [vmem:[%s3431_s3 + $0x18] sm:$0xff]  ;;  %2170 = vmatprep.subr.bf16.mxu1 %v2544_v8 }
   0x4   :  { %9 = vsyncpa [#allocation3], 0  ;;  %v75_v11 = vpack.c.bf16 %v54_v10, %v53_v5  ;;  %v55_v12 = vld [vmem:[%s3431_s3 + $0x20] sm:$0xff]  ;;  %v56_v13 = vld [vmem:[%s3431_s3 + $0x28] sm:$0xff]  ;;  %vm2545_vm0 = vmmov 0   ;;  %v19_v20 = vlaneseq  ;;  %vm84_vm3 = vcmask 523264  }
   0x5   :  { %2151 = vmatpush3.bf16.msra.mxu0 %v74_v9  ;;  %v26_v14 = vld [vmem:[%s3428_s0 + $0x28] sm:$0xff]  ;;  %v25_v15 = vld [vmem:[%s3428_s0 + $0x20] sm:$0xff]  ;;  %v76_v16 = vpack.c.bf16 %v56_v13, %v55_v12  ;;  %2158 = vmatprep.mubr.msk.bf16.mxu0 %vm2545_vm0, %v2544_v8  ;;  %v57_v17 = vld [vmem:[%s3431_s3 + $0x30] sm:$0xff]  ;;  %vm153_vm8 = vcmask 261120   ;;  %s2546_s19 = smov 96   ;;  %vm573_vm12 = vcmask 392192  }
   0x6   :  { %37 = vperm.xlu1 %2394, %v24_v6   ;;  %31 = vperm.xlu0 %2393, %v22_v7   ;;  %v58_v18 = vld [vmem:[%s3431_s3 + $0x38] sm:$0xff]  ;;  %v2631_v21 = vand.u32 127, %v19_v20  ;;  %v78_v37 = vld [vmem:[%s3431_s3 + $0x40] sm:$0xff]  ;;  %v79_v39 = vld [vmem:[%s3431_s3 + $0x48] sm:$0xff]  ;;  %s2550_s26 = smov 1   ;;  %s2552_s27 = smov [#allocation2]  }
   0x7   :  { %2152 = vmatprep.subr.bf16.mxu0 %v2544_v8  ;;  %2174 = vmatprep.mubr.msk.bf16.mxu1 %vm2545_vm0, %v2544_v8  ;;  %v77_v19 = vpack.c.bf16 %v58_v18, %v57_v17  ;;  %v80_v47 = vld [vmem:[%s3431_s3 + $0x50] sm:$0xff]  ;;  %v81_v49 = vld [vmem:[%s3431_s3 + $0x58] sm:$0xff]  ;;  %v82_v56 = vld [vmem:[%s3431_s3 + $0x60] sm:$0xff]  ;;  %s2006_s28 = sshll.u32 %s2552_s27, 4  ;;  %s2007_s28 = int_to_ptr.vmem [resolvable:$true] %s2006_s28 }
   0x8   :  { %v83_v59 = vld [vmem:[%s3431_s3 + $0x68] sm:$0xff]  ;;  %s2519_s29 = scalar_lea.vmem %s2007_s28, 16  ;;  %p2524_p1 = scmp.lt.s32.totalorder %s2007_s28, %s2007_s28 }
   0x9   :  { %2153 = vmatpush3.bf16.msra.mxu0 %v75_v11  ;;  %p2520_p0 = scmp.ne.s32.totalorder %s2007_s28, %s2519_s29 }
   0xa   :  { %43 = vperm.xlu1 %2394, %v26_v14   ;;  %40 = vperm.xlu0 %2393, %v25_v15  }
   0xb   :  { %2154 = vmatprep.subr.bf16.mxu0 %v2544_v8 }
   0xd   :  { %2155 = vmatpush3.bf16.msra.mxu0 %v76_v16 }
   0xe   :  { %2156 = vmatprep.subr.bf16.mxu0 %v2544_v8 }
  0x11   :  { %2157 = vmatpush3.bf16.msra.mxu0 %v77_v19 }
  0x12   :  { %2204 = vmatprep.subr.bf16.mxu0 %v2544_v8 }
  0x81   :  { %v29_v22 = vpop.permute.xlu0 %28  ;;  %v35_v23 = vpop.permute.xlu1 %34 }
  0x82   :  { %vm45_vm1 = vcmp.eq.s32.totalorder %v2631_v21, %v29_v22  ;;  %vm47_vm4 = vcmp.eq.s32.totalorder %v2631_v21, %v35_v23 }
  0x83   :  { %v2014_v25 = vsel %vm45_vm1, 1.0, %v2544_v8  ;;  %v2016_v29 = vsel %vm47_vm4, 1.0, %v2544_v8 }
  0x85   :  { %v32_v24 = vpop.permute.xlu0 %31  ;;  %v38_v28 = vpop.permute.xlu1 %37 }
  0x86   :  { %vm46_vm2 = vcmp.eq.s32.totalorder %v2631_v21, %v32_v24  ;;  %vm48_vm5 = vcmp.eq.s32.totalorder %v2631_v21, %v38_v28 }
  0x87   :  { %v2015_v26 = vsel %vm46_vm2, 1.0, %v2544_v8  ;;  %v2017_v30 = vsel %vm48_vm5, 1.0, %v2544_v8 }
  0x88   :  { %v71_v27 = vpack.c.bf16 %v2015_v26, %v2014_v25  ;;  %v72_v33 = vpack.c.bf16 %v2017_v30, %v2016_v29 }
  0x89   :  { %v44_v31 = vpop.permute.xlu1 %43  ;;  %v41_v32 = vpop.permute.xlu0 %40 }
  0x8a   :  { %2159 = vmatmul.mubr.msk.bf16.vlgmr.msra.gmra.mrb[0].mxu0 %vm84_vm3, %v71_v27  ;;  %vm50_vm6 = vcmp.eq.s32.totalorder %v2631_v21, %v44_v31  ;;  %vm49_vm7 = vcmp.eq.s32.totalorder %v2631_v21, %v41_v32 }
  0x8b   :  { %2162 = vmatprep.mubr.msk.bf16.mxu0 %vm2545_vm0, %v2544_v8  ;;  %v2019_v34 = vsel %vm50_vm6, 1.0, %v2544_v8  ;;  %v2018_v35 = vsel %vm49_vm7, 1.0, %v2544_v8 }
  0x8c   :  { %v73_v36 = vpack.c.bf16 %v2019_v34, %v2018_v35 }
  0x92   :  { %2163 = vmatmul.mubr.msk.bf16.gmra.mrb[4].mxu0 %vm84_vm3, %v72_v33 }
  0x93   :  { %2166 = vmatprep.mubr.msk.bf16.mxu0 %vm2545_vm0, %v2544_v8 }
  0x9a   :  { %2167 = vmatmul.mubr.msk.bf16.gmra.mrb[8].mxu0 %vm84_vm3, %v73_v36 }
  0x9b   :  { %2210 = vmatprep.mubr.msk.bf16.mxu0 %vm2545_vm0, %v2544_v8 }
 0x15d   :  { %v128_v38 = vpop.f32.mrb[0].mxu0 }
 0x15e   :  { %v129_v40 = vadd.f32 %v128_v38, %v78_v37  ;;  %v2160_v41 = vpop.f32.mrb[1].mxu0 }
 0x15f   :  { %v131_v42 = vpop.f32.mrb[2].mxu0 }
 0x160   :  { %v132_v43 = vadd.f32 %v131_v42, %v79_v39  ;;  %v2161_v44 = vpop.f32.mrb[3].mxu0  ;;  %v154_v45 = vsel %vm153_vm8, %v129_v40, 0.0 }
 0x161   :  { %155 = vadd.xlane.f32.xlu0 %v154_v45 }
 0x162   :  { %v157_v46 = vsel %vm153_vm8, %v132_v43, 0.0 }
 0x163   :  { %158 = vadd.xlane.f32.xlu1 %v157_v46 }
 0x165   :  { %v136_v48 = vpop.f32.mrb[4].mxu0 }
 0x166   :  { %v137_v50 = vadd.f32 %v136_v48, %v80_v47  ;;  %v2164_v51 = vpop.f32.mrb[5].mxu0 }
 0x167   :  { %v139_v52 = vpop.f32.mrb[6].mxu0 }
 0x168   :  { %v140_v53 = vadd.f32 %v139_v52, %v81_v49  ;;  %v2165_v54 = vpop.f32.mrb[7].mxu0  ;;  %v160_v55 = vsel %vm153_vm8, %v137_v50, 0.0  ;;  %v2023_v49 = vld [vmem:[%s3431_s3 + $0x70] ss:$0 sm:$0xff] }
 0x169   :  { %161 = vadd.xlane.f32.xlu0 %v160_v55  ;;  %v2024_v54 = vld [vmem:[%s3431_s3 + $0x78] ss:$0 sm:$0xff] }
 0x16a   :  { %v163_v57 = vsel %vm153_vm8, %v140_v53, 0.0 }
 0x16d   :  { %164 = vadd.xlane.f32.xlu0 %v163_v57  ;;  %v144_v58 = vpop.f32.mrb[8].mxu0 }
 0x16e   :  { %v145_v60 = vadd.f32 %v144_v58, %v82_v56  ;;  %v2168_v61 = vpop.f32.mrb[9].mxu0 }
 0x16f   :  { %v147_v62 = vpop.f32.mrb[10].mxu0 }
 0x170   :  { %v148_v63 = vadd.f32 %v147_v62, %v83_v59  ;;  %v2169_v0 = vpop.f32.mrb[11].mxu0  ;;  %v166_v1 = vsel %vm153_vm8, %v145_v60, 0.0 }
 0x171   :  { %167 = vadd.xlane.f32.xlu1 %v166_v1 }
 0x172   :  { %v169_v2 = vsel %vm153_vm8, %v148_v63, 0.0 }
 0x173   :  { %170 = vadd.xlane.f32.xlu0 %v169_v2 }
 0x1ee   :  { %v156_v3 = vpop.xlane.xlu0 %155 }
 0x1ef   :  { %v173_v4 = vmul.f32 0.03125, %v156_v3 }
 0x1f0   :  { %v159_v5 = vpop.xlane.xlu1 %158 }
 0x1f1   :  { %v179_v6 = vsub.f32 %v129_v40, %v173_v4  ;;  %v174_v7 = vmul.f32 0.03125, %v159_v5 }
 0x1f3   :  { %v180_v9 = vsub.f32 %v132_v43, %v174_v7  ;;  %v185_v10 = vmul.f32 %v179_v6, %v179_v6 }
 0x1f5   :  { %v191_v11 = vsel %vm153_vm8, %v185_v10, 0.0  ;;  %v186_v12 = vmul.f32 %v180_v9, %v180_v9 }
 0x1f6   :  { %v162_v13 = vpop.xlane.xlu0 %161  ;;  %192 = vadd.xlane.f32.xlu1 %v191_v11 }
 0x1f7   :  { %v175_v14 = vmul.f32 0.03125, %v162_v13  ;;  %v194_v15 = vsel %vm153_vm8, %v186_v12, 0.0 }
 0x1f8   :  { %195 = vadd.xlane.f32.xlu0 %v194_v15 }
 0x1f9   :  { %v181_v16 = vsub.f32 %v137_v50, %v175_v14 }
 0x1fa   :  { %v165_v17 = vpop.xlane.xlu0 %164 }
 0x1fb   :  { %v176_v18 = vmul.f32 0.03125, %v165_v17  ;;  %v187_v19 = vmul.f32 %v181_v16, %v181_v16 }
 0x1fd   :  { %v182_v22 = vsub.f32 %v140_v53, %v176_v18  ;;  %v197_v23 = vsel %vm153_vm8, %v187_v19, 0.0 }
 0x1fe   :  { %198 = vadd.xlane.f32.xlu1 %v197_v23  ;;  %v168_v24 = vpop.xlane.xlu1 %167 }
 0x1ff   :  { %v177_v25 = vmul.f32 0.03125, %v168_v24  ;;  %v188_v26 = vmul.f32 %v182_v22, %v182_v22 }
 0x200   :  { %v171_v27 = vpop.xlane.xlu0 %170 }
 0x201   :  { %v183_v28 = vsub.f32 %v145_v60, %v177_v25  ;;  %v178_v29 = vmul.f32 0.03125, %v171_v27  ;;  %v200_v30 = vsel %vm153_vm8, %v188_v26, 0.0 }
 0x202   :  { %201 = vadd.xlane.f32.xlu0 %v200_v30 }
 0x203   :  { %v184_v31 = vsub.f32 %v148_v63, %v178_v29  ;;  %v189_v32 = vmul.f32 %v183_v28, %v183_v28 }
 0x205   :  { %v203_v33 = vsel %vm153_vm8, %v189_v32, 0.0  ;;  %v190_v34 = vmul.f32 %v184_v31, %v184_v31 }
 0x206   :  { %204 = vadd.xlane.f32.xlu1 %v203_v33 }
 0x207   :  { %v206_v35 = vsel %vm153_vm8, %v190_v34, 0.0 }
 0x208   :  { %207 = vadd.xlane.f32.xlu0 %v206_v35 }
 0x283   :  { %v193_v36 = vpop.xlane.xlu1 %192 }
 0x284   :  { %v209_v37 = vmul.f32 0.03125, %v193_v36 }
 0x285   :  { %v196_v38 = vpop.xlane.xlu0 %195 }
 0x286   :  { %v215_v39 = vadd.f32 1e-12, %v209_v37  ;;  %v210_v40 = vmul.f32 0.03125, %v196_v38 }
 0x288   :  { %2395 = vrsqrt.f32 %v215_v39  ;;  %v216_v41 = vadd.f32 1e-12, %v210_v40 }
 0x28a   :  { %2397 = vrsqrt.f32 %v216_v41 }
 0x28b   :  { %v199_v42 = vpop.xlane.xlu1 %198 }
 0x28c   :  { %v211_v43 = vmul.f32 0.03125, %v199_v42 }
 0x28e   :  { %v217_v44 = vadd.f32 1e-12, %v211_v43 }
 0x28f   :  { %v202_v45 = vpop.xlane.xlu0 %201 }
 0x290   :  { %2399 = vrsqrt.f32 %v217_v44  ;;  %v212_v46 = vmul.f32 0.03125, %v202_v45 }
 0x292   :  { %v2396_v47 = vpop.eup %2395  ;;  %v218_v48 = vadd.f32 1e-12, %v212_v46 }
 0x293   :  { %v205_v50 = vpop.xlane.xlu1 %204  ;;  %v227_v51 = vmul.f32 %v2396_v47, %v179_v6 }
 0x294   :  { %v2398_v52 = vpop.eup %2397  ;;  %2401 = vrsqrt.f32 %v218_v48  ;;  %v213_v53 = vmul.f32 0.03125, %v205_v50 }
 0x295   :  { %v208_v55 = vpop.xlane.xlu0 %207  ;;  %v237_v56 = vmul.f32 %v2023_v49, %v227_v51  ;;  %v228_v57 = vmul.f32 %v2398_v52, %v180_v9 }
 0x296   :  { %v219_v58 = vadd.f32 1e-12, %v213_v53  ;;  %v214_v59 = vmul.f32 0.03125, %v208_v55  ;;  %v394_v55 = vld [vmem:[%s3431_s3 + $0x90] sm:$0xff] }
 0x297   :  { %v2690_v60 = vadd.f32 %v2024_v54, %v237_v56  ;;  %v238_v61 = vmul.f32 %v2023_v49, %v228_v57  ;;  %v395_v56 = vld [vmem:[%s3431_s3 + $0x98] sm:$0xff] }
 0x298   :  { %2403 = vrsqrt.f32 %v219_v58  ;;  %v220_v62 = vadd.f32 1e-12, %v214_v59  ;;  %v401_v57 = vpack.c.bf16 %v395_v56, %v394_v55  ;;  %v396_v58 = vld [vmem:[%s3431_s3 + $0xa0] sm:$0xff]  ;;  %v397_v59 = vld [vmem:[%s3431_s3 + $0xa8] sm:$0xff] }
 0x299   :  { %v296_v63 = vsel %vm153_vm8, %v2690_v60, 0.0  ;;  %v2694_v0 = vadd.f32 %v2024_v54, %v238_v61  ;;  %v402_v61 = vpack.c.bf16 %v397_v59, %v396_v58 }
 0x29a   :  { %v2400_v1 = vpop.eup %2399  ;;  %2405 = vrsqrt.f32 %v220_v62  ;;  %297 = vadd.xlane.f32.xlu1 %v296_v63  ;;  %2171 = vmatpush3.bf16.msra.mxu1 %v401_v57 }
 0x29b   :  { %v299_v2 = vsel %vm153_vm8, %v2694_v0, 0.0  ;;  %v229_v3 = vmul.f32 %v2400_v1, %v181_v16  ;;  %2172 = vmatprep.subr.bf16.mxu1 %v2544_v8 }
 0x29c   :  { %300 = vadd.xlane.f32.xlu0 %v299_v2 }
 0x29d   :  { %v239_v4 = vmul.f32 %v2023_v49, %v229_v3 }
 0x29e   :  { %v2402_v5 = vpop.eup %2401  ;;  %2173 = vmatpush3.bf16.msra.mxu1 %v402_v61 }
 0x29f   :  { %v2698_v6 = vadd.f32 %v2024_v54, %v239_v4  ;;  %v230_v7 = vmul.f32 %v2402_v5, %v182_v22  ;;  %2186 = vmatprep.subr.bf16.mxu1 %v2544_v8 }
 0x2a1   :  { %v302_v9 = vsel %vm153_vm8, %v2698_v6, 0.0  ;;  %v240_v10 = vmul.f32 %v2023_v49, %v230_v7 }
 0x2a2   :  { %v2404_v11 = vpop.eup %2403  ;;  %303 = vadd.xlane.f32.xlu1 %v302_v9 }
 0x2a3   :  { %v2702_v12 = vadd.f32 %v2024_v54, %v240_v10  ;;  %v231_v13 = vmul.f32 %v2404_v11, %v183_v28 }
 0x2a4   :  { %v2406_v14 = vpop.eup %2405 }
 0x2a5   :  { %v305_v15 = vsel %vm153_vm8, %v2702_v12, 0.0  ;;  %v241_v16 = vmul.f32 %v2023_v49, %v231_v13  ;;  %v232_v17 = vmul.f32 %v2406_v14, %v184_v31 }
 0x2a6   :  { %306 = vadd.xlane.f32.xlu0 %v305_v15  ;;  %v2026_v15 = vld [vmem:[%s3431_s3 + $0x80] ss:$0 sm:$0xff] }
 0x2a7   :  { %v2706_v18 = vadd.f32 %v2024_v54, %v241_v16  ;;  %v242_v19 = vmul.f32 %v2023_v49, %v232_v17 }
 0x2a9   :  { %v308_v22 = vsel %vm153_vm8, %v2706_v18, 0.0  ;;  %v2710_v23 = vadd.f32 %v2024_v54, %v242_v19 }
 0x2aa   :  { %309 = vadd.xlane.f32.xlu1 %v308_v22 }
 0x2ab   :  { %v311_v24 = vsel %vm153_vm8, %v2710_v23, 0.0 }
 0x2ac   :  { %312 = vadd.xlane.f32.xlu0 %v311_v24 }
 0x327   :  { %v298_v25 = vpop.xlane.xlu1 %297 }
 0x328   :  { %v314_v26 = vmul.f32 0.03125, %v298_v25 }
 0x329   :  { %v301_v27 = vpop.xlane.xlu0 %300 }
 0x32a   :  { %v320_v28 = vsub.f32 %v2690_v60, %v314_v26  ;;  %v315_v29 = vmul.f32 0.03125, %v301_v27 }
 0x32c   :  { %v2716_v30 = vsub.f32 %v2694_v0, %v315_v29  ;;  %v326_v31 = vmul.f32 %v320_v28, %v320_v28 }
 0x32e   :  { %v332_v32 = vsel %vm153_vm8, %v326_v31, 0.0  ;;  %v327_v33 = vmul.f32 %v2716_v30, %v2716_v30  ;;  %v2027_v31 = vld [vmem:[%s3431_s3 + $0x88] ss:$0 sm:$0xff] }
 0x32f   :  { %333 = vadd.xlane.f32.xlu1 %v332_v32  ;;  %v304_v34 = vpop.xlane.xlu1 %303 }
 0x330   :  { %v316_v35 = vmul.f32 0.03125, %v304_v34  ;;  %v335_v36 = vsel %vm153_vm8, %v327_v33, 0.0 }
 0x331   :  { %336 = vadd.xlane.f32.xlu0 %v335_v36 }
 0x332   :  { %v2723_v37 = vsub.f32 %v2698_v6, %v316_v35 }
 0x333   :  { %v307_v38 = vpop.xlane.xlu0 %306 }
 0x334   :  { %v317_v39 = vmul.f32 0.03125, %v307_v38  ;;  %v328_v40 = vmul.f32 %v2723_v37, %v2723_v37 }
 0x336   :  { %v2728_v41 = vsub.f32 %v2702_v12, %v317_v39  ;;  %v338_v42 = vsel %vm153_vm8, %v328_v40, 0.0 }
 0x337   :  { %339 = vadd.xlane.f32.xlu1 %v338_v42  ;;  %v310_v43 = vpop.xlane.xlu1 %309 }
 0x338   :  { %v318_v44 = vmul.f32 0.03125, %v310_v43  ;;  %v329_v45 = vmul.f32 %v2728_v41, %v2728_v41 }
 0x339   :  { %v313_v46 = vpop.xlane.xlu0 %312 }
 0x33a   :  { %v2734_v47 = vsub.f32 %v2706_v18, %v318_v44  ;;  %v319_v48 = vmul.f32 0.03125, %v313_v46  ;;  %v341_v49 = vsel %vm153_vm8, %v329_v45, 0.0 }
 0x33b   :  { %342 = vadd.xlane.f32.xlu0 %v341_v49 }
 0x33c   :  { %v2738_v50 = vsub.f32 %v2710_v23, %v319_v48  ;;  %v330_v51 = vmul.f32 %v2734_v47, %v2734_v47 }
 0x33e   :  { %v344_v52 = vsel %vm153_vm8, %v330_v51, 0.0  ;;  %v331_v53 = vmul.f32 %v2738_v50, %v2738_v50 }
 0x33f   :  { %345 = vadd.xlane.f32.xlu1 %v344_v52 }
 0x340   :  { %v347_v54 = vsel %vm153_vm8, %v331_v53, 0.0 }
 0x341   :  { %348 = vadd.xlane.f32.xlu0 %v347_v54 }
 0x3bc   :  { %v334_v62 = vpop.xlane.xlu1 %333 }
 0x3bd   :  { %v350_v63 = vmul.f32 0.03125, %v334_v62 }
 0x3be   :  { %v337_v1 = vpop.xlane.xlu0 %336 }
 0x3bf   :  { %v356_v2 = vadd.f32 1e-12, %v350_v63  ;;  %v351_v3 = vmul.f32 0.03125, %v337_v1 }
 0x3c1   :  { %2407 = vrsqrt.f32 %v356_v2  ;;  %v357_v4 = vadd.f32 1e-12, %v351_v3 }
 0x3c3   :  { %2409 = vrsqrt.f32 %v357_v4 }
 0x3c4   :  { %v340_v5 = vpop.xlane.xlu1 %339 }
 0x3c5   :  { %v352_v7 = vmul.f32 0.03125, %v340_v5 }
 0x3c7   :  { %v358_v9 = vadd.f32 1e-12, %v352_v7 }
 0x3c8   :  { %v343_v10 = vpop.xlane.xlu0 %342 }
 0x3c9   :  { %2411 = vrsqrt.f32 %v358_v9  ;;  %v353_v11 = vmul.f32 0.03125, %v343_v10 }
 0x3cb   :  { %v2408_v13 = vpop.eup %2407  ;;  %v359_v14 = vadd.f32 1e-12, %v353_v11 }
 0x3cc   :  { %v368_v16 = vmul.f32 %v2408_v13, %v320_v28  ;;  %v346_v17 = vpop.xlane.xlu1 %345 }
 0x3cd   :  { %v2410_v19 = vpop.eup %2409  ;;  %2413 = vrsqrt.f32 %v359_v14  ;;  %v354_v22 = vmul.f32 0.03125, %v346_v17 }
 0x3ce   :  { %v369_v24 = vmul.f32 %v2410_v19, %v2716_v30  ;;  %v349_v25 = vpop.xlane.xlu0 %348  ;;  %v378_v26 = vmul.f32 %v2026_v15, %v368_v16 }
 0x3cf   :  { %v360_v27 = vadd.f32 1e-12, %v354_v22  ;;  %v355_v29 = vmul.f32 0.03125, %v349_v25 }
 0x3d0   :  { %v379_v32 = vmul.f32 %v2026_v15, %v369_v24  ;;  %v388_v34 = vadd.f32 %v2027_v31, %v378_v26  ;;  %v2814_v26 = vshrl.u32 %v19_v20, 7 }
 0x3d1   :  { %2415 = vrsqrt.f32 %v360_v27  ;;  %v361_v33 = vadd.f32 1e-12, %v355_v29  ;;  %v253_v27 = vld [vmem:[%s3429_s1] sm:$0x1]  ;;  %s2548_s1 = smov 64  }
 0x3d2   :  { %v389_v35 = vadd.f32 %v2027_v31, %v379_v32  ;;  %v2025_v29 = vadd.f32 -1.0, %v253_v27  ;;  %v261_v32 = vshra.s32 %v2814_v26, 3  ;;  %v257_v20 = vadd.s32 16, %v2814_v26 }
 0x3d3   :  { %v2412_v28 = vpop.eup %2411  ;;  %2417 = vrsqrt.f32 %v361_v33  ;;  %v267_v33 = vshra.s32 %v2631_v21, 3 }
 0x3d4   :  { %v370_v36 = vmul.f32 %v2412_v28, %v2723_v37  ;;  %v398_v38 = vpack.c.bf16 %v389_v35, %v388_v34  ;;  %v281_v34 = vmul.f32 1e+09, %v2025_v29  ;;  %v285_v35 = vsub.s32 0, %v2814_v26 }
 0x3d5   :  { %vm2823_vm9 = vcmp.eq.s32.totalorder %v261_v32, %v267_v33 }
 0x3d6   :  { %2175 = vmatmul.mubr.msk.bf16.vlgmr.msra.gmra.mrb[0].mxu1 %vm153_vm8, %v398_v38  ;;  %v380_v40 = vmul.f32 %v2026_v15, %v370_v36  ;;  %v286_v38 = vrot.slane %v281_v34, %v285_v35 }
 0x3d7   :  { %v2414_v30 = vpop.eup %2413  ;;  %2178 = vmatprep.mubr.msk.bf16.mxu1 %vm2545_vm0, %v2544_v8 }
 0x3d8   :  { %v371_v39 = vmul.f32 %v2414_v30, %v2728_v41  ;;  %v390_v45 = vadd.f32 %v2027_v31, %v380_v40  ;;  %v2547_v40 = vmov -1e+09  }
 0x3da   :  { %v381_v42 = vmul.f32 %v2026_v15, %v371_v39  ;;  %v258_v39 = vadd.s32 24, %v2814_v26 }
 0x3db   :  { %v2416_v43 = vpop.eup %2415 }
 0x3dc   :  { %v372_v44 = vmul.f32 %v2416_v43, %v2734_v47  ;;  %v391_v46 = vadd.f32 %v2027_v31, %v381_v42  ;;  %v2028_v47 = vld [vmem:[%s3431_s3 + $0xb0] ss:$0 sm:$0xff]  ;;  %v274_v42 = vsel %vm2823_vm9, 0.0, %v2547_v40  ;;  %v263_v43 = vshra.s32 %v257_v20, 3 }
 0x3dd   :  { %v2418_v48 = vpop.eup %2417 }
 0x3de   :  { %v373_v49 = vmul.f32 %v2418_v48, %v2738_v50  ;;  %v399_v37 = vpack.c.bf16 %v391_v46, %v390_v45  ;;  %v382_v51 = vmul.f32 %v2026_v15, %v372_v44  ;;  %v288_v45 = vadd.f32 %v286_v38, %v274_v42 }
 0x3df   :  { %v264_v46 = vshra.s32 %v258_v39, 3  ;;  %vm2839_vm11 = vcmp.eq.s32.totalorder %v263_v43, %v267_v33 }
 0x3e0   :  { %2179 = vmatmul.mubr.msk.bf16.gmra.mrb[4].mxu1 %vm153_vm8, %v399_v37  ;;  %v383_v52 = vmul.f32 %v2026_v15, %v373_v49  ;;  %v392_v41 = vadd.f32 %v2027_v31, %v382_v51 }
 0x3e1   :  { %2182 = vmatprep.mubr.msk.bf16.mxu1 %vm2545_vm0, %v2544_v8  ;;  %vm2844_vm13 = vcmp.eq.s32.totalorder %v264_v46, %v267_v33 }
 0x3e2   :  { %v393_v53 = vadd.f32 %v2027_v31, %v383_v52  ;;  %v256_v31 = vadd.s32 8, %v2814_v26 }
 0x3e4   :  { %v400_v54 = vpack.c.bf16 %v393_v53, %v392_v41  ;;  %v262_v28 = vshra.s32 %v256_v31, 3  ;;  %v259_v53 = vadd.s32 32, %v2814_v26 }
 0x3e6   :  { %vm2828_vm10 = vcmp.eq.s32.totalorder %v262_v28, %v267_v33 }
 0x3e7   :  { %v275_v44 = vsel %vm2828_vm10, 0.0, %v2547_v40 }
 0x3e8   :  { %2183 = vmatmul.mubr.msk.bf16.gmra.mrb[8].mxu1 %vm153_vm8, %v400_v54  ;;  %v289_v51 = vadd.f32 %v286_v38, %v275_v44 }
 0x3e9   :  { %2192 = vmatprep.mubr.msk.bf16.mxu1 %vm2545_vm0, %v2544_v8 }
 0x4a9   :  { %v451_v50 = vpop.f32.mrb[0].mxu1 }
 0x4aa   :  { %v2176_v55 = vpop.f32.mrb[1].mxu1  ;;  %v452_v57 = vadd.f32 %v2028_v47, %v451_v50 }
 0x4ab   :  { %v454_v56 = vpop.f32.mrb[2].mxu1 }
 0x4ac   :  { %v455_v58 = vadd.f32 %v2028_v47, %v454_v56  ;;  %v2177_v59 = vpop.f32.mrb[3].mxu1  ;;  %v260_v56 = vadd.s32 40, %v2814_v26 }
 0x4ae   :  { %v2783_v61 = vpack.c.bf16 %v455_v58, %v452_v57  ;;  %v276_v57 = vsel %vm2839_vm11, 0.0, %v2547_v40 }
 0x4b0   :  { %480 = vrot.lane.b32.xlu1 %v2783_v61, %s2546_s19 }
 0x4b3   :  { %v459_v62 = vpop.f32.mrb[4].mxu1 }
 0x4b4   :  { %v2180_v63 = vpop.f32.mrb[5].mxu1  ;;  %v460_v2 = vadd.f32 %v2028_v47, %v459_v62  ;;  %v265_v62 = vshra.s32 %v259_v53, 3 }
 0x4b5   :  { %v462_v1 = vpop.f32.mrb[6].mxu1  ;;  %v277_v63 = vsel %vm2844_vm13, 0.0, %v2547_v40 }
 0x4b6   :  { %v463_v3 = vadd.f32 %v2028_v47, %v462_v1  ;;  %v2181_v4 = vpop.f32.mrb[7].mxu1  ;;  %vm2857_vm14 = vcmp.eq.s32.totalorder %v265_v62, %v267_v33 }
 0x4b8   :  { %v2787_v5 = vpack.c.bf16 %v463_v3, %v460_v2  ;;  %v290_v2 = vadd.f32 %v286_v38, %v276_v57  ;;  %v266_v3 = vshra.s32 %v260_v56, 3 }
 0x4ba   :  { %482 = vrot.lane.b32.xlu0 %v2787_v5, %s2546_s19  ;;  %vm2861_vm15 = vcmp.eq.s32.totalorder %v266_v3, %v267_v33 }
 0x4bb   :  { %v467_v7 = vpop.f32.mrb[8].mxu1  ;;  %v279_v27 = vsel %vm2861_vm15, 0.0, %v2547_v40 }
 0x4bc   :  { %v2184_v9 = vpop.f32.mrb[9].mxu1  ;;  %v468_v11 = vadd.f32 %v2028_v47, %v467_v7  ;;  %v293_v35 = vadd.f32 %v286_v38, %v279_v27 }
 0x4bd   :  { %v470_v10 = vpop.f32.mrb[10].mxu1 }
 0x4be   :  { %v471_v13 = vadd.f32 %v2028_v47, %v470_v10  ;;  %v2185_v14 = vpop.f32.mrb[11].mxu1  ;;  %v291_v10 = vadd.f32 %v286_v38, %v277_v63 }
 0x4c0   :  { %v2791_v15 = vpack.c.bf16 %v471_v13, %v468_v11 }
 0x4c2   :  { %484 = vrot.lane.b32.xlu1 %v2791_v15, %s2546_s19 }
 0x522   :  { %v481_v16 = vpop.permute.xlu1 %480 }
 0x523   :  { %v496_v17 = vsel %vm153_vm8, %v481_v16, 0 }
 0x524   :  { %2187 = vmatpush3.bf16.xpose.msra.mxu1 %v496_v17 }
 0x525   :  { %2188 = vmatprep.subr.bf16.mxu1 %v2544_v8 }
 0x52c   :  { %v483_v19 = vpop.permute.xlu0 %482 }
 0x52d   :  { %v499_v22 = vsel %vm153_vm8, %v483_v19, 0 }
 0x52e   :  { %2189 = vmatpush3.bf16.xpose.msra.mxu1 %v499_v22  ;;  %v278_v22 = vsel %vm2857_vm14, 0.0, %v2547_v40 }
 0x52f   :  { %2190 = vmatprep.subr.bf16.mxu1 %v2544_v8  ;;  %v292_v31 = vadd.f32 %v286_v38, %v278_v22 }
 0x534   :  { %v485_v24 = vpop.permute.xlu1 %484 }
 0x535   :  { %v502_v25 = vsel %vm153_vm8, %v485_v24, 0 }
 0x536   :  { %2191 = vmatpush3.bf16.xpose.msra.mxu1 %v502_v25 }
 0x537   :  { %2222 = vmatprep.subr.bf16.mxu1 %v2544_v8 }
 0x53d   :  { %2193 = vmatmul.mubr.msk.bf16.vlgmr.msra.gmra.mrb[12].mxu1 %vm153_vm8, %v2783_v61 }
 0x53e   :  { %2196 = vmatprep.mubr.msk.bf16.mxu1 %vm2545_vm0, %v2544_v8 }
 0x545   :  { %2197 = vmatmul.mubr.msk.bf16.gmra.mrb[16].mxu1 %vm153_vm8, %v2787_v5 }
 0x546   :  { %2200 = vmatprep.mubr.msk.bf16.mxu1 %vm2545_vm0, %v2544_v8 }
 0x54d   :  { %2201 = vmatmul.mubr.msk.bf16.gmra.mrb[20].mxu1 %vm153_vm8, %v2791_v15 }
 0x54e   :  { %2226 = vmatprep.mubr.msk.bf16.mxu1 %vm2545_vm0, %v2544_v8 }
 0x610   :  { %v538_v48 = vpop.f32.mrb[12].mxu1 }
 0x611   :  { %v561_v49 = vmul.f32 0.17677669, %v538_v48  ;;  %v2194_v37 = vpop.f32.mrb[13].mxu1 }
 0x612   :  { %v541_v41 = vpop.f32.mrb[14].mxu1 }
 0x613   :  { %v562_v54 = vmul.f32 0.17677669, %v541_v41  ;;  %v2195_v47 = vpop.f32.mrb[15].mxu1  ;;  %v567_v50 = vadd.f32 %v561_v49, %v288_v45 }
 0x615   :  { %v574_v58 = vsel %vm573_vm12, %v567_v50, -inf  ;;  %v568_v59 = vadd.f32 %v562_v54, %v289_v51 }
 0x616   :  { %575 = vmax.xlane.f32.xlu1 %v574_v58 }
 0x617   :  { %v577_v1 = vsel %vm573_vm12, %v568_v59, -inf }
 0x618   :  { %578 = vmax.xlane.f32.xlu0 %v577_v1  ;;  %v546_v4 = vpop.f32.mrb[16].mxu1 }
 0x619   :  { %v563_v7 = vmul.f32 0.17677669, %v546_v4  ;;  %v2198_v9 = vpop.f32.mrb[17].mxu1 }
 0x61a   :  { %v549_v13 = vpop.f32.mrb[18].mxu1 }
 0x61b   :  { %v564_v14 = vmul.f32 0.17677669, %v549_v13  ;;  %v2199_v16 = vpop.f32.mrb[19].mxu1  ;;  %v569_v17 = vadd.f32 %v563_v7, %v290_v2 }
 0x61d   :  { %v580_v24 = vsel %vm573_vm12, %v569_v17, -inf  ;;  %v570_v25 = vadd.f32 %v564_v14, %v291_v10 }
 0x61e   :  { %581 = vmax.xlane.f32.xlu0 %v580_v24 }
 0x61f   :  { %v583_v29 = vsel %vm573_vm12, %v570_v25, -inf }
 0x620   :  { %584 = vmax.xlane.f32.xlu1 %v583_v29  ;;  %v554_v32 = vpop.f32.mrb[20].mxu1 }
 0x621   :  { %v565_v33 = vmul.f32 0.17677669, %v554_v32  ;;  %v2202_v34 = vpop.f32.mrb[21].mxu1 }
 0x622   :  { %v557_v28 = vpop.f32.mrb[22].mxu1 }
 0x623   :  { %v566_v20 = vmul.f32 0.17677669, %v557_v28  ;;  %v2203_v39 = vpop.f32.mrb[23].mxu1  ;;  %v571_v42 = vadd.f32 %v565_v33, %v292_v31 }
 0x625   :  { %v586_v43 = vsel %vm573_vm12, %v571_v42, -inf  ;;  %v572_v44 = vadd.f32 %v566_v20, %v293_v35 }
 0x626   :  { %587 = vmax.xlane.f32.xlu0 %v586_v43 }
 0x627   :  { %v589_v45 = vsel %vm573_vm12, %v572_v44, -inf }
 0x628   :  { %590 = vmax.xlane.f32.xlu1 %v589_v45 }
 0x6a3   :  { %v576_v46 = vpop.xlane.xlu1 %575 }
 0x6a4   :  { %v592_v48 = vsub.f32 %v567_v50, %v576_v46 }
 0x6a5   :  { %v579_v49 = vpop.xlane.xlu0 %578 }
 0x6a6   :  { %v598_v37 = vmul.f32 1.442695, %v592_v48  ;;  %v593_v51 = vsub.f32 %v568_v59, %v579_v49 }
 0x6a8   :  { %2419 = vpow2.f32 %v598_v37  ;;  %v600_v53 = vmul.f32 1.442695, %v593_v51 }
 0x6aa   :  { %2421 = vpow2.f32 %v600_v53 }
 0x6ab   :  { %v582_v38 = vpop.xlane.xlu0 %581 }
 0x6ac   :  { %v594_v41 = vsub.f32 %v569_v17, %v582_v38 }
 0x6ad   :  { %v585_v54 = vpop.xlane.xlu1 %584 }
 0x6ae   :  { %v602_v47 = vmul.f32 1.442695, %v594_v41  ;;  %v595_v56 = vsub.f32 %v570_v25, %v585_v54  ;;  %v718_v25 = vld [vmem:[%s3431_s3 + $0xb8] sm:$0xff] }
 0x6b0   :  { %2423 = vpow2.f32 %v602_v47  ;;  %v604_v57 = vmul.f32 1.442695, %v595_v56  ;;  %v720_v47 = vld [vmem:[%s3431_s3 + $0xc8] sm:$0xff]  ;;  %v721_v56 = vld [vmem:[%s3431_s3 + $0xd0] sm:$0xff] }
 0x6b2   :  { %v2420_v58 = vpop.eup %2419  ;;  %2425 = vpow2.f32 %v604_v57  ;;  %v726_v57 = vpack.c.bf16 %v721_v56, %v720_v47 }
 0x6b3   :  { %v588_v62 = vpop.xlane.xlu0 %587  ;;  %v610_v63 = vsel %vm573_vm12, %v2420_v58, 0.0 }
 0x6b4   :  { %v2422_v1 = vpop.eup %2421  ;;  %v596_v50 = vsub.f32 %v571_v42, %v588_v62  ;;  %611 = vadd.xlane.f32.xlu0 %v610_v63 }
 0x6b5   :  { %v613_v59 = vsel %vm573_vm12, %v2422_v1, 0.0  ;;  %v591_v14 = vpop.xlane.xlu1 %590 }
 0x6b6   :  { %v606_v2 = vmul.f32 1.442695, %v596_v50  ;;  %614 = vadd.xlane.f32.xlu1 %v613_v59  ;;  %v597_v16 = vsub.f32 %v572_v44, %v591_v14 }
 0x6b8   :  { %2427 = vpow2.f32 %v606_v2  ;;  %v608_v17 = vmul.f32 1.442695, %v597_v16 }
 0x6ba   :  { %v2424_v3 = vpop.eup %2423  ;;  %2429 = vpow2.f32 %v608_v17 }
 0x6bb   :  { %v616_v4 = vsel %vm573_vm12, %v2424_v3, 0.0 }
 0x6bc   :  { %v2426_v7 = vpop.eup %2425  ;;  %617 = vadd.xlane.f32.xlu0 %v616_v4 }
 0x6bd   :  { %v619_v9 = vsel %vm573_vm12, %v2426_v7, 0.0 }
 0x6be   :  { %620 = vadd.xlane.f32.xlu1 %v619_v9 }
 0x6c2   :  { %v2428_v10 = vpop.eup %2427 }
 0x6c3   :  { %v622_v13 = vsel %vm573_vm12, %v2428_v10, 0.0 }
 0x6c4   :  { %623 = vadd.xlane.f32.xlu0 %v622_v13  ;;  %v2430_v22 = vpop.eup %2429 }
 0x6c5   :  { %v625_v24 = vsel %vm573_vm12, %v2430_v22, 0.0 }
 0x6cf   :  { %645 = vrot.lane.b32.xlu1 %v2787_v5, %s2548_s1  ;;  %v719_v5 = vld [vmem:[%s3431_s3 + $0xc0] sm:$0xff] }
 0x6d0   :  { %v725_v27 = vpack.c.bf16 %v719_v5, %v718_v25 }
 0x6d2   :  { %2223 = vmatpush3.bf16.msra.mxu1 %v725_v27 }
 0x6d3   :  { %2224 = vmatprep.subr.bf16.mxu1 %v2544_v8 }
 0x6d6   :  { %2225 = vmatpush3.bf16.msra.mxu1 %v726_v57 }
 0x6d7   :  { %2254 = vmatprep.subr.bf16.mxu1 %v2544_v8 }
 0x6da   :  { %643 = vrot.lane.b32.xlu0 %v2783_v61, %s2548_s1 }
 0x6f3   :  { %626 = vadd.xlane.f32.xlu1 %v625_v24 }
 0x704   :  { %647 = vrot.lane.b32.xlu1 %v2791_v15, %s2548_s1 }
 0x741   :  { %v612_v61 = vpop.xlane.xlu0 %611 }
 0x743   :  { %v615_v31 = vpop.xlane.xlu1 %614 }
 0x744   :  { %2431 = vrcp.f32 %v615_v31 }
 0x745   :  { %2433 = vrcp.f32 %v612_v61 }
 0x749   :  { %v618_v29 = vpop.xlane.xlu0 %617 }
 0x74b   :  { %v621_v33 = vpop.xlane.xlu1 %620 }
 0x74c   :  { %2435 = vrcp.f32 %v621_v33 }
 0x74d   :  { %2437 = vrcp.f32 %v618_v29 }
 0x74e   :  { %v2432_v35 = vpop.eup %2431 }
 0x74f   :  { %v646_v15 = vpop.permute.xlu1 %645  ;;  %v2434_v20 = vpop.eup %2433  ;;  %v635_v39 = vmul.f32 %v2432_v35, %v2422_v1 }
 0x750   :  { %v634_v42 = vmul.f32 %v2434_v20, %v2420_v58 }
 0x751   :  { %v624_v32 = vpop.xlane.xlu0 %623 }
 0x752   :  { %v640_v44 = vpack.c.bf16 %v635_v39, %v634_v42 }
 0x755   :  { %v644_v34 = vpop.permute.xlu0 %643 }
 0x756   :  { %2205 = vmatpush3.bf16.msra.mxu0 %v644_v34  ;;  %v2436_v45 = vpop.eup %2435 }
 0x757   :  { %2206 = vmatprep.subr.bf16.mxu0 %v2544_v8  ;;  %v2438_v46 = vpop.eup %2437  ;;  %v637_v48 = vmul.f32 %v2436_v45, %v2426_v7 }
 0x758   :  { %v636_v49 = vmul.f32 %v2438_v46, %v2424_v3 }
 0x75a   :  { %2207 = vmatpush3.bf16.msra.mxu0 %v646_v15  ;;  %v641_v37 = vpack.c.bf16 %v637_v48, %v636_v49 }
 0x75b   :  { %2208 = vmatprep.subr.bf16.mxu0 %v2544_v8 }
 0x780   :  { %v627_v28 = vpop.xlane.xlu1 %626 }
 0x781   :  { %2439 = vrcp.f32 %v627_v28 }
 0x782   :  { %2441 = vrcp.f32 %v624_v32 }
 0x784   :  { %v648_v43 = vpop.permute.xlu1 %647 }
 0x785   :  { %2209 = vmatpush3.bf16.msra.mxu0 %v648_v43 }
 0x786   :  { %2238 = vmatprep.subr.bf16.mxu0 %v2544_v8 }
 0x788   :  { %2211 = vmatmul.mubr.msk.bf16.vlgmr.msra.gmra.mrb[12].mxu0 %vm573_vm12, %v640_v44 }
 0x789   :  { %2214 = vmatprep.mubr.msk.bf16.mxu0 %vm2545_vm0, %v2544_v8 }
 0x78b   :  { %v2440_v51 = vpop.eup %2439 }
 0x78c   :  { %v2442_v53 = vpop.eup %2441  ;;  %v639_v38 = vmul.f32 %v2440_v51, %v2430_v22  ;;  %v2041_v22 = vld [vmem:[%s3431_s3 + $0xd8] ss:$0 sm:$0xff] }
 0x78d   :  { %v638_v41 = vmul.f32 %v2442_v53, %v2428_v10  ;;  %v996_v53 = vld [vmem:[%s3431_s3 + $0x118] sm:$0xff] }
 0x78f   :  { %v642_v54 = vpack.c.bf16 %v639_v38, %v638_v41  ;;  %v997_v38 = vld [vmem:[%s3431_s3 + $0x120] sm:$0xff] }
 0x790   :  { %2215 = vmatmul.mubr.msk.bf16.gmra.mrb[16].mxu0 %vm573_vm12, %v641_v37  ;;  %v1003_v41 = vpack.c.bf16 %v997_v38, %v996_v53  ;;  %v912_v53 = vld [vmem:[%s3431_s3 + $0x100] sm:$0xff]  ;;  %v913_v38 = vld [vmem:[%s3431_s3 + $0x108] sm:$0xff] }
 0x791   :  { %2218 = vmatprep.mubr.msk.bf16.mxu0 %vm2545_vm0, %v2544_v8 }
 0x798   :  { %2219 = vmatmul.mubr.msk.bf16.gmra.mrb[20].mxu0 %vm573_vm12, %v642_v54  ;;  %v999_v54 = vld [vmem:[%s3431_s3 + $0x130] sm:$0xff] }
 0x799   :  { %2242 = vmatprep.mubr.msk.bf16.mxu0 %vm2545_vm0, %v2544_v8 }
 0x85b   :  { %v695_v58 = vpop.f32.mrb[12].mxu0 }
 0x85c   :  { %v2212_v62 = vpop.f32.mrb[13].mxu0 }
 0x85d   :  { %v698_v63 = vpop.f32.mrb[14].mxu0 }
 0x85e   :  { %v722_v1 = vpack.c.bf16 %v698_v63, %v695_v58  ;;  %v2213_v50 = vpop.f32.mrb[15].mxu0 }
 0x860   :  { %2227 = vmatmul.mubr.msk.bf16.vlgmr.msra.gmra.mrb[24].mxu1 %vm153_vm8, %v722_v1 }
 0x861   :  { %2230 = vmatprep.mubr.msk.bf16.mxu1 %vm2545_vm0, %v2544_v8  ;;  %2255 = vmatpush3.bf16.msra.mxu1 %v1003_v41 }
 0x862   :  { %2256 = vmatprep.subr.bf16.mxu1 %v2544_v8 }
 0x863   :  { %v703_v59 = vpop.f32.mrb[16].mxu0 }
 0x864   :  { %v2216_v2 = vpop.f32.mrb[17].mxu0 }
 0x865   :  { %v706_v3 = vpop.f32.mrb[18].mxu0 }
 0x866   :  { %v723_v4 = vpack.c.bf16 %v706_v3, %v703_v59  ;;  %v2217_v7 = vpop.f32.mrb[19].mxu0 }
 0x868   :  { %2231 = vmatmul.mubr.msk.bf16.gmra.mrb[28].mxu1 %vm153_vm8, %v723_v4 }
 0x869   :  { %2234 = vmatprep.mubr.msk.bf16.mxu1 %vm2545_vm0, %v2544_v8 }
 0x86b   :  { %v711_v9 = vpop.f32.mrb[20].mxu0 }
 0x86c   :  { %v2220_v10 = vpop.f32.mrb[21].mxu0 }
 0x86d   :  { %v714_v13 = vpop.f32.mrb[22].mxu0 }
 0x86e   :  { %v724_v14 = vpack.c.bf16 %v714_v13, %v711_v9  ;;  %v2221_v16 = vpop.f32.mrb[23].mxu0 }
 0x870   :  { %2235 = vmatmul.mubr.msk.bf16.gmra.mrb[32].mxu1 %vm153_vm8, %v724_v14 }
 0x871   :  { %2258 = vmatprep.mubr.msk.bf16.mxu1 %vm2545_vm0, %v2544_v8 }
 0x933   :  { %v770_v17 = vpop.f32.mrb[24].mxu1 }
 0x934   :  { %v793_v24 = vadd.f32 %v770_v17, %v2690_v60  ;;  %v2228_v25 = vpop.f32.mrb[25].mxu1 }
 0x935   :  { %v773_v5 = vpop.f32.mrb[26].mxu1 }
 0x936   :  { %v2923_v27 = vadd.f32 %v2041_v22, %v793_v24  ;;  %v794_v61 = vadd.f32 %v773_v5, %v2694_v0  ;;  %v2229_v29 = vpop.f32.mrb[27].mxu1 }
 0x938   :  { %v2926_v31 = vadd.f32 %v2041_v22, %v794_v61  ;;  %v812_v32 = vsel %vm153_vm8, %v2923_v27, 0.0 }
 0x939   :  { %813 = vadd.xlane.f32.xlu0 %v812_v32 }
 0x93a   :  { %v815_v33 = vsel %vm153_vm8, %v2926_v31, 0.0 }
 0x93b   :  { %816 = vadd.xlane.f32.xlu1 %v815_v33  ;;  %v778_v34 = vpop.f32.mrb[28].mxu1  ;;  %v990_v33 = vld [vmem:[%s3430_s2] sm:$0xff] }
 0x93c   :  { %v795_v60 = vadd.f32 %v778_v34, %v2698_v6  ;;  %v2232_v15 = vpop.f32.mrb[29].mxu1  ;;  %v991_v34 = vld [vmem:[%s3430_s2 + $0x8] sm:$0xff] }
 0x93d   :  { %v781_v35 = vpop.f32.mrb[30].mxu1 }
 0x93e   :  { %v2933_v28 = vadd.f32 %v2041_v22, %v795_v60  ;;  %v796_v0 = vadd.f32 %v781_v35, %v2702_v12  ;;  %v2233_v20 = vpop.f32.mrb[31].mxu1  ;;  %v1000_v60 = vpack.c.bf16 %v991_v34, %v990_v33 }
 0x940   :  { %v2936_v39 = vadd.f32 %v2041_v22, %v796_v0  ;;  %v818_v42 = vsel %vm153_vm8, %v2933_v28, 0.0 }
 0x941   :  { %819 = vadd.xlane.f32.xlu0 %v818_v42 }
 0x942   :  { %v821_v6 = vsel %vm153_vm8, %v2936_v39, 0.0 }
 0x943   :  { %v786_v43 = vpop.f32.mrb[32].mxu1 }
 0x944   :  { %v797_v44 = vadd.f32 %v786_v43, %v2706_v18  ;;  %v2236_v45 = vpop.f32.mrb[33].mxu1  ;;  %v992_v43 = vld [vmem:[%s3430_s2 + $0x10] sm:$0xff] }
 0x945   :  { %822 = vadd.xlane.f32.xlu0 %v821_v6  ;;  %v789_v46 = vpop.f32.mrb[34].mxu1  ;;  %v994_v6 = vld [vmem:[%s3430_s2 + $0x20] sm:$0xff] }
 0x946   :  { %v2943_v48 = vadd.f32 %v2041_v22, %v797_v44  ;;  %v798_v12 = vadd.f32 %v789_v46, %v2710_v23  ;;  %v2237_v49 = vpop.f32.mrb[35].mxu1  ;;  %v998_v23 = vld [vmem:[%s3431_s3 + $0x128] sm:$0xff]  ;;  %v993_v44 = vld [vmem:[%s3430_s2 + $0x18] sm:$0xff] }
 0x947   :  { %v1004_v47 = vpack.c.bf16 %v999_v54, %v998_v23  ;;  %v1001_v45 = vpack.c.bf16 %v993_v44, %v992_v43  ;;  %v995_v46 = vld [vmem:[%s3430_s2 + $0x28] sm:$0xff]  ;;  %v910_v49 = vld [vmem:[%s3431_s3 + $0xf0] sm:$0xff]  ;;  %v918_v23 = vpack.c.bf16 %v913_v38, %v912_v53  ;;  %s2523_s2 = scalar_lea.vmem %s2007_s28, 32 }
 0x948   :  { %v2946_v37 = vadd.f32 %v2041_v22, %v798_v12  ;;  %v824_v51 = vsel %vm153_vm8, %v2943_v48, 0.0  ;;  %v1002_v12 = vpack.c.bf16 %v995_v46, %v994_v6  ;;  %p2525_p2 = scmp.lt.s32.totalorder %s2523_s2, %s2519_s29 }
 0x949   :  { %825 = vadd.xlane.f32.xlu1 %v824_v51  ;;  %2257 = vmatpush3.bf16.msra.mxu1 %v1004_v47  ;;  %v911_v51 = vld [vmem:[%s3431_s3 + $0xf8] sm:$0xff] }
 0x94a   :  { %v827_v18 = vsel %vm153_vm8, %v2946_v37, 0.0  ;;  %2288 = vmatprep.subr.bf16.mxu1 %v2544_v8  ;;  %p2526_p3 = por %p2525_p2, %p2524_p1 }
 0x94b   :  { %828 = vadd.xlane.f32.xlu0 %v827_v18  ;;  %v917_v18 = vpack.c.bf16 %v911_v51, %v910_v49 }
 0x94c   :  { %2259 = vmatmul.mubr.msk.bf16.vlgmr.msra.gmra.mrb[36].mxu1 %vm153_vm8, %v1000_v60  ;;  %p2527_p4 = pnand %p2526_p3, %p2520_p0 }
 0x94d   :  { %2262 = vmatprep.mubr.msk.bf16.mxu1 %vm2545_vm0, %v2544_v8  ;;  %2239 = vmatpush3.bf16.msra.mxu0 %v917_v18 }
 0x94e   :  { %2240 = vmatprep.subr.bf16.mxu0 %v2544_v8 }
 0x951   :  { %2241 = vmatpush3.bf16.msra.mxu0 %v918_v23 }
 0x952   :  { %2270 = vmatprep.subr.bf16.mxu0 %v2544_v8 }
 0x954   :  { %2263 = vmatmul.mubr.msk.bf16.gmra.mrb[40].mxu1 %vm153_vm8, %v1001_v45 }
 0x955   :  { %2266 = vmatprep.mubr.msk.bf16.mxu1 %vm2545_vm0, %v2544_v8 }
 0x95c   :  { %2267 = vmatmul.mubr.msk.bf16.gmra.mrb[44].mxu1 %vm153_vm8, %v1002_v12 }
 0x95d   :  { %2294 = vmatprep.mubr.msk.bf16.mxu1 %vm2545_vm0, %v2544_v8 }
 0x9c6   :  { %v814_v56 = vpop.xlane.xlu0 %813 }
 0x9c7   :  { %v830_v57 = vmul.f32 0.03125, %v814_v56 }
 0x9c8   :  { %v817_v58 = vpop.xlane.xlu1 %816 }
 0x9c9   :  { %v2967_v62 = vsub.f32 %v2923_v27, %v830_v57  ;;  %v831_v63 = vmul.f32 0.03125, %v817_v58 }
 0x9cb   :  { %v2970_v1 = vsub.f32 %v2926_v31, %v831_v63  ;;  %v842_v50 = vmul.f32 %v2967_v62, %v2967_v62 }
 0x9cd   :  { %v848_v59 = vsel %vm153_vm8, %v842_v50, 0.0  ;;  %v843_v2 = vmul.f32 %v2970_v1, %v2970_v1 }
 0x9ce   :  { %v820_v3 = vpop.xlane.xlu0 %819  ;;  %849 = vadd.xlane.f32.xlu1 %v848_v59 }
 0x9cf   :  { %v832_v4 = vmul.f32 0.03125, %v820_v3  ;;  %v851_v7 = vsel %vm153_vm8, %v843_v2, 0.0 }
 0x9d0   :  { %852 = vadd.xlane.f32.xlu0 %v851_v7  ;;  %v2042_v7 = vld [vmem:[%s3431_s3 + $0xe0] ss:$0 sm:$0xff] }
 0x9d1   :  { %v2979_v9 = vsub.f32 %v2933_v28, %v832_v4 }
 0x9d2   :  { %v823_v10 = vpop.xlane.xlu0 %822 }
 0x9d3   :  { %v833_v13 = vmul.f32 0.03125, %v823_v10  ;;  %v844_v14 = vmul.f32 %v2979_v9, %v2979_v9 }
 0x9d5   :  { %v2984_v16 = vsub.f32 %v2936_v39, %v833_v13  ;;  %v854_v17 = vsel %vm153_vm8, %v844_v14, 0.0 }
 0x9d6   :  { %855 = vadd.xlane.f32.xlu1 %v854_v17  ;;  %v826_v22 = vpop.xlane.xlu1 %825 }
 0x9d7   :  { %v834_v24 = vmul.f32 0.03125, %v826_v22  ;;  %v845_v25 = vmul.f32 %v2984_v16, %v2984_v16 }
 0x9d8   :  { %v829_v5 = vpop.xlane.xlu0 %828 }
 0x9d9   :  { %v2990_v61 = vsub.f32 %v2943_v48, %v834_v24  ;;  %v835_v29 = vmul.f32 0.03125, %v829_v5  ;;  %v857_v32 = vsel %vm153_vm8, %v845_v25, 0.0 }
 0x9da   :  { %858 = vadd.xlane.f32.xlu0 %v857_v32 }
 0x9db   :  { %v3000_v15 = vsub.f32 %v2946_v37, %v835_v29  ;;  %v846_v35 = vmul.f32 %v2990_v61, %v2990_v61  ;;  %v2043_v29 = vld [vmem:[%s3431_s3 + $0xe8] ss:$0 sm:$0xff] }
 0x9dd   :  { %v860_v0 = vsel %vm153_vm8, %v846_v35, 0.0  ;;  %v847_v20 = vmul.f32 %v3000_v15, %v3000_v15 }
 0x9de   :  { %861 = vadd.xlane.f32.xlu1 %v860_v0 }
 0x9df   :  { %v863_v42 = vsel %vm153_vm8, %v847_v20, 0.0 }
 0x9e0   :  { %864 = vadd.xlane.f32.xlu0 %v863_v42 }
 0xa5b   :  { %v850_v41 = vpop.xlane.xlu1 %849 }
 0xa5c   :  { %v866_v54 = vmul.f32 0.03125, %v850_v41 }
 0xa5d   :  { %v853_v47 = vpop.xlane.xlu0 %852 }
 0xa5e   :  { %v872_v56 = vadd.f32 1e-12, %v866_v54  ;;  %v867_v57 = vmul.f32 0.03125, %v853_v47 }
 0xa60   :  { %2443 = vrsqrt.f32 %v872_v56  ;;  %v873_v58 = vadd.f32 1e-12, %v867_v57 }
 0xa62   :  { %2445 = vrsqrt.f32 %v873_v58 }
 0xa63   :  { %v856_v63 = vpop.xlane.xlu1 %855 }
 0xa64   :  { %v868_v50 = vmul.f32 0.03125, %v856_v63 }
 0xa66   :  { %v874_v59 = vadd.f32 1e-12, %v868_v50 }
 0xa67   :  { %v859_v2 = vpop.xlane.xlu0 %858 }
 0xa68   :  { %2447 = vrsqrt.f32 %v874_v59  ;;  %v869_v3 = vmul.f32 0.03125, %v859_v2 }
 0xa6a   :  { %v2444_v4 = vpop.eup %2443  ;;  %v875_v10 = vadd.f32 1e-12, %v869_v3 }
 0xa6b   :  { %v884_v13 = vmul.f32 %v2444_v4, %v2967_v62  ;;  %v862_v14 = vpop.xlane.xlu1 %861 }
 0xa6c   :  { %v2446_v17 = vpop.eup %2445  ;;  %2449 = vrsqrt.f32 %v875_v10  ;;  %v870_v22 = vmul.f32 0.03125, %v862_v14 }
 0xa6d   :  { %v894_v24 = vmul.f32 %v2042_v7, %v884_v13  ;;  %v885_v25 = vmul.f32 %v2446_v17, %v2970_v1  ;;  %v865_v5 = vpop.xlane.xlu0 %864 }
 0xa6e   :  { %v876_v32 = vadd.f32 1e-12, %v870_v22  ;;  %v871_v33 = vmul.f32 0.03125, %v865_v5 }
 0xa6f   :  { %v895_v34 = vmul.f32 %v2042_v7, %v885_v25  ;;  %v904_v35 = vadd.f32 %v2043_v29, %v894_v24 }
 0xa70   :  { %2451 = vrsqrt.f32 %v876_v32  ;;  %v877_v60 = vadd.f32 1e-12, %v871_v33 }
 0xa71   :  { %v905_v0 = vadd.f32 %v2043_v29, %v895_v34  ;;  %v2044_v34 = vld [vmem:[%s3431_s3 + $0x110] ss:$0 sm:$0xff] }
 0xa72   :  { %v2448_v62 = vpop.eup %2447  ;;  %2453 = vrsqrt.f32 %v877_v60 }
 0xa73   :  { %v886_v20 = vmul.f32 %v2448_v62, %v2979_v9  ;;  %v914_v42 = vpack.c.bf16 %v905_v0, %v904_v35 }
 0xa75   :  { %2243 = vmatmul.mubr.msk.bf16.vlgmr.msra.gmra.mrb[24].mxu0 %vm153_vm8, %v914_v42  ;;  %v896_v44 = vmul.f32 %v2042_v7, %v886_v20 }
 0xa76   :  { %v2450_v1 = vpop.eup %2449  ;;  %2246 = vmatprep.mubr.msk.bf16.mxu0 %vm2545_vm0, %v2544_v8 }
 0xa77   :  { %v887_v43 = vmul.f32 %v2450_v1, %v2984_v16  ;;  %v906_v12 = vadd.f32 %v2043_v29, %v896_v44 }
 0xa79   :  { %v897_v45 = vmul.f32 %v2042_v7, %v887_v43 }
 0xa7a   :  { %v2452_v6 = vpop.eup %2451 }
 0xa7b   :  { %v888_v46 = vmul.f32 %v2452_v6, %v2990_v61  ;;  %v907_v49 = vadd.f32 %v2043_v29, %v897_v45  ;;  %v2048_v61 = vld [vmem:[%s3431_s3 + $0x138] ss:$0 sm:$0xff] }
 0xa7c   :  { %v2454_v51 = vpop.eup %2453 }
 0xa7d   :  { %v889_v18 = vmul.f32 %v2454_v51, %v3000_v15  ;;  %v915_v9 = vpack.c.bf16 %v907_v49, %v906_v12  ;;  %v898_v53 = vmul.f32 %v2042_v7, %v888_v46  ;;  %v1053_v15 = vpop.f32.mrb[36].mxu1 }
 0xa7e   :  { %v1054_v54 = vadd.f32 %v2048_v61, %v1053_v15  ;;  %v2260_v47 = vpop.f32.mrb[37].mxu1 }
 0xa7f   :  { %2247 = vmatmul.mubr.msk.bf16.gmra.mrb[28].mxu0 %vm153_vm8, %v915_v9  ;;  %v899_v38 = vmul.f32 %v2042_v7, %v889_v18  ;;  %v908_v16 = vadd.f32 %v2043_v29, %v898_v53  ;;  %v1056_v56 = vpop.f32.mrb[38].mxu1 }
 0xa80   :  { %2250 = vmatprep.mubr.msk.bf16.mxu0 %vm2545_vm0, %v2544_v8  ;;  %v1057_v57 = vadd.f32 %v2048_v61, %v1056_v56  ;;  %v2261_v58 = vpop.f32.mrb[39].mxu1 }
 0xa81   :  { %v909_v23 = vadd.f32 %v2043_v29, %v899_v38  ;;  %v1061_v59 = vpop.f32.mrb[40].mxu1 }
 0xa82   :  { %v3067_v63 = vpack.c.bf16 %v1057_v57, %v1054_v54  ;;  %v1062_v2 = vadd.f32 %v2048_v61, %v1061_v59  ;;  %v2264_v3 = vpop.f32.mrb[41].mxu1 }
 0xa83   :  { %v916_v41 = vpack.c.bf16 %v909_v23, %v908_v16  ;;  %v1064_v4 = vpop.f32.mrb[42].mxu1 }
 0xa84   :  { %v1106_v50 = vsel %vm153_vm8, %v3067_v63, 0  ;;  %v1065_v7 = vadd.f32 %v2048_v61, %v1064_v4  ;;  %v2265_v10 = vpop.f32.mrb[43].mxu1 }
 0xa85   :  { %2271 = vmatpush3.bf16.xpose.msra.mxu0 %v1106_v50  ;;  %v1069_v17 = vpop.f32.mrb[44].mxu1 }
 0xa86   :  { %2272 = vmatprep.subr.bf16.mxu0 %v2544_v8  ;;  %v3072_v13 = vpack.c.bf16 %v1065_v7, %v1062_v2  ;;  %v1070_v22 = vadd.f32 %v2048_v61, %v1069_v17  ;;  %v2268_v24 = vpop.f32.mrb[45].mxu1 }
 0xa87   :  { %2251 = vmatmul.mubr.msk.bf16.gmra.mrb[32].mxu0 %vm153_vm8, %v916_v41  ;;  %v1072_v25 = vpop.f32.mrb[46].mxu1  ;;  %v1076_v41 = vand.u32 7, %v2631_v21 }
 0xa88   :  { %2276 = vmatprep.mubr.msk.bf16.mxu0 %vm2545_vm0, %v2544_v8  ;;  %v1109_v14 = vsel %vm153_vm8, %v3072_v13, 0  ;;  %v1073_v5 = vadd.f32 %v2048_v61, %v1072_v25  ;;  %v2269_v29 = vpop.f32.mrb[47].mxu1 }
 0xa89   :  { %vm3095_vm1 = vcmp.lt.s32.totalorder %v1076_v41, 5 }
 0xa8a   :  { %v3077_v32 = vpack.c.bf16 %v1073_v5, %v1070_v22  ;;  %vm1078_vm2 = vmand %vm2823_vm9, %vm3095_vm1  ;;  %vm1874_vm9 = vcmask 1041408  }
 0xa8b   :  { %vm1079_vm3 = vmand %vm2828_vm10, %vm3095_vm1  ;;  %v1084_v54 = vsel %vm1078_vm2, 0.0, %v2547_v40  ;;  %vm1876_vm10 = vcmask 1042432  }
 0xa8c   :  { %v1112_v33 = vsel %vm153_vm8, %v3077_v32, 0  ;;  %v1085_v57 = vsel %vm1079_vm3, 0.0, %v2547_v40  ;;  %vm1080_vm4 = vmand %vm2839_vm11, %vm3095_vm1  ;;  %vm1878_vm11 = vcmask 1043456  }
 0xa8d   :  { %2273 = vmatpush3.bf16.xpose.msra.mxu0 %v1109_v14  ;;  %vm1081_vm5 = vmand %vm2844_vm13, %vm3095_vm1  ;;  %v1086_v4 = vsel %vm1080_vm4, 0.0, %v2547_v40  ;;  %vm1964_vm13 = vcmask 13312  }
 0xa8e   :  { %2274 = vmatprep.subr.bf16.mxu0 %v2544_v8  ;;  %v1087_v17 = vsel %vm1081_vm5, 0.0, %v2547_v40  ;;  %vm1082_vm6 = vmand %vm2857_vm14, %vm3095_vm1  ;;  %vm1984_vm14 = vcmask 13320  }
 0xa8f   :  { %vm1083_vm7 = vmand %vm2861_vm15, %vm3095_vm1  ;;  %vm1998_vm15 = vcmask 0  }
 0xa95   :  { %2275 = vmatpush3.bf16.xpose.msra.mxu0 %v1112_v33  ;;  %v1088_v33 = vsel %vm1082_vm6, 0.0, %v2547_v40 }
 0xa96   :  { %2306 = vmatprep.subr.bf16.mxu0 %v2544_v8 }
 0xb48   :  { %v967_v60 = vpop.f32.mrb[24].mxu0 }
 0xb49   :  { %v2244_v35 = vpop.f32.mrb[25].mxu0  ;;  %v968_v62 = vadd.f32 %v2044_v34, %v967_v60 }
 0xb4a   :  { %v970_v0 = vpop.f32.mrb[26].mxu0 }
 0xb4b   :  { %v971_v20 = vadd.f32 %v2044_v34, %v970_v0  ;;  %v2245_v42 = vpop.f32.mrb[27].mxu0  ;;  %v1089_v0 = vsel %vm1083_vm7, 0.0, %v2547_v40 }
 0xb4d   :  { %v1090_v1 = vpack.c.bf16 %v971_v20, %v968_v62 }
 0xb4f   :  { %2277 = vmatmul.mubr.msk.bf16.vlgmr.msra.gmra.mrb[36].mxu0 %vm153_vm8, %v1090_v1 }
 0xb50   :  { %2280 = vmatprep.mubr.msk.bf16.mxu0 %vm2545_vm0, %v2544_v8 }
 0xb52   :  { %v975_v43 = vpop.f32.mrb[28].mxu0 }
 0xb53   :  { %v2248_v44 = vpop.f32.mrb[29].mxu0  ;;  %v976_v6 = vadd.f32 %v2044_v34, %v975_v43 }
 0xb54   :  { %v978_v45 = vpop.f32.mrb[30].mxu0 }
 0xb55   :  { %v979_v46 = vadd.f32 %v2044_v34, %v978_v45  ;;  %v2249_v12 = vpop.f32.mrb[31].mxu0 }
 0xb57   :  { %v1091_v49 = vpack.c.bf16 %v979_v46, %v976_v6 }
 0xb59   :  { %2281 = vmatmul.mubr.msk.bf16.gmra.mrb[40].mxu0 %vm153_vm8, %v1091_v49 }
 0xb5a   :  { %v983_v51 = vpop.f32.mrb[32].mxu0  ;;  %2284 = vmatprep.mubr.msk.bf16.mxu0 %vm2545_vm0, %v2544_v8 }
 0xb5b   :  { %v2252_v18 = vpop.f32.mrb[33].mxu0  ;;  %v984_v53 = vadd.f32 %v2044_v34, %v983_v51 }
 0xb5c   :  { %v986_v9 = vpop.f32.mrb[34].mxu0 }
 0xb5d   :  { %v987_v38 = vadd.f32 %v2044_v34, %v986_v9  ;;  %v2253_v23 = vpop.f32.mrb[35].mxu0 }
 0xb5f   :  { %v1092_v16 = vpack.c.bf16 %v987_v38, %v984_v53 }
 0xb61   :  { %2285 = vmatmul.mubr.msk.bf16.gmra.mrb[44].mxu0 %vm153_vm8, %v1092_v16 }
 0xb62   :  { %2310 = vmatprep.mubr.msk.bf16.mxu0 %vm2545_vm0, %v2544_v8 }
 0xc22   :  { %v1148_v15 = vpop.f32.mrb[36].mxu0 }
 0xc23   :  { %v1171_v47 = vmul.f32 0.17677669, %v1148_v15  ;;  %v2278_v56 = vpop.f32.mrb[37].mxu0 }
 0xc24   :  { %v1151_v21 = vpop.f32.mrb[38].mxu0 }
 0xc25   :  { %v1172_v58 = vmul.f32 0.17677669, %v1151_v21  ;;  %v2279_v50 = vpop.f32.mrb[39].mxu0  ;;  %v1177_v59 = vadd.f32 %v1171_v47, %v1084_v54 }
 0xc27   :  { %v1183_v2 = vsel %vm573_vm12, %v1177_v59, -inf  ;;  %v1178_v36 = vadd.f32 %v1172_v58, %v1085_v57 }
 0xc28   :  { %1184 = vmax.xlane.f32.xlu1 %v1183_v2 }
 0xc29   :  { %v1186_v3 = vsel %vm573_vm12, %v1178_v36, -inf }
 0xc2a   :  { %1187 = vmax.xlane.f32.xlu0 %v1186_v3 }
 0xc2c   :  { %v1156_v30 = vpop.f32.mrb[40].mxu0 }
 0xc2d   :  { %v1173_v7 = vmul.f32 0.17677669, %v1156_v30  ;;  %v2282_v10 = vpop.f32.mrb[41].mxu0 }
 0xc2e   :  { %v1159_v14 = vpop.f32.mrb[42].mxu0 }
 0xc2f   :  { %v1174_v22 = vmul.f32 0.17677669, %v1159_v14  ;;  %v2283_v24 = vpop.f32.mrb[43].mxu0  ;;  %v1179_v25 = vadd.f32 %v1173_v7, %v1086_v4  ;;  %v1330_v4 = vld [vmem:[%s3431_s3 + $0x140] sm:$0xff]  ;;  %v1331_v7 = vld [vmem:[%s3431_s3 + $0x148] sm:$0xff] }
 0xc30   :  { %v1337_v10 = vpack.c.bf16 %v1331_v7, %v1330_v4 }
 0xc31   :  { %v1189_v52 = vsel %vm573_vm12, %v1179_v25, -inf  ;;  %v1180_v5 = vadd.f32 %v1174_v22, %v1087_v17 }
 0xc32   :  { %1190 = vmax.xlane.f32.xlu1 %v1189_v52  ;;  %2307 = vmatpush3.bf16.msra.mxu0 %v1337_v10 }
 0xc33   :  { %v1192_v55 = vsel %vm573_vm12, %v1180_v5, -inf  ;;  %2308 = vmatprep.subr.bf16.mxu0 %v2544_v8 }
 0xc34   :  { %1193 = vmax.xlane.f32.xlu0 %v1192_v55  ;;  %v1164_v29 = vpop.f32.mrb[44].mxu0 }
 0xc35   :  { %v1175_v34 = vmul.f32 0.17677669, %v1164_v29  ;;  %v2286_v60 = vpop.f32.mrb[45].mxu0 }
 0xc36   :  { %v1167_v35 = vpop.f32.mrb[46].mxu0 }
 0xc37   :  { %v1176_v62 = vmul.f32 0.17677669, %v1167_v35  ;;  %v2287_v11 = vpop.f32.mrb[47].mxu0  ;;  %v1181_v20 = vadd.f32 %v1175_v34, %v1088_v33 }
 0xc39   :  { %v1195_v42 = vsel %vm573_vm12, %v1181_v20, -inf  ;;  %v1182_v1 = vadd.f32 %v1176_v62, %v1089_v0 }
 0xc3a   :  { %1196 = vmax.xlane.f32.xlu1 %v1195_v42 }
 0xc3b   :  { %v1198_v43 = vsel %vm573_vm12, %v1182_v1, -inf }
 0xc3c   :  { %1199 = vmax.xlane.f32.xlu0 %v1198_v43 }
 0xc4b   :  { %1255 = vrot.lane.b32.xlu1 %v3067_v63, %s2546_s19 }
 0xcb5   :  { %v1185_v19 = vpop.xlane.xlu1 %1184 }
 0xcb6   :  { %v1201_v44 = vsub.f32 %v1177_v59, %v1185_v19 }
 0xcb7   :  { %v1188_v45 = vpop.xlane.xlu0 %1187 }
 0xcb8   :  { %v1207_v6 = vmul.f32 1.442695, %v1201_v44  ;;  %v1202_v46 = vsub.f32 %v1178_v36, %v1188_v45  ;;  %v1332_v44 = vld [vmem:[%s3431_s3 + $0x150] sm:$0xff]  ;;  %v1333_v45 = vld [vmem:[%s3431_s3 + $0x158] sm:$0xff] }
 0xcba   :  { %2455 = vpow2.f32 %v1207_v6  ;;  %v1209_v40 = vmul.f32 1.442695, %v1202_v46  ;;  %v1338_v6 = vpack.c.bf16 %v1333_v45, %v1332_v44 }
 0xcbc   :  { %2457 = vpow2.f32 %v1209_v40  ;;  %2309 = vmatpush3.bf16.msra.mxu0 %v1338_v6 }
 0xcbd   :  { %2338 = vmatprep.subr.bf16.mxu0 %v2544_v8 }
 0xcbf   :  { %v1191_v12 = vpop.xlane.xlu1 %1190 }
 0xcc0   :  { %v1203_v49 = vsub.f32 %v1179_v25, %v1191_v12 }
 0xcc1   :  { %v1194_v51 = vpop.xlane.xlu0 %1193 }
 0xcc2   :  { %v1211_v18 = vmul.f32 1.442695, %v1203_v49  ;;  %v1204_v9 = vsub.f32 %v1180_v5, %v1194_v51 }
 0xcc4   :  { %v2456_v53 = vpop.eup %2455  ;;  %2459 = vpow2.f32 %v1211_v18  ;;  %v1213_v38 = vmul.f32 1.442695, %v1204_v9 }
 0xcc5   :  { %v1219_v23 = vsel %vm573_vm12, %v2456_v53, 0.0 }
 0xcc6   :  { %v2458_v16 = vpop.eup %2457  ;;  %2461 = vpow2.f32 %v1213_v38  ;;  %1220 = vadd.xlane.f32.xlu1 %v1219_v23 }
 0xcc7   :  { %v1197_v63 = vpop.xlane.xlu1 %1196  ;;  %v1222_v41 = vsel %vm573_vm12, %v2458_v16, 0.0 }
 0xcc8   :  { %v1205_v61 = vsub.f32 %v1181_v20, %v1197_v63  ;;  %1223 = vadd.xlane.f32.xlu0 %v1222_v41 }
 0xcc9   :  { %v1200_v15 = vpop.xlane.xlu0 %1199 }
 0xcca   :  { %v1215_v54 = vmul.f32 1.442695, %v1205_v61  ;;  %v1206_v47 = vsub.f32 %v1182_v1, %v1200_v15 }
 0xccb   :  { %v1256_v56 = vpop.permute.xlu1 %1255 }
 0xccc   :  { %2463 = vpow2.f32 %v1215_v54  ;;  %v1217_v21 = vmul.f32 1.442695, %v1206_v47  ;;  %2289 = vmatpush3.bf16.msra.mxu1 %v1256_v56  ;;  %v2061_v47 = vld [vmem:[%s3431_s3 + $0x160] ss:$0 sm:$0xff] }
 0xccd   :  { %2290 = vmatprep.subr.bf16.mxu1 %v2544_v8 }
 0xcce   :  { %v2460_v57 = vpop.eup %2459  ;;  %2465 = vpow2.f32 %v1217_v21 }
 0xccf   :  { %v1225_v58 = vsel %vm573_vm12, %v2460_v57, 0.0 }
 0xcd0   :  { %v2462_v50 = vpop.eup %2461  ;;  %1226 = vadd.xlane.f32.xlu1 %v1225_v58 }
 0xcd1   :  { %v1228_v59 = vsel %vm573_vm12, %v2462_v50, 0.0 }
 0xcd2   :  { %1229 = vadd.xlane.f32.xlu0 %v1228_v59 }
 0xcd6   :  { %v2464_v2 = vpop.eup %2463 }
 0xcd7   :  { %v1231_v36 = vsel %vm573_vm12, %v2464_v2, 0.0 }
 0xcd8   :  { %v2466_v3 = vpop.eup %2465  ;;  %1232 = vadd.xlane.f32.xlu1 %v1231_v36 }
 0xcd9   :  { %v1234_v30 = vsel %vm573_vm12, %v2466_v3, 0.0 }
 0xcda   :  { %1235 = vadd.xlane.f32.xlu0 %v1234_v30 }
 0xce9   :  { %1259 = vrot.lane.b32.xlu1 %v3077_v32, %s2546_s19 }
 0xcf0   :  { %1257 = vrot.lane.b32.xlu0 %v3072_v13, %s2546_s19 }
 0xd53   :  { %v1221_v17 = vpop.xlane.xlu1 %1220 }
 0xd55   :  { %v1224_v14 = vpop.xlane.xlu0 %1223 }
 0xd56   :  { %2467 = vrcp.f32 %v1224_v14 }
 0xd57   :  { %2469 = vrcp.f32 %v1221_v17 }
 0xd5d   :  { %v1227_v22 = vpop.xlane.xlu1 %1226 }
 0xd5f   :  { %v1230_v32 = vpop.xlane.xlu0 %1229 }
 0xd60   :  { %2471 = vrcp.f32 %v1230_v32  ;;  %v2468_v25 = vpop.eup %2467 }
 0xd61   :  { %2473 = vrcp.f32 %v1227_v22  ;;  %v2470_v5 = vpop.eup %2469  ;;  %v1244_v55 = vmul.f32 %v2468_v25, %v2458_v16 }
 0xd62   :  { %v1243_v29 = vmul.f32 %v2470_v5, %v2456_v53 }
 0xd64   :  { %v1249_v34 = vpack.c.bf16 %v1244_v55, %v1243_v29 }
 0xd65   :  { %v1233_v13 = vpop.xlane.xlu1 %1232 }
 0xd67   :  { %v1236_v24 = vpop.xlane.xlu0 %1235 }
 0xd68   :  { %2475 = vrcp.f32 %v1236_v24 }
 0xd69   :  { %v1260_v33 = vpop.permute.xlu1 %1259  ;;  %2477 = vrcp.f32 %v1233_v13 }
 0xd6a   :  { %v2472_v60 = vpop.eup %2471 }
 0xd6b   :  { %v1258_v52 = vpop.permute.xlu0 %1257  ;;  %v2474_v35 = vpop.eup %2473  ;;  %v1246_v0 = vmul.f32 %v2472_v60, %v2462_v50 }
 0xd6c   :  { %2291 = vmatpush3.bf16.msra.mxu1 %v1258_v52  ;;  %v1245_v62 = vmul.f32 %v2474_v35, %v2460_v57 }
 0xd6d   :  { %2292 = vmatprep.subr.bf16.mxu1 %v2544_v8 }
 0xd6e   :  { %v1250_v11 = vpack.c.bf16 %v1246_v0, %v1245_v62 }
 0xd70   :  { %2293 = vmatpush3.bf16.msra.mxu1 %v1260_v33 }
 0xd71   :  { %2322 = vmatprep.subr.bf16.mxu1 %v2544_v8 }
 0xd72   :  { %v2476_v20 = vpop.eup %2475 }
 0xd73   :  { %2295 = vmatmul.mubr.msk.bf16.vlgmr.msra.gmra.mrb[48].mxu1 %vm573_vm12, %v1249_v34  ;;  %v2478_v42 = vpop.eup %2477  ;;  %v1248_v1 = vmul.f32 %v2476_v20, %v2466_v3 }
 0xd74   :  { %2298 = vmatprep.mubr.msk.bf16.mxu1 %vm2545_vm0, %v2544_v8  ;;  %v1247_v43 = vmul.f32 %v2478_v42, %v2464_v2 }
 0xd76   :  { %v1251_v19 = vpack.c.bf16 %v1248_v1, %v1247_v43 }
 0xd7b   :  { %2299 = vmatmul.mubr.msk.bf16.gmra.mrb[52].mxu1 %vm573_vm12, %v1250_v11 }
 0xd7c   :  { %2302 = vmatprep.mubr.msk.bf16.mxu1 %vm2545_vm0, %v2544_v8 }
 0xd83   :  { %2303 = vmatmul.mubr.msk.bf16.gmra.mrb[56].mxu1 %vm573_vm12, %v1251_v19  ;;  %vm1880_vm12 = vcmask 1044480  }
 0xd84   :  { %2326 = vmatprep.mubr.msk.bf16.mxu1 %vm2545_vm0, %v2544_v8 }
 0xe46   :  { %v1307_v46 = vpop.f32.mrb[48].mxu1 }
 0xe47   :  { %v2296_v40 = vpop.f32.mrb[49].mxu1 }
 0xe48   :  { %v1310_v12 = vpop.f32.mrb[50].mxu1 }
 0xe49   :  { %v1334_v49 = vpack.c.bf16 %v1310_v12, %v1307_v46  ;;  %v2297_v51 = vpop.f32.mrb[51].mxu1 }
 0xe4b   :  { %2311 = vmatmul.mubr.msk.bf16.vlgmr.msra.gmra.mrb[48].mxu0 %vm153_vm8, %v1334_v49 }
 0xe4c   :  { %2314 = vmatprep.mubr.msk.bf16.mxu0 %vm2545_vm0, %v2544_v8 }
 0xe4e   :  { %v1315_v18 = vpop.f32.mrb[52].mxu1 }
 0xe4f   :  { %v2300_v9 = vpop.f32.mrb[53].mxu1 }
 0xe50   :  { %v1318_v53 = vpop.f32.mrb[54].mxu1 }
 0xe51   :  { %v1335_v38 = vpack.c.bf16 %v1318_v53, %v1315_v18  ;;  %v2301_v23 = vpop.f32.mrb[55].mxu1 }
 0xe53   :  { %2315 = vmatmul.mubr.msk.bf16.gmra.mrb[52].mxu0 %vm153_vm8, %v1335_v38 }
 0xe54   :  { %2318 = vmatprep.mubr.msk.bf16.mxu0 %vm2545_vm0, %v2544_v8 }
 0xe56   :  { %v1323_v16 = vpop.f32.mrb[56].mxu1 }
 0xe57   :  { %v2304_v63 = vpop.f32.mrb[57].mxu1 }
 0xe58   :  { %v1326_v41 = vpop.f32.mrb[58].mxu1 }
 0xe59   :  { %v1336_v61 = vpack.c.bf16 %v1326_v41, %v1323_v16  ;;  %v2305_v15 = vpop.f32.mrb[59].mxu1 }
 0xe5a   :  { %v1522_v15 = vld [vmem:[%s3431_s3 + $0x178] sm:$0xff] }
 0xe5b   :  { %2319 = vmatmul.mubr.msk.bf16.gmra.mrb[56].mxu0 %vm153_vm8, %v1336_v61 }
 0xe5c   :  { %2354 = vmatprep.mubr.msk.bf16.mxu0 %vm2545_vm0, %v2544_v8 }
 0xf1e   :  { %v1382_v54 = vpop.f32.mrb[48].mxu0 }
 0xf1f   :  { %v1405_v56 = vadd.f32 %v1382_v54, %v2923_v27  ;;  %v2312_v21 = vpop.f32.mrb[49].mxu0  ;;  %v1523_v54 = vld [vmem:[%s3431_s3 + $0x180] sm:$0xff] }
 0xf20   :  { %v1385_v57 = vpop.f32.mrb[50].mxu0  ;;  %v1525_v21 = vld [vmem:[%s3431_s3 + $0x190] sm:$0xff] }
 0xf21   :  { %v3186_v58 = vadd.f32 %v2061_v47, %v1405_v56  ;;  %v1406_v50 = vadd.f32 %v1385_v57, %v2926_v31  ;;  %v2313_v59 = vpop.f32.mrb[51].mxu0  ;;  %v1524_v56 = vld [vmem:[%s3431_s3 + $0x188] sm:$0xff] }
 0xf22   :  { %v1530_v57 = vpack.c.bf16 %v1525_v21, %v1524_v56  ;;  %v1660_v56 = vld [vmem:[%s3431_s3 + $0x1c0] sm:$0xff]  ;;  %v1661_v21 = vld [vmem:[%s3431_s3 + $0x1c8] sm:$0xff] }
 0xf23   :  { %v3189_v2 = vadd.f32 %v2061_v47, %v1406_v50  ;;  %v1424_v36 = vsel %vm153_vm8, %v3186_v58, 0.0 }
 0xf24   :  { %1425 = vadd.xlane.f32.xlu1 %v1424_v36 }
 0xf25   :  { %v1427_v3 = vsel %vm153_vm8, %v3189_v2, 0.0 }
 0xf26   :  { %1428 = vadd.xlane.f32.xlu0 %v1427_v3  ;;  %v1390_v30 = vpop.f32.mrb[52].mxu0 }
 0xf27   :  { %v1407_v27 = vadd.f32 %v1390_v30, %v2933_v28  ;;  %v2316_v4 = vpop.f32.mrb[53].mxu0 }
 0xf28   :  { %v1393_v7 = vpop.f32.mrb[54].mxu0 }
 0xf29   :  { %v3196_v10 = vadd.f32 %v2061_v47, %v1407_v27  ;;  %v1408_v31 = vadd.f32 %v1393_v7, %v2936_v39  ;;  %v2317_v14 = vpop.f32.mrb[55].mxu0 }
 0xf2b   :  { %v3199_v17 = vadd.f32 %v2061_v47, %v1408_v31  ;;  %v1430_v32 = vsel %vm153_vm8, %v3196_v10, 0.0 }
 0xf2c   :  { %1431 = vadd.xlane.f32.xlu0 %v1430_v32 }
 0xf2d   :  { %v1433_v22 = vsel %vm153_vm8, %v3199_v17, 0.0 }
 0xf2e   :  { %1434 = vadd.xlane.f32.xlu1 %v1433_v22  ;;  %v1398_v24 = vpop.f32.mrb[56].mxu0 }
 0xf2f   :  { %v1409_v28 = vadd.f32 %v1398_v24, %v2943_v48  ;;  %v2320_v13 = vpop.f32.mrb[57].mxu0 }
 0xf30   :  { %v1401_v25 = vpop.f32.mrb[58].mxu0 }
 0xf31   :  { %v3206_v52 = vadd.f32 %v2061_v47, %v1409_v28  ;;  %v1410_v39 = vadd.f32 %v1401_v25, %v2946_v37  ;;  %v2321_v5 = vpop.f32.mrb[59].mxu0  ;;  %v2062_v28 = vld [vmem:[%s3431_s3 + $0x168] ss:$0 sm:$0xff] }
 0xf33   :  { %v3209_v55 = vadd.f32 %v2061_v47, %v1410_v39  ;;  %v1436_v29 = vsel %vm153_vm8, %v3206_v52, 0.0  ;;  %v1529_v47 = vpack.c.bf16 %v1523_v54, %v1522_v15  ;;  %v1658_v15 = vld [vmem:[%s3431_s3 + $0x1b0] sm:$0xff]  ;;  %v1659_v54 = vld [vmem:[%s3431_s3 + $0x1b8] sm:$0xff] }
 0xf34   :  { %1437 = vadd.xlane.f32.xlu0 %v1436_v29 }
 0xf35   :  { %v1439_v33 = vsel %vm153_vm8, %v3209_v55, 0.0  ;;  %2323 = vmatpush3.bf16.msra.mxu1 %v1529_v47  ;;  %v1676_v47 = vpack.c.bf16 %v1659_v54, %v1658_v15 }
 0xf36   :  { %1440 = vadd.xlane.f32.xlu1 %v1439_v33  ;;  %2324 = vmatprep.subr.bf16.mxu1 %v2544_v8 }
 0xf39   :  { %2325 = vmatpush3.bf16.msra.mxu1 %v1530_v57  ;;  %v1677_v57 = vpack.c.bf16 %v1661_v21, %v1660_v56 }
 0xfb1   :  { %v1426_v34 = vpop.xlane.xlu1 %1425 }
 0xfb2   :  { %v1442_v60 = vmul.f32 0.03125, %v1426_v34 }
 0xfb3   :  { %v1429_v48 = vpop.xlane.xlu0 %1428 }
 0xfb4   :  { %v1448_v35 = vsub.f32 %v3186_v58, %v1442_v60  ;;  %v1443_v0 = vmul.f32 0.03125, %v1429_v48  ;;  %v2063_v60 = vld [vmem:[%s3431_s3 + $0x170] ss:$0 sm:$0xff] }
 0xfb6   :  { %v3217_v62 = vsub.f32 %v3189_v2, %v1443_v0  ;;  %v1454_v37 = vmul.f32 %v1448_v35, %v1448_v35 }
 0xfb8   :  { %v1460_v11 = vsel %vm153_vm8, %v1454_v37, 0.0  ;;  %v1455_v20 = vmul.f32 %v3217_v62, %v3217_v62 }
 0xfb9   :  { %v1432_v42 = vpop.xlane.xlu0 %1431  ;;  %1461 = vadd.xlane.f32.xlu0 %v1460_v11 }
 0xfba   :  { %v1444_v1 = vmul.f32 0.03125, %v1432_v42  ;;  %v1463_v43 = vsel %vm153_vm8, %v1455_v20, 0.0 }
 0xfbb   :  { %v1435_v19 = vpop.xlane.xlu1 %1434  ;;  %1464 = vadd.xlane.f32.xlu1 %v1463_v43 }
 0xfbc   :  { %v3224_v44 = vsub.f32 %v3196_v10, %v1444_v1  ;;  %v1445_v45 = vmul.f32 0.03125, %v1435_v19 }
 0xfbe   :  { %v3227_v6 = vsub.f32 %v3199_v17, %v1445_v45  ;;  %v1456_v46 = vmul.f32 %v3224_v44, %v3224_v44 }
 0xfc0   :  { %v1466_v40 = vsel %vm153_vm8, %v1456_v46, 0.0  ;;  %v1457_v12 = vmul.f32 %v3227_v6, %v3227_v6 }
 0xfc1   :  { %1467 = vadd.xlane.f32.xlu0 %v1466_v40  ;;  %v1438_v49 = vpop.xlane.xlu0 %1437 }
 0xfc2   :  { %v1446_v51 = vmul.f32 0.03125, %v1438_v49  ;;  %v1469_v18 = vsel %vm153_vm8, %v1457_v12, 0.0 }
 0xfc3   :  { %1470 = vadd.xlane.f32.xlu1 %v1469_v18  ;;  %v1441_v9 = vpop.xlane.xlu1 %1440 }
 0xfc4   :  { %v3236_v53 = vsub.f32 %v3206_v52, %v1446_v51  ;;  %v1447_v38 = vmul.f32 0.03125, %v1441_v9 }
 0xfc6   :  { %v3239_v23 = vsub.f32 %v3209_v55, %v1447_v38  ;;  %v1458_v16 = vmul.f32 %v3236_v53, %v3236_v53 }
 0xfc8   :  { %v1472_v63 = vsel %vm153_vm8, %v1458_v16, 0.0  ;;  %v1459_v41 = vmul.f32 %v3239_v23, %v3239_v23 }
 0xfc9   :  { %1473 = vadd.xlane.f32.xlu0 %v1472_v63 }
 0xfca   :  { %v1475_v61 = vsel %vm153_vm8, %v1459_v41, 0.0 }
 0xfcb   :  { %1476 = vadd.xlane.f32.xlu1 %v1475_v61 }
0x1046   :  { %v1462_v50 = vpop.xlane.xlu0 %1461 }
0x1047   :  { %v1478_v59 = vmul.f32 0.03125, %v1462_v50  ;;  %v1662_v50 = vld [vmem:[%s3431_s3 + $0x1d0] sm:$0xff] }
0x1048   :  { %v1465_v36 = vpop.xlane.xlu1 %1464 }
0x1049   :  { %v1484_v3 = vadd.f32 1e-12, %v1478_v59  ;;  %v1479_v30 = vmul.f32 0.03125, %v1465_v36  ;;  %v1663_v59 = vld [vmem:[%s3431_s3 + $0x1d8] sm:$0xff] }
0x104a   :  { %v1678_v36 = vpack.c.bf16 %v1663_v59, %v1662_v50 }
0x104b   :  { %2479 = vrsqrt.f32 %v1484_v3  ;;  %v1485_v27 = vadd.f32 1e-12, %v1479_v30  ;;  %v1664_v3 = vld [vmem:[%s3431_s3 + $0x1e0] sm:$0xff]  ;;  %v1665_v30 = vld [vmem:[%s3431_s3 + $0x1e8] sm:$0xff] }
0x104d   :  { %2481 = vrsqrt.f32 %v1485_v27  ;;  %v1679_v27 = vpack.c.bf16 %v1665_v30, %v1664_v3 }
0x104e   :  { %v1468_v4 = vpop.xlane.xlu0 %1467 }
0x104f   :  { %v1480_v7 = vmul.f32 0.03125, %v1468_v4  ;;  %v1666_v4 = vld [vmem:[%s3431_s3 + $0x1f0] sm:$0xff] }
0x1050   :  { %v1471_v31 = vpop.xlane.xlu1 %1470 }
0x1051   :  { %v1486_v14 = vadd.f32 1e-12, %v1480_v7  ;;  %v1481_v32 = vmul.f32 0.03125, %v1471_v31  ;;  %v1667_v7 = vld [vmem:[%s3431_s3 + $0x1f8] sm:$0xff] }
0x1052   :  { %v1680_v31 = vpack.c.bf16 %v1667_v7, %v1666_v4 }
0x1053   :  { %2483 = vrsqrt.f32 %v1486_v14  ;;  %v1487_v22 = vadd.f32 1e-12, %v1481_v32  ;;  %v1668_v14 = vld [vmem:[%s3431_s3 + $0x200] sm:$0xff]  ;;  %v1669_v32 = vld [vmem:[%s3431_s3 + $0x208] sm:$0xff] }
0x1055   :  { %v2480_v24 = vpop.eup %2479  ;;  %2485 = vrsqrt.f32 %v1487_v22  ;;  %v1681_v22 = vpack.c.bf16 %v1669_v32, %v1668_v14 }
0x1056   :  { %v1496_v13 = vmul.f32 %v2480_v24, %v1448_v35  ;;  %v1474_v25 = vpop.xlane.xlu0 %1473  ;;  %v1670_v24 = vld [vmem:[%s3431_s3 + $0x210] sm:$0xff] }
0x1057   :  { %v2482_v39 = vpop.eup %2481  ;;  %v1482_v5 = vmul.f32 0.03125, %v1474_v25  ;;  %v2064_v25 = vld [vmem:[%s3431_s3 + $0x198] ss:$0 sm:$0xff] }
0x1058   :  { %v1506_v29 = vmul.f32 %v2062_v28, %v1496_v13  ;;  %v1497_v33 = vmul.f32 %v2482_v39, %v3217_v62  ;;  %v1477_v34 = vpop.xlane.xlu1 %1476 }
0x1059   :  { %v1488_v48 = vadd.f32 1e-12, %v1482_v5  ;;  %v1483_v0 = vmul.f32 0.03125, %v1477_v34 }
0x105a   :  { %v1507_v37 = vmul.f32 %v2062_v28, %v1497_v33  ;;  %v1516_v20 = vadd.f32 %v2063_v60, %v1506_v29 }
0x105b   :  { %2487 = vrsqrt.f32 %v1488_v48  ;;  %v1489_v11 = vadd.f32 1e-12, %v1483_v0 }
0x105c   :  { %v1517_v42 = vadd.f32 %v2063_v60, %v1507_v37 }
0x105d   :  { %v2484_v1 = vpop.eup %2483  ;;  %2489 = vrsqrt.f32 %v1489_v11 }
0x105e   :  { %v1498_v35 = vmul.f32 %v2484_v1, %v3224_v44  ;;  %v1526_v43 = vpack.c.bf16 %v1517_v42, %v1516_v20 }
0x105f   :  { %v2486_v19 = vpop.eup %2485 }
0x1060   :  { %v1499_v62 = vmul.f32 %v2486_v19, %v3227_v6  ;;  %2327 = vmatmul.mubr.msk.bf16.vlgmr.msra.gmra.mrb[60].mxu1 %vm153_vm8, %v1526_v43  ;;  %v1508_v45 = vmul.f32 %v2062_v28, %v1498_v35 }
0x1061   :  { %2330 = vmatprep.mubr.msk.bf16.mxu1 %vm2545_vm0, %v2544_v8 }
0x1062   :  { %v1509_v46 = vmul.f32 %v2062_v28, %v1499_v62  ;;  %v1518_v40 = vadd.f32 %v2063_v60, %v1508_v45 }
0x1064   :  { %v1519_v12 = vadd.f32 %v2063_v60, %v1509_v46 }
0x1065   :  { %v2488_v49 = vpop.eup %2487 }
0x1066   :  { %v1500_v51 = vmul.f32 %v2488_v49, %v3236_v53  ;;  %v1527_v18 = vpack.c.bf16 %v1519_v12, %v1518_v40  ;;  %v1656_v53 = vld [vmem:[%s3431_s3 + $0x1a0] sm:$0xff] }
0x1067   :  { %v2490_v9 = vpop.eup %2489 }
0x1068   :  { %v1501_v44 = vmul.f32 %v2490_v9, %v3239_v23  ;;  %2331 = vmatmul.mubr.msk.bf16.gmra.mrb[64].mxu1 %vm153_vm8, %v1527_v18  ;;  %v1510_v38 = vmul.f32 %v2062_v28, %v1500_v51  ;;  %v1657_v23 = vld [vmem:[%s3431_s3 + $0x1a8] sm:$0xff] }
0x1069   :  { %2334 = vmatprep.mubr.msk.bf16.mxu1 %vm2545_vm0, %v2544_v8  ;;  %v1675_v61 = vpack.c.bf16 %v1657_v23, %v1656_v53 }
0x106a   :  { %v1511_v6 = vmul.f32 %v2062_v28, %v1501_v44  ;;  %v1520_v16 = vadd.f32 %v2063_v60, %v1510_v38  ;;  %v1671_v28 = vld [vmem:[%s3431_s3 + $0x218] sm:$0xff] }
0x106b   :  { %2339 = vmatpush3.bf16.msra.mxu0 %v1675_v61  ;;  %v1682_v13 = vpack.c.bf16 %v1671_v28, %v1670_v24 }
0x106c   :  { %v1521_v63 = vadd.f32 %v2063_v60, %v1511_v6  ;;  %2340 = vmatprep.subr.bf16.mxu0 %v2544_v8 }
0x106e   :  { %v1528_v41 = vpack.c.bf16 %v1521_v63, %v1520_v16 }
0x106f   :  { %2341 = vmatpush3.bf16.msra.mxu0 %v1676_v47 }
0x1070   :  { %2335 = vmatmul.mubr.msk.bf16.gmra.mrb[68].mxu1 %vm153_vm8, %v1528_v41  ;;  %2342 = vmatprep.subr.bf16.mxu0 %v2544_v8 }
0x1071   :  { %2374 = vmatprep.mubr.msk.f32.mxu1 %vm2545_vm0, %v2544_v8 }
0x1073   :  { %2343 = vmatpush3.bf16.msra.mxu0 %v1677_v57 }
0x1074   :  { %2344 = vmatprep.subr.bf16.mxu0 %v2544_v8 }
0x1077   :  { %2345 = vmatpush3.bf16.msra.mxu0 %v1678_v36 }
0x1078   :  { %2346 = vmatprep.subr.bf16.mxu0 %v2544_v8 }
0x107b   :  { %2347 = vmatpush3.bf16.msra.mxu0 %v1679_v27 }
0x107c   :  { %2348 = vmatprep.subr.bf16.mxu0 %v2544_v8 }
0x107f   :  { %2349 = vmatpush3.bf16.msra.mxu0 %v1680_v31 }
0x1080   :  { %2350 = vmatprep.subr.bf16.mxu0 %v2544_v8 }
0x1083   :  { %2351 = vmatpush3.bf16.msra.mxu0 %v1681_v22 }
0x1084   :  { %2352 = vmatprep.subr.bf16.mxu0 %v2544_v8 }
0x1087   :  { %2353 = vmatpush3.bf16.msra.mxu0 %v1682_v13 }
0x1133   :  { %v1579_v39 = vpop.f32.mrb[60].mxu1 }
0x1134   :  { %v1580_v5 = vadd.f32 %v2064_v25, %v1579_v39  ;;  %v2328_v29 = vpop.f32.mrb[61].mxu1 }
0x1135   :  { %v1582_v33 = vpop.f32.mrb[62].mxu1 }
0x1136   :  { %v1602_v34 = vmul.f32 %v1580_v5, %v1580_v5  ;;  %v1583_v60 = vadd.f32 %v2064_v25, %v1582_v33  ;;  %v2329_v48 = vpop.f32.mrb[63].mxu1 }
0x1138   :  { %v1608_v0 = vmul.f32 %v1602_v34, %v1580_v5  ;;  %v1603_v37 = vmul.f32 %v1583_v60, %v1583_v60 }
0x113a   :  { %v1614_v11 = vmul.f32 0.044715, %v1608_v0  ;;  %v1609_v20 = vmul.f32 %v1603_v37, %v1583_v60 }
0x113b   :  { %v1587_v42 = vpop.f32.mrb[64].mxu1 }
0x113c   :  { %v1620_v1 = vadd.f32 %v1614_v11, %v1580_v5  ;;  %v1615_v35 = vmul.f32 0.044715, %v1609_v20  ;;  %v1588_v43 = vadd.f32 %v2064_v25, %v1587_v42  ;;  %v2332_v19 = vpop.f32.mrb[65].mxu1 }
0x113d   :  { %v1590_v62 = vpop.f32.mrb[66].mxu1 }
0x113e   :  { %v1626_v45 = vmul.f32 0.7978846, %v1620_v1  ;;  %v1621_v46 = vadd.f32 %v1615_v35, %v1583_v60  ;;  %v1604_v40 = vmul.f32 %v1588_v43, %v1588_v43  ;;  %v1591_v12 = vadd.f32 %v2064_v25, %v1590_v62  ;;  %v2333_v49 = vpop.f32.mrb[67].mxu1 }
0x1140   :  { %2491 = vtanh.f32 %v1626_v45  ;;  %v1627_v51 = vmul.f32 0.7978846, %v1621_v46  ;;  %v1610_v18 = vmul.f32 %v1604_v40, %v1588_v43  ;;  %v1605_v9 = vmul.f32 %v1591_v12, %v1591_v12 }
0x1142   :  { %2493 = vtanh.f32 %v1627_v51  ;;  %v1616_v44 = vmul.f32 0.044715, %v1610_v18  ;;  %v1611_v38 = vmul.f32 %v1605_v9, %v1591_v12 }
0x1143   :  { %v1595_v6 = vpop.f32.mrb[68].mxu1 }
0x1144   :  { %v1622_v16 = vadd.f32 %v1616_v44, %v1588_v43  ;;  %v1617_v63 = vmul.f32 0.044715, %v1611_v38  ;;  %v1596_v41 = vadd.f32 %v2064_v25, %v1595_v6  ;;  %v2336_v53 = vpop.f32.mrb[69].mxu1 }
0x1145   :  { %v1598_v23 = vpop.f32.mrb[70].mxu1 }
0x1146   :  { %v1628_v61 = vmul.f32 0.7978846, %v1622_v16  ;;  %v1623_v15 = vadd.f32 %v1617_v63, %v1591_v12  ;;  %v1606_v54 = vmul.f32 %v1596_v41, %v1596_v41  ;;  %v1599_v47 = vadd.f32 %v2064_v25, %v1598_v23  ;;  %v2337_v56 = vpop.f32.mrb[71].mxu1 }
0x1148   :  { %2495 = vtanh.f32 %v1628_v61  ;;  %v1629_v21 = vmul.f32 0.7978846, %v1623_v15  ;;  %v1612_v57 = vmul.f32 %v1606_v54, %v1596_v41  ;;  %v1607_v50 = vmul.f32 %v1599_v47, %v1599_v47 }
0x114a   :  { %v2492_v59 = vpop.eup %2491  ;;  %2497 = vtanh.f32 %v1629_v21  ;;  %v1618_v36 = vmul.f32 0.044715, %v1612_v57  ;;  %v1613_v3 = vmul.f32 %v1607_v50, %v1599_v47 }
0x114b   :  { %v1638_v30 = vadd.f32 1.0, %v2492_v59 }
0x114c   :  { %v2494_v27 = vpop.eup %2493  ;;  %v1624_v4 = vadd.f32 %v1618_v36, %v1596_v41  ;;  %v1619_v7 = vmul.f32 0.044715, %v1613_v3 }
0x114d   :  { %v1644_v31 = vmul.f32 0.5, %v1638_v30  ;;  %v1639_v14 = vadd.f32 1.0, %v2494_v27 }
0x114e   :  { %v1630_v32 = vmul.f32 0.7978846, %v1624_v4  ;;  %v1625_v22 = vadd.f32 %v1619_v7, %v1599_v47 }
0x114f   :  { %v1645_v24 = vmul.f32 0.5, %v1639_v14  ;;  %v1650_v13 = vmul.f32 %v1644_v31, %v1580_v5 }
0x1150   :  { %2499 = vtanh.f32 %v1630_v32  ;;  %v1631_v28 = vmul.f32 0.7978846, %v1625_v22 }
0x1151   :  { %v1651_v25 = vmul.f32 %v1645_v24, %v1583_v60 }
0x1152   :  { %v2496_v39 = vpop.eup %2495  ;;  %2501 = vtanh.f32 %v1631_v28 }
0x1153   :  { %v1672_v29 = vpack.c.bf16 %v1651_v25, %v1650_v13  ;;  %v1640_v33 = vadd.f32 1.0, %v2496_v39 }
0x1154   :  { %v2498_v34 = vpop.eup %2497 }
0x1155   :  { %2355 = vmatmul.mubr.bf16.vlgmr.msra.gmra.mrb[60].mxu0 %v1672_v29  ;;  %v1641_v48 = vadd.f32 1.0, %v2498_v34  ;;  %v1646_v0 = vmul.f32 0.5, %v1640_v33 }
0x1156   :  { %2358 = vmatprep.mubr.msk.bf16.mxu0 %vm2545_vm0, %v2544_v8 }
0x1157   :  { %v1647_v37 = vmul.f32 0.5, %v1641_v48  ;;  %v1652_v11 = vmul.f32 %v1646_v0, %v1588_v43  ;;  %v2068_v43 = vld [vmem:[%s3431_s3 + $0x220] ss:$0 sm:$0xff] }
0x1159   :  { %v1653_v20 = vmul.f32 %v1647_v37, %v1591_v12 }
0x115a   :  { %v2500_v42 = vpop.eup %2499 }
0x115b   :  { %v1673_v1 = vpack.c.bf16 %v1653_v20, %v1652_v11  ;;  %v1642_v35 = vadd.f32 1.0, %v2500_v42 }
0x115c   :  { %v2502_v19 = vpop.eup %2501 }
0x115d   :  { %2359 = vmatmul.mubr.bf16.gmra.mrb[64].mxu0 %v1673_v1  ;;  %v1643_v5 = vadd.f32 1.0, %v2502_v19  ;;  %v1648_v60 = vmul.f32 0.5, %v1642_v35 }
0x115e   :  { %2362 = vmatprep.mubr.msk.bf16.mxu0 %vm2545_vm0, %v2544_v8  ;;  %vm1872_vm0 = vcmask 1040384  }
0x115f   :  { %v1649_v62 = vmul.f32 0.5, %v1643_v5  ;;  %v1654_v45 = vmul.f32 %v1648_v60, %v1596_v41 }
0x1161   :  { %v1655_v46 = vmul.f32 %v1649_v62, %v1599_v47 }
0x1163   :  { %v1674_v40 = vpack.c.bf16 %v1655_v46, %v1654_v45  ;;  %v1882_v46 = vld [vmem:[%s3431_s3 + $0x238] sm:$0xff] }
0x1165   :  { %2363 = vmatmul.mubr.bf16.gmra.mrb[68].mxu0 %v1674_v40  ;;  %v1883_v40 = vld [vmem:[%s3431_s3 + $0x240] sm:$0xff] }
0x1228   :  { %v1717_v49 = vpop.f32.mrb[60].mxu0 }
0x1229   :  { %v1740_v12 = vadd.f32 %v1717_v49, %v3186_v58  ;;  %v2356_v51 = vpop.f32.mrb[61].mxu0  ;;  %v2378_v49 = vpack.c.bf16 %v1883_v40, %v1882_v46 }
0x122a   :  { %v1720_v18 = vpop.f32.mrb[62].mxu0  ;;  %v1885_v51 = vld [vmem:[%s3431_s3 + $0x250] sm:$0xff] }
0x122b   :  { %v1741_v9 = vadd.f32 %v1720_v18, %v3189_v2  ;;  %v2357_v44 = vpop.f32.mrb[63].mxu0  ;;  %v1751_v38 = vadd.f32 %v2068_v43, %v1740_v12  ;;  %v1884_v12 = vld [vmem:[%s3431_s3 + $0x248] sm:$0xff] }
0x122c   :  { %v2381_v18 = vpack.c.bf16 %v1885_v51, %v1884_v12 }
0x122d   :  { %v1759_v8 = vsel %vm153_vm8, %v1751_v38, 0.0  ;;  %v1752_v6 = vadd.f32 %v2068_v43, %v1741_v9 }
0x122e   :  { %1760 = vadd.xlane.f32.xlu0 %v1759_v8 }
0x122f   :  { %v1762_v53 = vsel %vm153_vm8, %v1752_v6, 0.0 }
0x1230   :  { %v1725_v16 = vpop.f32.mrb[64].mxu0 }
0x1231   :  { %v1742_v63 = vadd.f32 %v1725_v16, %v3196_v10  ;;  %v2360_v41 = vpop.f32.mrb[65].mxu0 }
0x1232   :  { %1763 = vadd.xlane.f32.xlu0 %v1762_v53  ;;  %v1728_v23 = vpop.f32.mrb[66].mxu0 }
0x1233   :  { %v1743_v58 = vadd.f32 %v1728_v23, %v3199_v17  ;;  %v2361_v61 = vpop.f32.mrb[67].mxu0  ;;  %v1753_v15 = vadd.f32 %v2068_v43, %v1742_v63 }
0x1235   :  { %v1765_v2 = vsel %vm153_vm8, %v1753_v15, 0.0  ;;  %v1754_v54 = vadd.f32 %v2068_v43, %v1743_v58 }
0x1236   :  { %1766 = vadd.xlane.f32.xlu1 %v1765_v2 }
0x1237   :  { %v1768_v57 = vsel %vm153_vm8, %v1754_v54, 0.0 }
0x1238   :  { %v1733_v47 = vpop.f32.mrb[68].mxu0 }
0x1239   :  { %v1744_v56 = vadd.f32 %v1733_v47, %v3206_v52  ;;  %v2364_v21 = vpop.f32.mrb[69].mxu0 }
0x123a   :  { %1769 = vadd.xlane.f32.xlu1 %v1768_v57  ;;  %v1736_v10 = vpop.f32.mrb[70].mxu0 }
0x123b   :  { %v1745_v50 = vadd.f32 %v1736_v10, %v3209_v55  ;;  %v2365_v59 = vpop.f32.mrb[71].mxu0  ;;  %v1755_v36 = vadd.f32 %v2068_v43, %v1744_v56 }
0x123d   :  { %v1771_v17 = vsel %vm153_vm8, %v1755_v36, 0.0  ;;  %v1756_v3 = vadd.f32 %v2068_v43, %v1745_v50  ;;  %v2549_v43 = vmov 0.0|0.0  }
0x123e   :  { %1772 = vadd.xlane.f32.xlu0 %v1771_v17  ;;  %2377 = vmatprep.subr.bf16.mxu1 %v2549_v43 }
0x123f   :  { %v1774_v30 = vsel %vm153_vm8, %v1756_v3, 0.0  ;;  %2379 = vmatpush3.bf16.msra.mxu1 %v2378_v49 }
0x1240   :  { %1775 = vadd.xlane.f32.xlu1 %v1774_v30  ;;  %2380 = vmatprep.subr.bf16.mxu1 %v2549_v43 }
0x1243   :  { %2382 = vmatpush3.bf16.msra.mxu1 %v2381_v18 }
0x12bb   :  { %v1761_v27 = vpop.xlane.xlu0 %1760 }
0x12bc   :  { %v1777_v4 = vmul.f32 0.03125, %v1761_v27 }
0x12be   :  { %v3357_v7 = vsub.f32 %v1751_v38, %v1777_v4 }
0x12bf   :  { %v1764_v52 = vpop.xlane.xlu0 %1763 }
0x12c0   :  { %v1778_v31 = vmul.f32 0.03125, %v1764_v52  ;;  %v1789_v14 = vmul.f32 %v3357_v7, %v3357_v7  ;;  %v2070_v52 = vld [vmem:[%s3431_s3 + $0x230] ss:$0 sm:$0xff] }
0x12c2   :  { %v3361_v32 = vsub.f32 %v1752_v6, %v1778_v31  ;;  %v1795_v55 = vsel %vm153_vm8, %v1789_v14, 0.0 }
0x12c3   :  { %v1767_v22 = vpop.xlane.xlu1 %1766  ;;  %1796 = vadd.xlane.f32.xlu0 %v1795_v55 }
0x12c4   :  { %v1779_v24 = vmul.f32 0.03125, %v1767_v22  ;;  %v1790_v28 = vmul.f32 %v3361_v32, %v3361_v32 }
0x12c6   :  { %v3366_v13 = vsub.f32 %v1753_v15, %v1779_v24  ;;  %v1798_v25 = vsel %vm153_vm8, %v1790_v28, 0.0 }
0x12c7   :  { %v1770_v39 = vpop.xlane.xlu1 %1769  ;;  %1799 = vadd.xlane.f32.xlu0 %v1798_v25 }
0x12c8   :  { %v1780_v29 = vmul.f32 0.03125, %v1770_v39  ;;  %v1791_v33 = vmul.f32 %v3366_v13, %v3366_v13 }
0x12ca   :  { %v3371_v34 = vsub.f32 %v1754_v54, %v1780_v29  ;;  %v1801_v48 = vsel %vm153_vm8, %v1791_v33, 0.0 }
0x12cb   :  { %v1773_v0 = vpop.xlane.xlu0 %1772  ;;  %1802 = vadd.xlane.f32.xlu1 %v1801_v48 }
0x12cc   :  { %v1781_v37 = vmul.f32 0.03125, %v1773_v0  ;;  %v1792_v11 = vmul.f32 %v3371_v34, %v3371_v34 }
0x12cd   :  { %v1776_v20 = vpop.xlane.xlu1 %1775 }
0x12ce   :  { %v3376_v42 = vsub.f32 %v1755_v36, %v1781_v37  ;;  %v1782_v1 = vmul.f32 0.03125, %v1776_v20  ;;  %v1804_v35 = vsel %vm153_vm8, %v1792_v11, 0.0  ;;  %v2069_v36 = vld [vmem:[%s3431_s3 + $0x228] ss:$0 sm:$0xff] }
0x12cf   :  { %1805 = vadd.xlane.f32.xlu1 %v1804_v35 }
0x12d0   :  { %v3379_v19 = vsub.f32 %v1756_v3, %v1782_v1  ;;  %v1793_v5 = vmul.f32 %v3376_v42, %v3376_v42 }
0x12d2   :  { %v1807_v60 = vsel %vm153_vm8, %v1793_v5, 0.0  ;;  %v1794_v62 = vmul.f32 %v3379_v19, %v3379_v19 }
0x12d3   :  { %1808 = vadd.xlane.f32.xlu0 %v1807_v60 }
0x12d4   :  { %v1810_v45 = vsel %vm153_vm8, %v1794_v62, 0.0 }
0x12d5   :  { %1811 = vadd.xlane.f32.xlu1 %v1810_v45 }
0x1350   :  { %v1797_v9 = vpop.xlane.xlu0 %1796 }
0x1351   :  { %v1813_v8 = vmul.f32 0.03125, %v1797_v9 }
0x1353   :  { %v1819_v41 = vadd.f32 1e-12, %v1813_v8 }
0x1354   :  { %v1800_v44 = vpop.xlane.xlu0 %1799 }
0x1355   :  { %v1814_v38 = vmul.f32 0.03125, %v1800_v44 }
0x1357   :  { %v1820_v6 = vadd.f32 1e-12, %v1814_v38 }
0x1358   :  { %v1803_v16 = vpop.xlane.xlu1 %1802 }
0x1359   :  { %2503 = vrsqrt.f32 %v1820_v6  ;;  %v1815_v63 = vmul.f32 0.03125, %v1803_v16 }
0x135b   :  { %v1821_v53 = vadd.f32 1e-12, %v1815_v63 }
0x135c   :  { %v1806_v23 = vpop.xlane.xlu1 %1805 }
0x135d   :  { %2505 = vrsqrt.f32 %v1821_v53  ;;  %v1816_v58 = vmul.f32 0.03125, %v1806_v23 }
0x135e   :  { %2507 = vrsqrt.f32 %v1819_v41 }
0x135f   :  { %v1822_v61 = vadd.f32 1e-12, %v1816_v58 }
0x1360   :  { %v1809_v15 = vpop.xlane.xlu0 %1808 }
0x1361   :  { %2509 = vrsqrt.f32 %v1822_v61  ;;  %v1817_v2 = vmul.f32 0.03125, %v1809_v15 }
0x1362   :  { %v1812_v54 = vpop.xlane.xlu1 %1811 }
0x1363   :  { %v2504_v47 = vpop.eup %2503  ;;  %v1823_v56 = vadd.f32 1e-12, %v1817_v2  ;;  %v1818_v21 = vmul.f32 0.03125, %v1812_v54 }
0x1364   :  { %v1832_v57 = vmul.f32 %v2504_v47, %v3361_v32 }
0x1365   :  { %2511 = vrsqrt.f32 %v1823_v56  ;;  %v1824_v10 = vadd.f32 1e-12, %v1818_v21 }
0x1366   :  { %v1842_v3 = vmul.f32 %v2069_v36, %v1832_v57 }
0x1367   :  { %v2506_v50 = vpop.eup %2505  ;;  %2513 = vrsqrt.f32 %v1824_v10 }
0x1368   :  { %v2508_v59 = vpop.eup %2507  ;;  %v1833_v17 = vmul.f32 %v2506_v50, %v3366_v13  ;;  %v1852_v14 = vadd.f32 %v2070_v52, %v1842_v3 }
0x1369   :  { %v1831_v4 = vmul.f32 %v2508_v59, %v3357_v7 }
0x136a   :  { %v1843_v30 = vmul.f32 %v2069_v36, %v1833_v17  ;;  %v1858_v39 = vrot.slane %v1852_v14, 7 }
0x136b   :  { %v2510_v27 = vpop.eup %2509  ;;  %v1841_v24 = vmul.f32 %v2069_v36, %v1831_v4 }
0x136c   :  { %v1834_v31 = vmul.f32 %v2510_v27, %v3371_v34  ;;  %v1853_v32 = vadd.f32 %v2070_v52, %v1843_v30 }
0x136d   :  { %v1851_v48 = vadd.f32 %v2070_v52, %v1841_v24 }
0x136e   :  { %v1844_v55 = vmul.f32 %v2069_v36, %v1834_v31  ;;  %v1861_v29 = vrot.slane %v1853_v32, 6 }
0x136f   :  { %v2512_v22 = vpop.eup %2511  ;;  %v1873_v11 = vsel %vm1872_vm0, %v1851_v48, %v1858_v39 }
0x1370   :  { %v1854_v28 = vadd.f32 %v2070_v52, %v1844_v55  ;;  %v1835_v25 = vmul.f32 %v2512_v22, %v3376_v42  ;;  %v1875_v35 = vsel %vm1874_vm9, %v1873_v11, %v1861_v29 }
0x1371   :  { %v2514_v13 = vpop.eup %2513 }
0x1372   :  { %v1845_v33 = vmul.f32 %v2069_v36, %v1835_v25  ;;  %v1836_v7 = vmul.f32 %v2514_v13, %v3379_v19  ;;  %v1864_v0 = vrot.slane %v1854_v28, 5  ;;  %v2071_v19 = vld [vmem:[%s3431_s3 + $0x258] ss:$0 sm:$0xff]  ;;  %s2551_s3 = smov 127  }
0x1374   :  { %v1846_v37 = vmul.f32 %v2069_v36, %v1836_v7  ;;  %v1855_v34 = vadd.f32 %v2070_v52, %v1845_v33  ;;  %v1877_v5 = vsel %vm1876_vm10, %v1875_v35, %v1864_v0 }
0x1376   :  { %v1856_v20 = vadd.f32 %v2070_v52, %v1846_v37  ;;  %v1867_v1 = vrot.slane %v1855_v34, 4 }
0x1378   :  { %v1870_v42 = vrot.slane %v1856_v20, 3  ;;  %v1879_v60 = vsel %vm1878_vm11, %v1877_v5, %v1867_v1 }
0x137a   :  { %v1881_v62 = vsel %vm1880_vm12, %v1879_v60, %v1870_v42 }
0x137b   :  { %2375 = vmatmul.mubr.msk.f32.vlgmr.msra.gmra.mrb[72].mxu1 %vm153_vm8, %v1881_v62  ;;  %vm1977_vm8 = vcmp.lt.s32.totalorder %v2814_v26, 2 }
0x144e   :  { %v1960_v45 = vpop.f32.mrb[72].mxu1 }
0x144f   :  { %v1961_v46 = vadd.f32 %v2071_v19, %v1960_v45  ;;  %v2376_v40 = vpop.f32.mrb[73].mxu1 }
0x1451   :  { %v1965_v49 = vsel %vm1964_vm13, %v1961_v46, -inf }
0x1452   :  { %1966 = vmax.xlane.f32.xlu0 %v1965_v49 }
0x14df   :  { %v1967_v43 = vpop.xlane.xlu0 %1966 }
0x14e0   :  { %v1968_v12 = vsub.f32 %v1961_v46, %v1967_v43 }
0x14e2   :  { %v1969_v51 = vmul.f32 1.442695, %v1968_v12 }
0x14e4   :  { %2515 = vpow2.f32 %v1969_v51 }
0x14ee   :  { %v2516_v18 = vpop.eup %2515 }
0x14ef   :  { %v1971_v9 = vsel %vm1964_vm13, %v2516_v18, 0.0 }
0x14f0   :  { %1972 = vadd.xlane.f32.xlu1 %v1971_v9 }
0x157d   :  { %v1973_v44 = vpop.xlane.xlu1 %1972 }
0x157e   :  { %2517 = vlog2.f32 %v1973_v44 }
0x1588   :  { %v2518_v38 = vpop.eup %2517 }
0x1589   :  { %v1975_v8 = vmul.f32 0.6931472, %v2518_v38 }
0x158b   :  { %v1976_v6 = vsub.f32 %v1968_v12, %v1975_v8 }
0x158d   :  { %1979 = vrot.lane.b32.xlu0 %v1976_v6, %s2550_s26 }
0x15ff   :  { %v1980_v16 = vpop.permute.xlu0 %1979 }
0x1600   :  { %v1982_v63 = vsel %vm1977_vm8, %v1976_v6, %v1980_v16 }
0x1601   :  { %v1983_v41 = vsub.f32 0.0, %v1982_v63 }
0x1603   :  { %v1985_v53 = vsel %vm1984_vm14, %v1983_v41, 0.0 }
0x1604   :  { %v1986_v23 = vrot.slane %v1985_v53, 4 }
0x1606   :  { %v1987_v58 = vadd.f32 %v1986_v23, %v1985_v53 }
0x1608   :  { %v1988_v61 = vrot.slane %v1987_v58, 2 }
0x160a   :  { %v1989_v15 = vadd.f32 %v1988_v61, %v1987_v58 }
0x160c   :  { %v1990_v2 = vrot.slane %v1989_v15, 1 }
0x160e   :  { %v1991_v54 = vadd.f32 %v1990_v2, %v1989_v15 }
0x1610   :  { %v1993_v47 = vmul.f32 0.16666667, %v1991_v54 }
0x1612   :  { %1995 = vrot.lane.b32.xlu1 %v1993_v47, %s2551_s3 }
0x1684   :  { %v1996_v56 = vpop.permute.xlu1 %1995 }
0x1685   :  { %1999 = vst.msk [vmem:[#allocation2] sm:$0x1] %vm1998_vm15, %v1996_v56 }
0x1686   :  { %2530 = shalt.err (!%p2527_p4)
}
0x1687   :  { %s2531_s6 = scalar_lea.hbm %s3432_s4, 16 }
0x1688   :  { %p2532_p5 = scmp.ne.s32.totalorder %s3432_s4, %s2531_s6  ;;  %p2535_p6 = scmp.lt.u32.totalorder %s2531_s6, %s3432_s4 }
0x168a   :  { %p2537_p7 = pnand %p2535_p6, %p2532_p5 }
0x168c   :  { %2540 = shalt.err (!%p2537_p7)
}
0x168d   :  { %2009 = dma.vmem_to_hbm [thread:$0]  %s2007_s28, 16, %s3432_s4, [#allocation3]  }
0x168e   :  { %2541 = dma.done.wait [#allocation3], 16  }
0x168f   :  { %2542 = vsyncadd [#allocation3], 4294967280 }
0x1690   :  { %2013 = vsyncpa [#allocation3], 1 }

// kernel: blip_ui_retrieval_forward.2
= control target key start
LH: loop header
LB: loop body
LE: loop exit
PB: predicated region body
PF: predicated region fallthrough
CT: control target
= control target key end

     0   :  { %16 = vsyncpa [#allocation3], 0  ;;  %s6437_s0 = inlined_call_operand.vmem [shape: f32[16,192], index: 0, kind: input, shape index: {}]   ;;  %s6438_s1 = inlined_call_operand.vmem [shape: s32[32,1], index: 1, kind: input, shape index: {}]   ;;  %s6439_s2 = inlined_call_operand.vmem [shape: s32[16,1], index: 2, kind: input, shape index: {}]   ;;  %s6440_s3 = inlined_call_operand.vmem [shape: f32[1,32], index: 3, kind: input, shape index: {}]   ;;  %s6441_s4 = inlined_call_operand.vmem [shape: f32[1,16], index: 4, kind: input, shape index: {}]   ;;  %s6442_s5 = inlined_call_operand.vmem [shape: f32[2,10], index: 5, kind: input, shape index: {}]   ;;  %s6443_s6 = inlined_call_operand.vmem [shape: f32[2,2], index: 6, kind: input, shape index: {}]   ;;  %s6444_s7 = inlined_call_operand.vmem [shape: f32[16,8], index: 7, kind: input, shape index: {}]   ;;  %s6445_s8 = inlined_call_operand.vmem [shape: f32[16,8], index: 8, kind: input, shape index: {}]   ;;  %s6446_s9 = inlined_call_operand.vmem [shape: f32[2], index: 9, kind: input, shape index: {}]   ;;  %s6447_s10 = inlined_call_operand.vmem [shape: f32[2000,128], index: 10, kind: input, shape index: {}]   ;;  %s6448_s11 = inlined_call_operand.vmem [shape: f32[40,128], index: 11, kind: output, shape index: {}]  }
   0x1   :  { %s41_s19 = sshll.u32 %s6446_s9, 4  ;;  %s42_s19 = int_to_ptr.vmem [resolvable:$true] %s41_s19 }
   0x2   :  { %s4907_s20 = scalar_lea.vmem %s42_s19, 16  ;;  %p4912_p1 = scmp.lt.s32.totalorder %s42_s19, %s42_s19 }
   0x3   :  { %p4908_p0 = scmp.ne.s32.totalorder %s42_s19, %s4907_s20  ;;  %p4913_p2 = scmp.lt.s32.totalorder %s4907_s20, %s4907_s20 }
   0x5   :  { %p4914_p3 = por %p4913_p2, %p4912_p1 }
   0x7   :  { %p4915_p4 = pnand %p4914_p3, %p4908_p0 }
   0x9   :  { %4918 = shalt.err (!%p4915_p4)
}
   0xa   :  { %s4921_s21 = smov [#allocation2]  }
   0xb   :  { %44 = dma.vmem_to_smem %s42_s19, 16, %s4921_s21, [#allocation3]  }
   0xc   :  { %4919 = dma.done.wait [#allocation3], 16  }
   0xd   :  { %4920 = vsyncadd [#allocation3], 4294967280 }
   0xe   :  { %50 = sfence }
   0xf   :  { %v79_v0 = vld [vmem:[%s6447_s10] sm:$0xff]  ;;  %v80_v1 = vld [vmem:[%s6447_s10 + $0x8] sm:$0xff]  ;;  %v81_v2 = vld [vmem:[%s6447_s10 + $0x10] sm:$0xff]  ;;  %v4922_v3 = vmov 0   ;;  %vm119_vm0 = vcmask 523264   ;;  %vm166_vm1 = vcmask 261120  }
  0x10   :  { %123 = vmatprep.subr.bf16.mxu0 %v4922_v3  ;;  %v105_v4 = vpack.c.bf16 %v80_v1, %v79_v0  ;;  %v82_v5 = vld [vmem:[%s6447_s10 + $0x18] sm:$0xff]  ;;  %4739 = vset.pattern.permute.xlu1 %v4922_v3  ;;  %v83_v7 = vld [vmem:[%s6447_s10 + $0x20] sm:$0xff]  ;;  %v84_v8 = vld [vmem:[%s6447_s10 + $0x28] sm:$0xff]  ;;  %vm4924_vm2 = vmmov 0   ;;  %s4925_s24 = smov 96   ;;  %vm317_vm8 = vcmask 130048  }
  0x11   :  { %4738 = vset.pattern.permute.xlu0 %v4922_v3  ;;  %v106_v6 = vpack.c.bf16 %v82_v5, %v81_v2  ;;  %v107_v9 = vpack.c.bf16 %v84_v8, %v83_v7  ;;  %v85_v10 = vld [vmem:[%s6447_s10 + $0x30] sm:$0xff]  ;;  %v86_v11 = vld [vmem:[%s6447_s10 + $0x38] sm:$0xff]  ;;  %v76_v12 = vld [vmem:[%s6437_s0 + $0x8] sm:$0xff]  ;;  %v4923_v2 = vmov 0.0   ;;  %s4927_s25 = smov 64   ;;  %vm680_vm9 = vcmask 1040384  }
  0x12   :  { %124 = vmatpush1.bf16.msra.mxu0 %v105_v4  ;;  %v78_v13 = vld [vmem:[%s6437_s0 + $0x18] sm:$0xff]  ;;  %v108_v15 = vpack.c.bf16 %v86_v11, %v85_v10  ;;  %v87_v16 = vld [vmem:[%s6447_s10 + $0x40] sm:$0xff]  ;;  %v88_v17 = vld [vmem:[%s6447_s10 + $0x48] sm:$0xff]  ;;  %4336 = vmatprep.subr.bf16.mxu1 %v4923_v2  ;;  %54 = vst [vmem:[%s6448_s11] sm:$0xff] %v4923_v2  ;;  %s52_s15 = sld [smem:[#allocation2]]  ;;  %s4078_s16 = sld [smem:[#allocation2 + $0x1]] }
  0x13   :  { %125 = vmatprep.subr.bf16.mxu0 %v4922_v3  ;;  %v5029_v14 = vpack.c.bf16 %v78_v13, %v76_v12  ;;  %v109_v18 = vpack.c.bf16 %v88_v17, %v87_v16  ;;  %v89_v19 = vld [vmem:[%s6447_s10 + $0x50] sm:$0xff]  ;;  %v90_v20 = vld [vmem:[%s6447_s10 + $0x58] sm:$0xff]  ;;  %v91_v22 = vld [vmem:[%s6447_s10 + $0x60] sm:$0xff]  ;;  %55 = vst [vmem:[%s6448_s11 + $0x8] sm:$0xff] %v4923_v2  ;;  %4340 = vmatprep.mubr.msk.bf16.mxu1 %vm4924_vm2, %v4923_v2 }
  0x14   :  { %v110_v21 = vpack.c.bf16 %v90_v20, %v89_v19  ;;  %v92_v23 = vld [vmem:[%s6447_s10 + $0x68] sm:$0xff]  ;;  %v93_v25 = vld [vmem:[%s6447_s10 + $0x70] sm:$0xff]  ;;  %v94_v26 = vld [vmem:[%s6447_s10 + $0x78] sm:$0xff]  ;;  %56 = vst [vmem:[%s6448_s11 + $0x10] sm:$0xff] %v4923_v2 }
  0x15   :  { %4079 = vmatprep.mubr.msk.bf16.mxu0 %vm119_vm0, %v5029_v14  ;;  %v111_v24 = vpack.c.bf16 %v92_v23, %v91_v22  ;;  %v112_v27 = vpack.c.bf16 %v94_v26, %v93_v25  ;;  %v95_v28 = vld [vmem:[%s6447_s10 + $0x80] sm:$0xff]  ;;  %v96_v29 = vld [vmem:[%s6447_s10 + $0x88] sm:$0xff]  ;;  %v97_v31 = vld [vmem:[%s6447_s10 + $0x90] sm:$0xff]  ;;  %57 = vst [vmem:[%s6448_s11 + $0x18] sm:$0xff] %v4923_v2 }
  0x16   :  { %126 = vmatpush1.bf16.msra.mxu0 %v106_v6  ;;  %v113_v30 = vpack.c.bf16 %v96_v29, %v95_v28  ;;  %v98_v32 = vld [vmem:[%s6447_s10 + $0x98] sm:$0xff]  ;;  %v99_v34 = vld [vmem:[%s6447_s10 + $0xa0] sm:$0xff]  ;;  %v100_v35 = vld [vmem:[%s6447_s10 + $0xa8] sm:$0xff]  ;;  %58 = vst [vmem:[%s6448_s11 + $0x20] sm:$0xff] %v4923_v2 }
  0x17   :  { %127 = vmatprep.subr.bf16.mxu0 %v4922_v3  ;;  %v114_v33 = vpack.c.bf16 %v98_v32, %v97_v31  ;;  %v115_v36 = vpack.c.bf16 %v100_v35, %v99_v34  ;;  %v101_v37 = vld [vmem:[%s6447_s10 + $0xb0] sm:$0xff]  ;;  %v102_v38 = vld [vmem:[%s6447_s10 + $0xb8] sm:$0xff]  ;;  %v75_v40 = vld [vmem:[%s6437_s0] sm:$0xff]  ;;  %v59_v35 = vlaneseq }
  0x18   :  { %v116_v39 = vpack.c.bf16 %v102_v38, %v101_v37  ;;  %v77_v41 = vld [vmem:[%s6437_s0 + $0x10] sm:$0xff]  ;;  %v117_v43 = vld [vmem:[%s6447_s10 + $0xc0] sm:$0xff]  ;;  %v118_v45 = vld [vmem:[%s6447_s10 + $0xc8] sm:$0xff]  ;;  %s3382_s17 = ssub.f32 1.0, %s4078_s16 }
  0x19   :  { %v5096_v42 = vpack.c.bf16 %v77_v41, %v75_v40  ;;  %v206_v63 = vld [vmem:[%s6447_s10 + $0xe0] sm:$0xff]  ;;  %v207_v0 = vld [vmem:[%s6447_s10 + $0xe8] sm:$0xff]  ;;  %v208_v1 = vld [vmem:[%s6447_s10 + $0xf0] sm:$0xff]  ;;  %v5176_v37 = vand.u32 127, %v59_v35 }
  0x1a   :  { %128 = vmatpush1.bf16.msra.mxu0 %v107_v9  ;;  %v211_v4 = vpack.c.bf16 %v207_v0, %v206_v63  ;;  %v209_v5 = vld [vmem:[%s6447_s10 + $0xf8] sm:$0xff]  ;;  %v4080_v16 = vld [vmem:[%s6447_s10 + $0xd0] ss:$0 sm:$0xff]  ;;  %v4082_v25 = vld [vmem:[%s6447_s10 + $0x100] ss:$0 sm:$0xff] }
  0x1b   :  { %129 = vmatprep.subr.bf16.mxu0 %v4922_v3  ;;  %v212_v6 = vpack.c.bf16 %v209_v5, %v208_v1  ;;  %v4081_v20 = vld [vmem:[%s6447_s10 + $0xd8] ss:$0 sm:$0xff]  ;;  %v5181_v40 = vshra.s32 %v5176_v37, 3  ;;  %v69_v41 = vand.u32 7, %v5176_v37 }
  0x1c   :  { %4337 = vmatpush3.bf16.msra.mxu1 %v211_v4 }
  0x1d   :  { %4338 = vmatprep.subr.bf16.mxu1 %v4923_v2  ;;  %vm70_vm4 = vcmp.lt.s32.totalorder %v69_v41, 5 }
  0x1e   :  { %130 = vmatpush1.bf16.msra.mxu0 %v108_v15 }
  0x1f   :  { %131 = vmatprep.subr.bf16.mxu0 %v4922_v3 }
  0x20   :  { %4339 = vmatpush3.bf16.msra.mxu1 %v212_v6 }
  0x21   :  { %4344 = vmatprep.subr.bf16.mxu1 %v4923_v2 }
  0x22   :  { %132 = vmatpush1.bf16.msra.mxu0 %v109_v18 }
  0x23   :  { %133 = vmatprep.subr.bf16.mxu0 %v4922_v3 }
  0x26   :  { %134 = vmatpush1.bf16.msra.mxu0 %v110_v21 }
  0x27   :  { %135 = vmatprep.subr.bf16.mxu0 %v4922_v3 }
  0x2a   :  { %136 = vmatpush1.bf16.msra.mxu0 %v111_v24 }
  0x2b   :  { %137 = vmatprep.subr.bf16.mxu0 %v4922_v3 }
  0x2e   :  { %138 = vmatpush1.bf16.msra.mxu0 %v112_v27 }
  0x2f   :  { %139 = vmatprep.subr.bf16.mxu0 %v4922_v3 }
  0x32   :  { %140 = vmatpush1.bf16.msra.mxu0 %v113_v30 }
  0x33   :  { %141 = vmatprep.subr.bf16.mxu0 %v4922_v3 }
  0x36   :  { %142 = vmatpush1.bf16.msra.mxu0 %v114_v33 }
  0x37   :  { %143 = vmatprep.subr.bf16.mxu0 %v4922_v3 }
  0x3a   :  { %144 = vmatpush1.bf16.msra.mxu0 %v115_v36  ;;  %v5174_v36 = vshrl.u32 %v59_v35, 7 }
  0x3b   :  { %145 = vmatprep.subr.bf16.mxu0 %v4922_v3 }
  0x3c   :  { %v61_v38 = vadd.s32 8, %v5174_v36 }
  0x3e   :  { %146 = vmatpush1.bf16.msra.mxu0 %v116_v39  ;;  %v64_v39 = vshra.s32 %v5174_v36, 3 }
  0x40   :  { %vm5185_vm3 = vcmp.eq.s32.totalorder %v64_v39, %v5181_v40 }
  0x41   :  { %156 = vmatmul.mubr.bf16.vlgmr.msra.gmra.mrb[0].mxu0 %v5096_v42  ;;  %vm71_vm6 = vmand %vm5185_vm3, %vm70_vm4 }
  0x42   :  { %4400 = vmatprep.mubr.msk.f32.mxu0 %vm4924_vm2, %v4923_v2 }
 0x114   :  { %v157_v44 = vpop.f32.mrb[0].mxu0 }
 0x115   :  { %v5105_v46 = vadd.f32 %v157_v44, %v117_v43  ;;  %v159_v47 = vpop.f32.mrb[1].mxu0  ;;  %v65_v43 = vshra.s32 %v61_v38, 3 }
 0x116   :  { %v160_v48 = vpop.f32.mrb[2].mxu0 }
 0x117   :  { %v5107_v49 = vadd.f32 %v160_v48, %v118_v45  ;;  %v162_v50 = vpop.f32.mrb[3].mxu0  ;;  %v167_v51 = vsel %vm166_vm1, %v5105_v46, 0.0  ;;  %vm5190_vm5 = vcmp.eq.s32.totalorder %v65_v43, %v5181_v40  ;;  %v4926_v48 = vmov -1e+09  }
 0x118   :  { %168 = vadd.xlane.f32.xlu0 %v167_v51  ;;  %vm72_vm7 = vmand %vm5190_vm5, %vm70_vm4  ;;  %v5199_v50 = vsel %vm71_vm6, 0.0, %v4926_v48  ;;  %vm2390_vm4 = vcmask 1042432  }
 0x119   :  { %v170_v52 = vsel %vm166_vm1, %v5107_v49, 0.0 }
 0x11c   :  { %171 = vadd.xlane.f32.xlu0 %v170_v52 }
 0x1a5   :  { %v169_v53 = vpop.xlane.xlu0 %168 }
 0x1a6   :  { %v174_v54 = vmul.f32 0.03125, %v169_v53 }
 0x1a8   :  { %v176_v55 = vsub.f32 %v5105_v46, %v174_v54  ;;  %v5202_v54 = vsel %vm72_vm7, 0.0, %v4926_v48  ;;  %vm2475_vm7 = vcmask 125952  }
 0x1a9   :  { %v172_v56 = vpop.xlane.xlu0 %171 }
 0x1aa   :  { %v175_v57 = vmul.f32 0.03125, %v172_v56  ;;  %v178_v58 = vmul.f32 %v176_v55, %v176_v55 }
 0x1ac   :  { %v177_v59 = vsub.f32 %v5107_v49, %v175_v57  ;;  %v180_v60 = vsel %vm166_vm1, %v178_v58, 0.0 }
 0x1ad   :  { %181 = vadd.xlane.f32.xlu1 %v180_v60 }
 0x1ae   :  { %v179_v61 = vmul.f32 %v177_v59, %v177_v59 }
 0x1b0   :  { %v183_v62 = vsel %vm166_vm1, %v179_v61, 0.0 }
 0x1b1   :  { %184 = vadd.xlane.f32.xlu1 %v183_v62 }
 0x23a   :  { %v182_v7 = vpop.xlane.xlu1 %181 }
 0x23b   :  { %v186_v8 = vmul.f32 0.03125, %v182_v7 }
 0x23d   :  { %v188_v9 = vadd.f32 1e-12, %v186_v8 }
 0x23e   :  { %v185_v10 = vpop.xlane.xlu1 %184 }
 0x23f   :  { %4740 = vrsqrt.f32 %v188_v9  ;;  %v187_v11 = vmul.f32 0.03125, %v185_v10 }
 0x241   :  { %v189_v12 = vadd.f32 1e-12, %v187_v11 }
 0x243   :  { %4742 = vrsqrt.f32 %v189_v12 }
 0x249   :  { %v4741_v13 = vpop.eup %4740 }
 0x24a   :  { %v192_v15 = vmul.f32 %v4741_v13, %v176_v55  ;;  %v388_v13 = vld [vmem:[%s6447_s10 + $0x108] sm:$0xff] }
 0x24c   :  { %v198_v19 = vmul.f32 %v4080_v16, %v192_v15  ;;  %v389_v15 = vld [vmem:[%s6447_s10 + $0x110] sm:$0xff] }
 0x24d   :  { %v4743_v17 = vpop.eup %4742 }
 0x24e   :  { %v193_v18 = vmul.f32 %v4743_v17, %v177_v59  ;;  %v204_v22 = vadd.f32 %v4081_v20, %v198_v19  ;;  %v393_v19 = vpack.c.bf16 %v389_v15, %v388_v13 }
 0x250   :  { %v199_v21 = vmul.f32 %v4080_v16, %v193_v18 }
 0x252   :  { %v205_v23 = vadd.f32 %v4081_v20, %v199_v21  ;;  %v390_v21 = vld [vmem:[%s6447_s10 + $0x118] sm:$0xff] }
 0x254   :  { %v210_v24 = vpack.c.bf16 %v205_v23, %v204_v22  ;;  %v391_v22 = vld [vmem:[%s6447_s10 + $0x120] sm:$0xff] }
 0x255   :  { %v394_v23 = vpack.c.bf16 %v391_v22, %v390_v21  ;;  %v562_v21 = vld [vmem:[%s6447_s10 + $0x168] sm:$0xff]  ;;  %v563_v22 = vld [vmem:[%s6447_s10 + $0x170] sm:$0xff] }
 0x256   :  { %4341 = vmatmul.mubr.msk.bf16.vlgmr.msra.gmra.mrb[0].mxu1 %vm166_vm1, %v210_v24 }
 0x257   :  { %4346 = vmatprep.mubr.msk.bf16.mxu1 %vm4924_vm2, %v4923_v2 }
 0x329   :  { %v255_v26 = vpop.f32.mrb[0].mxu1 }
 0x32a   :  { %v4342_v27 = vpop.f32.mrb[1].mxu1  ;;  %v256_v29 = vadd.f32 %v4082_v25, %v255_v26 }
 0x32b   :  { %v258_v28 = vpop.f32.mrb[2].mxu1 }
 0x32c   :  { %v259_v30 = vadd.f32 %v4082_v25, %v258_v28  ;;  %v4343_v31 = vpop.f32.mrb[3].mxu1 }
 0x32e   :  { %v262_v32 = vpack.c.bf16 %v259_v30, %v256_v29  ;;  %v4087_v30 = vld [vmem:[%s6447_s10 + $0x128] ss:$0 sm:$0xff] }
 0x330   :  { %264 = vrot.lane.b32.xlu0 %v262_v32, %s4925_s24 }
 0x3a2   :  { %v265_v33 = vpop.permute.xlu0 %264 }
 0x3a3   :  { %v270_v34 = vsel %vm166_vm1, %v265_v33, 0 }
 0x3a4   :  { %4345 = vmatpush3.bf16.xpose.msra.mxu1 %v270_v34 }
 0x3a5   :  { %4350 = vmatprep.subr.bf16.mxu1 %v4923_v2 }
 0x3ab   :  { %4347 = vmatmul.mubr.msk.bf16.vlgmr.msra.gmra.mrb[4].mxu1 %vm166_vm1, %v262_v32 }
 0x3ac   :  { %4352 = vmatprep.mubr.msk.bf16.mxu1 %vm4924_vm2, %v4923_v2 }
 0x47e   :  { %v306_v47 = vpop.f32.mrb[4].mxu1 }
 0x47f   :  { %v313_v51 = vmul.f32 0.17677669, %v306_v47  ;;  %v4348_v52 = vpop.f32.mrb[5].mxu1 }
 0x480   :  { %v309_v53 = vpop.f32.mrb[6].mxu1 }
 0x481   :  { %v314_v55 = vmul.f32 0.17677669, %v309_v53  ;;  %v4349_v56 = vpop.f32.mrb[7].mxu1  ;;  %v315_v57 = vadd.f32 %v313_v51, %v5199_v50 }
 0x483   :  { %v318_v58 = vsel %vm317_vm8, %v315_v57, -inf  ;;  %v316_v59 = vadd.f32 %v314_v55, %v5202_v54 }
 0x484   :  { %319 = vmax.xlane.f32.xlu1 %v318_v58 }
 0x485   :  { %v321_v60 = vsel %vm317_vm8, %v316_v59, -inf }
 0x488   :  { %322 = vmax.xlane.f32.xlu1 %v321_v60  ;;  %v489_v60 = vld [vmem:[%s6447_s10 + $0x148] sm:$0xff] }
 0x511   :  { %v320_v61 = vpop.xlane.xlu1 %319 }
 0x512   :  { %v324_v62 = vsub.f32 %v315_v57, %v320_v61 }
 0x514   :  { %v326_v63 = vmul.f32 1.442695, %v324_v62  ;;  %v490_v62 = vld [vmem:[%s6447_s10 + $0x150] sm:$0xff] }
 0x515   :  { %v323_v0 = vpop.xlane.xlu1 %322 }
 0x516   :  { %4744 = vpow2.f32 %v326_v63  ;;  %v325_v1 = vsub.f32 %v316_v59, %v323_v0  ;;  %v488_v59 = vld [vmem:[%s6447_s10 + $0x140] sm:$0xff]  ;;  %v491_v63 = vld [vmem:[%s6447_s10 + $0x158] sm:$0xff] }
 0x517   :  { %v493_v61 = vpack.c.bf16 %v489_v60, %v488_v59  ;;  %v494_v0 = vpack.c.bf16 %v491_v63, %v490_v62 }
 0x518   :  { %v328_v4 = vmul.f32 1.442695, %v325_v1 }
 0x51a   :  { %4746 = vpow2.f32 %v328_v4 }
 0x520   :  { %v4745_v5 = vpop.eup %4744 }
 0x521   :  { %v330_v6 = vsel %vm317_vm8, %v4745_v5, 0.0 }
 0x522   :  { %331 = vadd.xlane.f32.xlu1 %v330_v6 }
 0x524   :  { %v4747_v7 = vpop.eup %4746 }
 0x525   :  { %v333_v8 = vsel %vm317_vm8, %v4747_v7, 0.0 }
 0x526   :  { %334 = vadd.xlane.f32.xlu1 %v333_v8 }
 0x537   :  { %341 = vrot.lane.b32.xlu1 %v262_v32, %s4927_s25 }
 0x5af   :  { %v332_v9 = vpop.xlane.xlu1 %331 }
 0x5b0   :  { %4748 = vrcp.f32 %v332_v9 }
 0x5b3   :  { %v335_v10 = vpop.xlane.xlu1 %334 }
 0x5b4   :  { %4750 = vrcp.f32 %v335_v10 }
 0x5b7   :  { %v342_v11 = vpop.permute.xlu1 %341 }
 0x5b8   :  { %4351 = vmatpush3.bf16.msra.mxu1 %v342_v11  ;;  %v4088_v11 = vld [vmem:[%s6447_s10 + $0x130] ss:$0 sm:$0xff] }
 0x5b9   :  { %4356 = vmatprep.subr.bf16.mxu1 %v4923_v2 }
 0x5ba   :  { %v4749_v12 = vpop.eup %4748 }
 0x5bb   :  { %v338_v17 = vmul.f32 %v4749_v12, %v4745_v5 }
 0x5be   :  { %v4751_v16 = vpop.eup %4750 }
 0x5bf   :  { %v339_v18 = vmul.f32 %v4751_v16, %v4747_v7  ;;  %v4089_v16 = vld [vmem:[%s6447_s10 + $0x138] ss:$0 sm:$0xff] }
 0x5c1   :  { %v340_v20 = vpack.c.bf16 %v339_v18, %v338_v17 }
 0x5c3   :  { %4353 = vmatmul.mubr.msk.bf16.vlgmr.msra.gmra.mrb[8].mxu1 %vm317_vm8, %v340_v20 }
 0x5c4   :  { %4357 = vmatpush3.bf16.msra.mxu1 %v393_v19  ;;  %4360 = vmatprep.mubr.msk.bf16.mxu1 %vm4924_vm2, %v4923_v2 }
 0x5c5   :  { %4358 = vmatprep.subr.bf16.mxu1 %v4923_v2 }
 0x5c8   :  { %4359 = vmatpush3.bf16.msra.mxu1 %v394_v23  ;;  %v579_v23 = vpack.c.bf16 %v563_v22, %v562_v21 }
 0x5c9   :  { %4364 = vmatprep.subr.bf16.mxu1 %v4923_v2 }
 0x696   :  { %v381_v24 = vpop.f32.mrb[8].mxu1 }
 0x697   :  { %v4354_v25 = vpop.f32.mrb[9].mxu1 }
 0x698   :  { %v384_v26 = vpop.f32.mrb[10].mxu1  ;;  %v565_v25 = vld [vmem:[%s6447_s10 + $0x180] sm:$0xff] }
 0x699   :  { %v392_v27 = vpack.c.bf16 %v384_v26, %v381_v24  ;;  %v4355_v28 = vpop.f32.mrb[11].mxu1  ;;  %v564_v24 = vld [vmem:[%s6447_s10 + $0x178] sm:$0xff] }
 0x69a   :  { %v580_v26 = vpack.c.bf16 %v565_v25, %v564_v24  ;;  %v567_v28 = vld [vmem:[%s6447_s10 + $0x190] sm:$0xff] }
 0x69b   :  { %4361 = vmatmul.mubr.msk.bf16.vlgmr.msra.gmra.mrb[12].mxu1 %vm166_vm1, %v392_v27  ;;  %v566_v27 = vld [vmem:[%s6447_s10 + $0x188] sm:$0xff] }
 0x69c   :  { %4368 = vmatprep.mubr.msk.bf16.mxu1 %vm4924_vm2, %v4923_v2  ;;  %4365 = vmatpush3.bf16.msra.mxu1 %v493_v61 }
 0x69d   :  { %4366 = vmatprep.subr.bf16.mxu1 %v4923_v2 }
 0x6a0   :  { %4367 = vmatpush3.bf16.msra.mxu1 %v494_v0 }
 0x6a1   :  { %4372 = vmatprep.subr.bf16.mxu1 %v4923_v2 }
 0x76e   :  { %v432_v29 = vpop.f32.mrb[12].mxu1 }
 0x76f   :  { %v439_v31 = vadd.f32 %v432_v29, %v5105_v46  ;;  %v4362_v32 = vpop.f32.mrb[13].mxu1  ;;  %v581_v29 = vpack.c.bf16 %v567_v28, %v566_v27  ;;  %v4092_v27 = vld [vmem:[%s6447_s10 + $0x1e8] ss:$0 sm:$0xff] }
 0x770   :  { %v435_v33 = vpop.f32.mrb[14].mxu1 }
 0x771   :  { %v5236_v34 = vadd.f32 %v4087_v30, %v439_v31  ;;  %v440_v35 = vadd.f32 %v435_v33, %v5107_v49  ;;  %v4363_v38 = vpop.f32.mrb[15].mxu1  ;;  %v569_v31 = vld [vmem:[%s6447_s10 + $0x1a0] sm:$0xff]  ;;  %v570_v33 = vld [vmem:[%s6447_s10 + $0x1a8] sm:$0xff] }
 0x773   :  { %v5239_v39 = vadd.f32 %v4087_v30, %v440_v35  ;;  %v450_v41 = vsel %vm166_vm1, %v5236_v34, 0.0  ;;  %v568_v30 = vld [vmem:[%s6447_s10 + $0x198] sm:$0xff]  ;;  %v571_v35 = vld [vmem:[%s6447_s10 + $0x1b0] sm:$0xff] }
 0x774   :  { %451 = vadd.xlane.f32.xlu0 %v450_v41  ;;  %v582_v32 = vpack.c.bf16 %v569_v31, %v568_v30  ;;  %v583_v38 = vpack.c.bf16 %v571_v35, %v570_v33  ;;  %v572_v41 = vld [vmem:[%s6447_s10 + $0x1b8] sm:$0xff] }
 0x775   :  { %v453_v43 = vsel %vm166_vm1, %v5239_v39, 0.0 }
 0x776   :  { %454 = vadd.xlane.f32.xlu1 %v453_v43  ;;  %v573_v43 = vld [vmem:[%s6447_s10 + $0x1c0] sm:$0xff] }
 0x801   :  { %v452_v47 = vpop.xlane.xlu0 %451 }
 0x802   :  { %v456_v51 = vmul.f32 0.03125, %v452_v47  ;;  %v584_v47 = vpack.c.bf16 %v573_v43, %v572_v41 }
 0x803   :  { %v455_v46 = vpop.xlane.xlu1 %454 }
 0x804   :  { %v458_v52 = vsub.f32 %v5236_v34, %v456_v51  ;;  %v457_v53 = vmul.f32 0.03125, %v455_v46  ;;  %v574_v51 = vld [vmem:[%s6447_s10 + $0x1c8] sm:$0xff]  ;;  %v575_v46 = vld [vmem:[%s6447_s10 + $0x1d0] sm:$0xff] }
 0x806   :  { %v459_v55 = vsub.f32 %v5239_v39, %v457_v53  ;;  %v460_v49 = vmul.f32 %v458_v52, %v458_v52  ;;  %v576_v53 = vld [vmem:[%s6447_s10 + $0x1d8] sm:$0xff] }
 0x808   :  { %v462_v56 = vsel %vm166_vm1, %v460_v49, 0.0  ;;  %v461_v57 = vmul.f32 %v459_v55, %v459_v55 }
 0x809   :  { %463 = vadd.xlane.f32.xlu0 %v462_v56  ;;  %v4090_v56 = vld [vmem:[%s6447_s10 + $0x160] ss:$0 sm:$0xff] }
 0x80a   :  { %v465_v58 = vsel %vm166_vm1, %v461_v57, 0.0 }
 0x80d   :  { %466 = vadd.xlane.f32.xlu0 %v465_v58 }
 0x896   :  { %v464_v1 = vpop.xlane.xlu0 %463 }
 0x897   :  { %v468_v4 = vmul.f32 0.03125, %v464_v1 }
 0x899   :  { %v470_v5 = vadd.f32 1e-12, %v468_v4 }
 0x89a   :  { %v467_v6 = vpop.xlane.xlu0 %466 }
 0x89b   :  { %4752 = vrsqrt.f32 %v470_v5  ;;  %v469_v7 = vmul.f32 0.03125, %v467_v6 }
 0x89d   :  { %v471_v8 = vadd.f32 1e-12, %v469_v7 }
 0x89f   :  { %4754 = vrsqrt.f32 %v471_v8 }
 0x8a5   :  { %v4753_v9 = vpop.eup %4752 }
 0x8a6   :  { %v474_v10 = vmul.f32 %v4753_v9, %v458_v52  ;;  %v585_v52 = vpack.c.bf16 %v575_v46, %v574_v51  ;;  %v682_v46 = vld [vmem:[%s6447_s10 + $0x200] sm:$0xff] }
 0x8a8   :  { %v480_v13 = vmul.f32 %v4088_v11, %v474_v10 }
 0x8a9   :  { %v4755_v12 = vpop.eup %4754 }
 0x8aa   :  { %v475_v15 = vmul.f32 %v4755_v12, %v459_v55  ;;  %v486_v18 = vadd.f32 %v4089_v16, %v480_v13  ;;  %v577_v55 = vld [vmem:[%s6447_s10 + $0x1e0] sm:$0xff] }
 0x8ab   :  { %v586_v49 = vpack.c.bf16 %v577_v55, %v576_v53  ;;  %v4928_v55 = vmov 0.0|0.0  }
 0x8ac   :  { %v481_v17 = vmul.f32 %v4088_v11, %v475_v15  ;;  %4690 = vmatprep.subr.bf16.mxu0 %v4928_v55 }
 0x8ae   :  { %v487_v19 = vadd.f32 %v4089_v16, %v481_v17 }
 0x8b0   :  { %v492_v20 = vpack.c.bf16 %v487_v19, %v486_v18 }
 0x8b2   :  { %4369 = vmatmul.mubr.msk.bf16.vlgmr.msra.gmra.mrb[16].mxu1 %vm166_vm1, %v492_v20 }
 0x8b3   :  { %4388 = vmatprep.mubr.msk.bf16.mxu1 %vm4924_vm2, %v4923_v2  ;;  %4373 = vmatpush3.bf16.msra.mxu1 %v579_v23 }
 0x8b4   :  { %4374 = vmatprep.subr.bf16.mxu1 %v4923_v2 }
 0x8b7   :  { %4375 = vmatpush3.bf16.msra.mxu1 %v580_v26 }
 0x8b8   :  { %4376 = vmatprep.subr.bf16.mxu1 %v4923_v2 }
 0x8bb   :  { %4377 = vmatpush3.bf16.msra.mxu1 %v581_v29 }
 0x8bc   :  { %4378 = vmatprep.subr.bf16.mxu1 %v4923_v2 }
 0x8bf   :  { %4379 = vmatpush3.bf16.msra.mxu1 %v582_v32 }
 0x8c0   :  { %4380 = vmatprep.subr.bf16.mxu1 %v4923_v2 }
 0x8c3   :  { %4381 = vmatpush3.bf16.msra.mxu1 %v583_v38 }
 0x8c4   :  { %4382 = vmatprep.subr.bf16.mxu1 %v4923_v2 }
 0x8c7   :  { %4383 = vmatpush3.bf16.msra.mxu1 %v584_v47 }
 0x8c8   :  { %4384 = vmatprep.subr.bf16.mxu1 %v4923_v2 }
 0x8cb   :  { %4385 = vmatpush3.bf16.msra.mxu1 %v585_v52  ;;  %v683_v52 = vld [vmem:[%s6447_s10 + $0x208] sm:$0xff] }
 0x8cc   :  { %4386 = vmatprep.subr.bf16.mxu1 %v4923_v2  ;;  %v4691_v53 = vpack.c.bf16 %v683_v52, %v682_v46  ;;  %v791_v46 = vld [vmem:[%s6447_s10 + $0x2c0] sm:$0xff] }
 0x8ce   :  { %4692 = vmatpush3.bf16.msra.mxu0 %v4691_v53  ;;  %v792_v53 = vld [vmem:[%s6447_s10 + $0x2c8] sm:$0xff] }
 0x8cf   :  { %4387 = vmatpush3.bf16.msra.mxu1 %v586_v49  ;;  %4693 = vmatprep.subr.bf16.mxu0 %v4928_v55  ;;  %v684_v49 = vld [vmem:[%s6447_s10 + $0x210] sm:$0xff] }
 0x8d0   :  { %4403 = vmatprep.subr.bf16.mxu1 %v4923_v2 }
 0x985   :  { %v537_v57 = vpop.f32.mrb[16].mxu1 }
 0x986   :  { %v538_v58 = vadd.f32 %v4090_v56, %v537_v57  ;;  %v4370_v59 = vpop.f32.mrb[17].mxu1 }
 0x987   :  { %v540_v60 = vpop.f32.mrb[18].mxu1 }
 0x988   :  { %v544_v61 = vmul.f32 %v538_v58, %v538_v58  ;;  %v541_v62 = vadd.f32 %v4090_v56, %v540_v60  ;;  %v4371_v63 = vpop.f32.mrb[19].mxu1  ;;  %v685_v56 = vld [vmem:[%s6447_s10 + $0x218] sm:$0xff] }
 0x989   :  { %v4694_v57 = vpack.c.bf16 %v685_v56, %v684_v49  ;;  %v793_v49 = vld [vmem:[%s6447_s10 + $0x2d0] sm:$0xff] }
 0x98a   :  { %v546_v0 = vmul.f32 %v544_v61, %v538_v58  ;;  %v545_v1 = vmul.f32 %v541_v62, %v541_v62  ;;  %v806_v56 = vpack.c.bf16 %v793_v49, %v792_v53 }
 0x98b   :  { %4695 = vmatpush3.bf16.msra.mxu0 %v4694_v57  ;;  %v794_v57 = vld [vmem:[%s6447_s10 + $0x2d8] sm:$0xff] }
 0x98c   :  { %v548_v4 = vmul.f32 0.044715, %v546_v0  ;;  %v547_v5 = vmul.f32 %v545_v1, %v541_v62  ;;  %810 = vmatprep.subr.bf16.mxu0 %v4922_v3  ;;  %v4093_v1 = vld [vmem:[%s6447_s10 + $0x1f0] ss:$0 sm:$0xff] }
 0x98e   :  { %v550_v6 = vadd.f32 %v548_v4, %v538_v58  ;;  %v549_v7 = vmul.f32 0.044715, %v547_v5  ;;  %v4094_v5 = vld [vmem:[%s6447_s10 + $0x1f8] ss:$0 sm:$0xff] }
 0x990   :  { %v552_v8 = vmul.f32 0.7978846, %v550_v6  ;;  %v551_v9 = vadd.f32 %v549_v7, %v541_v62 }
 0x992   :  { %4756 = vtanh.f32 %v552_v8  ;;  %v553_v10 = vmul.f32 0.7978846, %v551_v9 }
 0x994   :  { %4758 = vtanh.f32 %v553_v10  ;;  %v772_v10 = vld [vmem:[%s6447_s10 + $0x228] sm:$0xff] }
 0x99c   :  { %v4757_v11 = vpop.eup %4756 }
 0x99d   :  { %v556_v12 = vadd.f32 1.0, %v4757_v11  ;;  %v773_v11 = vld [vmem:[%s6447_s10 + $0x230] sm:$0xff] }
 0x99e   :  { %v4759_v13 = vpop.eup %4758 }
 0x99f   :  { %v558_v15 = vmul.f32 0.5, %v556_v12  ;;  %v557_v16 = vadd.f32 1.0, %v4759_v13 }
 0x9a1   :  { %v559_v17 = vmul.f32 0.5, %v557_v16  ;;  %v560_v18 = vmul.f32 %v558_v15, %v538_v58  ;;  %v796_v16 = vpack.c.bf16 %v773_v11, %v772_v10 }
 0x9a3   :  { %v561_v19 = vmul.f32 %v559_v17, %v541_v62  ;;  %v774_v17 = vld [vmem:[%s6447_s10 + $0x238] sm:$0xff] }
 0x9a5   :  { %v578_v20 = vpack.c.bf16 %v561_v19, %v560_v18  ;;  %v775_v18 = vld [vmem:[%s6447_s10 + $0x240] sm:$0xff] }
 0x9a7   :  { %4389 = vmatmul.mubr.bf16.vlgmr.msra.gmra.mrb[20].mxu1 %v578_v20  ;;  %v797_v20 = vpack.c.bf16 %v775_v18, %v774_v17 }
 0x9a8   :  { %4407 = vmatprep.mubr.msk.bf16.mxu1 %vm4924_vm2, %v4923_v2 }
 0xa7a   :  { %v621_v21 = vpop.f32.mrb[20].mxu1 }
 0xa7b   :  { %v4390_v22 = vpop.f32.mrb[21].mxu1  ;;  %v628_v24 = vadd.f32 %v621_v21, %v5236_v34  ;;  %v776_v21 = vld [vmem:[%s6447_s10 + $0x248] sm:$0xff] }
 0xa7c   :  { %v624_v23 = vpop.f32.mrb[22].mxu1  ;;  %v777_v22 = vld [vmem:[%s6447_s10 + $0x250] sm:$0xff] }
 0xa7d   :  { %v629_v25 = vadd.f32 %v624_v23, %v5239_v39  ;;  %v4391_v26 = vpop.f32.mrb[23].mxu1  ;;  %v635_v30 = vadd.f32 %v4092_v27, %v628_v24  ;;  %v798_v23 = vpack.c.bf16 %v777_v22, %v776_v21  ;;  %v778_v24 = vld [vmem:[%s6447_s10 + $0x258] sm:$0xff] }
 0xa7e   :  { %v780_v26 = vld [vmem:[%s6447_s10 + $0x268] sm:$0xff]  ;;  %v893_v22 = vld [vmem:[%s6447_s10 + $0x318] sm:$0xff] }
 0xa7f   :  { %v636_v28 = vadd.f32 %v4092_v27, %v629_v25  ;;  %v639_v31 = vsel %vm166_vm1, %v635_v30, 0.0  ;;  %v781_v27 = vld [vmem:[%s6447_s10 + $0x270] sm:$0xff] }
 0xa81   :  { %v642_v29 = vsel %vm166_vm1, %v636_v28, 0.0 }
 0xa82   :  { %643 = vadd.xlane.f32.xlu0 %v642_v29  ;;  %v782_v29 = vld [vmem:[%s6447_s10 + $0x278] sm:$0xff] }
 0xa86   :  { %640 = vadd.xlane.f32.xlu0 %v639_v31 }
 0xb0f   :  { %v644_v32 = vpop.xlane.xlu0 %643 }
 0xb10   :  { %v646_v33 = vmul.f32 0.03125, %v644_v32  ;;  %v784_v32 = vld [vmem:[%s6447_s10 + $0x288] sm:$0xff] }
 0xb12   :  { %v648_v35 = vsub.f32 %v636_v28, %v646_v33  ;;  %v800_v28 = vpack.c.bf16 %v781_v27, %v780_v26  ;;  %v785_v33 = vld [vmem:[%s6447_s10 + $0x290] sm:$0xff] }
 0xb13   :  { %v641_v38 = vpop.xlane.xlu0 %640 }
 0xb14   :  { %v645_v34 = vmul.f32 0.03125, %v641_v38  ;;  %v650_v41 = vmul.f32 %v648_v35, %v648_v35  ;;  %v786_v38 = vld [vmem:[%s6447_s10 + $0x298] sm:$0xff] }
 0xb16   :  { %v647_v39 = vsub.f32 %v635_v30, %v645_v34  ;;  %v654_v43 = vsel %vm166_vm1, %v650_v41, 0.0  ;;  %v783_v30 = vld [vmem:[%s6447_s10 + $0x280] sm:$0xff] }
 0xb17   :  { %655 = vadd.xlane.f32.xlu0 %v654_v43  ;;  %v801_v31 = vpack.c.bf16 %v783_v30, %v782_v29  ;;  %v787_v34 = vld [vmem:[%s6447_s10 + $0x2a0] sm:$0xff]  ;;  %v789_v43 = vld [vmem:[%s6447_s10 + $0x2b0] sm:$0xff] }
 0xb18   :  { %v649_v47 = vmul.f32 %v647_v39, %v647_v39  ;;  %v803_v41 = vpack.c.bf16 %v787_v34, %v786_v38  ;;  %v4099_v34 = vld [vmem:[%s6447_s10 + $0x300] ss:$0 sm:$0xff] }
 0xb1a   :  { %v651_v51 = vsel %vm166_vm1, %v649_v47, 0.0 }
 0xb1b   :  { %652 = vadd.xlane.f32.xlu1 %v651_v51  ;;  %v790_v51 = vld [vmem:[%s6447_s10 + $0x2b8] sm:$0xff] }
 0xb1c   :  { %v805_v52 = vpack.c.bf16 %v791_v46, %v790_v51  ;;  %v4100_v51 = vld [vmem:[%s6447_s10 + $0x328] ss:$0 sm:$0xff] }
 0xba4   :  { %v656_v58 = vpop.xlane.xlu0 %655 }
 0xba5   :  { %v658_v59 = vmul.f32 0.03125, %v656_v58  ;;  %v795_v58 = vld [vmem:[%s6447_s10 + $0x2e0] sm:$0xff] }
 0xba7   :  { %v660_v60 = vadd.f32 1e-12, %v658_v59  ;;  %v807_v59 = vpack.c.bf16 %v795_v58, %v794_v57 }
 0xba8   :  { %v653_v61 = vpop.xlane.xlu1 %652 }
 0xba9   :  { %4760 = vrsqrt.f32 %v660_v60  ;;  %v657_v62 = vmul.f32 0.03125, %v653_v61 }
 0xbab   :  { %v659_v63 = vadd.f32 1e-12, %v657_v62  ;;  %v808_v62 = vld [vmem:[%s6447_s10 + $0x2e8] sm:$0xff] }
 0xbad   :  { %4762 = vrsqrt.f32 %v659_v63 }
 0xbb3   :  { %v4761_v0 = vpop.eup %4760 }
 0xbb4   :  { %v664_v4 = vmul.f32 %v4761_v0, %v648_v35  ;;  %v802_v35 = vpack.c.bf16 %v785_v33, %v784_v32 }
 0xbb6   :  { %v670_v6 = vmul.f32 %v4093_v1, %v664_v4 }
 0xbb7   :  { %v4763_v7 = vpop.eup %4762 }
 0xbb8   :  { %v663_v8 = vmul.f32 %v4763_v7, %v647_v39  ;;  %v676_v9 = vadd.f32 %v4094_v5, %v670_v6  ;;  %v788_v39 = vld [vmem:[%s6447_s10 + $0x2a8] sm:$0xff] }
 0xbb9   :  { %v804_v47 = vpack.c.bf16 %v789_v43, %v788_v39 }
 0xbba   :  { %v669_v12 = vmul.f32 %v4093_v1, %v663_v8  ;;  %4057 = vst.msk [vmem:[%s6448_s11 + $0x8] sm:$0xff] %vm166_vm1, %v676_v9  ;;  %v678_v15 = vrot.slane %v676_v9, 7 }
 0xbbc   :  { %v675_v13 = vadd.f32 %v4094_v5, %v669_v12 }
 0xbbe   :  { %v681_v19 = vsel %vm680_vm9, %v675_v13, %v678_v15  ;;  %4056 = vst.msk [vmem:[%s6448_s11] sm:$0xff] %vm166_vm1, %v675_v13 }
 0xbbf   :  { %4401 = vmatmul.mubr.msk.f32.vlgmr.msra.gmra.mrb[4].mxu0 %vm166_vm1, %v681_v19  ;;  %v891_v19 = vld [vmem:[%s6447_s10 + $0x308] sm:$0xff] }
 0xbc0   :  { %811 = vmatpush1.bf16.msra.mxu0 %v796_v16  ;;  %4097 = vmatprep.mubr.msk.bf16.mxu0 %vm119_vm0, %v5029_v14  ;;  %v779_v14 = vld [vmem:[%s6447_s10 + $0x260] sm:$0xff] }
 0xbc1   :  { %812 = vmatprep.subr.bf16.mxu0 %v4922_v3  ;;  %v799_v25 = vpack.c.bf16 %v779_v14, %v778_v24 }
 0xbc4   :  { %813 = vmatpush1.bf16.msra.mxu0 %v797_v20  ;;  %v892_v20 = vld [vmem:[%s6447_s10 + $0x310] sm:$0xff] }
 0xbc5   :  { %814 = vmatprep.subr.bf16.mxu0 %v4922_v3  ;;  %v896_v21 = vpack.c.bf16 %v892_v20, %v891_v19 }
 0xbc7   :  { %4404 = vmatpush3.bf16.msra.mxu1 %v896_v21 }
 0xbc8   :  { %815 = vmatpush1.bf16.msra.mxu0 %v798_v23  ;;  %4405 = vmatprep.subr.bf16.mxu1 %v4923_v2  ;;  %v894_v23 = vld [vmem:[%s6447_s10 + $0x320] sm:$0xff] }
 0xbc9   :  { %816 = vmatprep.subr.bf16.mxu0 %v4922_v3  ;;  %v897_v24 = vpack.c.bf16 %v894_v23, %v893_v22  ;;  %v1072_v23 = vld [vmem:[%s6447_s10 + $0x330] sm:$0xff] }
 0xbcb   :  { %4406 = vmatpush3.bf16.msra.mxu1 %v897_v24  ;;  %v1073_v24 = vld [vmem:[%s6447_s10 + $0x338] sm:$0xff] }
 0xbcc   :  { %817 = vmatpush1.bf16.msra.mxu0 %v799_v25  ;;  %4411 = vmatprep.subr.bf16.mxu1 %v4923_v2 }
 0xbcd   :  { %818 = vmatprep.subr.bf16.mxu0 %v4922_v3 }
 0xbd0   :  { %819 = vmatpush1.bf16.msra.mxu0 %v800_v28 }
 0xbd1   :  { %820 = vmatprep.subr.bf16.mxu0 %v4922_v3 }
 0xbd4   :  { %821 = vmatpush1.bf16.msra.mxu0 %v801_v31  ;;  %v4098_v31 = vld [vmem:[%s6447_s10 + $0x2f8] ss:$0 sm:$0xff] }
 0xbd5   :  { %822 = vmatprep.subr.bf16.mxu0 %v4922_v3 }
 0xbd8   :  { %823 = vmatpush1.bf16.msra.mxu0 %v802_v35 }
 0xbd9   :  { %824 = vmatprep.subr.bf16.mxu0 %v4922_v3 }
 0xbdc   :  { %825 = vmatpush1.bf16.msra.mxu0 %v803_v41 }
 0xbdd   :  { %826 = vmatprep.subr.bf16.mxu0 %v4922_v3 }
 0xbe0   :  { %827 = vmatpush1.bf16.msra.mxu0 %v804_v47 }
 0xbe1   :  { %828 = vmatprep.subr.bf16.mxu0 %v4922_v3 }
 0xbe4   :  { %829 = vmatpush1.bf16.msra.mxu0 %v805_v52 }
 0xbe5   :  { %830 = vmatprep.subr.bf16.mxu0 %v4922_v3 }
 0xbe8   :  { %831 = vmatpush1.bf16.msra.mxu0 %v806_v56 }
 0xbe9   :  { %832 = vmatprep.subr.bf16.mxu0 %v4922_v3  ;;  %v809_v3 = vld [vmem:[%s6447_s10 + $0x2f0] sm:$0xff] }
 0xbec   :  { %833 = vmatpush1.bf16.msra.mxu0 %v807_v59 }
 0xbed   :  { %4431 = vmatprep.subr.bf16.mxu0 %v4923_v2 }
 0xbef   :  { %843 = vmatmul.mubr.bf16.vlgmr.msra.gmra.mrb[8].mxu0 %v5096_v42 }
 0xbf0   :  { %4435 = vmatprep.mubr.msk.bf16.mxu0 %vm4924_vm2, %v4923_v2 }
 0xc92   :  { %v5462_v60 = vpop.f32.mrb[4].mxu0 }
 0xc93   :  { %v4402_v61 = vpop.f32.mrb[5].mxu0 }
 0xcc2   :  { %v844_v63 = vpop.f32.mrb[8].mxu0 }
 0xcc3   :  { %v5470_v0 = vadd.f32 %v844_v63, %v808_v62  ;;  %v846_v1 = vpop.f32.mrb[9].mxu0 }
 0xcc4   :  { %v847_v4 = vpop.f32.mrb[10].mxu0 }
 0xcc5   :  { %v5472_v42 = vadd.f32 %v847_v4, %v809_v3  ;;  %v849_v5 = vpop.f32.mrb[11].mxu0  ;;  %v853_v6 = vsel %vm166_vm1, %v5470_v0, 0.0 }
 0xcc6   :  { %854 = vadd.xlane.f32.xlu0 %v853_v6 }
 0xcc7   :  { %v856_v7 = vsel %vm166_vm1, %v5472_v42, 0.0 }
 0xcc8   :  { %857 = vadd.xlane.f32.xlu1 %v856_v7 }
 0xd53   :  { %v855_v8 = vpop.xlane.xlu0 %854 }
 0xd54   :  { %v859_v9 = vmul.f32 0.03125, %v855_v8 }
 0xd55   :  { %v858_v10 = vpop.xlane.xlu1 %857 }
 0xd56   :  { %v861_v11 = vsub.f32 %v5470_v0, %v859_v9  ;;  %v860_v12 = vmul.f32 0.03125, %v858_v10 }
 0xd58   :  { %v862_v13 = vsub.f32 %v5472_v42, %v860_v12  ;;  %v863_v15 = vmul.f32 %v861_v11, %v861_v11 }
 0xd5a   :  { %v865_v16 = vsel %vm166_vm1, %v863_v15, 0.0  ;;  %v864_v17 = vmul.f32 %v862_v13, %v862_v13 }
 0xd5b   :  { %866 = vadd.xlane.f32.xlu0 %v865_v16 }
 0xd5c   :  { %v868_v18 = vsel %vm166_vm1, %v864_v17, 0.0 }
 0xd5d   :  { %869 = vadd.xlane.f32.xlu1 %v868_v18 }
 0xde8   :  { %v867_v14 = vpop.xlane.xlu0 %866 }
 0xde9   :  { %v871_v25 = vmul.f32 0.03125, %v867_v14 }
 0xdea   :  { %v870_v26 = vpop.xlane.xlu1 %869 }
 0xdeb   :  { %v873_v27 = vadd.f32 1e-12, %v871_v25  ;;  %v872_v28 = vmul.f32 0.03125, %v870_v26 }
 0xded   :  { %4764 = vrsqrt.f32 %v873_v27  ;;  %v874_v29 = vadd.f32 1e-12, %v872_v28  ;;  %v1077_v27 = vpack.c.bf16 %v1073_v24, %v1072_v23 }
 0xdef   :  { %4766 = vrsqrt.f32 %v874_v29  ;;  %v1074_v29 = vld [vmem:[%s6447_s10 + $0x340] sm:$0xff] }
 0xdf7   :  { %v4765_v30 = vpop.eup %4764 }
 0xdf8   :  { %v877_v32 = vmul.f32 %v4765_v30, %v861_v11  ;;  %v1075_v30 = vld [vmem:[%s6447_s10 + $0x348] sm:$0xff] }
 0xdf9   :  { %v4767_v33 = vpop.eup %4766 }
 0xdfa   :  { %v883_v35 = vmul.f32 %v4098_v31, %v877_v32  ;;  %v878_v38 = vmul.f32 %v4767_v33, %v862_v13 }
 0xdfc   :  { %v884_v41 = vmul.f32 %v4098_v31, %v878_v38  ;;  %v889_v39 = vadd.f32 %v4099_v34, %v883_v35  ;;  %v1078_v31 = vpack.c.bf16 %v1075_v30, %v1074_v29  ;;  %v1248_v29 = vld [vmem:[%s6447_s10 + $0x3a0] sm:$0xff]  ;;  %v1249_v30 = vld [vmem:[%s6447_s10 + $0x3a8] sm:$0xff] }
 0xdfe   :  { %v890_v43 = vadd.f32 %v4099_v34, %v884_v41 }
 0xe00   :  { %v895_v47 = vpack.c.bf16 %v890_v43, %v889_v39  ;;  %v4105_v39 = vld [vmem:[%s6447_s10 + $0x350] ss:$0 sm:$0xff] }
 0xe02   :  { %4408 = vmatmul.mubr.msk.bf16.vlgmr.msra.gmra.mrb[24].mxu1 %vm166_vm1, %v895_v47 }
 0xe03   :  { %4413 = vmatprep.mubr.msk.bf16.mxu1 %vm4924_vm2, %v4923_v2 }
 0xed5   :  { %v940_v46 = vpop.f32.mrb[24].mxu1 }
 0xed6   :  { %v4409_v52 = vpop.f32.mrb[25].mxu1  ;;  %v941_v49 = vadd.f32 %v4100_v51, %v940_v46 }
 0xed7   :  { %v943_v53 = vpop.f32.mrb[26].mxu1 }
 0xed8   :  { %v944_v56 = vadd.f32 %v4100_v51, %v943_v53  ;;  %v4410_v57 = vpop.f32.mrb[27].mxu1 }
 0xeda   :  { %v947_v58 = vpack.c.bf16 %v944_v56, %v941_v49 }
 0xedc   :  { %949 = vrot.lane.b32.xlu0 %v947_v58, %s4925_s24 }
 0xf4e   :  { %v950_v59 = vpop.permute.xlu0 %949 }
 0xf4f   :  { %v955_v61 = vsel %vm166_vm1, %v950_v59, 0 }
 0xf50   :  { %4412 = vmatpush3.bf16.xpose.msra.mxu1 %v955_v61 }
 0xf51   :  { %4417 = vmatprep.subr.bf16.mxu1 %v4923_v2 }
 0xf57   :  { %4414 = vmatmul.mubr.msk.bf16.vlgmr.msra.gmra.mrb[28].mxu1 %vm166_vm1, %v947_v58 }
 0xf58   :  { %4419 = vmatprep.mubr.msk.bf16.mxu1 %vm4924_vm2, %v4923_v2 }
0x102a   :  { %v991_v62 = vpop.f32.mrb[28].mxu1 }
0x102b   :  { %v998_v63 = vmul.f32 0.17677669, %v991_v62  ;;  %v4415_v3 = vpop.f32.mrb[29].mxu1 }
0x102c   :  { %v994_v1 = vpop.f32.mrb[30].mxu1 }
0x102d   :  { %v999_v4 = vmul.f32 0.17677669, %v994_v1  ;;  %v4416_v5 = vpop.f32.mrb[31].mxu1  ;;  %v1000_v6 = vadd.f32 %v998_v63, %v5199_v50 }
0x102e   :  { %v1173_v5 = vld [vmem:[%s6447_s10 + $0x370] sm:$0xff] }
0x102f   :  { %v1002_v7 = vsel %vm317_vm8, %v1000_v6, -inf  ;;  %v1001_v8 = vadd.f32 %v999_v4, %v5202_v54  ;;  %v1172_v4 = vld [vmem:[%s6447_s10 + $0x368] sm:$0xff] }
0x1030   :  { %1003 = vmax.xlane.f32.xlu1 %v1002_v7  ;;  %v5568_v7 = vld [vmem:[%s6448_s11 + $0x10] sm:$0xff] }
0x1031   :  { %v1005_v9 = vsel %vm317_vm8, %v1001_v8, -inf }
0x1034   :  { %1006 = vmax.xlane.f32.xlu1 %v1005_v9  ;;  %v1175_v9 = vld [vmem:[%s6447_s10 + $0x380] sm:$0xff] }
0x10bd   :  { %v1004_v10 = vpop.xlane.xlu1 %1003 }
0x10be   :  { %v1008_v11 = vsub.f32 %v1000_v6, %v1004_v10  ;;  %v1177_v6 = vpack.c.bf16 %v1173_v5, %v1172_v4 }
0x10c0   :  { %v1010_v12 = vmul.f32 1.442695, %v1008_v11  ;;  %4432 = vmatpush3.bf16.msra.mxu0 %v1177_v6 }
0x10c1   :  { %v1007_v13 = vpop.xlane.xlu1 %1006  ;;  %4433 = vmatprep.subr.bf16.mxu0 %v5568_v7 }
0x10c2   :  { %4768 = vpow2.f32 %v1010_v12  ;;  %v1009_v15 = vsub.f32 %v1001_v8, %v1007_v13  ;;  %v1174_v8 = vld [vmem:[%s6447_s10 + $0x378] sm:$0xff] }
0x10c3   :  { %v1178_v10 = vpack.c.bf16 %v1175_v9, %v1174_v8 }
0x10c4   :  { %v1012_v16 = vmul.f32 1.442695, %v1009_v15 }
0x10c5   :  { %4434 = vmatpush3.bf16.msra.mxu0 %v1178_v10 }
0x10c6   :  { %4770 = vpow2.f32 %v1012_v16  ;;  %4696 = vmatprep.subr.bf16.mxu0 %v4928_v55 }
0x10cc   :  { %v4769_v17 = vpop.eup %4768 }
0x10cd   :  { %v1014_v18 = vsel %vm317_vm8, %v4769_v17, 0.0 }
0x10ce   :  { %1015 = vadd.xlane.f32.xlu1 %v1014_v18 }
0x10d0   :  { %v4771_v50 = vpop.eup %4770 }
0x10d1   :  { %v1017_v19 = vsel %vm317_vm8, %v4771_v50, 0.0 }
0x10d2   :  { %1018 = vadd.xlane.f32.xlu1 %v1017_v19  ;;  %v4106_v19 = vld [vmem:[%s6447_s10 + $0x358] ss:$0 sm:$0xff] }
0x10e3   :  { %1025 = vrot.lane.b32.xlu1 %v947_v58, %s4927_s25 }
0x115b   :  { %v1016_v54 = vpop.xlane.xlu1 %1015 }
0x115c   :  { %4772 = vrcp.f32 %v1016_v54 }
0x115f   :  { %v1019_v20 = vpop.xlane.xlu1 %1018 }
0x1160   :  { %4774 = vrcp.f32 %v1019_v20 }
0x1163   :  { %v1026_v21 = vpop.permute.xlu1 %1025 }
0x1164   :  { %4418 = vmatpush3.bf16.msra.mxu1 %v1026_v21 }
0x1165   :  { %4423 = vmatprep.subr.bf16.mxu1 %v4923_v2 }
0x1166   :  { %v4773_v22 = vpop.eup %4772 }
0x1167   :  { %v1022_v25 = vmul.f32 %v4773_v22, %v4769_v17  ;;  %v4107_v22 = vld [vmem:[%s6447_s10 + $0x360] ss:$0 sm:$0xff] }
0x116a   :  { %v4775_v14 = vpop.eup %4774 }
0x116b   :  { %v1023_v26 = vmul.f32 %v4775_v14, %v4771_v50 }
0x116d   :  { %v1024_v28 = vpack.c.bf16 %v1023_v26, %v1022_v25  ;;  %v1246_v26 = vld [vmem:[%s6447_s10 + $0x390] sm:$0xff] }
0x116f   :  { %4420 = vmatmul.mubr.msk.bf16.vlgmr.msra.gmra.mrb[32].mxu1 %vm317_vm8, %v1024_v28 }
0x1170   :  { %4424 = vmatpush3.bf16.msra.mxu1 %v1077_v27  ;;  %4427 = vmatprep.mubr.msk.bf16.mxu1 %vm4924_vm2, %v4923_v2  ;;  %v1247_v27 = vld [vmem:[%s6447_s10 + $0x398] sm:$0xff] }
0x1171   :  { %4425 = vmatprep.subr.bf16.mxu1 %v4923_v2  ;;  %v1263_v28 = vpack.c.bf16 %v1247_v27, %v1246_v26 }
0x1174   :  { %4426 = vmatpush3.bf16.msra.mxu1 %v1078_v31  ;;  %v1264_v31 = vpack.c.bf16 %v1249_v30, %v1248_v29  ;;  %v4110_v29 = vld [vmem:[%s6447_s10 + $0x410] ss:$0 sm:$0xff] }
0x1175   :  { %4439 = vmatprep.subr.bf16.mxu1 %v4923_v2 }
0x1242   :  { %v1065_v32 = vpop.f32.mrb[32].mxu1 }
0x1243   :  { %v4421_v33 = vpop.f32.mrb[33].mxu1 }
0x1244   :  { %v1068_v35 = vpop.f32.mrb[34].mxu1  ;;  %v1251_v33 = vld [vmem:[%s6447_s10 + $0x3b8] sm:$0xff] }
0x1245   :  { %v1076_v38 = vpack.c.bf16 %v1068_v35, %v1065_v32  ;;  %v4422_v34 = vpop.f32.mrb[35].mxu1  ;;  %v1250_v32 = vld [vmem:[%s6447_s10 + $0x3b0] sm:$0xff] }
0x1246   :  { %v1265_v35 = vpack.c.bf16 %v1251_v33, %v1250_v32  ;;  %v1253_v34 = vld [vmem:[%s6447_s10 + $0x3c8] sm:$0xff] }
0x1247   :  { %4428 = vmatmul.mubr.msk.bf16.vlgmr.msra.gmra.mrb[36].mxu1 %vm166_vm1, %v1076_v38  ;;  %v1252_v38 = vld [vmem:[%s6447_s10 + $0x3c0] sm:$0xff] }
0x1248   :  { %4455 = vmatprep.mubr.msk.bf16.mxu1 %vm4924_vm2, %v4923_v2  ;;  %4440 = vmatpush3.bf16.msra.mxu1 %v1263_v28 }
0x1249   :  { %4441 = vmatprep.subr.bf16.mxu1 %v5568_v7 }
0x124c   :  { %4442 = vmatpush3.bf16.msra.mxu1 %v1264_v31 }
0x124d   :  { %4443 = vmatprep.subr.bf16.mxu1 %v5568_v7 }
0x1250   :  { %4444 = vmatpush3.bf16.msra.mxu1 %v1265_v35 }
0x1251   :  { %4445 = vmatprep.subr.bf16.mxu1 %v5568_v7 }
0x131a   :  { %v1116_v41 = vpop.f32.mrb[36].mxu1 }
0x131b   :  { %v1123_v43 = vadd.f32 %v1116_v41, %v5470_v0  ;;  %v4429_v47 = vpop.f32.mrb[37].mxu1  ;;  %v1266_v41 = vpack.c.bf16 %v1253_v34, %v1252_v38 }
0x131c   :  { %v1119_v51 = vpop.f32.mrb[38].mxu1 }
0x131d   :  { %v5546_v46 = vadd.f32 %v4105_v39, %v1123_v43  ;;  %v1124_v52 = vadd.f32 %v1119_v51, %v5472_v42  ;;  %v4430_v53 = vpop.f32.mrb[39].mxu1  ;;  %4446 = vmatpush3.bf16.msra.mxu1 %v1266_v41  ;;  %v1255_v43 = vld [vmem:[%s6447_s10 + $0x3d8] sm:$0xff]  ;;  %v1256_v51 = vld [vmem:[%s6447_s10 + $0x3e0] sm:$0xff] }
0x131e   :  { %4447 = vmatprep.subr.bf16.mxu1 %v5568_v7 }
0x131f   :  { %v5549_v49 = vadd.f32 %v4105_v39, %v1124_v52  ;;  %v1134_v56 = vsel %vm166_vm1, %v5546_v46, 0.0  ;;  %v1254_v39 = vld [vmem:[%s6447_s10 + $0x3d0] sm:$0xff]  ;;  %v1257_v52 = vld [vmem:[%s6447_s10 + $0x3e8] sm:$0xff] }
0x1320   :  { %1135 = vadd.xlane.f32.xlu0 %v1134_v56  ;;  %v1267_v47 = vpack.c.bf16 %v1255_v43, %v1254_v39  ;;  %v1268_v53 = vpack.c.bf16 %v1257_v52, %v1256_v51  ;;  %v1258_v56 = vld [vmem:[%s6447_s10 + $0x3f0] sm:$0xff]  ;;  %v1455_v52 = vld [vmem:[%s6438_s1 + $0x8] sm:$0xff] }
0x1321   :  { %v1137_v2 = vsel %vm166_vm1, %v5549_v49, 0.0 }
0x1322   :  { %1138 = vadd.xlane.f32.xlu1 %v1137_v2  ;;  %4448 = vmatpush3.bf16.msra.mxu1 %v1267_v47  ;;  %v1259_v2 = vld [vmem:[%s6447_s10 + $0x3f8] sm:$0xff] }
0x1323   :  { %4449 = vmatprep.subr.bf16.mxu1 %v5568_v7 }
0x1326   :  { %4450 = vmatpush3.bf16.msra.mxu1 %v1268_v53  ;;  %v1454_v53 = vld [vmem:[%s6438_s1] sm:$0xff] }
0x1327   :  { %4451 = vmatprep.subr.bf16.mxu1 %v5568_v7 }
0x13ad   :  { %v1136_v57 = vpop.xlane.xlu0 %1135 }
0x13ae   :  { %v1140_v58 = vmul.f32 0.03125, %v1136_v57  ;;  %v1269_v57 = vpack.c.bf16 %v1259_v2, %v1258_v56  ;;  %v1456_v56 = vld [vmem:[%s6438_s1 + $0x10] sm:$0xff]  ;;  %v1457_v2 = vld [vmem:[%s6438_s1 + $0x18] sm:$0xff] }
0x13af   :  { %v1139_v0 = vpop.xlane.xlu1 %1138 }
0x13b0   :  { %v1142_v59 = vsub.f32 %v5546_v46, %v1140_v58  ;;  %v1141_v61 = vmul.f32 0.03125, %v1139_v0  ;;  %4452 = vmatpush3.bf16.msra.mxu1 %v1269_v57  ;;  %v1260_v58 = vld [vmem:[%s6447_s10 + $0x400] sm:$0xff]  ;;  %v1261_v0 = vld [vmem:[%s6447_s10 + $0x408] sm:$0xff] }
0x13b1   :  { %4453 = vmatprep.subr.bf16.mxu1 %v5568_v7  ;;  %v1365_v57 = vld [vmem:[%s6447_s10 + $0x428] sm:$0xff] }
0x13b2   :  { %v1143_v62 = vsub.f32 %v5549_v49, %v1141_v61  ;;  %v1144_v42 = vmul.f32 %v1142_v59, %v1142_v59  ;;  %v4108_v61 = vld [vmem:[%s6447_s10 + $0x388] ss:$0 sm:$0xff] }
0x13b4   :  { %v1146_v63 = vsel %vm166_vm1, %v1144_v42, 0.0  ;;  %v1145_v3 = vmul.f32 %v1143_v62, %v1143_v62 }
0x13b5   :  { %1147 = vadd.xlane.f32.xlu0 %v1146_v63 }
0x13b6   :  { %v1149_v1 = vsel %vm166_vm1, %v1145_v3, 0.0 }
0x13b9   :  { %1150 = vadd.xlane.f32.xlu0 %v1149_v1 }
0x1442   :  { %v1148_v11 = vpop.xlane.xlu0 %1147 }
0x1443   :  { %v1152_v12 = vmul.f32 0.03125, %v1148_v11 }
0x1445   :  { %v1154_v13 = vadd.f32 1e-12, %v1152_v12 }
0x1446   :  { %v1151_v15 = vpop.xlane.xlu0 %1150 }
0x1447   :  { %4776 = vrsqrt.f32 %v1154_v13  ;;  %v1153_v16 = vmul.f32 0.03125, %v1151_v15 }
0x1449   :  { %v1155_v17 = vadd.f32 1e-12, %v1153_v16 }
0x144b   :  { %4778 = vrsqrt.f32 %v1155_v17 }
0x1451   :  { %v4777_v18 = vpop.eup %4776 }
0x1452   :  { %v1158_v50 = vmul.f32 %v4777_v18, %v1142_v59  ;;  %v1270_v59 = vpack.c.bf16 %v1261_v0, %v1260_v58  ;;  %v1366_v58 = vld [vmem:[%s6447_s10 + $0x430] sm:$0xff] }
0x1453   :  { %v4697_v0 = vpack.c.bf16 %v1366_v58, %v1365_v57 }
0x1454   :  { %v1164_v21 = vmul.f32 %v4106_v19, %v1158_v50  ;;  %4454 = vmatpush3.bf16.msra.mxu1 %v1270_v59  ;;  %v1367_v59 = vld [vmem:[%s6447_s10 + $0x438] sm:$0xff] }
0x1455   :  { %v4779_v54 = vpop.eup %4778 }
0x1456   :  { %v1159_v20 = vmul.f32 %v4779_v54, %v1143_v62  ;;  %v1170_v24 = vadd.f32 %v4107_v22, %v1164_v21 }
0x1458   :  { %v1165_v23 = vmul.f32 %v4106_v19, %v1159_v20 }
0x145a   :  { %v1171_v14 = vadd.f32 %v4107_v22, %v1165_v23 }
0x145c   :  { %v1176_v25 = vpack.c.bf16 %v1171_v14, %v1170_v24 }
0x145e   :  { %4436 = vmatmul.mubr.msk.bf16.vlgmr.msra.gmra.mrb[12].mxu0 %vm166_vm1, %v1176_v25 }
0x145f   :  { %4467 = vmatprep.mubr.msk.f32.mxu0 %vm4924_vm2, %v5568_v7  ;;  %4698 = vmatpush3.bf16.msra.mxu0 %v4697_v0 }
0x1460   :  { %4699 = vmatprep.subr.bf16.mxu0 %v4928_v55 }
0x1531   :  { %v1221_v62 = vpop.f32.mrb[12].mxu0 }
0x1532   :  { %v1222_v42 = vadd.f32 %v4108_v61, %v1221_v62  ;;  %v4437_v63 = vpop.f32.mrb[13].mxu0  ;;  %v1474_v62 = vld [vmem:[%s6447_s10 + $0x450] sm:$0xff] }
0x1533   :  { %v1224_v3 = vpop.f32.mrb[14].mxu0  ;;  %v1475_v63 = vld [vmem:[%s6447_s10 + $0x458] sm:$0xff] }
0x1534   :  { %v1228_v1 = vmul.f32 %v1222_v42, %v1222_v42  ;;  %v1225_v4 = vadd.f32 %v4108_v61, %v1224_v3  ;;  %v4438_v5 = vpop.f32.mrb[15].mxu0  ;;  %v1368_v61 = vld [vmem:[%s6447_s10 + $0x440] sm:$0xff]  ;;  %v1492_v3 = vpack.c.bf16 %v1475_v63, %v1474_v62 }
0x1536   :  { %v1230_v6 = vmul.f32 %v1228_v1, %v1222_v42  ;;  %v1229_v8 = vmul.f32 %v1225_v4, %v1225_v4 }
0x1538   :  { %v1232_v9 = vmul.f32 0.044715, %v1230_v6  ;;  %v1231_v10 = vmul.f32 %v1229_v8, %v1225_v4 }
0x153a   :  { %v1234_v11 = vadd.f32 %v1232_v9, %v1222_v42  ;;  %v1233_v12 = vmul.f32 0.044715, %v1231_v10 }
0x153c   :  { %v1236_v13 = vmul.f32 0.7978846, %v1234_v11  ;;  %v1235_v15 = vadd.f32 %v1233_v12, %v1225_v4  ;;  %v4111_v11 = vld [vmem:[%s6447_s10 + $0x418] ss:$0 sm:$0xff] }
0x153e   :  { %4780 = vtanh.f32 %v1236_v13  ;;  %v1237_v16 = vmul.f32 0.7978846, %v1235_v15 }
0x1540   :  { %4782 = vtanh.f32 %v1237_v16  ;;  %v4112_v16 = vld [vmem:[%s6447_s10 + $0x420] ss:$0 sm:$0xff] }
0x1548   :  { %v4781_v17 = vpop.eup %4780 }
0x1549   :  { %v1240_v18 = vadd.f32 1.0, %v4781_v17 }
0x154a   :  { %v4783_v50 = vpop.eup %4782 }
0x154b   :  { %v1242_v19 = vmul.f32 0.5, %v1240_v18  ;;  %v1241_v54 = vadd.f32 1.0, %v4783_v50 }
0x154d   :  { %v1243_v20 = vmul.f32 0.5, %v1241_v54  ;;  %v1244_v21 = vmul.f32 %v1242_v19, %v1222_v42  ;;  %v4700_v42 = vpack.c.bf16 %v1368_v61, %v1367_v59  ;;  %v1499_v59 = vld [vmem:[%s6447_s10 + $0x4a8] sm:$0xff] }
0x154f   :  { %v1245_v22 = vmul.f32 %v1243_v20, %v1225_v4  ;;  %4701 = vmatpush3.bf16.msra.mxu0 %v4700_v42 }
0x1550   :  { %4470 = vmatprep.subr.bf16.mxu0 %v1492_v3 }
0x1551   :  { %v1262_v23 = vpack.c.bf16 %v1245_v22, %v1244_v21  ;;  %v1476_v22 = vld [vmem:[%s6447_s10 + $0x460] sm:$0xff] }
0x1553   :  { %4456 = vmatmul.mubr.bf16.vlgmr.msra.gmra.mrb[40].mxu1 %v1262_v23  ;;  %v1477_v23 = vld [vmem:[%s6447_s10 + $0x468] sm:$0xff] }
0x1626   :  { %v1305_v24 = vpop.f32.mrb[40].mxu1 }
0x1627   :  { %v4457_v14 = vpop.f32.mrb[41].mxu1  ;;  %v1312_v26 = vadd.f32 %v1305_v24, %v5546_v46 }
0x1628   :  { %v1308_v25 = vpop.f32.mrb[42].mxu1 }
0x1629   :  { %v1313_v27 = vadd.f32 %v1308_v25, %v5549_v49  ;;  %v4458_v28 = vpop.f32.mrb[43].mxu1  ;;  %v1319_v32 = vadd.f32 %v4110_v29, %v1312_v26  ;;  %v1493_v26 = vpack.c.bf16 %v1477_v23, %v1476_v22 }
0x162b   :  { %v1320_v30 = vadd.f32 %v4110_v29, %v1313_v27  ;;  %v1323_v33 = vsel %vm166_vm1, %v1319_v32, 0.0  ;;  %v1478_v29 = vld [vmem:[%s6447_s10 + $0x470] sm:$0xff] }
0x162d   :  { %v1326_v31 = vsel %vm166_vm1, %v1320_v30, 0.0 }
0x162e   :  { %1327 = vadd.xlane.f32.xlu0 %v1326_v31 }
0x1632   :  { %1324 = vadd.xlane.f32.xlu0 %v1323_v33  ;;  %v1481_v33 = vld [vmem:[%s6447_s10 + $0x488] sm:$0xff] }
0x16bb   :  { %v1328_v35 = vpop.xlane.xlu0 %1327 }
0x16bc   :  { %v1330_v38 = vmul.f32 0.03125, %v1328_v35 }
0x16be   :  { %v1332_v34 = vsub.f32 %v1320_v30, %v1330_v38  ;;  %v1479_v30 = vld [vmem:[%s6447_s10 + $0x478] sm:$0xff] }
0x16bf   :  { %v1325_v41 = vpop.xlane.xlu0 %1324  ;;  %v1494_v31 = vpack.c.bf16 %v1479_v30, %v1478_v29 }
0x16c0   :  { %v1329_v46 = vmul.f32 0.03125, %v1325_v41  ;;  %v1334_v39 = vmul.f32 %v1332_v34, %v1332_v34 }
0x16c2   :  { %v1331_v49 = vsub.f32 %v1319_v32, %v1329_v46  ;;  %v1338_v43 = vsel %vm166_vm1, %v1334_v39, 0.0  ;;  %v1480_v32 = vld [vmem:[%s6447_s10 + $0x480] sm:$0xff] }
0x16c3   :  { %1339 = vadd.xlane.f32.xlu0 %v1338_v43  ;;  %v1495_v38 = vpack.c.bf16 %v1481_v33, %v1480_v32  ;;  %v1496_v43 = vld [vmem:[%s6447_s10 + $0x490] sm:$0xff] }
0x16c4   :  { %v1333_v47 = vmul.f32 %v1331_v49, %v1331_v49 }
0x16c6   :  { %v1335_v51 = vsel %vm166_vm1, %v1333_v47, 0.0 }
0x16c7   :  { %1336 = vadd.xlane.f32.xlu1 %v1335_v51  ;;  %v1498_v51 = vld [vmem:[%s6447_s10 + $0x4a0] sm:$0xff] }
0x16d8   :  { %1462 = vperm.xlu1 %4739, %v1455_v52  }
0x16d9   :  { %1459 = vperm.xlu0 %4738, %v1454_v53  }
0x16dc   :  { %1465 = vperm.xlu1 %4739, %v1456_v56  }
0x16e0   :  { %1468 = vperm.xlu1 %4739, %v1457_v2  }
0x1750   :  { %v1340_v1 = vpop.xlane.xlu0 %1339 }
0x1751   :  { %v1342_v4 = vmul.f32 0.03125, %v1340_v1 }
0x1753   :  { %v1344_v5 = vadd.f32 1e-12, %v1342_v4 }
0x1754   :  { %v1337_v6 = vpop.xlane.xlu1 %1336 }
0x1755   :  { %4784 = vrsqrt.f32 %v1344_v5  ;;  %v1341_v8 = vmul.f32 0.03125, %v1337_v6 }
0x1757   :  { %v1343_v9 = vadd.f32 1e-12, %v1341_v8 }
0x1758   :  { %v1460_v12 = vpop.permute.xlu0 %1459  ;;  %v1463_v15 = vpop.permute.xlu1 %1462 }
0x1759   :  { %4786 = vrsqrt.f32 %v1343_v9  ;;  %vm1471_vm10 = vcmp.eq.s32.totalorder %v5176_v37, %v1463_v15  ;;  %vm1470_vm11 = vcmp.eq.s32.totalorder %v5176_v37, %v1460_v12 }
0x175a   :  { %v4116_v54 = vsel %vm1471_vm10, 1.0, %v5568_v7  ;;  %v4115_v20 = vsel %vm1470_vm11, 1.0, %v5568_v7  ;;  %vm4062_vm11 = vcmask 254976  }
0x175b   :  { %v1490_v25 = vpack.c.bf16 %v4116_v54, %v4115_v20 }
0x175c   :  { %v1466_v27 = vpop.permute.xlu1 %1465 }
0x175d   :  { %vm1472_vm12 = vcmp.eq.s32.totalorder %v5176_v37, %v1466_v27 }
0x175f   :  { %v4785_v10 = vpop.eup %4784 }
0x1760   :  { %v1348_v13 = vmul.f32 %v4785_v10, %v1332_v34  ;;  %v1469_v35 = vpop.permute.xlu1 %1468  ;;  %v4117_v34 = vsel %vm1472_vm12, 1.0, %v5568_v7  ;;  %vm4069_vm12 = vcmask 25600  }
0x1761   :  { %vm1473_vm13 = vcmp.eq.s32.totalorder %v5176_v37, %v1469_v35  ;;  %v4121_v35 = vld [vmem:[%s6447_s10 + $0x4b0] ss:$0 sm:$0xff] }
0x1762   :  { %v1354_v17 = vmul.f32 %v4111_v11, %v1348_v13  ;;  %v4118_v41 = vsel %vm1473_vm13, 1.0, %v5568_v7  ;;  %v1497_v7 = vld [vmem:[%s6447_s10 + $0x498] sm:$0xff] }
0x1763   :  { %v4787_v18 = vpop.eup %4786  ;;  %v1491_v46 = vpack.c.bf16 %v4118_v41, %v4117_v34  ;;  %v4122_v34 = vld [vmem:[%s6447_s10 + $0x4b8] ss:$0 sm:$0xff] }
0x1764   :  { %v1347_v50 = vmul.f32 %v4787_v18, %v1331_v49  ;;  %v1360_v19 = vadd.f32 %v4112_v16, %v1354_v17 }
0x1766   :  { %v1353_v21 = vmul.f32 %v4111_v11, %v1347_v50  ;;  %v1362_v14 = vrot.slane %v1360_v19, 7 }
0x1768   :  { %v1359_v24 = vadd.f32 %v4112_v16, %v1353_v21 }
0x176a   :  { %v1364_v28 = vsel %vm680_vm9, %v1359_v24, %v1362_v14 }
0x176b   :  { %4468 = vmatmul.mubr.msk.f32.vlgmr.msra.gmra.mrb[6].mxu0 %vm166_vm1, %v1364_v28 }
0x176c   :  { %4471 = vmatpush3.bf16.msra.mxu0 %v1492_v3  ;;  %4478 = vmatprep.mubr.msk.bf16.mxu0 %vm119_vm0, %v1490_v25 }
0x176d   :  { %4472 = vmatprep.subr.bf16.mxu0 %v1493_v26 }
0x1770   :  { %4473 = vmatpush3.bf16.msra.mxu0 %v1493_v26 }
0x1771   :  { %4474 = vmatprep.subr.bf16.mxu0 %v1494_v31 }
0x1774   :  { %4475 = vmatpush3.bf16.msra.mxu0 %v1494_v31 }
0x1775   :  { %4476 = vmatprep.subr.bf16.mxu0 %v1495_v38 }
0x1778   :  { %4477 = vmatpush3.bf16.msra.mxu0 %v1495_v38 }
0x177b   :  { %4479 = vmatmul.mubr.msk.bf16.vlgmr.msra.gmra.mrb[16].mxu0 %vm119_vm0, %v1491_v46 }
0x183e   :  { %v5721_v39 = vpop.f32.mrb[6].mxu0 }
0x183f   :  { %v4469_v49 = vpop.f32.mrb[7].mxu0 }
0x184e   :  { %v4480_v47 = vpop.f32.mrb[16].mxu0 }
0x184f   :  { %v1540_v52 = vpop.f32.mrb[17].mxu0  ;;  %v1549_v57 = vadd.f32 %v4480_v47, %v1498_v51 }
0x1850   :  { %v1541_v53 = vadd.f32 %v1540_v52, %v1496_v43  ;;  %v4481_v56 = vpop.f32.mrb[18].mxu0 }
0x1851   :  { %v1543_v2 = vpop.f32.mrb[19].mxu0  ;;  %v1552_v62 = vadd.f32 %v4481_v56, %v1499_v59  ;;  %v1563_v42 = vsel %vm166_vm1, %v1549_v57, 0.0 }
0x1852   :  { %v1544_v58 = vadd.f32 %v1543_v2, %v1497_v7  ;;  %v1557_v0 = vsel %vm166_vm1, %v1541_v53, 0.0 }
0x1853   :  { %1558 = vadd.xlane.f32.xlu1 %v1557_v0  ;;  %v1566_v63 = vsel %vm166_vm1, %v1552_v62, 0.0 }
0x1854   :  { %v1560_v61 = vsel %vm166_vm1, %v1544_v58, 0.0 }
0x1855   :  { %1561 = vadd.xlane.f32.xlu0 %v1560_v61 }
0x1857   :  { %1564 = vadd.xlane.f32.xlu1 %v1563_v42 }
0x185b   :  { %1567 = vadd.xlane.f32.xlu1 %v1566_v63 }
0x18e0   :  { %v1559_v3 = vpop.xlane.xlu1 %1558 }
0x18e1   :  { %v1569_v1 = vmul.f32 0.03125, %v1559_v3 }
0x18e2   :  { %v1562_v4 = vpop.xlane.xlu0 %1561 }
0x18e3   :  { %v1573_v5 = vsub.f32 %v1541_v53, %v1569_v1  ;;  %v1570_v6 = vmul.f32 0.03125, %v1562_v4 }
0x18e4   :  { %v1565_v8 = vpop.xlane.xlu1 %1564 }
0x18e5   :  { %v1574_v9 = vsub.f32 %v1544_v58, %v1570_v6  ;;  %v1571_v10 = vmul.f32 0.03125, %v1565_v8  ;;  %v1577_v11 = vmul.f32 %v1573_v5, %v1573_v5 }
0x18e7   :  { %v1575_v12 = vsub.f32 %v1549_v57, %v1571_v10  ;;  %v1581_v13 = vsel %vm166_vm1, %v1577_v11, 0.0  ;;  %v1578_v15 = vmul.f32 %v1574_v9, %v1574_v9 }
0x18e8   :  { %1582 = vadd.xlane.f32.xlu1 %v1581_v13  ;;  %v1568_v16 = vpop.xlane.xlu1 %1567 }
0x18e9   :  { %v1572_v17 = vmul.f32 0.03125, %v1568_v16  ;;  %v1579_v18 = vmul.f32 %v1575_v12, %v1575_v12  ;;  %v1584_v19 = vsel %vm166_vm1, %v1578_v15, 0.0 }
0x18eb   :  { %v1576_v50 = vsub.f32 %v1552_v62, %v1572_v17  ;;  %v1587_v54 = vsel %vm166_vm1, %v1579_v18, 0.0 }
0x18ec   :  { %1585 = vadd.xlane.f32.xlu1 %v1584_v19  ;;  %1588 = vadd.xlane.f32.xlu0 %v1587_v54 }
0x18ed   :  { %v1580_v20 = vmul.f32 %v1576_v50, %v1576_v50 }
0x18ef   :  { %v1590_v21 = vsel %vm166_vm1, %v1580_v20, 0.0 }
0x18f0   :  { %1591 = vadd.xlane.f32.xlu1 %v1590_v21  ;;  %v1718_v21 = vld [vmem:[%s6447_s10 + $0x4d0] sm:$0xff] }
0x1975   :  { %v1583_v22 = vpop.xlane.xlu1 %1582 }
0x1976   :  { %v1593_v23 = vmul.f32 0.03125, %v1583_v22  ;;  %v1719_v22 = vld [vmem:[%s6447_s10 + $0x4d8] sm:$0xff] }
0x1978   :  { %v1597_v24 = vadd.f32 1e-12, %v1593_v23  ;;  %v1724_v23 = vpack.c.bf16 %v1719_v22, %v1718_v21 }
0x1979   :  { %v1589_v14 = vpop.xlane.xlu0 %1588  ;;  %v1586_v25 = vpop.xlane.xlu1 %1585 }
0x197a   :  { %4788 = vrsqrt.f32 %v1597_v24  ;;  %v1595_v26 = vmul.f32 0.03125, %v1589_v14  ;;  %v1594_v27 = vmul.f32 0.03125, %v1586_v25  ;;  %4482 = vmatprep.subr.bf16.mxu0 %v1724_v23  ;;  %v1720_v24 = vld [vmem:[%s6447_s10 + $0x4e0] sm:$0xff]  ;;  %v1721_v14 = vld [vmem:[%s6447_s10 + $0x4e8] sm:$0xff] }
0x197b   :  { %4483 = vmatpush3.bf16.msra.mxu0 %v1724_v23  ;;  %v1725_v25 = vpack.c.bf16 %v1721_v14, %v1720_v24  ;;  %v1625_v23 = vld [vmem:[%s6440_s3] sm:$0x1]  ;;  %v1627_v14 = vadd.s32 24, %v5174_v36 }
0x197c   :  { %v1599_v28 = vadd.f32 1e-12, %v1595_v26  ;;  %v1598_v29 = vadd.f32 1e-12, %v1594_v27  ;;  %v4123_v24 = vadd.f32 -1.0, %v1625_v23 }
0x197d   :  { %v1592_v30 = vpop.xlane.xlu1 %1591  ;;  %4484 = vmatprep.subr.bf16.mxu0 %v1725_v25 }
0x197e   :  { %4790 = vrsqrt.f32 %v1599_v28  ;;  %v1596_v31 = vmul.f32 0.03125, %v1592_v30 }
0x197f   :  { %4792 = vrsqrt.f32 %v1598_v29  ;;  %4485 = vmatpush3.bf16.msra.mxu0 %v1725_v25  ;;  %v1626_v25 = vadd.s32 16, %v5174_v36 }
0x1980   :  { %v1600_v32 = vadd.f32 1e-12, %v1596_v31 }
0x1982   :  { %4794 = vrsqrt.f32 %v1600_v32 }
0x1984   :  { %v4789_v33 = vpop.eup %4788 }
0x1985   :  { %v1605_v38 = vmul.f32 %v4789_v33, %v1573_v5 }
0x1987   :  { %v1613_v41 = vmul.f32 %v4121_v35, %v1605_v38 }
0x1988   :  { %v4791_v46 = vpop.eup %4790 }
0x1989   :  { %v4793_v49 = vpop.eup %4792  ;;  %v5749_v43 = vadd.f32 %v4122_v34, %v1613_v41  ;;  %v1607_v47 = vmul.f32 %v4791_v46, %v1575_v12 }
0x198a   :  { %v1606_v51 = vmul.f32 %v4793_v49, %v1574_v9 }
0x198b   :  { %v1650_v52 = vsel %vm166_vm1, %v5749_v43, 0.0  ;;  %v1615_v7 = vmul.f32 %v4121_v35, %v1607_v47  ;;  %v4124_v47 = vld [vmem:[%s6447_s10 + $0x4c0] ss:$0 sm:$0xff] }
0x198c   :  { %v4795_v53 = vpop.eup %4794  ;;  %1651 = vadd.xlane.f32.xlu0 %v1650_v52  ;;  %v1614_v56 = vmul.f32 %v4121_v35, %v1606_v51 }
0x198d   :  { %v5753_v2 = vadd.f32 %v4122_v34, %v1615_v7  ;;  %v1608_v57 = vmul.f32 %v4795_v53, %v1576_v50 }
0x198e   :  { %v5755_v58 = vadd.f32 %v4122_v34, %v1614_v56 }
0x198f   :  { %v1656_v0 = vsel %vm166_vm1, %v5753_v2, 0.0  ;;  %v1616_v59 = vmul.f32 %v4121_v35, %v1608_v57  ;;  %v4125_v57 = vld [vmem:[%s6447_s10 + $0x4c8] ss:$0 sm:$0xff] }
0x1990   :  { %1657 = vadd.xlane.f32.xlu0 %v1656_v0  ;;  %v1653_v61 = vsel %vm166_vm1, %v5755_v58, 0.0 }
0x1991   :  { %1654 = vadd.xlane.f32.xlu1 %v1653_v61  ;;  %v5761_v62 = vadd.f32 %v4122_v34, %v1616_v59 }
0x1993   :  { %v1659_v42 = vsel %vm166_vm1, %v5761_v62, 0.0 }
0x1995   :  { %1660 = vadd.xlane.f32.xlu1 %v1659_v42 }
0x1a19   :  { %v1652_v63 = vpop.xlane.xlu0 %1651 }
0x1a1a   :  { %v1662_v3 = vmul.f32 0.03125, %v1652_v63 }
0x1a1c   :  { %v1666_v1 = vsub.f32 %v5749_v43, %v1662_v3 }
0x1a1d   :  { %v1658_v4 = vpop.xlane.xlu0 %1657 }
0x1a1e   :  { %v1664_v5 = vmul.f32 0.03125, %v1658_v4  ;;  %v1655_v6 = vpop.xlane.xlu1 %1654  ;;  %v1670_v8 = vmul.f32 %v1666_v1, %v1666_v1 }
0x1a1f   :  { %v1663_v9 = vmul.f32 0.03125, %v1655_v6 }
0x1a20   :  { %v1668_v10 = vsub.f32 %v5753_v2, %v1664_v5  ;;  %v1674_v11 = vsel %vm166_vm1, %v1670_v8, 0.0 }
0x1a21   :  { %v1667_v12 = vsub.f32 %v5755_v58, %v1663_v9  ;;  %1675 = vadd.xlane.f32.xlu0 %v1674_v11 }
0x1a22   :  { %v1661_v13 = vpop.xlane.xlu1 %1660  ;;  %v1672_v15 = vmul.f32 %v1668_v10, %v1668_v10 }
0x1a23   :  { %v1665_v16 = vmul.f32 0.03125, %v1661_v13  ;;  %v1671_v17 = vmul.f32 %v1667_v12, %v1667_v12 }
0x1a24   :  { %v1680_v18 = vsel %vm166_vm1, %v1672_v15, 0.0 }
0x1a25   :  { %v1669_v50 = vsub.f32 %v5761_v62, %v1665_v16  ;;  %1681 = vadd.xlane.f32.xlu0 %v1680_v18  ;;  %v1677_v19 = vsel %vm166_vm1, %v1671_v17, 0.0 }
0x1a26   :  { %1678 = vadd.xlane.f32.xlu1 %v1677_v19 }
0x1a27   :  { %v1673_v54 = vmul.f32 %v1669_v50, %v1669_v50 }
0x1a29   :  { %v1683_v20 = vsel %vm166_vm1, %v1673_v54, 0.0 }
0x1a2a   :  { %1684 = vadd.xlane.f32.xlu1 %v1683_v20 }
0x1aae   :  { %v1676_v26 = vpop.xlane.xlu0 %1675 }
0x1aaf   :  { %v1686_v27 = vmul.f32 0.03125, %v1676_v26  ;;  %v1637_v26 = vmul.f32 1e+09, %v4123_v24 }
0x1ab1   :  { %v1690_v28 = vadd.f32 1e-12, %v1686_v27  ;;  %v1641_v27 = vsub.s32 0, %v5174_v36 }
0x1ab2   :  { %v1682_v29 = vpop.xlane.xlu0 %1681 }
0x1ab3   :  { %4796 = vrsqrt.f32 %v1690_v28  ;;  %v1688_v30 = vmul.f32 0.03125, %v1682_v29  ;;  %v1679_v31 = vpop.xlane.xlu1 %1678  ;;  %v1629_v28 = vshra.s32 %v1627_v14, 3  ;;  %v1628_v29 = vshra.s32 %v1626_v25, 3 }
0x1ab4   :  { %v1687_v32 = vmul.f32 0.03125, %v1679_v31  ;;  %v5824_v31 = vsel %vm5185_vm3, 0.0, %v4926_v48  ;;  %vm2388_vm3 = vcmask 1041408  }
0x1ab5   :  { %v1692_v33 = vadd.f32 1e-12, %v1688_v30  ;;  %v1642_v30 = vrot.slane %v1637_v26, %v1641_v27  ;;  %vm1631_vm14 = vcmp.eq.s32.totalorder %v1629_v28, %v5181_v40  ;;  %vm1630_vm15 = vcmp.eq.s32.totalorder %v1628_v29, %v5181_v40  ;;  %v1970_v28 = vld [vmem:[%s6447_s10 + $0x4f8] sm:$0xff] }
0x1ab6   :  { %v1691_v35 = vadd.f32 1e-12, %v1687_v32  ;;  %v5830_v32 = vsel %vm5190_vm5, 0.0, %v4926_v48 }
0x1ab7   :  { %4798 = vrsqrt.f32 %v1692_v33  ;;  %v1685_v38 = vpop.xlane.xlu1 %1684  ;;  %v1635_v33 = vsel %vm1631_vm14, 0.0, %v4926_v48  ;;  %v1645_v44 = vadd.f32 %v1642_v30, %v5830_v32 }
0x1ab8   :  { %4800 = vrsqrt.f32 %v1691_v35  ;;  %v1689_v34 = vmul.f32 0.03125, %v1685_v38  ;;  %v1644_v38 = vadd.f32 %v1642_v30, %v5824_v31 }
0x1aba   :  { %v1693_v41 = vadd.f32 1e-12, %v1689_v34 }
0x1abc   :  { %4802 = vrsqrt.f32 %v1693_v41  ;;  %v1634_v41 = vsel %vm1630_vm15, 0.0, %v4926_v48 }
0x1abd   :  { %v4797_v46 = vpop.eup %4796 }
0x1abe   :  { %v1698_v49 = vmul.f32 %v4797_v46, %v1666_v1 }
0x1ac0   :  { %v1706_v56 = vmul.f32 %v4124_v47, %v1698_v49 }
0x1ac1   :  { %v4799_v51 = vpop.eup %4798 }
0x1ac2   :  { %v4801_v52 = vpop.eup %4800  ;;  %v1700_v7 = vmul.f32 %v4799_v51, %v1668_v10  ;;  %v1714_v63 = vadd.f32 %v4125_v57, %v1706_v56  ;;  %v4126_v10 = vld [vmem:[%s6447_s10 + $0x4f0] ss:$0 sm:$0xff] }
0x1ac3   :  { %v1699_v53 = vmul.f32 %v4801_v52, %v1667_v12 }
0x1ac4   :  { %v1708_v61 = vmul.f32 %v4124_v47, %v1700_v7 }
0x1ac5   :  { %v1707_v0 = vmul.f32 %v4124_v47, %v1699_v53  ;;  %v1646_v53 = vadd.f32 %v1642_v30, %v1634_v41 }
0x1ac6   :  { %v4803_v59 = vpop.eup %4802  ;;  %v1716_v5 = vadd.f32 %v4125_v57, %v1708_v61 }
0x1ac7   :  { %v1701_v42 = vmul.f32 %v4803_v59, %v1669_v50  ;;  %v1715_v3 = vadd.f32 %v4125_v57, %v1707_v0 }
0x1ac9   :  { %v1709_v1 = vmul.f32 %v4124_v47, %v1701_v42  ;;  %v1722_v4 = vpack.c.bf16 %v1715_v3, %v1714_v63  ;;  %v1647_v47 = vadd.f32 %v1642_v30, %v1635_v33 }
0x1acb   :  { %4486 = vmatprep.mubr.msk.bf16.mxu0 %vm166_vm1, %v1722_v4  ;;  %v1717_v6 = vadd.f32 %v4125_v57, %v1709_v1 }
0x1acd   :  { %v1723_v8 = vpack.c.bf16 %v1717_v6, %v1716_v5 }
0x1acf   :  { %4487 = vmatmul.mubr.msk.bf16.vlgmr.msra.gmra.mrb[20].mxu0 %vm166_vm1, %v1723_v8 }
0x1ba2   :  { %v4488_v9 = vpop.f32.mrb[20].mxu0 }
0x1ba3   :  { %v1771_v11 = vpop.f32.mrb[21].mxu0  ;;  %v1780_v13 = vadd.f32 %v4488_v9, %v4126_v10 }
0x1ba4   :  { %v4489_v12 = vpop.f32.mrb[22].mxu0  ;;  %v1772_v17 = vadd.f32 %v4126_v10, %v1771_v11 }
0x1ba5   :  { %v1783_v15 = vadd.f32 %v4489_v12, %v4126_v10  ;;  %v1774_v16 = vpop.f32.mrb[23].mxu0 }
0x1ba6   :  { %v1775_v18 = vadd.f32 %v4126_v10, %v1774_v16 }
0x1ba7   :  { %v5796_v50 = vpack.c.bf16 %v1783_v15, %v1780_v13 }
0x1ba8   :  { %v5798_v19 = vpack.c.bf16 %v1775_v18, %v1772_v17 }
0x1ba9   :  { %1792 = vrot.lane.b32.xlu1 %v5796_v50, %s4925_s24 }
0x1baa   :  { %1790 = vrot.lane.b32.xlu0 %v5798_v19, %s4925_s24  ;;  %4494 = vmatprep.mubr.msk.bf16.mxu1 %vm166_vm1, %v5798_v19 }
0x1c1b   :  { %v1793_v21 = vpop.permute.xlu1 %1792 }
0x1c1c   :  { %v1791_v54 = vpop.permute.xlu0 %1790  ;;  %v1804_v22 = vsel %vm166_vm1, %v1793_v21, 0 }
0x1c1d   :  { %v1801_v20 = vsel %vm166_vm1, %v1791_v54, 0  ;;  %4726 = vmatprep.subr.msk.bf16.mxu1 %vm166_vm1, %v1791_v54 }
0x1c1e   :  { %4491 = vmatpush3.bf16.xpose.msra.mxu1 %v1801_v20 }
0x1c1f   :  { %4727 = vmatprep.subr.msk.bf16.mxu1 %vm166_vm1, %v1793_v21 }
0x1c26   :  { %4493 = vmatpush3.bf16.xpose.msra.mxu1 %v1804_v22 }
0x1c2d   :  { %4495 = vmatmul.mubr.msk.bf16.vlgmr.msra.gmra.mrb[44].mxu1 %vm166_vm1, %v5796_v50 }
0x1d00   :  { %v4496_v35 = vpop.f32.mrb[44].mxu1 }
0x1d01   :  { %v1840_v34 = vpop.f32.mrb[45].mxu1  ;;  %v1857_v52 = vmul.f32 0.17677669, %v4496_v35 }
0x1d02   :  { %v1855_v46 = vmul.f32 0.17677669, %v1840_v34  ;;  %v4497_v49 = vpop.f32.mrb[46].mxu1 }
0x1d03   :  { %v1858_v51 = vmul.f32 0.17677669, %v4497_v49  ;;  %v1843_v40 = vpop.f32.mrb[47].mxu1  ;;  %v1861_v61 = vadd.f32 %v1857_v52, %v1646_v53 }
0x1d04   :  { %v1856_v7 = vmul.f32 0.17677669, %v1843_v40  ;;  %v1859_v45 = vadd.f32 %v1855_v46, %v1644_v38  ;;  %v1973_v40 = vld [vmem:[%s6447_s10 + $0x510] sm:$0xff] }
0x1d05   :  { %v1862_v0 = vadd.f32 %v1858_v51, %v1647_v47  ;;  %v1869_v42 = vsel %vm166_vm1, %v1861_v61, -inf  ;;  %v1972_v51 = vld [vmem:[%s6447_s10 + $0x508] sm:$0xff] }
0x1d06   :  { %v1863_v56 = vsel %vm166_vm1, %v1859_v45, -inf  ;;  %v1860_v57 = vadd.f32 %v1856_v7, %v1645_v44  ;;  %v1977_v52 = vpack.c.bf16 %v1973_v40, %v1972_v51 }
0x1d07   :  { %1864 = vmax.xlane.f32.xlu1 %v1863_v56  ;;  %v1872_v48 = vsel %vm166_vm1, %v1862_v0, -inf }
0x1d08   :  { %v1866_v59 = vsel %vm166_vm1, %v1860_v57, -inf }
0x1d09   :  { %1867 = vmax.xlane.f32.xlu0 %v1866_v59 }
0x1d0b   :  { %1873 = vmax.xlane.f32.xlu1 %v1872_v48 }
0x1d0d   :  { %1870 = vmax.xlane.f32.xlu0 %v1869_v42 }
0x1d94   :  { %v1865_v63 = vpop.xlane.xlu1 %1864 }
0x1d95   :  { %v1875_v5 = vsub.f32 %v1859_v45, %v1865_v63 }
0x1d96   :  { %v1868_v3 = vpop.xlane.xlu0 %1867 }
0x1d97   :  { %v1876_v1 = vsub.f32 %v1860_v57, %v1868_v3  ;;  %v1879_v12 = vmul.f32 1.442695, %v1875_v5 }
0x1d98   :  { %v1874_v4 = vpop.xlane.xlu1 %1873 }
0x1d99   :  { %v1878_v6 = vsub.f32 %v1862_v0, %v1874_v4  ;;  %v1881_v8 = vmul.f32 1.442695, %v1876_v1 }
0x1d9a   :  { %v1871_v9 = vpop.xlane.xlu0 %1870 }
0x1d9b   :  { %v1885_v10 = vmul.f32 1.442695, %v1878_v6  ;;  %v1877_v11 = vsub.f32 %v1861_v61, %v1871_v9  ;;  %v4135_v61 = vld [vmem:[%s6447_s10 + $0x518] ss:$0 sm:$0xff] }
0x1d9d   :  { %4804 = vpow2.f32 %v1885_v10  ;;  %v1883_v13 = vmul.f32 1.442695, %v1877_v11 }
0x1d9e   :  { %4806 = vpow2.f32 %v1881_v8 }
0x1d9f   :  { %4808 = vpow2.f32 %v1883_v13 }
0x1da0   :  { %4810 = vpow2.f32 %v1879_v12 }
0x1da7   :  { %v4805_v15 = vpop.eup %4804 }
0x1da8   :  { %v4807_v16 = vpop.eup %4806  ;;  %v1896_v17 = vsel %vm166_vm1, %v4805_v15, 0.0 }
0x1da9   :  { %v4809_v18 = vpop.eup %4808  ;;  %1897 = vadd.xlane.f32.xlu1 %v1896_v17  ;;  %v1890_v21 = vsel %vm166_vm1, %v4807_v16, 0.0 }
0x1daa   :  { %v1893_v54 = vsel %vm166_vm1, %v4809_v18, 0.0  ;;  %v4811_v20 = vpop.eup %4810 }
0x1dab   :  { %1894 = vadd.xlane.f32.xlu0 %v1893_v54  ;;  %v1887_v22 = vsel %vm166_vm1, %v4811_v20, 0.0 }
0x1dad   :  { %1891 = vadd.xlane.f32.xlu1 %v1890_v21 }
0x1daf   :  { %1888 = vadd.xlane.f32.xlu0 %v1887_v22 }
0x1dbe   :  { %1911 = vrot.lane.b32.xlu1 %v5796_v50, %s4927_s25  ;;  %v1971_v50 = vld [vmem:[%s6447_s10 + $0x500] sm:$0xff] }
0x1dc5   :  { %1909 = vrot.lane.b32.xlu0 %v5798_v19, %s4927_s25  ;;  %v1976_v19 = vpack.c.bf16 %v1971_v50, %v1970_v28 }
0x1e36   :  { %v1898_v23 = vpop.xlane.xlu1 %1897 }
0x1e38   :  { %v1895_v24 = vpop.xlane.xlu0 %1894 }
0x1e39   :  { %4812 = vrcp.f32 %v1895_v24 }
0x1e3a   :  { %v1892_v14 = vpop.xlane.xlu1 %1891 }
0x1e3b   :  { %4814 = vrcp.f32 %v1892_v14 }
0x1e3c   :  { %4816 = vrcp.f32 %v1898_v23  ;;  %v1889_v25 = vpop.xlane.xlu0 %1888 }
0x1e3d   :  { %4818 = vrcp.f32 %v1889_v25 }
0x1e3e   :  { %v1912_v29 = vpop.permute.xlu1 %1911 }
0x1e40   :  { %v1910_v26 = vpop.permute.xlu0 %1909 }
0x1e41   :  { %4498 = vmatprep.subr.bf16.mxu0 %v1910_v26 }
0x1e42   :  { %4499 = vmatpush3.bf16.msra.mxu0 %v1910_v26 }
0x1e43   :  { %4500 = vmatprep.subr.bf16.mxu0 %v1912_v29  ;;  %v4813_v30 = vpop.eup %4812 }
0x1e44   :  { %v1905_v34 = vmul.f32 %v4813_v30, %v4809_v18  ;;  %v2116_v30 = vld [vmem:[%s6447_s10 + $0x530] sm:$0xff] }
0x1e45   :  { %v4815_v33 = vpop.eup %4814 }
0x1e46   :  { %v4817_v35 = vpop.eup %4816  ;;  %4501 = vmatpush3.bf16.msra.mxu0 %v1912_v29  ;;  %v1904_v46 = vmul.f32 %v4815_v33, %v4807_v16  ;;  %v2117_v33 = vld [vmem:[%s6447_s10 + $0x538] sm:$0xff] }
0x1e47   :  { %v4819_v38 = vpop.eup %4818  ;;  %4506 = vmatprep.subr.bf16.mxu0 %v1976_v19  ;;  %v1906_v49 = vmul.f32 %v4817_v35, %v4805_v15  ;;  %v2122_v35 = vpack.c.bf16 %v2117_v33, %v2116_v30  ;;  %v2229_v30 = vld [vmem:[%s6447_s10 + $0x5a0] sm:$0xff] }
0x1e48   :  { %v1903_v41 = vmul.f32 %v4819_v38, %v4811_v20  ;;  %v2118_v38 = vld [vmem:[%s6447_s10 + $0x540] sm:$0xff] }
0x1e49   :  { %v1908_v47 = vpack.c.bf16 %v1906_v49, %v1905_v34  ;;  %4514 = vmatprep.subr.bf16.mxu1 %v2122_v35  ;;  %v2119_v34 = vld [vmem:[%s6447_s10 + $0x548] sm:$0xff] }
0x1e4a   :  { %v1907_v44 = vpack.c.bf16 %v1904_v46, %v1903_v41  ;;  %4515 = vmatpush3.bf16.msra.mxu1 %v2122_v35  ;;  %v2123_v41 = vpack.c.bf16 %v2119_v34, %v2118_v38  ;;  %v2230_v35 = vld [vmem:[%s6447_s10 + $0x5a8] sm:$0xff]  ;;  %v2231_v38 = vld [vmem:[%s6447_s10 + $0x5b0] sm:$0xff] }
0x1e4b   :  { %v2243_v34 = vpack.c.bf16 %v2231_v38, %v2230_v35 }
0x1e4c   :  { %4502 = vmatprep.mubr.msk.bf16.mxu0 %vm166_vm1, %v1907_v44  ;;  %4516 = vmatprep.subr.bf16.mxu1 %v2123_v41 }
0x1e4d   :  { %4503 = vmatmul.mubr.msk.bf16.vlgmr.msra.gmra.mrb[24].mxu0 %vm166_vm1, %v1908_v47 }
0x1e4e   :  { %4507 = vmatpush3.bf16.msra.mxu0 %v1976_v19  ;;  %4517 = vmatpush3.bf16.msra.mxu1 %v2123_v41  ;;  %v2232_v41 = vld [vmem:[%s6447_s10 + $0x5b8] sm:$0xff] }
0x1e4f   :  { %4508 = vmatprep.subr.bf16.mxu0 %v1977_v52  ;;  %4702 = vmatprep.subr.bf16.mxu1 %v4928_v55 }
0x1e52   :  { %4509 = vmatpush3.bf16.msra.mxu0 %v1977_v52 }
0x1f20   :  { %v4504_v7 = vpop.f32.mrb[24].mxu0 }
0x1f21   :  { %v1955_v45 = vpop.f32.mrb[25].mxu0 }
0x1f22   :  { %v4505_v53 = vpop.f32.mrb[26].mxu0 }
0x1f23   :  { %v1975_v56 = vpack.c.bf16 %v4505_v53, %v4504_v7  ;;  %v1958_v57 = vpop.f32.mrb[27].mxu0 }
0x1f24   :  { %v1974_v0 = vpack.c.bf16 %v1958_v57, %v1955_v45 }
0x1f26   :  { %4510 = vmatprep.mubr.msk.bf16.mxu0 %vm166_vm1, %v1974_v0 }
0x1f27   :  { %4511 = vmatmul.mubr.msk.bf16.vlgmr.msra.gmra.mrb[28].mxu0 %vm166_vm1, %v1975_v56 }
0x1ffa   :  { %v4512_v59 = vpop.f32.mrb[28].mxu0 }
0x1ffb   :  { %v2018_v48 = vpop.f32.mrb[29].mxu0  ;;  %v2035_v4 = vadd.f32 %v4512_v59, %v5753_v2  ;;  %v4136_v59 = vld [vmem:[%s6447_s10 + $0x520] ss:$0 sm:$0xff] }
0x1ffc   :  { %v2033_v42 = vadd.f32 %v2018_v48, %v5749_v43  ;;  %v4513_v63 = vpop.f32.mrb[30].mxu0 }
0x1ffd   :  { %v2036_v3 = vadd.f32 %v4513_v63, %v5761_v62  ;;  %v2021_v1 = vpop.f32.mrb[31].mxu0  ;;  %v5879_v11 = vadd.f32 %v4135_v61, %v2035_v4 }
0x1ffe   :  { %v5870_v5 = vadd.f32 %v4135_v61, %v2033_v42  ;;  %v2034_v6 = vadd.f32 %v2021_v1, %v5755_v58 }
0x1fff   :  { %v5873_v8 = vadd.f32 %v4135_v61, %v2036_v3  ;;  %v2054_v58 = vsel %vm166_vm1, %v5879_v11, 0.0  ;;  %v4137_v3 = vld [vmem:[%s6447_s10 + $0x528] ss:$0 sm:$0xff] }
0x2000   :  { %v5875_v9 = vadd.f32 %v4135_v61, %v2034_v6  ;;  %v2048_v10 = vsel %vm166_vm1, %v5870_v5, 0.0 }
0x2001   :  { %2049 = vadd.xlane.f32.xlu1 %v2048_v10  ;;  %v2057_v2 = vsel %vm166_vm1, %v5873_v8, 0.0 }
0x2002   :  { %v2051_v43 = vsel %vm166_vm1, %v5875_v9, 0.0 }
0x2003   :  { %2052 = vadd.xlane.f32.xlu0 %v2051_v43 }
0x2005   :  { %2058 = vadd.xlane.f32.xlu1 %v2057_v2 }
0x2007   :  { %2055 = vadd.xlane.f32.xlu0 %v2054_v58 }
0x208e   :  { %v2050_v62 = vpop.xlane.xlu1 %2049 }
0x208f   :  { %v2060_v12 = vmul.f32 0.03125, %v2050_v62 }
0x2090   :  { %v2053_v13 = vpop.xlane.xlu0 %2052 }
0x2091   :  { %v2064_v15 = vsub.f32 %v5870_v5, %v2060_v12  ;;  %v2061_v16 = vmul.f32 0.03125, %v2053_v13 }
0x2092   :  { %v2059_v17 = vpop.xlane.xlu1 %2058 }
0x2093   :  { %v2065_v18 = vsub.f32 %v5875_v9, %v2061_v16  ;;  %v2063_v54 = vmul.f32 0.03125, %v2059_v17  ;;  %v2068_v20 = vmul.f32 %v2064_v15, %v2064_v15 }
0x2094   :  { %v2056_v21 = vpop.xlane.xlu0 %2055 }
0x2095   :  { %v2067_v22 = vsub.f32 %v5873_v8, %v2063_v54  ;;  %v2062_v23 = vmul.f32 0.03125, %v2056_v21  ;;  %v2072_v24 = vsel %vm166_vm1, %v2068_v20, 0.0  ;;  %v2069_v14 = vmul.f32 %v2065_v18, %v2065_v18  ;;  %v2220_v54 = vld [vmem:[%s6447_s10 + $0x558] sm:$0xff]  ;;  %v2221_v20 = vld [vmem:[%s6447_s10 + $0x560] sm:$0xff] }
0x2096   :  { %2073 = vadd.xlane.f32.xlu0 %v2072_v24  ;;  %v2238_v21 = vpack.c.bf16 %v2221_v20, %v2220_v54 }
0x2097   :  { %v2066_v25 = vsub.f32 %v5879_v11, %v2062_v23  ;;  %v2075_v26 = vsel %vm166_vm1, %v2069_v14, 0.0  ;;  %v2071_v28 = vmul.f32 %v2067_v22, %v2067_v22  ;;  %v2223_v23 = vld [vmem:[%s6447_s10 + $0x570] sm:$0xff]  ;;  %v2224_v14 = vld [vmem:[%s6447_s10 + $0x578] sm:$0xff] }
0x2098   :  { %2076 = vadd.xlane.f32.xlu1 %v2075_v26  ;;  %4522 = vmatprep.subr.bf16.mxu0 %v2238_v21 }
0x2099   :  { %v2070_v50 = vmul.f32 %v2066_v25, %v2066_v25  ;;  %v2081_v29 = vsel %vm166_vm1, %v2071_v28, 0.0  ;;  %4523 = vmatpush3.bf16.msra.mxu0 %v2238_v21  ;;  %v2226_v28 = vld [vmem:[%s6447_s10 + $0x588] sm:$0xff] }
0x209b   :  { %v2078_v19 = vsel %vm166_vm1, %v2070_v50, 0.0  ;;  %v2227_v50 = vld [vmem:[%s6447_s10 + $0x590] sm:$0xff] }
0x209c   :  { %2082 = vadd.xlane.f32.xlu1 %v2081_v29  ;;  %2079 = vadd.xlane.f32.xlu0 %v2078_v19  ;;  %v2241_v29 = vpack.c.bf16 %v2227_v50, %v2226_v28  ;;  %v2228_v19 = vld [vmem:[%s6447_s10 + $0x598] sm:$0xff] }
0x209d   :  { %v2242_v33 = vpack.c.bf16 %v2229_v30, %v2228_v19 }
0x2123   :  { %v2074_v46 = vpop.xlane.xlu0 %2073 }
0x2124   :  { %v2084_v49 = vmul.f32 0.03125, %v2074_v46  ;;  %v2233_v46 = vld [vmem:[%s6447_s10 + $0x5c0] sm:$0xff] }
0x2125   :  { %v2077_v44 = vpop.xlane.xlu1 %2076 }
0x2126   :  { %v2088_v47 = vadd.f32 1e-12, %v2084_v49  ;;  %v2085_v51 = vmul.f32 0.03125, %v2077_v44  ;;  %v2244_v49 = vpack.c.bf16 %v2233_v46, %v2232_v41  ;;  %v2234_v44 = vld [vmem:[%s6447_s10 + $0x5c8] sm:$0xff] }
0x2128   :  { %4820 = vrsqrt.f32 %v2088_v47  ;;  %v2089_v40 = vadd.f32 1e-12, %v2085_v51  ;;  %v2235_v47 = vld [vmem:[%s6447_s10 + $0x5d0] sm:$0xff] }
0x2129   :  { %v2083_v52 = vpop.xlane.xlu1 %2082  ;;  %v2080_v7 = vpop.xlane.xlu0 %2079  ;;  %v2245_v51 = vpack.c.bf16 %v2235_v47, %v2234_v44  ;;  %v4141_v44 = vld [vmem:[%s6447_s10 + $0x5d8] ss:$0 sm:$0xff] }
0x212a   :  { %4822 = vrsqrt.f32 %v2089_v40  ;;  %v2087_v45 = vmul.f32 0.03125, %v2083_v52  ;;  %v2086_v53 = vmul.f32 0.03125, %v2080_v7  ;;  %v4138_v40 = vld [vmem:[%s6447_s10 + $0x550] ss:$0 sm:$0xff] }
0x212c   :  { %v2091_v56 = vadd.f32 1e-12, %v2087_v45  ;;  %v2090_v57 = vadd.f32 1e-12, %v2086_v53 }
0x212e   :  { %4824 = vrsqrt.f32 %v2091_v56 }
0x212f   :  { %4826 = vrsqrt.f32 %v2090_v57 }
0x2132   :  { %v4821_v0 = vpop.eup %4820 }
0x2133   :  { %v2096_v61 = vmul.f32 %v4821_v0, %v2064_v15 }
0x2134   :  { %v4823_v48 = vpop.eup %4822 }
0x2135   :  { %v2097_v42 = vmul.f32 %v4823_v48, %v2065_v18  ;;  %v2104_v63 = vmul.f32 %v4136_v59, %v2096_v61  ;;  %v5919_v18 = vld [vmem:[%s6448_s11 + $0x10] sm:$0xff] }
0x2137   :  { %v2105_v1 = vmul.f32 %v4136_v59, %v2097_v42  ;;  %v2112_v43 = vadd.f32 %v4137_v3, %v2104_v63 }
0x2138   :  { %v4825_v4 = vpop.eup %4824 }
0x2139   :  { %v4827_v6 = vpop.eup %4826  ;;  %v2099_v10 = vmul.f32 %v4825_v4, %v2067_v22  ;;  %v2113_v2 = vadd.f32 %v4137_v3, %v2105_v1  ;;  %v2222_v22 = vld [vmem:[%s6447_s10 + $0x568] sm:$0xff] }
0x213a   :  { %v2098_v58 = vmul.f32 %v4827_v6, %v2066_v25  ;;  %v2239_v24 = vpack.c.bf16 %v2223_v23, %v2222_v22  ;;  %v2225_v25 = vld [vmem:[%s6447_s10 + $0x580] sm:$0xff] }
0x213b   :  { %v2107_v62 = vmul.f32 %v4136_v59, %v2099_v10  ;;  %v2120_v12 = vpack.c.bf16 %v2113_v2, %v2112_v43  ;;  %v2240_v26 = vpack.c.bf16 %v2225_v25, %v2224_v14 }
0x213c   :  { %v2106_v13 = vmul.f32 %v4136_v59, %v2098_v58  ;;  %4524 = vmatprep.subr.bf16.mxu0 %v2239_v24 }
0x213d   :  { %4518 = vmatprep.mubr.msk.bf16.mxu1 %vm166_vm1, %v2120_v12  ;;  %v2115_v15 = vadd.f32 %v4137_v3, %v2107_v62  ;;  %4525 = vmatpush3.bf16.msra.mxu0 %v2239_v24 }
0x213e   :  { %v2114_v16 = vadd.f32 %v4137_v3, %v2106_v13  ;;  %4526 = vmatprep.subr.bf16.mxu0 %v2240_v26 }
0x2140   :  { %v2121_v17 = vpack.c.bf16 %v2115_v15, %v2114_v16 }
0x2141   :  { %4527 = vmatpush3.bf16.msra.mxu0 %v2240_v26 }
0x2142   :  { %4519 = vmatmul.mubr.msk.bf16.vlgmr.msra.gmra.mrb[48].mxu1 %vm166_vm1, %v2121_v17  ;;  %4528 = vmatprep.subr.bf16.mxu0 %v2241_v29 }
0x2143   :  { %4550 = vmatprep.mubr.msk.f32.mxu1 %vm4924_vm2, %v5919_v18 }
0x2145   :  { %4529 = vmatpush3.bf16.msra.mxu0 %v2241_v29 }
0x2146   :  { %4530 = vmatprep.subr.bf16.mxu0 %v2242_v33 }
0x2149   :  { %4531 = vmatpush3.bf16.msra.mxu0 %v2242_v33 }
0x214a   :  { %4532 = vmatprep.subr.bf16.mxu0 %v2243_v34 }
0x214d   :  { %4533 = vmatpush3.bf16.msra.mxu0 %v2243_v34 }
0x214e   :  { %4534 = vmatprep.subr.bf16.mxu0 %v2244_v49 }
0x2151   :  { %4535 = vmatpush3.bf16.msra.mxu0 %v2244_v49 }
0x2152   :  { %4536 = vmatprep.subr.bf16.mxu0 %v2245_v51 }
0x2155   :  { %4537 = vmatpush3.bf16.msra.mxu0 %v2245_v51 }
0x2156   :  { %4573 = vmatprep.subr.bf16.mxu0 %v5919_v18 }
0x2215   :  { %v4520_v52 = vpop.f32.mrb[48].mxu1 }
0x2216   :  { %v2178_v7 = vadd.f32 %v4520_v52, %v4138_v40  ;;  %v2169_v45 = vpop.f32.mrb[49].mxu1 }
0x2217   :  { %v2170_v53 = vadd.f32 %v4138_v40, %v2169_v45  ;;  %v4521_v56 = vpop.f32.mrb[50].mxu1 }
0x2218   :  { %v2186_v57 = vmul.f32 %v2178_v7, %v2178_v7  ;;  %v2181_v0 = vadd.f32 %v4521_v56, %v4138_v40  ;;  %v2172_v59 = vpop.f32.mrb[51].mxu1 }
0x2219   :  { %v2184_v61 = vmul.f32 %v2170_v53, %v2170_v53  ;;  %v2173_v48 = vadd.f32 %v4138_v40, %v2172_v59 }
0x221a   :  { %v2190_v42 = vmul.f32 %v2186_v57, %v2178_v7  ;;  %v2187_v63 = vmul.f32 %v2181_v0, %v2181_v0 }
0x221b   :  { %v2188_v3 = vmul.f32 %v2184_v61, %v2170_v53  ;;  %v2185_v1 = vmul.f32 %v2173_v48, %v2173_v48 }
0x221c   :  { %v2194_v4 = vmul.f32 0.044715, %v2190_v42  ;;  %v2191_v6 = vmul.f32 %v2187_v63, %v2181_v0 }
0x221d   :  { %v2192_v10 = vmul.f32 0.044715, %v2188_v3  ;;  %v2189_v43 = vmul.f32 %v2185_v1, %v2173_v48 }
0x221e   :  { %v2198_v2 = vadd.f32 %v2194_v4, %v2178_v7  ;;  %v2195_v58 = vmul.f32 0.044715, %v2191_v6 }
0x221f   :  { %v2196_v62 = vadd.f32 %v2192_v10, %v2170_v53  ;;  %v2193_v12 = vmul.f32 0.044715, %v2189_v43 }
0x2220   :  { %v2202_v13 = vmul.f32 0.7978846, %v2198_v2  ;;  %v2199_v15 = vadd.f32 %v2195_v58, %v2181_v0 }
0x2221   :  { %v2200_v16 = vmul.f32 0.7978846, %v2196_v62  ;;  %v2197_v17 = vadd.f32 %v2193_v12, %v2173_v48 }
0x2222   :  { %4828 = vtanh.f32 %v2202_v13  ;;  %v2203_v54 = vmul.f32 0.7978846, %v2199_v15 }
0x2223   :  { %4830 = vtanh.f32 %v2200_v16  ;;  %v2201_v20 = vmul.f32 0.7978846, %v2197_v17 }
0x2224   :  { %4832 = vtanh.f32 %v2203_v54 }
0x2225   :  { %4834 = vtanh.f32 %v2201_v20 }
0x222c   :  { %v4829_v21 = vpop.eup %4828 }
0x222d   :  { %v4831_v22 = vpop.eup %4830  ;;  %v2210_v23 = vadd.f32 1.0, %v4829_v21  ;;  %v2483_v21 = vld [vmem:[%s6439_s2 + $0x8] sm:$0xff] }
0x222e   :  { %v4833_v24 = vpop.eup %4832  ;;  %v2208_v14 = vadd.f32 1.0, %v4831_v22  ;;  %v2482_v22 = vld [vmem:[%s6439_s2] sm:$0xff] }
0x222f   :  { %v4835_v25 = vpop.eup %4834  ;;  %v2214_v26 = vmul.f32 0.5, %v2210_v23  ;;  %v2211_v28 = vadd.f32 1.0, %v4833_v24  ;;  %v2392_v23 = vld [vmem:[%s6447_s10 + $0x5f0] sm:$0xff]  ;;  %v2393_v24 = vld [vmem:[%s6447_s10 + $0x5f8] sm:$0xff] }
0x2230   :  { %v2209_v50 = vadd.f32 1.0, %v4835_v25  ;;  %v2212_v29 = vmul.f32 0.5, %v2208_v14  ;;  %v4703_v14 = vpack.c.bf16 %v2393_v24, %v2392_v23  ;;  %v2394_v25 = vld [vmem:[%s6447_s10 + $0x600] sm:$0xff] }
0x2231   :  { %v2215_v19 = vmul.f32 0.5, %v2211_v28  ;;  %v2218_v33 = vmul.f32 %v2214_v26, %v2178_v7  ;;  %v2395_v26 = vld [vmem:[%s6447_s10 + $0x608] sm:$0xff] }
0x2232   :  { %v2213_v30 = vmul.f32 0.5, %v2209_v50  ;;  %v2216_v38 = vmul.f32 %v2212_v29, %v2170_v53  ;;  %4704 = vmatpush3.bf16.msra.mxu1 %v4703_v14  ;;  %v4706_v28 = vpack.c.bf16 %v2395_v26, %v2394_v25 }
0x2233   :  { %v2219_v35 = vmul.f32 %v2215_v19, %v2181_v0  ;;  %4705 = vmatprep.subr.bf16.mxu1 %v4928_v55 }
0x2234   :  { %v2217_v34 = vmul.f32 %v2213_v30, %v2173_v48 }
0x2235   :  { %v2237_v41 = vpack.c.bf16 %v2219_v35, %v2218_v33 }
0x2236   :  { %v2236_v46 = vpack.c.bf16 %v2217_v34, %v2216_v38  ;;  %4707 = vmatpush3.bf16.msra.mxu1 %v4706_v28 }
0x2237   :  { %4553 = vmatprep.subr.bf16.mxu1 %v5919_v18 }
0x2238   :  { %4538 = vmatprep.mubr.bf16.mxu0 %v2236_v46 }
0x2239   :  { %4539 = vmatmul.mubr.bf16.vlgmr.msra.gmra.mrb[32].mxu0 %v2237_v41 }
0x223a   :  { %4575 = vmatprep.mubr.msk.bf16.mxu0 %vm4924_vm2, %v5919_v18 }
0x230c   :  { %v4540_v49 = vpop.f32.mrb[32].mxu0 }
0x230d   :  { %v2297_v47 = vadd.f32 %v4540_v49, %v5879_v11  ;;  %v2280_v51 = vpop.f32.mrb[33].mxu0 }
0x230e   :  { %v4541_v40 = vpop.f32.mrb[34].mxu0  ;;  %v2295_v53 = vadd.f32 %v2280_v51, %v5870_v5 }
0x230f   :  { %v2298_v52 = vadd.f32 %v4541_v40, %v5873_v8  ;;  %v2283_v7 = vpop.f32.mrb[35].mxu0  ;;  %v2306_v45 = vadd.f32 %v4141_v44, %v2297_v47  ;;  %v4142_v40 = vld [vmem:[%s6447_s10 + $0x5e0] ss:$0 sm:$0xff] }
0x2310   :  { %v2296_v56 = vadd.f32 %v2283_v7, %v5875_v9  ;;  %v2304_v48 = vadd.f32 %v4141_v44, %v2295_v53 }
0x2311   :  { %v2316_v57 = vsel %vm166_vm1, %v2306_v45, 0.0  ;;  %v2307_v0 = vadd.f32 %v4141_v44, %v2298_v52 }
0x2312   :  { %2317 = vadd.xlane.f32.xlu1 %v2316_v57  ;;  %v2305_v59 = vadd.f32 %v4141_v44, %v2296_v56  ;;  %v2310_v8 = vsel %vm166_vm1, %v2304_v48, 0.0 }
0x2313   :  { %v2319_v11 = vsel %vm166_vm1, %v2307_v0, 0.0 }
0x2314   :  { %v2313_v61 = vsel %vm166_vm1, %v2305_v59, 0.0 }
0x2315   :  { %2314 = vadd.xlane.f32.xlu0 %v2313_v61 }
0x2316   :  { %2320 = vadd.xlane.f32.xlu1 %v2319_v11 }
0x2319   :  { %2311 = vadd.xlane.f32.xlu0 %v2310_v8 }
0x239f   :  { %v2318_v42 = vpop.xlane.xlu1 %2317 }
0x23a0   :  { %v2324_v63 = vmul.f32 0.03125, %v2318_v42 }
0x23a2   :  { %v2328_v5 = vsub.f32 %v2306_v45, %v2324_v63  ;;  %v2315_v3 = vpop.xlane.xlu0 %2314 }
0x23a3   :  { %v2323_v9 = vmul.f32 0.03125, %v2315_v3  ;;  %v2321_v1 = vpop.xlane.xlu1 %2320  ;;  %v2493_v3 = vld [vmem:[%s6447_s10 + $0x620] sm:$0xff] }
0x23a4   :  { %v2325_v4 = vmul.f32 0.03125, %v2321_v1  ;;  %v2332_v6 = vmul.f32 %v2328_v5, %v2328_v5 }
0x23a5   :  { %v2327_v10 = vsub.f32 %v2305_v59, %v2323_v9 }
0x23a6   :  { %v2329_v43 = vsub.f32 %v2307_v0, %v2325_v4  ;;  %v2312_v2 = vpop.xlane.xlu0 %2311  ;;  %v2340_v58 = vsel %vm166_vm1, %v2332_v6, 0.0  ;;  %v4143_v0 = vld [vmem:[%s6447_s10 + $0x5e8] ss:$0 sm:$0xff] }
0x23a7   :  { %v2322_v62 = vmul.f32 0.03125, %v2312_v2  ;;  %2341 = vadd.xlane.f32.xlu1 %v2340_v58  ;;  %v2331_v12 = vmul.f32 %v2327_v10, %v2327_v10  ;;  %v2494_v58 = vld [vmem:[%s6447_s10 + $0x628] sm:$0xff] }
0x23a8   :  { %v2333_v13 = vmul.f32 %v2329_v43, %v2329_v43 }
0x23a9   :  { %v2326_v15 = vsub.f32 %v2304_v48, %v2322_v62  ;;  %v2337_v16 = vsel %vm166_vm1, %v2331_v12, 0.0  ;;  %v2495_v62 = vld [vmem:[%s6447_s10 + $0x630] sm:$0xff] }
0x23aa   :  { %2338 = vadd.xlane.f32.xlu0 %v2337_v16  ;;  %v2343_v17 = vsel %vm166_vm1, %v2333_v13, 0.0  ;;  %v2506_v13 = vpack.c.bf16 %v2495_v62, %v2494_v58  ;;  %v2497_v16 = vld [vmem:[%s6447_s10 + $0x640] sm:$0xff] }
0x23ab   :  { %2344 = vadd.xlane.f32.xlu1 %v2343_v17  ;;  %v2330_v54 = vmul.f32 %v2326_v15, %v2326_v15 }
0x23ad   :  { %v2334_v20 = vsel %vm166_vm1, %v2330_v54, 0.0 }
0x23ae   :  { %2335 = vadd.xlane.f32.xlu0 %v2334_v20  ;;  %v2498_v20 = vld [vmem:[%s6447_s10 + $0x648] sm:$0xff] }
0x23bc   :  { %2488 = vperm.xlu1 %4739, %v2483_v21   ;;  %v2499_v21 = vld [vmem:[%s6447_s10 + $0x650] sm:$0xff] }
0x23bd   :  { %v2508_v23 = vpack.c.bf16 %v2499_v21, %v2498_v20  ;;  %v2646_v21 = vld [vmem:[%s6447_s10 + $0x688] sm:$0xff] }
0x23c4   :  { %2485 = vperm.xlu0 %4738, %v2482_v22  }
0x2434   :  { %v2342_v50 = vpop.xlane.xlu1 %2341 }
0x2435   :  { %v2348_v29 = vmul.f32 0.03125, %v2342_v50 }
0x2437   :  { %v2352_v19 = vadd.f32 1e-12, %v2348_v29  ;;  %v2339_v30 = vpop.xlane.xlu0 %2338  ;;  %v2510_v29 = vld [vmem:[%s6447_s10 + $0x660] sm:$0xff] }
0x2438   :  { %v2347_v33 = vmul.f32 0.03125, %v2339_v30  ;;  %v2345_v35 = vpop.xlane.xlu1 %2344 }
0x2439   :  { %4836 = vrsqrt.f32 %v2352_v19  ;;  %v2349_v38 = vmul.f32 0.03125, %v2345_v35 }
0x243a   :  { %v2351_v34 = vadd.f32 1e-12, %v2347_v33 }
0x243b   :  { %v2353_v41 = vadd.f32 1e-12, %v2349_v38  ;;  %v2336_v46 = vpop.xlane.xlu0 %2335 }
0x243c   :  { %4838 = vrsqrt.f32 %v2351_v34  ;;  %v2346_v49 = vmul.f32 0.03125, %v2336_v46  ;;  %v2489_v22 = vpop.permute.xlu1 %2488 }
0x243d   :  { %4840 = vrsqrt.f32 %v2353_v41  ;;  %vm2491_vm6 = vcmp.eq.s32.totalorder %v5176_v37, %v2489_v22  ;;  %v2647_v22 = vld [vmem:[%s6447_s10 + $0x690] sm:$0xff] }
0x243e   :  { %v2350_v44 = vadd.f32 1e-12, %v2346_v49  ;;  %v4147_v14 = vsel %vm2491_vm6, 1.0, %v5919_v18 }
0x2440   :  { %4842 = vrsqrt.f32 %v2350_v44 }
0x2443   :  { %v4837_v47 = vpop.eup %4836  ;;  %v2486_v17 = vpop.permute.xlu0 %2485 }
0x2444   :  { %v2360_v51 = vmul.f32 %v4837_v47, %v2328_v5  ;;  %v2492_v5 = vld [vmem:[%s6447_s10 + $0x618] sm:$0xff]  ;;  %vm2490_vm5 = vcmp.eq.s32.totalorder %v5176_v37, %v2486_v17 }
0x2445   :  { %v4146_v24 = vsel %vm2490_vm5, 1.0, %v5919_v18  ;;  %v2509_v37 = vld [vmem:[%s6447_s10 + $0x658] sm:$0xff] }
0x2446   :  { %v4839_v52 = vpop.eup %4838  ;;  %v2368_v53 = vmul.f32 %v4142_v40, %v2360_v51  ;;  %v2504_v25 = vpack.c.bf16 %v4147_v14, %v4146_v24  ;;  %v2648_v24 = vld [vmem:[%s6447_s10 + $0x698] sm:$0xff]  ;;  %v2649_v14 = vld [vmem:[%s6447_s10 + $0x6a0] sm:$0xff] }
0x2447   :  { %v4841_v7 = vpop.eup %4840  ;;  %v2359_v45 = vmul.f32 %v4839_v52, %v2327_v10 }
0x2448   :  { %v2361_v56 = vmul.f32 %v4841_v7, %v2329_v43  ;;  %v2376_v8 = vadd.f32 %v4143_v0, %v2368_v53  ;;  %v2505_v43 = vpack.c.bf16 %v2493_v3, %v2492_v5  ;;  %v4150_v5 = vld [vmem:[%s6447_s10 + $0x670] ss:$0 sm:$0xff] }
0x2449   :  { %v2367_v57 = vmul.f32 %v4142_v40, %v2359_v45 }
0x244a   :  { %v4843_v59 = vpop.eup %4842  ;;  %v2369_v61 = vmul.f32 %v4142_v40, %v2361_v56  ;;  %v2382_v4 = vrot.slane %v2376_v8, 6  ;;  %v4149_v8 = vld [vmem:[%s6447_s10 + $0x668] ss:$0 sm:$0xff] }
0x244b   :  { %v2358_v48 = vmul.f32 %v4843_v59, %v2326_v15  ;;  %v2375_v11 = vadd.f32 %v4143_v0, %v2367_v57  ;;  %v2496_v15 = vld [vmem:[%s6447_s10 + $0x638] sm:$0xff] }
0x244c   :  { %v2377_v63 = vadd.f32 %v4143_v0, %v2369_v61  ;;  %v2507_v54 = vpack.c.bf16 %v2497_v16, %v2496_v15 }
0x244d   :  { %v2366_v42 = vmul.f32 %v4142_v40, %v2358_v48  ;;  %v2379_v1 = vrot.slane %v2375_v11, 7 }
0x244e   :  { %v2385_v6 = vrot.slane %v2377_v63, 5 }
0x244f   :  { %v2374_v9 = vadd.f32 %v4143_v0, %v2366_v42 }
0x2451   :  { %v2387_v10 = vsel %vm680_vm9, %v2374_v9, %v2379_v1 }
0x2452   :  { %v2389_v2 = vsel %vm2388_vm3, %v2387_v10, %v2382_v4 }
0x2453   :  { %v2391_v12 = vsel %vm2390_vm4, %v2389_v2, %v2385_v6 }
0x2454   :  { %4551 = vmatmul.mubr.msk.f32.vlgmr.msra.gmra.mrb[52].mxu1 %vm166_vm1, %v2391_v12 }
0x2455   :  { %4554 = vmatpush3.bf16.msra.mxu1 %v2505_v43  ;;  %4561 = vmatprep.mubr.msk.bf16.mxu1 %vm4924_vm2, %v5919_v18 }
0x2456   :  { %4555 = vmatprep.subr.bf16.mxu1 %v5919_v18 }
0x2459   :  { %4556 = vmatpush3.bf16.msra.mxu1 %v2506_v13 }
0x245a   :  { %4557 = vmatprep.subr.bf16.mxu1 %v5919_v18 }
0x245d   :  { %4558 = vmatpush3.bf16.msra.mxu1 %v2507_v54 }
0x245e   :  { %4559 = vmatprep.subr.bf16.mxu1 %v5919_v18 }
0x2461   :  { %4560 = vmatpush3.bf16.msra.mxu1 %v2508_v23  ;;  %v2651_v23 = vpack.c.bf16 %v2647_v22, %v2646_v21 }
0x2462   :  { %4565 = vmatprep.subr.bf16.mxu1 %v5919_v18 }
0x2464   :  { %4562 = vmatmul.mubr.msk.bf16.vlgmr.msra.gmra.mrb[56].mxu1 %vm119_vm0, %v2504_v25  ;;  %v2652_v25 = vpack.c.bf16 %v2649_v14, %v2648_v24  ;;  %v2828_v24 = vld [vmem:[%s6447_s10 + $0x6b8] sm:$0xff]  ;;  %vm765_vm0 = vcmask 123904  }
0x2465   :  { %4569 = vmatprep.mubr.msk.bf16.mxu1 %vm4924_vm2, %v5919_v18  ;;  %4566 = vmatpush3.bf16.msra.mxu1 %v2651_v23  ;;  %v2827_v23 = vld [vmem:[%s6447_s10 + $0x6b0] sm:$0xff] }
0x2466   :  { %4567 = vmatprep.subr.bf16.mxu1 %v5919_v18  ;;  %v2832_v14 = vpack.c.bf16 %v2828_v24, %v2827_v23 }
0x2469   :  { %4568 = vmatpush3.bf16.msra.mxu1 %v2652_v25 }
0x246a   :  { %4579 = vmatprep.subr.bf16.mxu1 %v5919_v18 }
0x2527   :  { %v6058_v26 = vpop.f32.mrb[52].mxu1 }
0x2528   :  { %v4552_v28 = vpop.f32.mrb[53].mxu1 }
0x2537   :  { %v2548_v50 = vpop.f32.mrb[56].mxu1 }
0x2538   :  { %v2549_v19 = vadd.f32 %v2548_v50, %v2509_v37  ;;  %v4563_v30 = vpop.f32.mrb[57].mxu1 }
0x2539   :  { %v2551_v33 = vpop.f32.mrb[58].mxu1 }
0x253a   :  { %v2552_v35 = vadd.f32 %v2551_v33, %v2510_v29  ;;  %v4564_v38 = vpop.f32.mrb[59].mxu1  ;;  %v2557_v34 = vsel %vm166_vm1, %v2549_v19, 0.0 }
0x253b   :  { %2558 = vadd.xlane.f32.xlu1 %v2557_v34 }
0x253c   :  { %v2560_v41 = vsel %vm166_vm1, %v2552_v35, 0.0 }
0x253d   :  { %2561 = vadd.xlane.f32.xlu0 %v2560_v41 }
0x25c8   :  { %v2559_v46 = vpop.xlane.xlu1 %2558 }
0x25c9   :  { %v2563_v49 = vmul.f32 0.03125, %v2559_v46 }
0x25ca   :  { %v2562_v44 = vpop.xlane.xlu0 %2561 }
0x25cb   :  { %v2565_v47 = vsub.f32 %v2549_v19, %v2563_v49  ;;  %v2564_v51 = vmul.f32 0.03125, %v2562_v44  ;;  %v4153_v49 = vld [vmem:[%s6447_s10 + $0x680] ss:$0 sm:$0xff] }
0x25cd   :  { %v2566_v40 = vsub.f32 %v2552_v35, %v2564_v51  ;;  %v2567_v52 = vmul.f32 %v2565_v47, %v2565_v47  ;;  %v4152_v35 = vld [vmem:[%s6447_s10 + $0x678] ss:$0 sm:$0xff] }
0x25cf   :  { %v2569_v7 = vsel %vm166_vm1, %v2567_v52, 0.0  ;;  %v2568_v45 = vmul.f32 %v2566_v40, %v2566_v40  ;;  %v4154_v52 = vld [vmem:[%s6447_s10 + $0x6a8] ss:$0 sm:$0xff] }
0x25d0   :  { %2570 = vadd.xlane.f32.xlu0 %v2569_v7 }
0x25d1   :  { %v2572_v53 = vsel %vm166_vm1, %v2568_v45, 0.0 }
0x25d2   :  { %2573 = vadd.xlane.f32.xlu1 %v2572_v53 }
0x265d   :  { %v2571_v56 = vpop.xlane.xlu0 %2570 }
0x265e   :  { %v2575_v57 = vmul.f32 0.03125, %v2571_v56 }
0x265f   :  { %v2574_v0 = vpop.xlane.xlu1 %2573 }
0x2660   :  { %v2577_v59 = vadd.f32 1e-12, %v2575_v57  ;;  %v2576_v61 = vmul.f32 0.03125, %v2574_v0 }
0x2662   :  { %4844 = vrsqrt.f32 %v2577_v59  ;;  %v2578_v48 = vadd.f32 1e-12, %v2576_v61 }
0x2664   :  { %4846 = vrsqrt.f32 %v2578_v48 }
0x266c   :  { %v4845_v11 = vpop.eup %4844 }
0x266d   :  { %v2581_v42 = vmul.f32 %v4845_v11, %v2565_v47  ;;  %v2595_v11 = vld [vmem:[%s6441_s4] sm:$0x1] }
0x266e   :  { %v4847_v63 = vpop.eup %4846 }
0x266f   :  { %v2587_v3 = vmul.f32 %v4149_v8, %v2581_v42  ;;  %v2582_v9 = vmul.f32 %v4847_v63, %v2566_v40 }
0x2671   :  { %v6076_v1 = vadd.f32 %v4150_v5, %v2587_v3  ;;  %v2588_v4 = vmul.f32 %v4149_v8, %v2582_v9  ;;  %v4151_v8 = vadd.f32 -1.0, %v2595_v11 }
0x2673   :  { %v2608_v6 = vsel %vm166_vm1, %v6076_v1, 0.0  ;;  %v6080_v10 = vadd.f32 %v4150_v5, %v2588_v4  ;;  %v2597_v42 = vmul.f32 1e+09, %v4151_v8 }
0x2674   :  { %2609 = vadd.xlane.f32.xlu0 %v2608_v6 }
0x2675   :  { %v2611_v43 = vsel %vm166_vm1, %v6080_v10, 0.0  ;;  %v2602_v63 = vrot.slane %v2597_v42, %v1641_v27 }
0x2676   :  { %2612 = vadd.xlane.f32.xlu1 %v2611_v43 }
0x2677   :  { %v2604_v5 = vadd.f32 %v2602_v63, %v5824_v31  ;;  %v2605_v6 = vadd.f32 %v2602_v63, %v5830_v32 }
0x2701   :  { %v2610_v2 = vpop.xlane.xlu0 %2609 }
0x2702   :  { %v2614_v58 = vmul.f32 0.03125, %v2610_v2 }
0x2703   :  { %v2613_v62 = vpop.xlane.xlu1 %2612 }
0x2704   :  { %v2616_v12 = vsub.f32 %v6076_v1, %v2614_v58  ;;  %v2615_v13 = vmul.f32 0.03125, %v2613_v62 }
0x2706   :  { %v2617_v15 = vsub.f32 %v6080_v10, %v2615_v13  ;;  %v2618_v16 = vmul.f32 %v2616_v12, %v2616_v12 }
0x2708   :  { %v2620_v17 = vsel %vm166_vm1, %v2618_v16, 0.0  ;;  %v2619_v54 = vmul.f32 %v2617_v15, %v2617_v15 }
0x2709   :  { %2621 = vadd.xlane.f32.xlu0 %v2620_v17 }
0x270a   :  { %v2623_v20 = vsel %vm166_vm1, %v2619_v54, 0.0 }
0x270b   :  { %2624 = vadd.xlane.f32.xlu1 %v2623_v20 }
0x2796   :  { %v2622_v28 = vpop.xlane.xlu0 %2621 }
0x2797   :  { %v2626_v37 = vmul.f32 0.03125, %v2622_v28 }
0x2798   :  { %v2625_v50 = vpop.xlane.xlu1 %2624 }
0x2799   :  { %v2628_v29 = vadd.f32 1e-12, %v2626_v37  ;;  %v2627_v19 = vmul.f32 0.03125, %v2625_v50 }
0x279b   :  { %4848 = vrsqrt.f32 %v2628_v29  ;;  %v2629_v30 = vadd.f32 1e-12, %v2627_v19 }
0x279d   :  { %4850 = vrsqrt.f32 %v2629_v30 }
0x27a5   :  { %v4849_v33 = vpop.eup %4848 }
0x27a6   :  { %v2632_v38 = vmul.f32 %v4849_v33, %v2616_v12 }
0x27a7   :  { %v4851_v34 = vpop.eup %4850 }
0x27a8   :  { %v2638_v41 = vmul.f32 %v4152_v35, %v2632_v38  ;;  %v2633_v46 = vmul.f32 %v4851_v34, %v2617_v15  ;;  %v2830_v38 = vld [vmem:[%s6447_s10 + $0x6c8] sm:$0xff] }
0x27aa   :  { %v2639_v44 = vmul.f32 %v4152_v35, %v2633_v46  ;;  %v2644_v47 = vadd.f32 %v4153_v49, %v2638_v41  ;;  %v2829_v35 = vld [vmem:[%s6447_s10 + $0x6c0] sm:$0xff] }
0x27ab   :  { %v2833_v34 = vpack.c.bf16 %v2830_v38, %v2829_v35  ;;  %v3006_v35 = vld [vmem:[%s6447_s10 + $0x738] sm:$0xff] }
0x27ac   :  { %v2645_v51 = vadd.f32 %v4153_v49, %v2639_v44 }
0x27ae   :  { %v2650_v40 = vpack.c.bf16 %v2645_v51, %v2644_v47 }
0x27b0   :  { %4570 = vmatmul.mubr.msk.bf16.vlgmr.msra.gmra.mrb[60].mxu1 %vm166_vm1, %v2650_v40  ;;  %v4159_v40 = vld [vmem:[%s6447_s10 + $0x6d0] ss:$0 sm:$0xff] }
0x27b1   :  { %4581 = vmatprep.mubr.msk.bf16.mxu1 %vm4924_vm2, %v5919_v18 }
0x2883   :  { %v2695_v7 = vpop.f32.mrb[60].mxu1 }
0x2884   :  { %v4571_v45 = vpop.f32.mrb[61].mxu1  ;;  %v2696_v56 = vadd.f32 %v4154_v52, %v2695_v7 }
0x2885   :  { %v2698_v53 = vpop.f32.mrb[62].mxu1 }
0x2886   :  { %v2699_v57 = vadd.f32 %v4154_v52, %v2698_v53  ;;  %v4572_v0 = vpop.f32.mrb[63].mxu1 }
0x2888   :  { %v2702_v59 = vpack.c.bf16 %v2699_v57, %v2696_v56 }
0x288a   :  { %2704 = vrot.lane.b32.xlu0 %v2702_v59, %s4925_s24 }
0x28fc   :  { %v2705_v61 = vpop.permute.xlu0 %2704 }
0x28fd   :  { %v2710_v48 = vsel %vm166_vm1, %v2705_v61, 0 }
0x28fe   :  { %4574 = vmatpush3.bf16.xpose.msra.mxu0 %v2710_v48 }
0x28ff   :  { %4585 = vmatprep.subr.bf16.mxu0 %v5919_v18 }
0x2905   :  { %4576 = vmatmul.mubr.msk.bf16.vlgmr.msra.gmra.mrb[36].mxu0 %vm166_vm1, %v2702_v59 }
0x2906   :  { %4589 = vmatprep.mubr.msk.bf16.mxu0 %vm4924_vm2, %v5919_v18  ;;  %4586 = vmatpush3.bf16.msra.mxu0 %v2832_v14 }
0x2907   :  { %4587 = vmatprep.subr.bf16.mxu0 %v5919_v18 }
0x290a   :  { %4588 = vmatpush3.bf16.msra.mxu0 %v2833_v34  ;;  %v3007_v34 = vld [vmem:[%s6447_s10 + $0x740] sm:$0xff] }
0x290b   :  { %4601 = vmatprep.subr.bf16.mxu0 %v5919_v18 }
0x29d8   :  { %v2746_v3 = vpop.f32.mrb[36].mxu0 }
0x29d9   :  { %v2753_v9 = vmul.f32 0.17677669, %v2746_v3  ;;  %v4577_v4 = vpop.f32.mrb[37].mxu0 }
0x29da   :  { %v2749_v43 = vpop.f32.mrb[38].mxu0  ;;  %v2927_v4 = vld [vmem:[%s6447_s10 + $0x6e8] sm:$0xff] }
0x29db   :  { %v2755_v2 = vadd.f32 %v2753_v9, %v2604_v5  ;;  %v2754_v58 = vmul.f32 0.17677669, %v2749_v43  ;;  %v4578_v62 = vpop.f32.mrb[39].mxu0 }
0x29dd   :  { %v2756_v12 = vadd.f32 %v2754_v58, %v2605_v6  ;;  %v2757_v13 = vsel %vm317_vm8, %v2755_v2, -inf  ;;  %v2928_v6 = vld [vmem:[%s6447_s10 + $0x6f0] sm:$0xff]  ;;  %v2930_v58 = vld [vmem:[%s6447_s10 + $0x700] sm:$0xff] }
0x29de   :  { %2758 = vmax.xlane.f32.xlu1 %v2757_v13  ;;  %v2932_v43 = vpack.c.bf16 %v2928_v6, %v2927_v4 }
0x29df   :  { %v2760_v15 = vsel %vm317_vm8, %v2756_v12, -inf }
0x29e2   :  { %2761 = vmax.xlane.f32.xlu1 %v2760_v15 }
0x2a6b   :  { %v2759_v36 = vpop.xlane.xlu1 %2758 }
0x2a6c   :  { %v2763_v27 = vsub.f32 %v2755_v2, %v2759_v36  ;;  %v2929_v2 = vld [vmem:[%s6447_s10 + $0x6f8] sm:$0xff] }
0x2a6d   :  { %v2933_v62 = vpack.c.bf16 %v2930_v58, %v2929_v2 }
0x2a6e   :  { %v2765_v16 = vmul.f32 1.442695, %v2763_v27 }
0x2a6f   :  { %v2762_v31 = vpop.xlane.xlu1 %2761 }
0x2a70   :  { %4852 = vpow2.f32 %v2765_v16  ;;  %v2764_v17 = vsub.f32 %v2756_v12, %v2762_v31 }
0x2a72   :  { %v2767_v54 = vmul.f32 1.442695, %v2764_v17 }
0x2a74   :  { %4854 = vpow2.f32 %v2767_v54  ;;  %v4160_v54 = vld [vmem:[%s6447_s10 + $0x6d8] ss:$0 sm:$0xff] }
0x2a7a   :  { %v4853_v32 = vpop.eup %4852 }
0x2a7b   :  { %v2769_v20 = vsel %vm317_vm8, %v4853_v32, 0.0 }
0x2a7c   :  { %2770 = vadd.xlane.f32.xlu1 %v2769_v20 }
0x2a7e   :  { %v4855_v21 = vpop.eup %4854 }
0x2a7f   :  { %v2772_v22 = vsel %vm317_vm8, %v4855_v21, 0.0 }
0x2a80   :  { %2773 = vadd.xlane.f32.xlu1 %v2772_v22  ;;  %v4161_v22 = vld [vmem:[%s6447_s10 + $0x6e0] ss:$0 sm:$0xff] }
0x2a91   :  { %2780 = vrot.lane.b32.xlu1 %v2702_v59, %s4927_s25 }
0x2b09   :  { %v2771_v25 = vpop.xlane.xlu1 %2770 }
0x2b0a   :  { %4856 = vrcp.f32 %v2771_v25 }
0x2b0d   :  { %v2774_v28 = vpop.xlane.xlu1 %2773 }
0x2b0e   :  { %4858 = vrcp.f32 %v2774_v28  ;;  %v3001_v28 = vld [vmem:[%s6447_s10 + $0x710] sm:$0xff] }
0x2b11   :  { %v2781_v37 = vpop.permute.xlu1 %2780 }
0x2b12   :  { %4580 = vmatpush3.bf16.msra.mxu1 %v2781_v37  ;;  %v3002_v37 = vld [vmem:[%s6447_s10 + $0x718] sm:$0xff] }
0x2b13   :  { %4593 = vmatprep.subr.bf16.mxu1 %v5919_v18 }
0x2b14   :  { %v4857_v50 = vpop.eup %4856 }
0x2b15   :  { %v2777_v19 = vmul.f32 %v4857_v50, %v4853_v32  ;;  %v3018_v50 = vpack.c.bf16 %v3002_v37, %v3001_v28 }
0x2b18   :  { %v4859_v29 = vpop.eup %4858 }
0x2b19   :  { %v2778_v30 = vmul.f32 %v4859_v29, %v4855_v21  ;;  %v3003_v29 = vld [vmem:[%s6447_s10 + $0x720] sm:$0xff] }
0x2b1b   :  { %v2779_v33 = vpack.c.bf16 %v2778_v30, %v2777_v19  ;;  %v3004_v19 = vld [vmem:[%s6447_s10 + $0x728] sm:$0xff] }
0x2b1c   :  { %v3019_v30 = vpack.c.bf16 %v3004_v19, %v3003_v29 }
0x2b1d   :  { %4582 = vmatmul.mubr.msk.bf16.vlgmr.msra.gmra.mrb[64].mxu1 %vm317_vm8, %v2779_v33  ;;  %v3005_v33 = vld [vmem:[%s6447_s10 + $0x730] sm:$0xff] }
0x2b1e   :  { %4597 = vmatprep.mubr.msk.bf16.mxu1 %vm4924_vm2, %v5919_v18  ;;  %4594 = vmatpush3.bf16.msra.mxu1 %v2932_v43  ;;  %v3020_v38 = vpack.c.bf16 %v3006_v35, %v3005_v33 }
0x2b1f   :  { %4595 = vmatprep.subr.bf16.mxu1 %v5919_v18 }
0x2b22   :  { %4596 = vmatpush3.bf16.msra.mxu1 %v2933_v62 }
0x2b23   :  { %4708 = vmatprep.subr.bf16.mxu1 %v4928_v55 }
0x2bf0   :  { %v2820_v41 = vpop.f32.mrb[64].mxu1 }
0x2bf1   :  { %v4583_v46 = vpop.f32.mrb[65].mxu1 }
0x2bf2   :  { %v2823_v49 = vpop.f32.mrb[66].mxu1 }
0x2bf3   :  { %v2831_v44 = vpack.c.bf16 %v2823_v49, %v2820_v41  ;;  %v4584_v47 = vpop.f32.mrb[67].mxu1  ;;  %v3008_v41 = vld [vmem:[%s6447_s10 + $0x748] sm:$0xff]  ;;  %v3009_v49 = vld [vmem:[%s6447_s10 + $0x750] sm:$0xff] }
0x2bf4   :  { %v3021_v46 = vpack.c.bf16 %v3008_v41, %v3007_v34 }
0x2bf5   :  { %4590 = vmatmul.mubr.msk.bf16.vlgmr.msra.gmra.mrb[40].mxu0 %vm166_vm1, %v2831_v44  ;;  %v3010_v44 = vld [vmem:[%s6447_s10 + $0x758] sm:$0xff] }
0x2bf6   :  { %4617 = vmatprep.mubr.msk.bf16.mxu0 %vm4924_vm2, %v5919_v18  ;;  %4602 = vmatpush3.bf16.msra.mxu0 %v3018_v50  ;;  %v3022_v47 = vpack.c.bf16 %v3010_v44, %v3009_v49  ;;  %v4144_v49 = vld [vmem:[%s6447_s10 + $0x610] ss:$0 sm:$0xff] }
0x2bf7   :  { %4603 = vmatprep.subr.bf16.mxu0 %v5919_v18 }
0x2bfa   :  { %4604 = vmatpush3.bf16.msra.mxu0 %v3019_v30 }
0x2bfb   :  { %4605 = vmatprep.subr.bf16.mxu0 %v5919_v18 }
0x2bfe   :  { %4606 = vmatpush3.bf16.msra.mxu0 %v3020_v38 }
0x2bff   :  { %4607 = vmatprep.subr.bf16.mxu0 %v5919_v18 }
0x2c02   :  { %4608 = vmatpush3.bf16.msra.mxu0 %v3021_v46 }
0x2c03   :  { %4609 = vmatprep.subr.bf16.mxu0 %v5919_v18 }
0x2c06   :  { %4610 = vmatpush3.bf16.msra.mxu0 %v3022_v47 }
0x2c07   :  { %4611 = vmatprep.subr.bf16.mxu0 %v5919_v18 }
0x2cc8   :  { %v2871_v51 = vpop.f32.mrb[40].mxu0 }
0x2cc9   :  { %v2878_v52 = vadd.f32 %v2871_v51, %v6076_v1  ;;  %v4591_v7 = vpop.f32.mrb[41].mxu0  ;;  %v3011_v51 = vld [vmem:[%s6447_s10 + $0x760] sm:$0xff] }
0x2cca   :  { %v2874_v45 = vpop.f32.mrb[42].mxu0  ;;  %v3013_v7 = vld [vmem:[%s6447_s10 + $0x770] sm:$0xff] }
0x2ccb   :  { %v6157_v53 = vadd.f32 %v4159_v40, %v2878_v52  ;;  %v2879_v56 = vadd.f32 %v2874_v45, %v6080_v10  ;;  %v4592_v57 = vpop.f32.mrb[43].mxu0  ;;  %v3014_v45 = vld [vmem:[%s6447_s10 + $0x778] sm:$0xff] }
0x2ccc   :  { %v3015_v57 = vld [vmem:[%s6447_s10 + $0x780] sm:$0xff] }
0x2ccd   :  { %v6160_v0 = vadd.f32 %v4159_v40, %v2879_v56  ;;  %v2889_v59 = vsel %vm166_vm1, %v6157_v53, 0.0  ;;  %v3012_v40 = vld [vmem:[%s6447_s10 + $0x768] sm:$0xff]  ;;  %v3024_v56 = vpack.c.bf16 %v3014_v45, %v3013_v7 }
0x2cce   :  { %2890 = vadd.xlane.f32.xlu0 %v2889_v59  ;;  %v3023_v52 = vpack.c.bf16 %v3012_v40, %v3011_v51  ;;  %v3016_v59 = vld [vmem:[%s6447_s10 + $0x788] sm:$0xff]  ;;  %v2471_v51 = vadd.f32 %v4144_v49, %v6058_v26 }
0x2ccf   :  { %v2892_v61 = vsel %vm166_vm1, %v6160_v0, 0.0  ;;  %v3120_v45 = vld [vmem:[%s6447_s10 + $0x7a8] sm:$0xff] }
0x2cd0   :  { %2893 = vadd.xlane.f32.xlu1 %v2892_v61  ;;  %4612 = vmatpush3.bf16.msra.mxu0 %v3023_v52  ;;  %v3025_v61 = vpack.c.bf16 %v3016_v59, %v3015_v57  ;;  %v3122_v57 = vld [vmem:[%s6447_s10 + $0x7b8] sm:$0xff]  ;;  %v3123_v59 = vld [vmem:[%s6447_s10 + $0x7c0] sm:$0xff] }
0x2cd1   :  { %4613 = vmatprep.subr.bf16.mxu0 %v5919_v18 }
0x2cd4   :  { %4614 = vmatpush3.bf16.msra.mxu0 %v3024_v56  ;;  %v3121_v56 = vld [vmem:[%s6447_s10 + $0x7b0] sm:$0xff] }
0x2cd5   :  { %4615 = vmatprep.subr.bf16.mxu0 %v5919_v18  ;;  %v4709_v26 = vpack.c.bf16 %v3121_v56, %v3120_v45 }
0x2cd8   :  { %4616 = vmatpush3.bf16.msra.mxu0 %v3025_v61  ;;  %v3209_v61 = vld [vmem:[%s6444_s7] sm:$0xff] }
0x2cd9   :  { %4723 = vmatprep.subr.bf16.mxu0 %v4928_v55 }
0x2d5b   :  { %v2891_v48 = vpop.xlane.xlu0 %2890 }
0x2d5c   :  { %v2895_v11 = vmul.f32 0.03125, %v2891_v48  ;;  %v4162_v48 = vld [vmem:[%s6447_s10 + $0x708] ss:$0 sm:$0xff] }
0x2d5d   :  { %v2894_v1 = vpop.xlane.xlu1 %2893 }
0x2d5e   :  { %v2897_v8 = vsub.f32 %v6157_v53, %v2895_v11  ;;  %v2896_v42 = vmul.f32 0.03125, %v2894_v1 }
0x2d60   :  { %v2898_v63 = vsub.f32 %v6160_v0, %v2896_v42  ;;  %v2899_v10 = vmul.f32 %v2897_v8, %v2897_v8 }
0x2d62   :  { %v2901_v5 = vsel %vm166_vm1, %v2899_v10, 0.0  ;;  %v2900_v3 = vmul.f32 %v2898_v63, %v2898_v63 }
0x2d63   :  { %2902 = vadd.xlane.f32.xlu0 %v2901_v5 }
0x2d64   :  { %v2904_v9 = vsel %vm166_vm1, %v2900_v3, 0.0 }
0x2d67   :  { %2905 = vadd.xlane.f32.xlu0 %v2904_v9 }
0x2df0   :  { %v2903_v12 = vpop.xlane.xlu0 %2902 }
0x2df1   :  { %v2907_v13 = vmul.f32 0.03125, %v2903_v12 }
0x2df3   :  { %v2909_v15 = vadd.f32 1e-12, %v2907_v13 }
0x2df4   :  { %v2906_v36 = vpop.xlane.xlu0 %2905 }
0x2df5   :  { %4860 = vrsqrt.f32 %v2909_v15  ;;  %v2908_v27 = vmul.f32 0.03125, %v2906_v36 }
0x2df7   :  { %v2910_v16 = vadd.f32 1e-12, %v2908_v27 }
0x2df9   :  { %4862 = vrsqrt.f32 %v2910_v16 }
0x2dff   :  { %v4861_v31 = vpop.eup %4860 }
0x2e00   :  { %v2913_v17 = vmul.f32 %v4861_v31, %v2897_v8 }
0x2e02   :  { %v2919_v20 = vmul.f32 %v4160_v54, %v2913_v17 }
0x2e03   :  { %v4863_v32 = vpop.eup %4862 }
0x2e04   :  { %v2914_v21 = vmul.f32 %v4863_v32, %v2898_v63  ;;  %v2925_v24 = vadd.f32 %v4161_v22, %v2919_v20  ;;  %v6255_v32 = vld [vmem:[%s6448_s11 + $0x10] sm:$0xff] }
0x2e06   :  { %v2920_v23 = vmul.f32 %v4160_v54, %v2914_v21 }
0x2e08   :  { %v2926_v14 = vadd.f32 %v4161_v22, %v2920_v23 }
0x2e0a   :  { %v2931_v25 = vpack.c.bf16 %v2926_v14, %v2925_v24 }
0x2e0c   :  { %4598 = vmatmul.mubr.msk.bf16.vlgmr.msra.gmra.mrb[68].mxu1 %vm166_vm1, %v2931_v25  ;;  %v4164_v25 = vld [vmem:[%s6447_s10 + $0x790] ss:$0 sm:$0xff] }
0x2e0d   :  { %4629 = vmatprep.mubr.msk.f32.mxu1 %vm4924_vm2, %v5919_v18  ;;  %4710 = vmatpush3.bf16.msra.mxu1 %v4709_v26 }
0x2e0e   :  { %4711 = vmatprep.subr.bf16.mxu1 %v4928_v55 }
0x2edf   :  { %v2976_v11 = vpop.f32.mrb[68].mxu1 }
0x2ee0   :  { %v2977_v1 = vadd.f32 %v4162_v48, %v2976_v11  ;;  %v4599_v8 = vpop.f32.mrb[69].mxu1  ;;  %v3210_v11 = vld [vmem:[%s6444_s7 + $0x8] sm:$0xff] }
0x2ee1   :  { %v2979_v18 = vpop.f32.mrb[70].mxu1 }
0x2ee2   :  { %v2983_v42 = vmul.f32 %v2977_v1, %v2977_v1  ;;  %v2980_v63 = vadd.f32 %v4162_v48, %v2979_v18  ;;  %v4600_v10 = vpop.f32.mrb[71].mxu1  ;;  %v4712_v48 = vpack.c.bf16 %v3123_v59, %v3122_v57 }
0x2ee4   :  { %v2985_v5 = vmul.f32 %v2983_v42, %v2977_v1  ;;  %v2984_v3 = vmul.f32 %v2980_v63, %v2980_v63  ;;  %4713 = vmatpush3.bf16.msra.mxu1 %v4712_v48 }
0x2ee5   :  { %4632 = vmatprep.subr.mxu1 %v6255_v32 }
0x2ee6   :  { %v2987_v9 = vmul.f32 0.044715, %v2985_v5  ;;  %v2986_v4 = vmul.f32 %v2984_v3, %v2980_v63 }
0x2ee8   :  { %v2989_v6 = vadd.f32 %v2987_v9, %v2977_v1  ;;  %v2988_v43 = vmul.f32 0.044715, %v2986_v4 }
0x2eea   :  { %v2991_v2 = vmul.f32 0.7978846, %v2989_v6  ;;  %v2990_v58 = vadd.f32 %v2988_v43, %v2980_v63  ;;  %v4165_v43 = vld [vmem:[%s6447_s10 + $0x798] ss:$0 sm:$0xff] }
0x2eec   :  { %4864 = vtanh.f32 %v2991_v2  ;;  %v2992_v62 = vmul.f32 0.7978846, %v2990_v58  ;;  %v4166_v58 = vld [vmem:[%s6447_s10 + $0x7a0] ss:$0 sm:$0xff] }
0x2eee   :  { %4866 = vtanh.f32 %v2992_v62 }
0x2ef6   :  { %v4865_v12 = vpop.eup %4864 }
0x2ef7   :  { %v2995_v13 = vadd.f32 1.0, %v4865_v12 }
0x2ef8   :  { %v4867_v15 = vpop.eup %4866 }
0x2ef9   :  { %v2997_v36 = vmul.f32 0.5, %v2995_v13  ;;  %v2996_v27 = vadd.f32 1.0, %v4867_v15 }
0x2efb   :  { %v2998_v16 = vmul.f32 0.5, %v2996_v27  ;;  %v2999_v31 = vmul.f32 %v2997_v36, %v2977_v1  ;;  %v6300_v1 = vpack.c.bf16 %v3210_v11, %v3209_v61 }
0x2efd   :  { %v3000_v17 = vmul.f32 %v2998_v16, %v2980_v63 }
0x2eff   :  { %v3017_v54 = vpack.c.bf16 %v3000_v17, %v2999_v31 }
0x2f01   :  { %4618 = vmatmul.mubr.bf16.vlgmr.msra.gmra.mrb[44].mxu0 %v3017_v54 }
0x2f02   :  { %4677 = vmatprep.mubr.msk.f32.mxu0 %vm4924_vm2, %v6255_v32  ;;  %4725 = vmatpush3.bf16.msra.mxu0 %v6300_v1 }
0x2f03   :  { %4685 = vmatprep.subr.mxu0 %v6255_v32 }
0x2fd4   :  { %v3060_v20 = vpop.f32.mrb[44].mxu0 }
0x2fd5   :  { %v4619_v21 = vpop.f32.mrb[45].mxu0  ;;  %v3067_v23 = vadd.f32 %v3060_v20, %v6157_v53  ;;  %v4113_v53 = vld [vmem:[%s6447_s10 + $0x448] ss:$0 sm:$0xff]  ;;  %v4095_v20 = vld [vmem:[%s6447_s10 + $0x220] ss:$0 sm:$0xff] }
0x2fd6   :  { %v3063_v22 = vpop.f32.mrb[46].mxu0  ;;  %v6270_v34 = vadd.f32 %v4113_v53, %v5721_v39  ;;  %v2474_v39 = vmul.f32 %v2471_v51, %v2471_v51  ;;  %v4167_v21 = vld [vmem:[%s6447_s10 + $0x7c8] ss:$0 sm:$0xff] }
0x2fd7   :  { %v3068_v24 = vadd.f32 %v3063_v22, %v6160_v0  ;;  %v4620_v14 = vpop.f32.mrb[47].mxu0  ;;  %v3074_v37 = vadd.f32 %v4164_v25, %v3067_v23  ;;  %v761_v23 = vadd.f32 %v4095_v20, %v5462_v60 }
0x2fd8   :  { %v1447_v47 = vmul.f32 %v6270_v34, %v6270_v34  ;;  %v2476_v7 = vsel %vm2475_vm7, %v2474_v39, 0.0 }
0x2fd9   :  { %v3075_v28 = vadd.f32 %v4164_v25, %v3068_v24  ;;  %v3078_v29 = vsel %vm166_vm1, %v3074_v37, 0.0 }
0x2fda   :  { %v1448_v52 = vsel %vm765_vm0, %v1447_v47, 0.0 }
0x2fdb   :  { %v3081_v50 = vsel %vm166_vm1, %v3075_v28, 0.0 }
0x2fdc   :  { %3082 = vadd.xlane.f32.xlu0 %v3081_v50  ;;  %v764_v50 = vmul.f32 %v761_v23, %v761_v23 }
0x2fe0   :  { %3079 = vadd.xlane.f32.xlu0 %v3078_v29 }
0x3069   :  { %v3083_v19 = vpop.xlane.xlu0 %3082 }
0x306a   :  { %v3085_v30 = vmul.f32 0.03125, %v3083_v19  ;;  %v766_v19 = vsel %vm765_vm0, %v764_v50, 0.0 }
0x306c   :  { %v3087_v33 = vsub.f32 %v3075_v28, %v3085_v30 }
0x306d   :  { %v3080_v0 = vpop.xlane.xlu0 %3079 }
0x306e   :  { %v3084_v35 = vmul.f32 0.03125, %v3080_v0  ;;  %v3089_v38 = vmul.f32 %v3087_v33, %v3087_v33 }
0x3070   :  { %v3086_v41 = vsub.f32 %v3074_v37, %v3084_v35  ;;  %v3093_v46 = vsel %vm166_vm1, %v3089_v38, 0.0  ;;  %v3211_v38 = vld [vmem:[%s6445_s8] sm:$0xff] }
0x3071   :  { %3094 = vadd.xlane.f32.xlu0 %v3093_v46 }
0x3072   :  { %v3088_v44 = vmul.f32 %v3086_v41, %v3086_v41 }
0x3074   :  { %v3090_v40 = vsel %vm166_vm1, %v3088_v44, 0.0 }
0x3075   :  { %3091 = vadd.xlane.f32.xlu1 %v3090_v40 }
0x3079   :  { %1449 = vadd.xlane.f32.xlu1 %v1448_v52 }
0x307d   :  { %2477 = vadd.xlane.f32.xlu1 %v2476_v7 }
0x30fe   :  { %v3095_v8 = vpop.xlane.xlu0 %3094 }
0x30ff   :  { %v3097_v18 = vmul.f32 0.03125, %v3095_v8 }
0x3101   :  { %v3099_v42 = vadd.f32 1e-12, %v3097_v18 }
0x3102   :  { %v3092_v63 = vpop.xlane.xlu1 %3091 }
0x3103   :  { %4868 = vrsqrt.f32 %v3099_v42  ;;  %v3096_v10 = vmul.f32 0.03125, %v3092_v63 }
0x3105   :  { %v3098_v5 = vadd.f32 1e-12, %v3096_v10  ;;  %v3366_v10 = vstv %s52_s15 }
0x3106   :  { %v1450_v3 = vpop.xlane.xlu1 %1449 }
0x3107   :  { %4870 = vrsqrt.f32 %v3098_v5  ;;  %v1451_v30 = vmax.f32 %v1450_v3, 1e-24 }
0x310a   :  { %v2478_v9 = vpop.xlane.xlu1 %2477 }
0x310b   :  { %v2479_v4 = vmax.f32 %v2478_v9, 1e-24 }
0x310d   :  { %v4869_v6 = vpop.eup %4868  ;;  %4872 = vrsqrt.f32 %v2479_v4 }
0x310e   :  { %v3103_v2 = vmul.f32 %v4869_v6, %v3087_v33 }
0x3110   :  { %v3109_v62 = vmul.f32 %v4165_v43, %v3103_v2 }
0x3111   :  { %v4871_v12 = vpop.eup %4870 }
0x3112   :  { %v3102_v13 = vmul.f32 %v4871_v12, %v3086_v41  ;;  %v3115_v15 = vadd.f32 %v4166_v58, %v3109_v62  ;;  %v3212_v41 = vld [vmem:[%s6445_s8 + $0x8] sm:$0xff]  ;;  %s4929_s8 = smov 2  }
0x3113   :  { %v4715_v44 = vpack.c.bf16 %v3212_v41, %v3211_v38 }
0x3114   :  { %v3108_v36 = vmul.f32 %v4165_v43, %v3102_v13  ;;  %v3117_v16 = vrot.slane %v3115_v15, 7 }
0x3116   :  { %v3114_v27 = vadd.f32 %v4166_v58, %v3108_v36 }
0x3117   :  { %v4873_v31 = vpop.eup %4872 }
0x3118   :  { %v3119_v17 = vsel %vm680_vm9, %v3114_v27, %v3117_v16  ;;  %v6312_v54 = vmul.f32 %v4873_v31, %v2471_v51  ;;  %vm4031_vm9 = vcmask 9216  }
0x3119   :  { %4630 = vmatmul.mubr.msk.f32.vlgmr.msra.gmra.mrb[54].mxu1 %vm166_vm1, %v3119_v17  ;;  %vm3364_vm1 = vcmask 15360  }
0x311a   :  { %4678 = vmatmul.mubr.msk.f32.vlgmr.msra.gmra.mrb[48].mxu0 %vm317_vm8, %v6312_v54  ;;  %4634 = vmatprep.mubr.msk.f32.mxu1 %vm4924_vm2, %v6255_v32 }
0x311b   :  { %4687 = vmatprep.mubr.msk.f32.mxu0 %vm4924_vm2, %v6255_v32 }
0x31ec   :  { %v3198_v22 = vpop.f32.mrb[54].mxu1 }
0x31ed   :  { %v3199_v24 = vadd.f32 %v4167_v21, %v3198_v22  ;;  %v4631_v14 = vpop.f32.mrb[55].mxu1  ;;  %v6328_v25 = vpop.f32.mrb[48].mxu0 }
0x31ee   :  { %v4679_v28 = vpop.f32.mrb[49].mxu0 }
0x31ef   :  { %v3202_v37 = vmul.f32 %v3199_v24, %v3199_v24 }
0x31f1   :  { %v3203_v29 = vsel %vm765_vm0, %v3202_v37, 0.0 }
0x31f2   :  { %3204 = vadd.xlane.f32.xlu0 %v3203_v29 }
0x31f6   :  { %767 = vadd.xlane.f32.xlu0 %v766_v19 }
0x327f   :  { %v3205_v33 = vpop.xlane.xlu0 %3204 }
0x3280   :  { %v3206_v53 = vmax.f32 %v3205_v33, 1e-24 }
0x3282   :  { %4874 = vrsqrt.f32 %v3206_v53 }
0x3283   :  { %4876 = vrsqrt.f32 %v1451_v30  ;;  %v768_v0 = vpop.xlane.xlu0 %767 }
0x3284   :  { %v769_v60 = vmax.f32 %v768_v0, 1e-24 }
0x3286   :  { %4878 = vrsqrt.f32 %v769_v60 }
0x328c   :  { %v4875_v35 = vpop.eup %4874 }
0x328d   :  { %v4877_v46 = vpop.eup %4876  ;;  %v6338_v49 = vmul.f32 %v4875_v35, %v3199_v24 }
0x328e   :  { %v6343_v51 = vmul.f32 %v4877_v46, %v6270_v34 }
0x328f   :  { %4633 = vmatpush3.xpose.msk.msra.mxu1 %vm317_vm8, %v6338_v49 }
0x3290   :  { %v4879_v47 = vpop.eup %4878  ;;  %4714 = vmatprep.subr.bf16.mxu1 %v4928_v55 }
0x3291   :  { %v771_v40 = vmul.f32 %v4879_v47, %v761_v23 }
0x3292   :  { %4635 = vmatmul.mubr.msk.f32.vlgmr.msra.gmra.mrb[72].mxu1 %vm317_vm8, %v6343_v51 }
0x3293   :  { %4716 = vmatpush3.bf16.msra.mxu1 %v4715_v44  ;;  %4686 = vmatpush3.xpose.msk.msra.mxu0 %vm317_vm8, %v771_v40 }
0x3294   :  { %4641 = vmatprep.mubr.msk.f32.mxu1 %vm4924_vm2, %v6255_v32  ;;  %4644 = vmatprep.subr.mxu1 %v6255_v32 }
0x3296   :  { %4642 = vmatmul.mubr.msk.f32.vlgmr.msra.gmra.mrb[74].mxu1 %vm317_vm8, %v6343_v51  ;;  %4688 = vmatmul.mubr.msk.f32.vlgmr.msra.gmra.mrb[50].mxu0 %vm317_vm8, %v6312_v54 }
0x3297   :  { %4646 = vmatprep.mubr.msk.f32.mxu1 %vm4924_vm2, %v6255_v32 }
0x329c   :  { %4645 = vmatpush3.xpose.msk.msra.mxu1 %vm317_vm8, %v6343_v51 }
0x329d   :  { %4717 = vmatprep.subr.bf16.mxu1 %v4928_v55 }
0x329f   :  { %4647 = vmatmul.mubr.msk.f32.vlgmr.msra.gmra.mrb[76].mxu1 %vm317_vm8, %v6338_v49 }
0x32a0   :  { %4719 = vmatpush3.bf16.msra.mxu1 %v6300_v1  ;;  %4653 = vmatprep.mubr.msk.f32.mxu1 %vm4924_vm2, %v6255_v32 }
0x32a1   :  { %4656 = vmatprep.subr.mxu1 %v6255_v32 }
0x32a3   :  { %4654 = vmatmul.mubr.msk.f32.vlgmr.msra.gmra.mrb[78].mxu1 %vm317_vm8, %v6338_v49 }
0x32a4   :  { %4658 = vmatprep.mubr.msk.f32.mxu1 %vm4924_vm2, %v6255_v32 }
0x32a9   :  { %4657 = vmatpush3.xpose.msk.msra.mxu1 %vm317_vm8, %v6338_v49 }
0x32aa   :  { %4720 = vmatprep.subr.bf16.mxu1 %v4928_v55 }
0x32ac   :  { %4659 = vmatmul.mubr.msk.f32.vlgmr.msra.gmra.mrb[80].mxu1 %vm317_vm8, %v771_v40 }
0x32ad   :  { %4722 = vmatpush3.bf16.msra.mxu1 %v4715_v44  ;;  %4665 = vmatprep.mubr.msk.f32.mxu1 %vm4924_vm2, %v6255_v32 }
0x32ae   :  { %4668 = vmatprep.subr.mxu1 %v6255_v32 }
0x32b0   :  { %4666 = vmatmul.mubr.msk.f32.vlgmr.msra.gmra.mrb[82].mxu1 %vm317_vm8, %v771_v40 }
0x32b1   :  { %4670 = vmatprep.mubr.msk.f32.mxu1 %vm4924_vm2, %v6255_v32 }
0x32b6   :  { %4669 = vmatpush3.xpose.msk.msra.mxu1 %vm317_vm8, %v6343_v51 }
0x32b7   :  { %4680 = vmatprep.subr.mxu1 %v6255_v32 }
0x32b9   :  { %4671 = vmatmul.mubr.msk.f32.vlgmr.msra.gmra.mrb[84].mxu1 %vm317_vm8, %v6312_v54 }
0x32ba   :  { %4681 = vmatpush3.xpose.msk.msra.mxu1 %vm317_vm8, %v6312_v54  ;;  %4682 = vmatprep.mubr.msk.f32.mxu1 %vm4924_vm2, %v6255_v32  ;;  %vm3368_vm2 = vcmask 74752  }
0x32bd   :  { %4683 = vmatmul.mubr.msk.f32.vlgmr.msra.gmra.mrb[86].mxu1 %vm317_vm8, %v771_v40 }
0x3365   :  { %v3286_v55 = vpop.f32.mrb[72].mxu1 }
0x3366   :  { %v4636_v34 = vpop.f32.mrb[73].mxu1 }
0x3369   :  { %v3356_v39 = vpop.f32.mrb[74].mxu1  ;;  %v4026_v52 = vpop.f32.mrb[50].mxu0 }
0x336a   :  { %v4689_v7 = vpop.f32.mrb[51].mxu0  ;;  %3361 = vrot.lane.b32.xlu0 %v3356_v39, %s4929_s8  ;;  %v4643_v45 = vpop.f32.mrb[75].mxu1  ;;  %v4030_v16 = vmul.f32 %v4026_v52, %v3366_v10 }
0x336c   :  { %v4044_v17 = vsel %vm4031_vm9, %v4030_v16, -inf }
0x336e   :  { %3838 = vrot.lane.b32.xlu0 %v6328_v25, %s4929_s8 }
0x3372   :  { %v3452_v56 = vpop.f32.mrb[76].mxu1 }
0x3373   :  { %v4648_v26 = vpop.f32.mrb[77].mxu1 }
0x3376   :  { %v3522_v57 = vpop.f32.mrb[78].mxu1 }
0x3377   :  { %3527 = vrot.lane.b32.xlu1 %v3522_v57, %s4929_s8  ;;  %v4655_v32 = vpop.f32.mrb[79].mxu1  ;;  %v3213_v57 = vld [vmem:[%s6442_s5] sm:$0x3]  ;;  %s4930_s5 = smov 16  }
0x3378   :  { %v3380_v32 = vstv %s4078_s16 }
0x337f   :  { %v3614_v59 = vpop.f32.mrb[80].mxu1 }
0x3380   :  { %v4660_v61 = vpop.f32.mrb[81].mxu1 }
0x3383   :  { %v3684_v48 = vpop.f32.mrb[82].mxu1 }
0x3384   :  { %3689 = vrot.lane.b32.xlu1 %v3684_v48, %s4929_s8  ;;  %v4667_v11 = vpop.f32.mrb[83].mxu1 }
0x338c   :  { %v3763_v1 = vpop.f32.mrb[84].mxu1 }
0x338d   :  { %v4672_v8 = vpop.f32.mrb[85].mxu1 }
0x3390   :  { %v3955_v18 = vpop.f32.mrb[86].mxu1 }
0x3391   :  { %v4684_v42 = vpop.f32.mrb[87].mxu1  ;;  %v3959_v44 = vmul.f32 %v3955_v18, %v3366_v10 }
0x33dc   :  { %v3362_v63 = vpop.permute.xlu0 %3361 }
0x33dd   :  { %v3365_v5 = vsel %vm3364_vm1, %v3286_v55, %v3362_v63  ;;  %v4032_v55 = vsel %vm4031_vm9, %v3959_v44, -inf }
0x33de   :  { %v3367_v3 = vmul.f32 %v3366_v10, %v3365_v5 }
0x33e0   :  { %v3839_v9 = vpop.permute.xlu0 %3838  ;;  %v3369_v4 = vsel %vm3368_vm2, %v3367_v3, -inf }
0x33e1   :  { %v3841_v6 = vsel %vm3364_vm1, %v3763_v1, %v3839_v9  ;;  %3370 = vmax.xlane.f32.xlu1 %v3369_v4 }
0x33e2   :  { %v3842_v43 = vmul.f32 %v3841_v6, %v3366_v10 }
0x33e4   :  { %v3860_v2 = vsel %vm3368_vm2, %v3842_v43, -inf }
0x33e5   :  { %3861 = vmax.xlane.f32.xlu1 %v3860_v2 }
0x33e9   :  { %v3528_v58 = vpop.permute.xlu1 %3527 }
0x33ea   :  { %v3530_v62 = vsel %vm3364_vm1, %v3452_v56, %v3528_v58 }
0x33eb   :  { %v3531_v12 = vmul.f32 %v3530_v62, %v3366_v10 }
0x33ed   :  { %v3532_v13 = vsel %vm3368_vm2, %v3531_v12, -inf }
0x33ee   :  { %3533 = vmax.xlane.f32.xlu0 %v3532_v13 }
0x33f6   :  { %v3690_v15 = vpop.permute.xlu1 %3689 }
0x33f7   :  { %v3692_v36 = vsel %vm3364_vm1, %v3614_v59, %v3690_v15  ;;  %v3383_v59 = vstv %s3382_s17 }
0x33f8   :  { %v3693_v27 = vmul.f32 %v3692_v36, %v3366_v10  ;;  %v3384_v1 = vmul.f32 %v3383_v59, %v3213_v57 }
0x33fa   :  { %v3843_v31 = vsel %vm3368_vm2, %v3693_v27, -inf }
0x33fb   :  { %3844 = vmax.xlane.f32.xlu0 %v3843_v31  ;;  %v3887_v31 = vld [vmem:[%s6443_s6] sm:$0x3] }
0x33fc   :  { %vm3888_vm10 = vcmp.gt.f32.partialorder %v3887_v31, 0.5 }
0x33ff   :  { %4045 = vmax.xlane.f32.xlu0 %v4044_v17 }
0x346e   :  { %v3371_v54 = vpop.xlane.xlu1 %3370 }
0x346f   :  { %v3372_v20 = vsub.f32 %v3367_v3, %v3371_v54 }
0x3471   :  { %v3373_v21 = vmul.f32 1.442695, %v3372_v20 }
0x3472   :  { %v3862_v22 = vpop.xlane.xlu1 %3861 }
0x3473   :  { %4880 = vpow2.f32 %v3373_v21  ;;  %v3863_v23 = vsub.f32 %v3842_v43, %v3862_v22 }
0x3475   :  { %v3864_v28 = vmul.f32 1.442695, %v3863_v23 }
0x347b   :  { %v3534_v24 = vpop.xlane.xlu0 %3533 }
0x347c   :  { %v3535_v14 = vsub.f32 %v3531_v12, %v3534_v24 }
0x347d   :  { %v4881_v25 = vpop.eup %4880 }
0x347e   :  { %v3536_v37 = vmul.f32 1.442695, %v3535_v14  ;;  %v3375_v50 = vsel %vm3368_vm2, %v4881_v25, 0.0 }
0x347f   :  { %3376 = vadd.xlane.f32.xlu1 %v3375_v50 }
0x3480   :  { %4882 = vpow2.f32 %v3536_v37 }
0x3481   :  { %4884 = vpow2.f32 %v3864_v28 }
0x3488   :  { %v3845_v29 = vpop.xlane.xlu0 %3844 }
0x3489   :  { %v3846_v19 = vsub.f32 %v3693_v27, %v3845_v29 }
0x348a   :  { %v4883_v30 = vpop.eup %4882 }
0x348b   :  { %v3847_v33 = vmul.f32 1.442695, %v3846_v19  ;;  %v3538_v53 = vsel %vm3368_vm2, %v4883_v30, 0.0  ;;  %v4885_v0 = vpop.eup %4884 }
0x348c   :  { %3539 = vadd.xlane.f32.xlu0 %v3538_v53  ;;  %v4046_v60 = vpop.xlane.xlu0 %4045  ;;  %v3866_v41 = vsel %vm3368_vm2, %v4885_v0, 0.0 }
0x348d   :  { %4886 = vpow2.f32 %v3847_v33  ;;  %v4047_v35 = vsub.f32 %v4030_v16, %v4046_v60 }
0x348f   :  { %v4048_v38 = vmul.f32 1.442695, %v4047_v35 }
0x3490   :  { %3867 = vadd.xlane.f32.xlu0 %v3866_v41 }
0x3491   :  { %4888 = vpow2.f32 %v4048_v38 }
0x3497   :  { %v4887_v46 = vpop.eup %4886 }
0x3498   :  { %v3849_v47 = vsel %vm3368_vm2, %v4887_v46, 0.0 }
0x3499   :  { %3850 = vadd.xlane.f32.xlu1 %v3849_v47 }
0x349b   :  { %v4889_v40 = vpop.eup %4888 }
0x349c   :  { %v4050_v34 = vsel %vm4031_vm9, %v4889_v40, 0.0 }
0x349d   :  { %4033 = vmax.xlane.f32.xlu1 %v4032_v55  ;;  %4051 = vadd.xlane.f32.xlu0 %v4050_v34 }
0x350c   :  { %v3377_v7 = vpop.xlane.xlu1 %3376 }
0x3519   :  { %v3540_v39 = vpop.xlane.xlu0 %3539 }
0x351a   :  { %4890 = vrcp.f32 %v3540_v39 }
0x351d   :  { %v3868_v52 = vpop.xlane.xlu0 %3867 }
0x351e   :  { %4892 = vlog2.f32 %v3868_v52 }
0x351f   :  { %4894 = vrcp.f32 %v3377_v7 }
0x3524   :  { %v4891_v45 = vpop.eup %4890 }
0x3525   :  { %v3542_v56 = vmul.f32 %v4891_v45, %v4883_v30 }
0x3526   :  { %v3851_v26 = vpop.xlane.xlu1 %3850 }
0x3527   :  { %4896 = vlog2.f32 %v3851_v26  ;;  %v3543_v61 = vmul.f32 %v3542_v56, %v3380_v32 }
0x3528   :  { %v4893_v48 = vpop.eup %4892 }
0x3529   :  { %v3870_v11 = vmul.f32 0.6931472, %v4893_v48  ;;  %v3544_v63 = vadd.f32 %v3543_v61, %v3384_v1  ;;  %v4895_v10 = vpop.eup %4894 }
0x352a   :  { %v4034_v8 = vpop.xlane.xlu1 %4033  ;;  %v3379_v4 = vmul.f32 %v4895_v10, %v4881_v25  ;;  %v4052_v36 = vpop.xlane.xlu0 %4051 }
0x352b   :  { %v3871_v18 = vsub.f32 %v3863_v23, %v3870_v11  ;;  %v4035_v42 = vsub.f32 %v3959_v44, %v4034_v8 }
0x352c   :  { %v3381_v2 = vmul.f32 %v3380_v32, %v3379_v4 }
0x352d   :  { %v4036_v5 = vmul.f32 1.442695, %v4035_v42  ;;  %v3872_v3 = vmul.f32 %v3871_v18, %v3544_v63 }
0x352e   :  { %v3385_v62 = vadd.f32 %v3384_v1, %v3381_v2 }
0x352f   :  { %4898 = vpow2.f32 %v4036_v5  ;;  %v3873_v9 = vsel %vm3368_vm2, %v3872_v3, 0.0 }
0x3530   :  { %3874 = vadd.xlane.f32.xlu0 %v3873_v9  ;;  %4900 = vrcp.f32 %v4052_v36 }
0x3531   :  { %v4897_v6 = vpop.eup %4896 }
0x3532   :  { %v3853_v43 = vmul.f32 0.6931472, %v4897_v6 }
0x3534   :  { %v3854_v58 = vsub.f32 %v3846_v19, %v3853_v43 }
0x3536   :  { %v3855_v15 = vmul.f32 %v3854_v58, %v3385_v62 }
0x3538   :  { %v3856_v27 = vsel %vm3368_vm2, %v3855_v15, 0.0 }
0x3539   :  { %v4899_v12 = vpop.eup %4898 }
0x353a   :  { %v4038_v13 = vsel %vm4031_vm9, %v4899_v12, 0.0  ;;  %v4901_v16 = vpop.eup %4900 }
0x353b   :  { %4039 = vadd.xlane.f32.xlu1 %v4038_v13  ;;  %v4054_v17 = vmul.f32 %v4901_v16, %v4889_v40 }
0x353d   :  { %v4055_v54 = vsel %vm3888_vm10, 0.0, %v4054_v17 }
0x353f   :  { %3857 = vadd.xlane.f32.xlu1 %v3856_v27 }
0x3546   :  { %4058 = vrot.lane.b32.xlu0 %v6338_v49, %s4930_s5 }
0x3550   :  { %4065 = vrot.lane.b32.xlu1 %v4055_v54, %s4929_s8 }
0x35bd   :  { %v3875_v20 = vpop.xlane.xlu0 %3874 }
0x35c1   :  { %v4059_v21 = vpop.permute.xlu0 %4058 }
0x35c2   :  { %v4061_v22 = vsel %vm317_vm8, %v6343_v51, %v4059_v21  ;;  %vm4071_vm8 = vcmask 0  }
0x35c3   :  { %4063 = vst.msk [vmem:[%s6448_s11 + $0x10] sm:$0x3] %vm4062_vm11, %v4061_v22 }
0x35c8   :  { %v4040_v49 = vpop.xlane.xlu1 %4039 }
0x35c9   :  { %4902 = vrcp.f32 %v4040_v49 }
0x35cc   :  { %v3858_v23 = vpop.xlane.xlu1 %3857 }
0x35cd   :  { %v3859_v24 = vsub.f32 0.0, %v3858_v23 }
0x35cf   :  { %v3876_v14 = vsub.f32 %v3859_v24, %v3875_v20 }
0x35d0   :  { %v4066_v51 = vpop.permute.xlu1 %4065 }
0x35d1   :  { %v3877_v25 = vmul.f32 0.5, %v3876_v14 }
0x35d3   :  { %v4903_v28 = vpop.eup %4902  ;;  %v3878_v37 = vsel %vm2388_vm3, %v3877_v25, 0.0 }
0x35d4   :  { %v3879_v50 = vrot.slane %v3878_v37, 4  ;;  %v4042_v29 = vmul.f32 %v4903_v28, %v4899_v12 }
0x35d6   :  { %v3880_v19 = vadd.f32 %v3879_v50, %v3878_v37  ;;  %v4043_v30 = vsel %vm3888_vm10, 0.0, %v4042_v29 }
0x35d7   :  { %v4068_v33 = vsel %vm3364_vm1, %v4043_v30, %v4066_v51 }
0x35d8   :  { %v3881_v53 = vrot.slane %v3880_v19, 2  ;;  %4070 = vst.msk [vmem:[%s6448_s11 + $0x18] sm:$0x3] %vm4069_vm12, %v4068_v33 }
0x35da   :  { %v3882_v0 = vadd.f32 %v3881_v53, %v3880_v19 }
0x35dc   :  { %v3883_v60 = vrot.slane %v3882_v0, 1 }
0x35de   :  { %v3884_v35 = vadd.f32 %v3883_v60, %v3882_v0 }
0x35e0   :  { %v3886_v38 = vmul.f32 0.5, %v3884_v35 }
0x35e2   :  { %4072 = vst.msk [vmem:[%s6448_s11 + $0x20] sm:$0x1] %vm4071_vm8, %v3886_v38 }
0x35e3   :  { %4077 = vsyncpa [#allocation3], 1 }

</bundles_post_ra>
